<compile_context>
chip_gen: v6e
topology: v6e:2x2x1
jax: 0.10.0
libtpu: 0.0.40
codegen_flags: <defaults>
</compile_context>

<pallas_src>
import functools

import jax
import jax.numpy as jnp
from jax.experimental import pallas as pl
from jax.experimental.pallas import tpu as pltpu

BN_EPS = 1e-5
PAD = 4                         # max spatial halo (dil_conv_5x5: k=5, dil=2)
LPAD = 8                        # left column pad -> interior starts sublane-aligned
VMEM_LIMIT = 32 * 1024 * 1024

PRIMITIVES = [
    "none", "max_pool_3x3", "avg_pool_3x3", "skip_connect",
    "sep_conv_3x3", "sep_conv_5x5", "dil_conv_3x3", "dil_conv_5x5",
]


# ---------------------------------------------------------------------------
# Fused whole-cell kernel: one grid step = one (batch element, edge) pair.
# ---------------------------------------------------------------------------
def _cell_kernel(src_ref, dst_ref, wskip_ref,                 # SMEM tables
                 s0_ref, s1_ref,                              # raw inputs
                 pre0w_ref, pre0b_ref, pre1w_ref, pre1b_ref,  # preprocess (BN folded)
                 invcnt_ref,                                  # avg-pool inverse counts
                 dwA_ref, dwB_ref, dwC_ref,                   # depthwise tap slabs
                 w1_ref, b1_ref, w2_ref, b2_ref,              # block-diag pointwise
                 pool_ref,                                    # pool BN scale/shift
                 out_ref,
                 states, cbuf, mbuf, abuf,                    # VMEM scratch
                 *, H, W, C, steps, multiplier):
    f32 = jnp.float32
    bf16 = jnp.bfloat16
    HW = H * W
    C2 = 2 * C
    e = pl.program_id(1)
    num_e = pl.num_programs(1)

    # ---- once per batch block: scratch halos + preprocess s0/s1 --------------
    @pl.when(e == 0)
    def _init():
        cbuf[...] = jnp.zeros(cbuf.shape, f32)                 # zero halo persists
        mbuf[...] = jnp.full(mbuf.shape, -jnp.inf, f32)        # -inf halo persists
        abuf[...] = jnp.zeros(abuf.shape, f32)
        states[...] = jnp.zeros(states.shape, f32)
        x0 = jnp.maximum(s0_ref[...], 0.0).reshape(HW, -1).astype(bf16)
        h0 = jnp.dot(x0, pre0w_ref[...],
                     preferred_element_type=f32) + pre0b_ref[...]
        states[0:1] = h0.reshape(1, H, W, C)
        x1 = jnp.maximum(s1_ref[...], 0.0).reshape(HW, -1).astype(bf16)
        h1 = jnp.dot(x1, pre1w_ref[...],
                     preferred_element_type=f32) + pre1b_ref[...]
        states[1:2] = h1.reshape(1, H, W, C)

    src = src_ref[0, e]
    dst = dst_ref[0, e]
    w_skip = wskip_ref[0, e]

    x = states[src]                                            # (H, W, C) edge input

    # ---- max_pool_3x3 / avg_pool_3x3 (+BN, arch weight folded on host) -------
    mbuf[1:1 + H, LPAD:LPAD + W, :] = x                        # aligned interior store
    abuf[1:1 + H, LPAD:LPAD + W, :] = x
    mx = None
    av = None
    for dj in (-1, 0, 1):                                      # column shift paid once
        cm = mbuf[:, LPAD + dj:LPAD + dj + W, :]               # (H+2, W, C)
        ca = abuf[:, LPAD + dj:LPAD + dj + W, :]
        for di in (-1, 0, 1):
            tm = cm[1 + di:1 + di + H]
            ta = ca[1 + di:1 + di + H]
            mx = tm if mx is None else jnp.maximum(mx, tm)
            av = ta if av is None else av + ta

    def prow(i):
        return pool_ref[i:i + 1, :].reshape(1, 1, C)

    pool_out = (mx * prow(0) + prow(1)
                + (av * invcnt_ref[...]) * prow(2) + prow(3))

    # ---- conv branches: shared zero-padded channel-duplicated ReLU(x) --------
    rx = jnp.maximum(x, 0.0)
    cbuf[PAD:PAD + H, LPAD:LPAD + W, :] = jnp.concatenate([rx, rx], axis=-1)

    def dw_group(wref, step):
        # 5x5 unit grid of taps at spacing `step`; 3x3 kernels were zero-padded
        # into the grid centre on the host.  dj-outer: each (possibly shifted)
        # column slice of the padded scratch is loaded once and reused 5x.
        R = 2 * step
        acc = None
        for uj in range(5):
            dj = (uj - 2) * step
            col = cbuf[PAD - R:PAD + H + R, LPAD + dj:LPAD + dj + W, :]
            for ui in range(5):
                di = (ui - 2) * step
                t = 5 * ui + uj
                wt = wref[t:t + 1, :].reshape(1, 1, C2)
                term = col[R + di:R + di + H] * wt
                acc = term if acc is None else acc + term
        return acc                                              # (H, W, 2C) f32

    ga = dw_group(dwA_ref, 1)          # [sep3.dw1 | sep5.dw1](relu(x))
    gb = dw_group(dwB_ref, 2)          # [dil3.dw  | dil5.dw ](relu(x))

    # level-1 pointwise convs of all four branches: ONE block-diag bf16 matmul
    lhs1 = jnp.concatenate([ga.reshape(HW, C2).astype(bf16),
                            gb.reshape(HW, C2).astype(bf16)], axis=1)
    y1 = jnp.dot(lhs1, w1_ref[...], preferred_element_type=f32) + b1_ref[...]
    dil_out = y1[:, C2:].reshape(H, W, C)          # w6*dil3_out + w7*dil5_out

    # level-2 (sep convs): second ReLU -> dw -> pointwise as one block matmul
    cbuf[PAD:PAD + H, LPAD:LPAD + W, :] = (
        jnp.maximum(y1[:, :C2], 0.0).reshape(H, W, C2))
    gc = dw_group(dwC_ref, 1)                      # [sep3.dw2 | sep5.dw2]
    y2 = jnp.dot(gc.reshape(HW, C2).astype(bf16), w2_ref[...],
                 preferred_element_type=f32) + b2_ref[...]
    sep_out = y2.reshape(H, W, C)                  # w4*sep3_out + w5*sep5_out

    # ---- MixedOp combine ('none' = 0) + running state accumulation -----------
    res = w_skip * x + pool_out + dil_out + sep_out
    states[pl.ds(dst, 1)] = states[pl.ds(dst, 1)] + res[None]

    # ---- final cell output: concat of last `multiplier` states (lane dense) --
    @pl.when(e == num_e - 1)
    def _finalize():
        first = 2 + steps - multiplier
        out_ref[...] = jnp.concatenate(
            [states[first + m] for m in range(multiplier)], axis=-1)


# ---------------------------------------------------------------------------
# Host-side folding / packing (pure JAX, runs under jit)
# ---------------------------------------------------------------------------
def _fold_bn(w, mean, var):
    # conv1x1 (Cin,Cout) followed by eval BatchNorm(affine=False):
    #   (x @ W - mean) * invstd  ==  x @ (W*invstd) + (-mean*invstd)
    invstd = 1.0 / jnp.sqrt(var + BN_EPS)
    return w * invstd[None, :], (-mean * invstd)[None, :]


def _edge_topology(steps):
    src, dst = [], []
    for i in range(steps):
        for j in range(2 + i):
            src.append(j)
            dst.append(2 + i)
    return src, dst


def pack_cell_params(params, arch_w, H, W):
    """Fold eval BN and architecture weights into packed per-edge slabs."""
    C = params["pre0_w"].shape[1]
    f32 = jnp.float32
    bf16 = jnp.bfloat16
    pre0_w, pre0_b = _fold_bn(params["pre0_w"], *params["pre0_bn"])
    pre1_w, pre1_b = _fold_bn(params["pre1_w"], *params["pre1_bn"])

    def embed3(k):           # (3,3,C) -> (25,C), zero-padded into 5x5 unit grid
        return jnp.zeros((5, 5, C), f32).at[1:4, 1:4, :].set(k).reshape(25, C)

    dwA, dwB, dwC, W1s, b1s, W2s, b2s, pools = [], [], [], [], [], [], [], []
    for e, ed in enumerate(params["edges"]):
        w = arch_w[e]
        dwA.append(jnp.concatenate([embed3(ed["sep3"]["dw1"]),
                                    ed["sep5"]["dw1"].reshape(25, C)], axis=1))
        dwB.append(jnp.concatenate([embed3(ed["dil3"]["dw"]),
                                    ed["dil5"]["dw"].reshape(25, C)], axis=1))
        dwC.append(jnp.concatenate([embed3(ed["sep3"]["dw2"]),
                                    ed["sep5"]["dw2"].reshape(25, C)], axis=1))

        s3w, s3b = _fold_bn(ed["sep3"]["pw1"], *ed["sep3"]["bn1"])
        s5w, s5b = _fold_bn(ed["sep5"]["pw1"], *ed["sep5"]["bn1"])
        d3w, d3b = _fold_bn(ed["dil3"]["pw"], *ed["dil3"]["bn"])
        d5w, d5b = _fold_bn(ed["dil5"]["pw"], *ed["dil5"]["bn"])
        W1 = jnp.zeros((4 * C, 3 * C), f32)
        W1 = W1.at[0:C, 0:C].set(s3w)
        W1 = W1.at[C:2 * C, C:2 * C].set(s5w)
        W1 = W1.at[2 * C:3 * C, 2 * C:3 * C].set(w[6] * d3w)   # dil3 * arch w
        W1 = W1.at[3 * C:4 * C, 2 * C:3 * C].set(w[7] * d5w)   # dil5 * arch w
        W1s.append(W1)
        b1s.append(jnp.concatenate([s3b, s5b, w[6] * d3b + w[7] * d5b], axis=1))

        p3w, p3b = _fold_bn(ed["sep3"]["pw2"], *ed["sep3"]["bn2"])
        p5w, p5b = _fold_bn(ed["sep5"]["pw2"], *ed["sep5"]["bn2"])
        W2s.append(jnp.concatenate([w[4] * p3w, w[5] * p5w], axis=0))
        b2s.append(w[4] * p3b + w[5] * p5b)

        m_mean, m_var = ed["maxpool_bn"]
        a_mean, a_var = ed["avgpool_bn"]
        mi = 1.0 / jnp.sqrt(m_var + BN_EPS)
        ai = 1.0 / jnp.sqrt(a_var + BN_EPS)
        pools.append(jnp.stack([w[1] * mi, -w[1] * m_mean * mi,
                                w[2] * ai, -w[2] * a_mean * ai], axis=0))

    # avg_pool count_include_pad=False inverse counts, pre-broadcast lane-dense
    ih = jnp.minimum(jnp.arange(H) + 1, H - 1) - jnp.maximum(jnp.arange(H) - 1, 0) + 1
    iw = jnp.minimum(jnp.arange(W) + 1, W - 1) - jnp.maximum(jnp.arange(W) - 1, 0) + 1
    inv = 1.0 / (ih[:, None] * iw[None, :]).astype(f32)
    inv_cnt = jnp.broadcast_to(inv[:, :, None], (H, W, C))

    return dict(
        pre0_w=pre0_w.astype(bf16), pre0_b=pre0_b,
        pre1_w=pre1_w.astype(bf16), pre1_b=pre1_b,
        inv_cnt=inv_cnt,
        dwA=jnp.stack(dwA), dwB=jnp.stack(dwB), dwC=jnp.stack(dwC),
        W1=jnp.stack(W1s).astype(bf16), b1=jnp.stack(b1s),
        W2=jnp.stack(W2s).astype(bf16), b2=jnp.stack(b2s),
        pool=jnp.stack(pools),
        w_skip=arch_w[:, 3].reshape(1, -1).astype(f32),
    )


# ---------------------------------------------------------------------------
# Cell forward (PyTorch NCHW in / NCHW out)
# ---------------------------------------------------------------------------
def cell_forward(params, s0_nchw, s1_nchw, weights, *, steps, multiplier):
    s0 = jnp.transpose(s0_nchw, (0, 2, 3, 1)).astype(jnp.float32)   # NCHW -> NHWC
    s1 = jnp.transpose(s1_nchw, (0, 2, 3, 1)).astype(jnp.float32)
    N, H, W, _ = s0.shape
    C = params["pre0_w"].shape[1]
    src_l, dst_l = _edge_topology(steps)
    E = len(src_l)
    assert weights.shape[0] == E

    p = pack_cell_params(params, weights.astype(jnp.float32), H, W)
    src_t = jnp.asarray([src_l], dtype=jnp.int32)
    dst_t = jnp.asarray([dst_l], dtype=jnp.int32)

    smem = pl.BlockSpec(memory_space=pltpu.MemorySpace.SMEM)

    def rep(a):                       # replicated: same block for every grid point
        nd = a.ndim
        return pl.BlockSpec(a.shape, lambda n, e: (0,) * nd)

    def per_edge(a):                  # leading dim selected by the edge grid axis
        nd = a.ndim
        return pl.BlockSpec((None,) + a.shape[1:],
                            lambda n, e: (e,) + (0,) * (nd - 1))

    def per_batch(a):                 # leading dim selected by the batch grid axis
        nd = a.ndim
        return pl.BlockSpec((None,) + a.shape[1:],
                            lambda n, e: (n,) + (0,) * (nd - 1))

    out = pl.pallas_call(
        functools.partial(_cell_kernel, H=H, W=W, C=C,
                          steps=steps, multiplier=multiplier),
        out_shape=jax.ShapeDtypeStruct((N, H, W, multiplier * C), jnp.float32),
        grid=(N, E),
        in_specs=[smem, smem, smem,
                  per_batch(s0), per_batch(s1),
                  rep(p["pre0_w"]), rep(p["pre0_b"]),
                  rep(p["pre1_w"]), rep(p["pre1_b"]),
                  rep(p["inv_cnt"]),
                  per_edge(p["dwA"]), per_edge(p["dwB"]), per_edge(p["dwC"]),
                  per_edge(p["W1"]), per_edge(p["b1"]),
                  per_edge(p["W2"]), per_edge(p["b2"]),
                  per_edge(p["pool"])],
        out_specs=pl.BlockSpec((None, H, W, multiplier * C),
                               lambda n, e: (n, 0, 0, 0)),
        scratch_shapes=[
            pltpu.VMEM((2 + steps, H, W, C), jnp.float32),              # states
            pltpu.VMEM((H + 2 * PAD, LPAD + W + PAD, 2 * C), jnp.float32),  # conv pad
            pltpu.VMEM((H + 2, LPAD + W + 1, C), jnp.float32),          # max-pool pad
            pltpu.VMEM((H + 2, LPAD + W + 1, C), jnp.float32),          # avg-pool pad
        ],
        compiler_params=pltpu.CompilerParams(
            dimension_semantics=("parallel", "arbitrary"),
            vmem_limit_bytes=VMEM_LIMIT),
    )(src_t, dst_t, p["w_skip"],
      s0, s1, p["pre0_w"], p["pre0_b"], p["pre1_w"], p["pre1_b"],
      p["inv_cnt"], p["dwA"], p["dwB"], p["dwC"],
      p["W1"], p["b1"], p["W2"], p["b2"], p["pool"])

    return jnp.transpose(out, (0, 3, 1, 2))                     # NHWC -> NCHW


# ---------------------------------------------------------------------------
# Deterministic parameter construction (shapes follow the PyTorch module)
# ---------------------------------------------------------------------------
def init_cell_params(key, C_pp, C_p, C, steps):
    num_edges = sum(2 + i for i in range(steps))
    keys = jax.random.split(key, 2 + num_edges)

    def conv1x1_w(k, cin, cout):
        return 0.1 * jax.random.normal(k, (cin, cout), jnp.float32)

    def dw_w(k, K, c):
        return 0.1 * jax.random.normal(k, (K, K, c), jnp.float32)

    def bn_stats(c):  # BatchNorm2d(affine=False) fresh-init running stats (eval)
        return (jnp.zeros((c,), jnp.float32), jnp.ones((c,), jnp.float32))

    params = {
        "pre0_w": conv1x1_w(keys[0], C_pp, C), "pre0_bn": bn_stats(C),
        "pre1_w": conv1x1_w(keys[1], C_p, C), "pre1_bn": bn_stats(C),
        "edges": [],
    }
    for e in range(num_edges):
        ek = jax.random.split(keys[2 + e], 12)
        params["edges"].append({
            "maxpool_bn": bn_stats(C),
            "avgpool_bn": bn_stats(C),
            "sep3": {"dw1": dw_w(ek[0], 3, C), "pw1": conv1x1_w(ek[1], C, C), "bn1": bn_stats(C),
                     "dw2": dw_w(ek[2], 3, C), "pw2": conv1x1_w(ek[3], C, C), "bn2": bn_stats(C)},
            "sep5": {"dw1": dw_w(ek[4], 5, C), "pw1": conv1x1_w(ek[5], C, C), "bn1": bn_stats(C),
                     "dw2": dw_w(ek[6], 5, C), "pw2": conv1x1_w(ek[7], C, C), "bn2": bn_stats(C)},
            "dil3": {"dw": dw_w(ek[8], 3, C), "pw": conv1x1_w(ek[9], C, C), "bn": bn_stats(C)},
            "dil5": {"dw": dw_w(ek[10], 5, C), "pw": conv1x1_w(ek[11], C, C), "bn": bn_stats(C)},
        })
    return params


if __name__ == "__main__":
    steps, multiplier = 2, 2
    N, C_pp, C_p, C, H, W = 2, 32, 32, 64, 8, 8     # multiplier*C = 128 lane-dense out
    num_edges = sum(2 + i for i in range(steps))

    key = jax.random.PRNGKey(0)
    k_s0, k_s1, k_a, k_p = jax.random.split(key, 4)
    s0 = jax.random.normal(k_s0, (N, C_pp, H, W), jnp.float32)   # NCHW, like PyTorch
    s1 = jax.random.normal(k_s1, (N, C_p, H, W), jnp.float32)
    alphas = jax.random.normal(k_a, (num_edges, len(PRIMITIVES)), jnp.float32)
    arch_weights = jax.nn.softmax(alphas, axis=-1)
    params = init_cell_params(k_p, C_pp, C_p, C, steps)

    fwd = jax.jit(functools.partial(cell_forward, steps=steps, multiplier=multiplier))
    out = fwd(params, s0, s1, arch_weights)
    jax.block_until_ready(out)
    assert out.shape == (N, multiplier * C, H, W)
    assert bool(jnp.all(jnp.isfinite(out)))
    print("KERNEL_OK")
</pallas_src>

<mosaic_0001>
module attributes {stable_mosaic.version = 11 : i64} {
  func.func @_cell_kernel(%arg0: i32, %arg1: i32, %arg2: memref<1x5xi32, #tpu.memory_space<smem>>, %arg3: memref<1x5xi32, #tpu.memory_space<smem>>, %arg4: memref<1x5xf32, #tpu.memory_space<smem>>, %arg5: memref<1x8x8x32xf32, #tpu.memory_space<vmem>>, %arg6: memref<1x8x8x32xf32, #tpu.memory_space<vmem>>, %arg7: memref<32x64xbf16, #tpu.memory_space<vmem>>, %arg8: memref<1x64xf32, #tpu.memory_space<vmem>>, %arg9: memref<32x64xbf16, #tpu.memory_space<vmem>>, %arg10: memref<1x64xf32, #tpu.memory_space<vmem>>, %arg11: memref<8x8x64xf32, #tpu.memory_space<vmem>>, %arg12: memref<1x25x128xf32, #tpu.memory_space<vmem>>, %arg13: memref<1x25x128xf32, #tpu.memory_space<vmem>>, %arg14: memref<1x25x128xf32, #tpu.memory_space<vmem>>, %arg15: memref<1x256x192xbf16, #tpu.memory_space<vmem>>, %arg16: memref<1x1x192xf32, #tpu.memory_space<vmem>>, %arg17: memref<1x128x64xbf16, #tpu.memory_space<vmem>>, %arg18: memref<1x1x64xf32, #tpu.memory_space<vmem>>, %arg19: memref<1x4x64xf32, #tpu.memory_space<vmem>>, %arg20: memref<1x8x8x128xf32, #tpu.memory_space<vmem>>, %arg21: memref<4x8x8x64xf32, #tpu.memory_space<vmem>>, %arg22: memref<16x20x128xf32, #tpu.memory_space<vmem>>, %arg23: memref<10x17x64xf32, #tpu.memory_space<vmem>>, %arg24: memref<10x17x64xf32, #tpu.memory_space<vmem>>) attributes {dimension_semantics = [#tpu.dimension_semantics<parallel>, #tpu.dimension_semantics<arbitrary>], iteration_bounds = array<i64: 2, 5>, scalar_prefetch = 0 : i64, scratch_operands = 4 : i64, tpu.core_type = #tpu.core_type<tc>, window_params = [{transform_indices = @transform_0, window_bounds = array<i64: 1, 5>}, {transform_indices = @transform_1, window_bounds = array<i64: 1, 5>}, {transform_indices = @transform_2, window_bounds = array<i64: 1, 5>}, {transform_indices = @transform_3, window_bounds = array<i64: 1, 8, 8, 32>}, {transform_indices = @transform_4, window_bounds = array<i64: 1, 8, 8, 32>}, {pipeline_mode = #tpu.pipeline_mode<synchronous>, transform_indices = @transform_5, window_bounds = array<i64: 32, 64>}, {pipeline_mode = #tpu.pipeline_mode<synchronous>, transform_indices = @transform_6, window_bounds = array<i64: 1, 64>}, {pipeline_mode = #tpu.pipeline_mode<synchronous>, transform_indices = @transform_7, window_bounds = array<i64: 32, 64>}, {pipeline_mode = #tpu.pipeline_mode<synchronous>, transform_indices = @transform_8, window_bounds = array<i64: 1, 64>}, {pipeline_mode = #tpu.pipeline_mode<synchronous>, transform_indices = @transform_9, window_bounds = array<i64: 8, 8, 64>}, {transform_indices = @transform_10, window_bounds = array<i64: 1, 25, 128>}, {transform_indices = @transform_11, window_bounds = array<i64: 1, 25, 128>}, {transform_indices = @transform_12, window_bounds = array<i64: 1, 25, 128>}, {transform_indices = @transform_13, window_bounds = array<i64: 1, 256, 192>}, {transform_indices = @transform_14, window_bounds = array<i64: 1, 1, 192>}, {transform_indices = @transform_15, window_bounds = array<i64: 1, 128, 64>}, {transform_indices = @transform_16, window_bounds = array<i64: 1, 1, 64>}, {transform_indices = @transform_17, window_bounds = array<i64: 1, 4, 64>}, {transform_indices = @transform_18, window_bounds = array<i64: 1, 8, 8, 128>}]} {
    %c0_i32 = arith.constant 0 : i32
    %0 = arith.cmpi eq, %arg1, %c0_i32 : i32
    %1 = arith.extui %0 : i1 to i32
    %c0_i32_0 = arith.constant 0 : i32
    %2 = arith.cmpi ne, %1, %c0_i32_0 : i32
    scf.if %2 {
      %cst_319 = arith.constant 0.000000e+00 : f32
      %661 = vector.broadcast %cst_319 : f32 to vector<16x20x128xf32>
      %c0_320 = arith.constant 0 : index
      %c0_321 = arith.constant 0 : index
      %c0_322 = arith.constant 0 : index
      %662 = vector.load %arg22[%c0_320, %c0_321, %c0_322] : memref<16x20x128xf32, #tpu.memory_space<vmem>>, vector<16x20x128xf32>
      tpu.vector_store %arg22[%c0_320, %c0_321, %c0_322], %661 {strides = array<i32>} : memref<16x20x128xf32, #tpu.memory_space<vmem>>, vector<16x20x128xf32>,
      %cst_323 = arith.constant 0xFF800000 : f32
      %663 = vector.broadcast %cst_323 : f32 to vector<10x17x64xf32>
      %c0_324 = arith.constant 0 : index
      %c0_325 = arith.constant 0 : index
      %c0_326 = arith.constant 0 : index
      %664 = vector.load %arg23[%c0_324, %c0_325, %c0_326] : memref<10x17x64xf32, #tpu.memory_space<vmem>>, vector<10x17x64xf32>
      tpu.vector_store %arg23[%c0_324, %c0_325, %c0_326], %663 {strides = array<i32>} : memref<10x17x64xf32, #tpu.memory_space<vmem>>, vector<10x17x64xf32>,
      %cst_327 = arith.constant 0.000000e+00 : f32
      %665 = vector.broadcast %cst_327 : f32 to vector<10x17x64xf32>
      %c0_328 = arith.constant 0 : index
      %c0_329 = arith.constant 0 : index
      %c0_330 = arith.constant 0 : index
      %666 = vector.load %arg24[%c0_328, %c0_329, %c0_330] : memref<10x17x64xf32, #tpu.memory_space<vmem>>, vector<10x17x64xf32>
      tpu.vector_store %arg24[%c0_328, %c0_329, %c0_330], %665 {strides = array<i32>} : memref<10x17x64xf32, #tpu.memory_space<vmem>>, vector<10x17x64xf32>,
      %cst_331 = arith.constant 0.000000e+00 : f32
      %667 = vector.broadcast %cst_331 : f32 to vector<4x8x8x64xf32>
      %c0_332 = arith.constant 0 : index
      %c0_333 = arith.constant 0 : index
      %c0_334 = arith.constant 0 : index
      %c0_335 = arith.constant 0 : index
      %668 = vector.load %arg21[%c0_332, %c0_333, %c0_334, %c0_335] : memref<4x8x8x64xf32, #tpu.memory_space<vmem>>, vector<4x8x8x64xf32>
      tpu.vector_store %arg21[%c0_332, %c0_333, %c0_334, %c0_335], %667 {strides = array<i32>} : memref<4x8x8x64xf32, #tpu.memory_space<vmem>>, vector<4x8x8x64xf32>,
      %c0_336 = arith.constant 0 : index
      %c0_337 = arith.constant 0 : index
      %c0_338 = arith.constant 0 : index
      %c0_339 = arith.constant 0 : index
      %669 = vector.load %arg5[%c0_336, %c0_337, %c0_338, %c0_339] : memref<1x8x8x32xf32, #tpu.memory_space<vmem>>, vector<1x8x8x32xf32>
      %670 = vector.shape_cast %669 : vector<1x8x8x32xf32> to vector<8x8x32xf32>
      %cst_340 = arith.constant 0.000000e+00 : f32
      %671 = vector.broadcast %cst_340 : f32 to vector<8x8x32xf32>
      %672 = arith.maximumf %670, %671 : vector<8x8x32xf32>
      %673 = vector.shape_cast %672 : vector<8x8x32xf32> to vector<64x32xf32>
      %674 = arith.truncf %673 : vector<64x32xf32> to vector<64x32xbf16>
      %c0_341 = arith.constant 0 : index
      %c0_342 = arith.constant 0 : index
      %675 = vector.load %arg7[%c0_341, %c0_342] : memref<32x64xbf16, #tpu.memory_space<vmem>>, vector<32x64xbf16>
      %cst_343 = arith.constant dense<0.000000e+00> : vector<64x64xf32>
      %676 = tpu.matmul %674, %675, %cst_343 {dimension_numbers = #tpu.dot_dimension_numbers<[1], [0], [0], [1], [0, 0, 1, 1], [], []>} : vector<64x32xbf16>, vector<32x64xbf16>, vector<64x64xf32> -> vector<64x64xf32>
      %c0_344 = arith.constant 0 : index
      %c0_345 = arith.constant 0 : index
      %677 = vector.load %arg8[%c0_344, %c0_345] : memref<1x64xf32, #tpu.memory_space<vmem>>, vector<1x64xf32>
      %678 = vector.broadcast %677 : vector<1x64xf32> to vector<64x64xf32>
      %679 = arith.addf %676, %678 : vector<64x64xf32>
      %680 = vector.shape_cast %679 : vector<64x64xf32> to vector<1x8x8x64xf32>
      %c0_346 = arith.constant 0 : index
      %c0_347 = arith.constant 0 : index
      %c0_348 = arith.constant 0 : index
      %c0_349 = arith.constant 0 : index
      %681 = vector.load %arg21[%c0_346, %c0_347, %c0_348, %c0_349] : memref<4x8x8x64xf32, #tpu.memory_space<vmem>>, vector<1x8x8x64xf32>
      tpu.vector_store %arg21[%c0_346, %c0_347, %c0_348, %c0_349], %680 {strides = array<i32>} : memref<4x8x8x64xf32, #tpu.memory_space<vmem>>, vector<1x8x8x64xf32>,
      %c0_350 = arith.constant 0 : index
      %c0_351 = arith.constant 0 : index
      %c0_352 = arith.constant 0 : index
      %c0_353 = arith.constant 0 : index
      %682 = vector.load %arg6[%c0_350, %c0_351, %c0_352, %c0_353] : memref<1x8x8x32xf32, #tpu.memory_space<vmem>>, vector<1x8x8x32xf32>
      %683 = vector.shape_cast %682 : vector<1x8x8x32xf32> to vector<8x8x32xf32>
      %cst_354 = arith.constant 0.000000e+00 : f32
      %684 = vector.broadcast %cst_354 : f32 to vector<8x8x32xf32>
      %685 = arith.maximumf %683, %684 : vector<8x8x32xf32>
      %686 = vector.shape_cast %685 : vector<8x8x32xf32> to vector<64x32xf32>
      %687 = arith.truncf %686 : vector<64x32xf32> to vector<64x32xbf16>
      %c0_355 = arith.constant 0 : index
      %c0_356 = arith.constant 0 : index
      %688 = vector.load %arg9[%c0_355, %c0_356] : memref<32x64xbf16, #tpu.memory_space<vmem>>, vector<32x64xbf16>
      %cst_357 = arith.constant dense<0.000000e+00> : vector<64x64xf32>
      %689 = tpu.matmul %687, %688, %cst_357 {dimension_numbers = #tpu.dot_dimension_numbers<[1], [0], [0], [1], [0, 0, 1, 1], [], []>} : vector<64x32xbf16>, vector<32x64xbf16>, vector<64x64xf32> -> vector<64x64xf32>
      %c0_358 = arith.constant 0 : index
      %c0_359 = arith.constant 0 : index
      %690 = vector.load %arg10[%c0_358, %c0_359] : memref<1x64xf32, #tpu.memory_space<vmem>>, vector<1x64xf32>
      %691 = vector.broadcast %690 : vector<1x64xf32> to vector<64x64xf32>
      %692 = arith.addf %689, %691 : vector<64x64xf32>
      %693 = vector.shape_cast %692 : vector<64x64xf32> to vector<1x8x8x64xf32>
      %c1_360 = arith.constant 1 : index
      %c0_361 = arith.constant 0 : index
      %c0_362 = arith.constant 0 : index
      %c0_363 = arith.constant 0 : index
      %694 = vector.load %arg21[%c1_360, %c0_361, %c0_362, %c0_363] : memref<4x8x8x64xf32, #tpu.memory_space<vmem>>, vector<1x8x8x64xf32>
      tpu.vector_store %arg21[%c1_360, %c0_361, %c0_362, %c0_363], %693 {strides = array<i32>} : memref<4x8x8x64xf32, #tpu.memory_space<vmem>>, vector<1x8x8x64xf32>,
    } else {
    }
    %c0 = arith.constant 0 : index
    %3 = arith.index_cast %arg1 : i32 to index
    %4 = memref.load %arg2[%c0, %3] : memref<1x5xi32, #tpu.memory_space<smem>>
    %c0_1 = arith.constant 0 : index
    %5 = arith.index_cast %arg1 : i32 to index
    %6 = memref.load %arg3[%c0_1, %5] : memref<1x5xi32, #tpu.memory_space<smem>>
    %c0_2 = arith.constant 0 : index
    %7 = arith.index_cast %arg1 : i32 to index
    %8 = memref.load %arg4[%c0_2, %7] : memref<1x5xf32, #tpu.memory_space<smem>>
    %9 = arith.index_cast %4 : i32 to index
    %c0_3 = arith.constant 0 : index
    %c0_4 = arith.constant 0 : index
    %c0_5 = arith.constant 0 : index
    %10 = vector.load %arg21[%9, %c0_3, %c0_4, %c0_5] : memref<4x8x8x64xf32, #tpu.memory_space<vmem>>, vector<1x8x8x64xf32>
    %11 = vector.shape_cast %10 : vector<1x8x8x64xf32> to vector<8x8x64xf32>
    %c1 = arith.constant 1 : index
    %c8 = arith.constant 8 : index
    %c0_6 = arith.constant 0 : index
    %12 = vector.load %arg23[%c1, %c8, %c0_6] : memref<10x17x64xf32, #tpu.memory_space<vmem>>, vector<8x8x64xf32>
    tpu.vector_store %arg23[%c1, %c8, %c0_6], %11 {strides = array<i32>} : memref<10x17x64xf32, #tpu.memory_space<vmem>>, vector<8x8x64xf32>,
    %c1_7 = arith.constant 1 : index
    %c8_8 = arith.constant 8 : index
    %c0_9 = arith.constant 0 : index
    %13 = vector.load %arg24[%c1_7, %c8_8, %c0_9] : memref<10x17x64xf32, #tpu.memory_space<vmem>>, vector<8x8x64xf32>
    tpu.vector_store %arg24[%c1_7, %c8_8, %c0_9], %11 {strides = array<i32>} : memref<10x17x64xf32, #tpu.memory_space<vmem>>, vector<8x8x64xf32>,
    %c0_10 = arith.constant 0 : index
    %c7 = arith.constant 7 : index
    %c0_11 = arith.constant 0 : index
    %14 = vector.load %arg23[%c0_10, %c7, %c0_11] : memref<10x17x64xf32, #tpu.memory_space<vmem>>, vector<10x8x64xf32>
    %c0_12 = arith.constant 0 : index
    %c7_13 = arith.constant 7 : index
    %c0_14 = arith.constant 0 : index
    %15 = vector.load %arg24[%c0_12, %c7_13, %c0_14] : memref<10x17x64xf32, #tpu.memory_space<vmem>>, vector<10x8x64xf32>
    %16 = vector.extract_strided_slice %14 {offsets = [0, 0, 0], sizes = [8, 8, 64], strides = [1, 1, 1]} : vector<10x8x64xf32> to vector<8x8x64xf32>
    %17 = vector.extract_strided_slice %15 {offsets = [0, 0, 0], sizes = [8, 8, 64], strides = [1, 1, 1]} : vector<10x8x64xf32> to vector<8x8x64xf32>
    %18 = vector.extract_strided_slice %14 {offsets = [1, 0, 0], sizes = [8, 8, 64], strides = [1, 1, 1]} : vector<10x8x64xf32> to vector<8x8x64xf32>
    %19 = vector.extract_strided_slice %15 {offsets = [1, 0, 0], sizes = [8, 8, 64], strides = [1, 1, 1]} : vector<10x8x64xf32> to vector<8x8x64xf32>
    %20 = arith.maximumf %16, %18 : vector<8x8x64xf32>
    %21 = arith.addf %17, %19 : vector<8x8x64xf32>
    %22 = vector.extract_strided_slice %14 {offsets = [2, 0, 0], sizes = [8, 8, 64], strides = [1, 1, 1]} : vector<10x8x64xf32> to vector<8x8x64xf32>
    %23 = vector.extract_strided_slice %15 {offsets = [2, 0, 0], sizes = [8, 8, 64], strides = [1, 1, 1]} : vector<10x8x64xf32> to vector<8x8x64xf32>
    %24 = arith.maximumf %20, %22 : vector<8x8x64xf32>
    %25 = arith.addf %21, %23 : vector<8x8x64xf32>
    %c0_15 = arith.constant 0 : index
    %c8_16 = arith.constant 8 : index
    %c0_17 = arith.constant 0 : index
    %26 = vector.load %arg23[%c0_15, %c8_16, %c0_17] : memref<10x17x64xf32, #tpu.memory_space<vmem>>, vector<10x8x64xf32>
    %c0_18 = arith.constant 0 : index
    %c8_19 = arith.constant 8 : index
    %c0_20 = arith.constant 0 : index
    %27 = vector.load %arg24[%c0_18, %c8_19, %c0_20] : memref<10x17x64xf32, #tpu.memory_space<vmem>>, vector<10x8x64xf32>
    %28 = vector.extract_strided_slice %26 {offsets = [0, 0, 0], sizes = [8, 8, 64], strides = [1, 1, 1]} : vector<10x8x64xf32> to vector<8x8x64xf32>
    %29 = vector.extract_strided_slice %27 {offsets = [0, 0, 0], sizes = [8, 8, 64], strides = [1, 1, 1]} : vector<10x8x64xf32> to vector<8x8x64xf32>
    %30 = arith.maximumf %24, %28 : vector<8x8x64xf32>
    %31 = arith.addf %25, %29 : vector<8x8x64xf32>
    %32 = vector.extract_strided_slice %26 {offsets = [1, 0, 0], sizes = [8, 8, 64], strides = [1, 1, 1]} : vector<10x8x64xf32> to vector<8x8x64xf32>
    %33 = vector.extract_strided_slice %27 {offsets = [1, 0, 0], sizes = [8, 8, 64], strides = [1, 1, 1]} : vector<10x8x64xf32> to vector<8x8x64xf32>
    %34 = arith.maximumf %30, %32 : vector<8x8x64xf32>
    %35 = arith.addf %31, %33 : vector<8x8x64xf32>
    %36 = vector.extract_strided_slice %26 {offsets = [2, 0, 0], sizes = [8, 8, 64], strides = [1, 1, 1]} : vector<10x8x64xf32> to vector<8x8x64xf32>
    %37 = vector.extract_strided_slice %27 {offsets = [2, 0, 0], sizes = [8, 8, 64], strides = [1, 1, 1]} : vector<10x8x64xf32> to vector<8x8x64xf32>
    %38 = arith.maximumf %34, %36 : vector<8x8x64xf32>
    %39 = arith.addf %35, %37 : vector<8x8x64xf32>
    %c0_21 = arith.constant 0 : index
    %c9 = arith.constant 9 : index
    %c0_22 = arith.constant 0 : index
    %40 = vector.load %arg23[%c0_21, %c9, %c0_22] : memref<10x17x64xf32, #tpu.memory_space<vmem>>, vector<10x8x64xf32>
    %c0_23 = arith.constant 0 : index
    %c9_24 = arith.constant 9 : index
    %c0_25 = arith.constant 0 : index
    %41 = vector.load %arg24[%c0_23, %c9_24, %c0_25] : memref<10x17x64xf32, #tpu.memory_space<vmem>>, vector<10x8x64xf32>
    %42 = vector.extract_strided_slice %40 {offsets = [0, 0, 0], sizes = [8, 8, 64], strides = [1, 1, 1]} : vector<10x8x64xf32> to vector<8x8x64xf32>
    %43 = vector.extract_strided_slice %41 {offsets = [0, 0, 0], sizes = [8, 8, 64], strides = [1, 1, 1]} : vector<10x8x64xf32> to vector<8x8x64xf32>
    %44 = arith.maximumf %38, %42 : vector<8x8x64xf32>
    %45 = arith.addf %39, %43 : vector<8x8x64xf32>
    %46 = vector.extract_strided_slice %40 {offsets = [1, 0, 0], sizes = [8, 8, 64], strides = [1, 1, 1]} : vector<10x8x64xf32> to vector<8x8x64xf32>
    %47 = vector.extract_strided_slice %41 {offsets = [1, 0, 0], sizes = [8, 8, 64], strides = [1, 1, 1]} : vector<10x8x64xf32> to vector<8x8x64xf32>
    %48 = arith.maximumf %44, %46 : vector<8x8x64xf32>
    %49 = arith.addf %45, %47 : vector<8x8x64xf32>
    %50 = vector.extract_strided_slice %40 {offsets = [2, 0, 0], sizes = [8, 8, 64], strides = [1, 1, 1]} : vector<10x8x64xf32> to vector<8x8x64xf32>
    %51 = vector.extract_strided_slice %41 {offsets = [2, 0, 0], sizes = [8, 8, 64], strides = [1, 1, 1]} : vector<10x8x64xf32> to vector<8x8x64xf32>
    %52 = arith.maximumf %48, %50 : vector<8x8x64xf32>
    %53 = arith.addf %49, %51 : vector<8x8x64xf32>
    %c0_26 = arith.constant 0 : index
    %c0_27 = arith.constant 0 : index
    %c0_28 = arith.constant 0 : index
    %54 = vector.load %arg19[%c0_26, %c0_27, %c0_28] : memref<1x4x64xf32, #tpu.memory_space<vmem>>, vector<1x1x64xf32>
    %55 = vector.shape_cast %54 : vector<1x1x64xf32> to vector<1x64xf32>
    %56 = vector.shape_cast %55 : vector<1x64xf32> to vector<1x1x64xf32>
    %57 = vector.broadcast %56 : vector<1x1x64xf32> to vector<8x8x64xf32>
    %58 = arith.mulf %52, %57 : vector<8x8x64xf32>
    %c0_29 = arith.constant 0 : index
    %c1_30 = arith.constant 1 : index
    %c0_31 = arith.constant 0 : index
    %59 = vector.load %arg19[%c0_29, %c1_30, %c0_31] : memref<1x4x64xf32, #tpu.memory_space<vmem>>, vector<1x1x64xf32>
    %60 = vector.shape_cast %59 : vector<1x1x64xf32> to vector<1x64xf32>
    %61 = vector.shape_cast %60 : vector<1x64xf32> to vector<1x1x64xf32>
    %62 = vector.broadcast %61 : vector<1x1x64xf32> to vector<8x8x64xf32>
    %63 = arith.addf %58, %62 : vector<8x8x64xf32>
    %c0_32 = arith.constant 0 : index
    %c0_33 = arith.constant 0 : index
    %c0_34 = arith.constant 0 : index
    %64 = vector.load %arg11[%c0_32, %c0_33, %c0_34] : memref<8x8x64xf32, #tpu.memory_space<vmem>>, vector<8x8x64xf32>
    %65 = arith.mulf %53, %64 : vector<8x8x64xf32>
    %c0_35 = arith.constant 0 : index
    %c2 = arith.constant 2 : index
    %c0_36 = arith.constant 0 : index
    %66 = vector.load %arg19[%c0_35, %c2, %c0_36] : memref<1x4x64xf32, #tpu.memory_space<vmem>>, vector<1x1x64xf32>
    %67 = vector.shape_cast %66 : vector<1x1x64xf32> to vector<1x64xf32>
    %68 = vector.shape_cast %67 : vector<1x64xf32> to vector<1x1x64xf32>
    %69 = vector.broadcast %68 : vector<1x1x64xf32> to vector<8x8x64xf32>
    %70 = arith.mulf %65, %69 : vector<8x8x64xf32>
    %71 = arith.addf %63, %70 : vector<8x8x64xf32>
    %c0_37 = arith.constant 0 : index
    %c3 = arith.constant 3 : index
    %c0_38 = arith.constant 0 : index
    %72 = vector.load %arg19[%c0_37, %c3, %c0_38] : memref<1x4x64xf32, #tpu.memory_space<vmem>>, vector<1x1x64xf32>
    %73 = vector.shape_cast %72 : vector<1x1x64xf32> to vector<1x64xf32>
    %74 = vector.shape_cast %73 : vector<1x64xf32> to vector<1x1x64xf32>
    %75 = vector.broadcast %74 : vector<1x1x64xf32> to vector<8x8x64xf32>
    %76 = arith.addf %71, %75 : vector<8x8x64xf32>
    %cst = arith.constant 0.000000e+00 : f32
    %77 = vector.broadcast %cst : f32 to vector<8x8x64xf32>
    %78 = arith.maximumf %11, %77 : vector<8x8x64xf32>
    %79 = tpu.concatenate %78, %78 in 2 : vector<8x8x64xf32>, vector<8x8x64xf32> -> vector<8x8x128xf32>
    %c4 = arith.constant 4 : index
    %c8_39 = arith.constant 8 : index
    %c0_40 = arith.constant 0 : index
    %80 = vector.load %arg22[%c4, %c8_39, %c0_40] : memref<16x20x128xf32, #tpu.memory_space<vmem>>, vector<8x8x128xf32>
    tpu.vector_store %arg22[%c4, %c8_39, %c0_40], %79 {strides = array<i32>} : memref<16x20x128xf32, #tpu.memory_space<vmem>>, vector<8x8x128xf32>,
    %c2_41 = arith.constant 2 : index
    %c6 = arith.constant 6 : index
    %c0_42 = arith.constant 0 : index
    %81 = vector.load %arg22[%c2_41, %c6, %c0_42] : memref<16x20x128xf32, #tpu.memory_space<vmem>>, vector<12x8x128xf32>
    %c0_43 = arith.constant 0 : index
    %c0_44 = arith.constant 0 : index
    %c0_45 = arith.constant 0 : index
    %82 = vector.load %arg12[%c0_43, %c0_44, %c0_45] : memref<1x25x128xf32, #tpu.memory_space<vmem>>, vector<1x1x128xf32>
    %83 = vector.shape_cast %82 : vector<1x1x128xf32> to vector<1x128xf32>
    %84 = vector.shape_cast %83 : vector<1x128xf32> to vector<1x1x128xf32>
    %85 = vector.extract_strided_slice %81 {offsets = [0, 0, 0], sizes = [8, 8, 128], strides = [1, 1, 1]} : vector<12x8x128xf32> to vector<8x8x128xf32>
    %86 = vector.broadcast %84 : vector<1x1x128xf32> to vector<8x8x128xf32>
    %87 = arith.mulf %85, %86 : vector<8x8x128xf32>
    %c0_46 = arith.constant 0 : index
    %c5 = arith.constant 5 : index
    %c0_47 = arith.constant 0 : index
    %88 = vector.load %arg12[%c0_46, %c5, %c0_47] : memref<1x25x128xf32, #tpu.memory_space<vmem>>, vector<1x1x128xf32>
    %89 = vector.shape_cast %88 : vector<1x1x128xf32> to vector<1x128xf32>
    %90 = vector.shape_cast %89 : vector<1x128xf32> to vector<1x1x128xf32>
    %91 = vector.extract_strided_slice %81 {offsets = [1, 0, 0], sizes = [8, 8, 128], strides = [1, 1, 1]} : vector<12x8x128xf32> to vector<8x8x128xf32>
    %92 = vector.broadcast %90 : vector<1x1x128xf32> to vector<8x8x128xf32>
    %93 = arith.mulf %91, %92 : vector<8x8x128xf32>
    %94 = arith.addf %87, %93 : vector<8x8x128xf32>
    %c0_48 = arith.constant 0 : index
    %c10 = arith.constant 10 : index
    %c0_49 = arith.constant 0 : index
    %95 = vector.load %arg12[%c0_48, %c10, %c0_49] : memref<1x25x128xf32, #tpu.memory_space<vmem>>, vector<1x1x128xf32>
    %96 = vector.shape_cast %95 : vector<1x1x128xf32> to vector<1x128xf32>
    %97 = vector.shape_cast %96 : vector<1x128xf32> to vector<1x1x128xf32>
    %98 = vector.extract_strided_slice %81 {offsets = [2, 0, 0], sizes = [8, 8, 128], strides = [1, 1, 1]} : vector<12x8x128xf32> to vector<8x8x128xf32>
    %99 = vector.broadcast %97 : vector<1x1x128xf32> to vector<8x8x128xf32>
    %100 = arith.mulf %98, %99 : vector<8x8x128xf32>
    %101 = arith.addf %94, %100 : vector<8x8x128xf32>
    %c0_50 = arith.constant 0 : index
    %c15 = arith.constant 15 : index
    %c0_51 = arith.constant 0 : index
    %102 = vector.load %arg12[%c0_50, %c15, %c0_51] : memref<1x25x128xf32, #tpu.memory_space<vmem>>, vector<1x1x128xf32>
    %103 = vector.shape_cast %102 : vector<1x1x128xf32> to vector<1x128xf32>
    %104 = vector.shape_cast %103 : vector<1x128xf32> to vector<1x1x128xf32>
    %105 = vector.extract_strided_slice %81 {offsets = [3, 0, 0], sizes = [8, 8, 128], strides = [1, 1, 1]} : vector<12x8x128xf32> to vector<8x8x128xf32>
    %106 = vector.broadcast %104 : vector<1x1x128xf32> to vector<8x8x128xf32>
    %107 = arith.mulf %105, %106 : vector<8x8x128xf32>
    %108 = arith.addf %101, %107 : vector<8x8x128xf32>
    %c0_52 = arith.constant 0 : index
    %c20 = arith.constant 20 : index
    %c0_53 = arith.constant 0 : index
    %109 = vector.load %arg12[%c0_52, %c20, %c0_53] : memref<1x25x128xf32, #tpu.memory_space<vmem>>, vector<1x1x128xf32>
    %110 = vector.shape_cast %109 : vector<1x1x128xf32> to vector<1x128xf32>
    %111 = vector.shape_cast %110 : vector<1x128xf32> to vector<1x1x128xf32>
    %112 = vector.extract_strided_slice %81 {offsets = [4, 0, 0], sizes = [8, 8, 128], strides = [1, 1, 1]} : vector<12x8x128xf32> to vector<8x8x128xf32>
    %113 = vector.broadcast %111 : vector<1x1x128xf32> to vector<8x8x128xf32>
    %114 = arith.mulf %112, %113 : vector<8x8x128xf32>
    %115 = arith.addf %108, %114 : vector<8x8x128xf32>
    %c2_54 = arith.constant 2 : index
    %c7_55 = arith.constant 7 : index
    %c0_56 = arith.constant 0 : index
    %116 = vector.load %arg22[%c2_54, %c7_55, %c0_56] : memref<16x20x128xf32, #tpu.memory_space<vmem>>, vector<12x8x128xf32>
    %c0_57 = arith.constant 0 : index
    %c1_58 = arith.constant 1 : index
    %c0_59 = arith.constant 0 : index
    %117 = vector.load %arg12[%c0_57, %c1_58, %c0_59] : memref<1x25x128xf32, #tpu.memory_space<vmem>>, vector<1x1x128xf32>
    %118 = vector.shape_cast %117 : vector<1x1x128xf32> to vector<1x128xf32>
    %119 = vector.shape_cast %118 : vector<1x128xf32> to vector<1x1x128xf32>
    %120 = vector.extract_strided_slice %116 {offsets = [0, 0, 0], sizes = [8, 8, 128], strides = [1, 1, 1]} : vector<12x8x128xf32> to vector<8x8x128xf32>
    %121 = vector.broadcast %119 : vector<1x1x128xf32> to vector<8x8x128xf32>
    %122 = arith.mulf %120, %121 : vector<8x8x128xf32>
    %123 = arith.addf %115, %122 : vector<8x8x128xf32>
    %c0_60 = arith.constant 0 : index
    %c6_61 = arith.constant 6 : index
    %c0_62 = arith.constant 0 : index
    %124 = vector.load %arg12[%c0_60, %c6_61, %c0_62] : memref<1x25x128xf32, #tpu.memory_space<vmem>>, vector<1x1x128xf32>
    %125 = vector.shape_cast %124 : vector<1x1x128xf32> to vector<1x128xf32>
    %126 = vector.shape_cast %125 : vector<1x128xf32> to vector<1x1x128xf32>
    %127 = vector.extract_strided_slice %116 {offsets = [1, 0, 0], sizes = [8, 8, 128], strides = [1, 1, 1]} : vector<12x8x128xf32> to vector<8x8x128xf32>
    %128 = vector.broadcast %126 : vector<1x1x128xf32> to vector<8x8x128xf32>
    %129 = arith.mulf %127, %128 : vector<8x8x128xf32>
    %130 = arith.addf %123, %129 : vector<8x8x128xf32>
    %c0_63 = arith.constant 0 : index
    %c11 = arith.constant 11 : index
    %c0_64 = arith.constant 0 : index
    %131 = vector.load %arg12[%c0_63, %c11, %c0_64] : memref<1x25x128xf32, #tpu.memory_space<vmem>>, vector<1x1x128xf32>
    %132 = vector.shape_cast %131 : vector<1x1x128xf32> to vector<1x128xf32>
    %133 = vector.shape_cast %132 : vector<1x128xf32> to vector<1x1x128xf32>
    %134 = vector.extract_strided_slice %116 {offsets = [2, 0, 0], sizes = [8, 8, 128], strides = [1, 1, 1]} : vector<12x8x128xf32> to vector<8x8x128xf32>
    %135 = vector.broadcast %133 : vector<1x1x128xf32> to vector<8x8x128xf32>
    %136 = arith.mulf %134, %135 : vector<8x8x128xf32>
    %137 = arith.addf %130, %136 : vector<8x8x128xf32>
    %c0_65 = arith.constant 0 : index
    %c16 = arith.constant 16 : index
    %c0_66 = arith.constant 0 : index
    %138 = vector.load %arg12[%c0_65, %c16, %c0_66] : memref<1x25x128xf32, #tpu.memory_space<vmem>>, vector<1x1x128xf32>
    %139 = vector.shape_cast %138 : vector<1x1x128xf32> to vector<1x128xf32>
    %140 = vector.shape_cast %139 : vector<1x128xf32> to vector<1x1x128xf32>
    %141 = vector.extract_strided_slice %116 {offsets = [3, 0, 0], sizes = [8, 8, 128], strides = [1, 1, 1]} : vector<12x8x128xf32> to vector<8x8x128xf32>
    %142 = vector.broadcast %140 : vector<1x1x128xf32> to vector<8x8x128xf32>
    %143 = arith.mulf %141, %142 : vector<8x8x128xf32>
    %144 = arith.addf %137, %143 : vector<8x8x128xf32>
    %c0_67 = arith.constant 0 : index
    %c21 = arith.constant 21 : index
    %c0_68 = arith.constant 0 : index
    %145 = vector.load %arg12[%c0_67, %c21, %c0_68] : memref<1x25x128xf32, #tpu.memory_space<vmem>>, vector<1x1x128xf32>
    %146 = vector.shape_cast %145 : vector<1x1x128xf32> to vector<1x128xf32>
    %147 = vector.shape_cast %146 : vector<1x128xf32> to vector<1x1x128xf32>
    %148 = vector.extract_strided_slice %116 {offsets = [4, 0, 0], sizes = [8, 8, 128], strides = [1, 1, 1]} : vector<12x8x128xf32> to vector<8x8x128xf32>
    %149 = vector.broadcast %147 : vector<1x1x128xf32> to vector<8x8x128xf32>
    %150 = arith.mulf %148, %149 : vector<8x8x128xf32>
    %151 = arith.addf %144, %150 : vector<8x8x128xf32>
    %c2_69 = arith.constant 2 : index
    %c8_70 = arith.constant 8 : index
    %c0_71 = arith.constant 0 : index
    %152 = vector.load %arg22[%c2_69, %c8_70, %c0_71] : memref<16x20x128xf32, #tpu.memory_space<vmem>>, vector<12x8x128xf32>
    %c0_72 = arith.constant 0 : index
    %c2_73 = arith.constant 2 : index
    %c0_74 = arith.constant 0 : index
    %153 = vector.load %arg12[%c0_72, %c2_73, %c0_74] : memref<1x25x128xf32, #tpu.memory_space<vmem>>, vector<1x1x128xf32>
    %154 = vector.shape_cast %153 : vector<1x1x128xf32> to vector<1x128xf32>
    %155 = vector.shape_cast %154 : vector<1x128xf32> to vector<1x1x128xf32>
    %156 = vector.extract_strided_slice %152 {offsets = [0, 0, 0], sizes = [8, 8, 128], strides = [1, 1, 1]} : vector<12x8x128xf32> to vector<8x8x128xf32>
    %157 = vector.broadcast %155 : vector<1x1x128xf32> to vector<8x8x128xf32>
    %158 = arith.mulf %156, %157 : vector<8x8x128xf32>
    %159 = arith.addf %151, %158 : vector<8x8x128xf32>
    %c0_75 = arith.constant 0 : index
    %c7_76 = arith.constant 7 : index
    %c0_77 = arith.constant 0 : index
    %160 = vector.load %arg12[%c0_75, %c7_76, %c0_77] : memref<1x25x128xf32, #tpu.memory_space<vmem>>, vector<1x1x128xf32>
    %161 = vector.shape_cast %160 : vector<1x1x128xf32> to vector<1x128xf32>
    %162 = vector.shape_cast %161 : vector<1x128xf32> to vector<1x1x128xf32>
    %163 = vector.extract_strided_slice %152 {offsets = [1, 0, 0], sizes = [8, 8, 128], strides = [1, 1, 1]} : vector<12x8x128xf32> to vector<8x8x128xf32>
    %164 = vector.broadcast %162 : vector<1x1x128xf32> to vector<8x8x128xf32>
    %165 = arith.mulf %163, %164 : vector<8x8x128xf32>
    %166 = arith.addf %159, %165 : vector<8x8x128xf32>
    %c0_78 = arith.constant 0 : index
    %c12 = arith.constant 12 : index
    %c0_79 = arith.constant 0 : index
    %167 = vector.load %arg12[%c0_78, %c12, %c0_79] : memref<1x25x128xf32, #tpu.memory_space<vmem>>, vector<1x1x128xf32>
    %168 = vector.shape_cast %167 : vector<1x1x128xf32> to vector<1x128xf32>
    %169 = vector.shape_cast %168 : vector<1x128xf32> to vector<1x1x128xf32>
    %170 = vector.extract_strided_slice %152 {offsets = [2, 0, 0], sizes = [8, 8, 128], strides = [1, 1, 1]} : vector<12x8x128xf32> to vector<8x8x128xf32>
    %171 = vector.broadcast %169 : vector<1x1x128xf32> to vector<8x8x128xf32>
    %172 = arith.mulf %170, %171 : vector<8x8x128xf32>
    %173 = arith.addf %166, %172 : vector<8x8x128xf32>
    %c0_80 = arith.constant 0 : index
    %c17 = arith.constant 17 : index
    %c0_81 = arith.constant 0 : index
    %174 = vector.load %arg12[%c0_80, %c17, %c0_81] : memref<1x25x128xf32, #tpu.memory_space<vmem>>, vector<1x1x128xf32>
    %175 = vector.shape_cast %174 : vector<1x1x128xf32> to vector<1x128xf32>
    %176 = vector.shape_cast %175 : vector<1x128xf32> to vector<1x1x128xf32>
    %177 = vector.extract_strided_slice %152 {offsets = [3, 0, 0], sizes = [8, 8, 128], strides = [1, 1, 1]} : vector<12x8x128xf32> to vector<8x8x128xf32>
    %178 = vector.broadcast %176 : vector<1x1x128xf32> to vector<8x8x128xf32>
    %179 = arith.mulf %177, %178 : vector<8x8x128xf32>
    %180 = arith.addf %173, %179 : vector<8x8x128xf32>
    %c0_82 = arith.constant 0 : index
    %c22 = arith.constant 22 : index
    %c0_83 = arith.constant 0 : index
    %181 = vector.load %arg12[%c0_82, %c22, %c0_83] : memref<1x25x128xf32, #tpu.memory_space<vmem>>, vector<1x1x128xf32>
    %182 = vector.shape_cast %181 : vector<1x1x128xf32> to vector<1x128xf32>
    %183 = vector.shape_cast %182 : vector<1x128xf32> to vector<1x1x128xf32>
    %184 = vector.extract_strided_slice %152 {offsets = [4, 0, 0], sizes = [8, 8, 128], strides = [1, 1, 1]} : vector<12x8x128xf32> to vector<8x8x128xf32>
    %185 = vector.broadcast %183 : vector<1x1x128xf32> to vector<8x8x128xf32>
    %186 = arith.mulf %184, %185 : vector<8x8x128xf32>
    %187 = arith.addf %180, %186 : vector<8x8x128xf32>
    %c2_84 = arith.constant 2 : index
    %c9_85 = arith.constant 9 : index
    %c0_86 = arith.constant 0 : index
    %188 = vector.load %arg22[%c2_84, %c9_85, %c0_86] : memref<16x20x128xf32, #tpu.memory_space<vmem>>, vector<12x8x128xf32>
    %c0_87 = arith.constant 0 : index
    %c3_88 = arith.constant 3 : index
    %c0_89 = arith.constant 0 : index
    %189 = vector.load %arg12[%c0_87, %c3_88, %c0_89] : memref<1x25x128xf32, #tpu.memory_space<vmem>>, vector<1x1x128xf32>
    %190 = vector.shape_cast %189 : vector<1x1x128xf32> to vector<1x128xf32>
    %191 = vector.shape_cast %190 : vector<1x128xf32> to vector<1x1x128xf32>
    %192 = vector.extract_strided_slice %188 {offsets = [0, 0, 0], sizes = [8, 8, 128], strides = [1, 1, 1]} : vector<12x8x128xf32> to vector<8x8x128xf32>
    %193 = vector.broadcast %191 : vector<1x1x128xf32> to vector<8x8x128xf32>
    %194 = arith.mulf %192, %193 : vector<8x8x128xf32>
    %195 = arith.addf %187, %194 : vector<8x8x128xf32>
    %c0_90 = arith.constant 0 : index
    %c8_91 = arith.constant 8 : index
    %c0_92 = arith.constant 0 : index
    %196 = vector.load %arg12[%c0_90, %c8_91, %c0_92] : memref<1x25x128xf32, #tpu.memory_space<vmem>>, vector<1x1x128xf32>
    %197 = vector.shape_cast %196 : vector<1x1x128xf32> to vector<1x128xf32>
    %198 = vector.shape_cast %197 : vector<1x128xf32> to vector<1x1x128xf32>
    %199 = vector.extract_strided_slice %188 {offsets = [1, 0, 0], sizes = [8, 8, 128], strides = [1, 1, 1]} : vector<12x8x128xf32> to vector<8x8x128xf32>
    %200 = vector.broadcast %198 : vector<1x1x128xf32> to vector<8x8x128xf32>
    %201 = arith.mulf %199, %200 : vector<8x8x128xf32>
    %202 = arith.addf %195, %201 : vector<8x8x128xf32>
    %c0_93 = arith.constant 0 : index
    %c13 = arith.constant 13 : index
    %c0_94 = arith.constant 0 : index
    %203 = vector.load %arg12[%c0_93, %c13, %c0_94] : memref<1x25x128xf32, #tpu.memory_space<vmem>>, vector<1x1x128xf32>
    %204 = vector.shape_cast %203 : vector<1x1x128xf32> to vector<1x128xf32>
    %205 = vector.shape_cast %204 : vector<1x128xf32> to vector<1x1x128xf32>
    %206 = vector.extract_strided_slice %188 {offsets = [2, 0, 0], sizes = [8, 8, 128], strides = [1, 1, 1]} : vector<12x8x128xf32> to vector<8x8x128xf32>
    %207 = vector.broadcast %205 : vector<1x1x128xf32> to vector<8x8x128xf32>
    %208 = arith.mulf %206, %207 : vector<8x8x128xf32>
    %209 = arith.addf %202, %208 : vector<8x8x128xf32>
    %c0_95 = arith.constant 0 : index
    %c18 = arith.constant 18 : index
    %c0_96 = arith.constant 0 : index
    %210 = vector.load %arg12[%c0_95, %c18, %c0_96] : memref<1x25x128xf32, #tpu.memory_space<vmem>>, vector<1x1x128xf32>
    %211 = vector.shape_cast %210 : vector<1x1x128xf32> to vector<1x128xf32>
    %212 = vector.shape_cast %211 : vector<1x128xf32> to vector<1x1x128xf32>
    %213 = vector.extract_strided_slice %188 {offsets = [3, 0, 0], sizes = [8, 8, 128], strides = [1, 1, 1]} : vector<12x8x128xf32> to vector<8x8x128xf32>
    %214 = vector.broadcast %212 : vector<1x1x128xf32> to vector<8x8x128xf32>
    %215 = arith.mulf %213, %214 : vector<8x8x128xf32>
    %216 = arith.addf %209, %215 : vector<8x8x128xf32>
    %c0_97 = arith.constant 0 : index
    %c23 = arith.constant 23 : index
    %c0_98 = arith.constant 0 : index
    %217 = vector.load %arg12[%c0_97, %c23, %c0_98] : memref<1x25x128xf32, #tpu.memory_space<vmem>>, vector<1x1x128xf32>
    %218 = vector.shape_cast %217 : vector<1x1x128xf32> to vector<1x128xf32>
    %219 = vector.shape_cast %218 : vector<1x128xf32> to vector<1x1x128xf32>
    %220 = vector.extract_strided_slice %188 {offsets = [4, 0, 0], sizes = [8, 8, 128], strides = [1, 1, 1]} : vector<12x8x128xf32> to vector<8x8x128xf32>
    %221 = vector.broadcast %219 : vector<1x1x128xf32> to vector<8x8x128xf32>
    %222 = arith.mulf %220, %221 : vector<8x8x128xf32>
    %223 = arith.addf %216, %222 : vector<8x8x128xf32>
    %c2_99 = arith.constant 2 : index
    %c10_100 = arith.constant 10 : index
    %c0_101 = arith.constant 0 : index
    %224 = vector.load %arg22[%c2_99, %c10_100, %c0_101] : memref<16x20x128xf32, #tpu.memory_space<vmem>>, vector<12x8x128xf32>
    %c0_102 = arith.constant 0 : index
    %c4_103 = arith.constant 4 : index
    %c0_104 = arith.constant 0 : index
    %225 = vector.load %arg12[%c0_102, %c4_103, %c0_104] : memref<1x25x128xf32, #tpu.memory_space<vmem>>, vector<1x1x128xf32>
    %226 = vector.shape_cast %225 : vector<1x1x128xf32> to vector<1x128xf32>
    %227 = vector.shape_cast %226 : vector<1x128xf32> to vector<1x1x128xf32>
    %228 = vector.extract_strided_slice %224 {offsets = [0, 0, 0], sizes = [8, 8, 128], strides = [1, 1, 1]} : vector<12x8x128xf32> to vector<8x8x128xf32>
    %229 = vector.broadcast %227 : vector<1x1x128xf32> to vector<8x8x128xf32>
    %230 = arith.mulf %228, %229 : vector<8x8x128xf32>
    %231 = arith.addf %223, %230 : vector<8x8x128xf32>
    %c0_105 = arith.constant 0 : index
    %c9_106 = arith.constant 9 : index
    %c0_107 = arith.constant 0 : index
    %232 = vector.load %arg12[%c0_105, %c9_106, %c0_107] : memref<1x25x128xf32, #tpu.memory_space<vmem>>, vector<1x1x128xf32>
    %233 = vector.shape_cast %232 : vector<1x1x128xf32> to vector<1x128xf32>
    %234 = vector.shape_cast %233 : vector<1x128xf32> to vector<1x1x128xf32>
    %235 = vector.extract_strided_slice %224 {offsets = [1, 0, 0], sizes = [8, 8, 128], strides = [1, 1, 1]} : vector<12x8x128xf32> to vector<8x8x128xf32>
    %236 = vector.broadcast %234 : vector<1x1x128xf32> to vector<8x8x128xf32>
    %237 = arith.mulf %235, %236 : vector<8x8x128xf32>
    %238 = arith.addf %231, %237 : vector<8x8x128xf32>
    %c0_108 = arith.constant 0 : index
    %c14 = arith.constant 14 : index
    %c0_109 = arith.constant 0 : index
    %239 = vector.load %arg12[%c0_108, %c14, %c0_109] : memref<1x25x128xf32, #tpu.memory_space<vmem>>, vector<1x1x128xf32>
    %240 = vector.shape_cast %239 : vector<1x1x128xf32> to vector<1x128xf32>
    %241 = vector.shape_cast %240 : vector<1x128xf32> to vector<1x1x128xf32>
    %242 = vector.extract_strided_slice %224 {offsets = [2, 0, 0], sizes = [8, 8, 128], strides = [1, 1, 1]} : vector<12x8x128xf32> to vector<8x8x128xf32>
    %243 = vector.broadcast %241 : vector<1x1x128xf32> to vector<8x8x128xf32>
    %244 = arith.mulf %242, %243 : vector<8x8x128xf32>
    %245 = arith.addf %238, %244 : vector<8x8x128xf32>
    %c0_110 = arith.constant 0 : index
    %c19 = arith.constant 19 : index
    %c0_111 = arith.constant 0 : index
    %246 = vector.load %arg12[%c0_110, %c19, %c0_111] : memref<1x25x128xf32, #tpu.memory_space<vmem>>, vector<1x1x128xf32>
    %247 = vector.shape_cast %246 : vector<1x1x128xf32> to vector<1x128xf32>
    %248 = vector.shape_cast %247 : vector<1x128xf32> to vector<1x1x128xf32>
    %249 = vector.extract_strided_slice %224 {offsets = [3, 0, 0], sizes = [8, 8, 128], strides = [1, 1, 1]} : vector<12x8x128xf32> to vector<8x8x128xf32>
    %250 = vector.broadcast %248 : vector<1x1x128xf32> to vector<8x8x128xf32>
    %251 = arith.mulf %249, %250 : vector<8x8x128xf32>
    %252 = arith.addf %245, %251 : vector<8x8x128xf32>
    %c0_112 = arith.constant 0 : index
    %c24 = arith.constant 24 : index
    %c0_113 = arith.constant 0 : index
    %253 = vector.load %arg12[%c0_112, %c24, %c0_113] : memref<1x25x128xf32, #tpu.memory_space<vmem>>, vector<1x1x128xf32>
    %254 = vector.shape_cast %253 : vector<1x1x128xf32> to vector<1x128xf32>
    %255 = vector.shape_cast %254 : vector<1x128xf32> to vector<1x1x128xf32>
    %256 = vector.extract_strided_slice %224 {offsets = [4, 0, 0], sizes = [8, 8, 128], strides = [1, 1, 1]} : vector<12x8x128xf32> to vector<8x8x128xf32>
    %257 = vector.broadcast %255 : vector<1x1x128xf32> to vector<8x8x128xf32>
    %258 = arith.mulf %256, %257 : vector<8x8x128xf32>
    %259 = arith.addf %252, %258 : vector<8x8x128xf32>
    %c0_114 = arith.constant 0 : index
    %c4_115 = arith.constant 4 : index
    %c0_116 = arith.constant 0 : index
    %260 = vector.load %arg22[%c0_114, %c4_115, %c0_116] : memref<16x20x128xf32, #tpu.memory_space<vmem>>, vector<16x8x128xf32>
    %c0_117 = arith.constant 0 : index
    %c0_118 = arith.constant 0 : index
    %c0_119 = arith.constant 0 : index
    %261 = vector.load %arg13[%c0_117, %c0_118, %c0_119] : memref<1x25x128xf32, #tpu.memory_space<vmem>>, vector<1x1x128xf32>
    %262 = vector.shape_cast %261 : vector<1x1x128xf32> to vector<1x128xf32>
    %263 = vector.shape_cast %262 : vector<1x128xf32> to vector<1x1x128xf32>
    %264 = vector.extract_strided_slice %260 {offsets = [0, 0, 0], sizes = [8, 8, 128], strides = [1, 1, 1]} : vector<16x8x128xf32> to vector<8x8x128xf32>
    %265 = vector.broadcast %263 : vector<1x1x128xf32> to vector<8x8x128xf32>
    %266 = arith.mulf %264, %265 : vector<8x8x128xf32>
    %c0_120 = arith.constant 0 : index
    %c5_121 = arith.constant 5 : index
    %c0_122 = arith.constant 0 : index
    %267 = vector.load %arg13[%c0_120, %c5_121, %c0_122] : memref<1x25x128xf32, #tpu.memory_space<vmem>>, vector<1x1x128xf32>
    %268 = vector.shape_cast %267 : vector<1x1x128xf32> to vector<1x128xf32>
    %269 = vector.shape_cast %268 : vector<1x128xf32> to vector<1x1x128xf32>
    %270 = vector.extract_strided_slice %260 {offsets = [2, 0, 0], sizes = [8, 8, 128], strides = [1, 1, 1]} : vector<16x8x128xf32> to vector<8x8x128xf32>
    %271 = vector.broadcast %269 : vector<1x1x128xf32> to vector<8x8x128xf32>
    %272 = arith.mulf %270, %271 : vector<8x8x128xf32>
    %273 = arith.addf %266, %272 : vector<8x8x128xf32>
    %c0_123 = arith.constant 0 : index
    %c10_124 = arith.constant 10 : index
    %c0_125 = arith.constant 0 : index
    %274 = vector.load %arg13[%c0_123, %c10_124, %c0_125] : memref<1x25x128xf32, #tpu.memory_space<vmem>>, vector<1x1x128xf32>
    %275 = vector.shape_cast %274 : vector<1x1x128xf32> to vector<1x128xf32>
    %276 = vector.shape_cast %275 : vector<1x128xf32> to vector<1x1x128xf32>
    %277 = vector.extract_strided_slice %260 {offsets = [4, 0, 0], sizes = [8, 8, 128], strides = [1, 1, 1]} : vector<16x8x128xf32> to vector<8x8x128xf32>
    %278 = vector.broadcast %276 : vector<1x1x128xf32> to vector<8x8x128xf32>
    %279 = arith.mulf %277, %278 : vector<8x8x128xf32>
    %280 = arith.addf %273, %279 : vector<8x8x128xf32>
    %c0_126 = arith.constant 0 : index
    %c15_127 = arith.constant 15 : index
    %c0_128 = arith.constant 0 : index
    %281 = vector.load %arg13[%c0_126, %c15_127, %c0_128] : memref<1x25x128xf32, #tpu.memory_space<vmem>>, vector<1x1x128xf32>
    %282 = vector.shape_cast %281 : vector<1x1x128xf32> to vector<1x128xf32>
    %283 = vector.shape_cast %282 : vector<1x128xf32> to vector<1x1x128xf32>
    %284 = vector.extract_strided_slice %260 {offsets = [6, 0, 0], sizes = [8, 8, 128], strides = [1, 1, 1]} : vector<16x8x128xf32> to vector<8x8x128xf32>
    %285 = vector.broadcast %283 : vector<1x1x128xf32> to vector<8x8x128xf32>
    %286 = arith.mulf %284, %285 : vector<8x8x128xf32>
    %287 = arith.addf %280, %286 : vector<8x8x128xf32>
    %c0_129 = arith.constant 0 : index
    %c20_130 = arith.constant 20 : index
    %c0_131 = arith.constant 0 : index
    %288 = vector.load %arg13[%c0_129, %c20_130, %c0_131] : memref<1x25x128xf32, #tpu.memory_space<vmem>>, vector<1x1x128xf32>
    %289 = vector.shape_cast %288 : vector<1x1x128xf32> to vector<1x128xf32>
    %290 = vector.shape_cast %289 : vector<1x128xf32> to vector<1x1x128xf32>
    %291 = vector.extract_strided_slice %260 {offsets = [8, 0, 0], sizes = [8, 8, 128], strides = [1, 1, 1]} : vector<16x8x128xf32> to vector<8x8x128xf32>
    %292 = vector.broadcast %290 : vector<1x1x128xf32> to vector<8x8x128xf32>
    %293 = arith.mulf %291, %292 : vector<8x8x128xf32>
    %294 = arith.addf %287, %293 : vector<8x8x128xf32>
    %c0_132 = arith.constant 0 : index
    %c6_133 = arith.constant 6 : index
    %c0_134 = arith.constant 0 : index
    %295 = vector.load %arg22[%c0_132, %c6_133, %c0_134] : memref<16x20x128xf32, #tpu.memory_space<vmem>>, vector<16x8x128xf32>
    %c0_135 = arith.constant 0 : index
    %c1_136 = arith.constant 1 : index
    %c0_137 = arith.constant 0 : index
    %296 = vector.load %arg13[%c0_135, %c1_136, %c0_137] : memref<1x25x128xf32, #tpu.memory_space<vmem>>, vector<1x1x128xf32>
    %297 = vector.shape_cast %296 : vector<1x1x128xf32> to vector<1x128xf32>
    %298 = vector.shape_cast %297 : vector<1x128xf32> to vector<1x1x128xf32>
    %299 = vector.extract_strided_slice %295 {offsets = [0, 0, 0], sizes = [8, 8, 128], strides = [1, 1, 1]} : vector<16x8x128xf32> to vector<8x8x128xf32>
    %300 = vector.broadcast %298 : vector<1x1x128xf32> to vector<8x8x128xf32>
    %301 = arith.mulf %299, %300 : vector<8x8x128xf32>
    %302 = arith.addf %294, %301 : vector<8x8x128xf32>
    %c0_138 = arith.constant 0 : index
    %c6_139 = arith.constant 6 : index
    %c0_140 = arith.constant 0 : index
    %303 = vector.load %arg13[%c0_138, %c6_139, %c0_140] : memref<1x25x128xf32, #tpu.memory_space<vmem>>, vector<1x1x128xf32>
    %304 = vector.shape_cast %303 : vector<1x1x128xf32> to vector<1x128xf32>
    %305 = vector.shape_cast %304 : vector<1x128xf32> to vector<1x1x128xf32>
    %306 = vector.extract_strided_slice %295 {offsets = [2, 0, 0], sizes = [8, 8, 128], strides = [1, 1, 1]} : vector<16x8x128xf32> to vector<8x8x128xf32>
    %307 = vector.broadcast %305 : vector<1x1x128xf32> to vector<8x8x128xf32>
    %308 = arith.mulf %306, %307 : vector<8x8x128xf32>
    %309 = arith.addf %302, %308 : vector<8x8x128xf32>
    %c0_141 = arith.constant 0 : index
    %c11_142 = arith.constant 11 : index
    %c0_143 = arith.constant 0 : index
    %310 = vector.load %arg13[%c0_141, %c11_142, %c0_143] : memref<1x25x128xf32, #tpu.memory_space<vmem>>, vector<1x1x128xf32>
    %311 = vector.shape_cast %310 : vector<1x1x128xf32> to vector<1x128xf32>
    %312 = vector.shape_cast %311 : vector<1x128xf32> to vector<1x1x128xf32>
    %313 = vector.extract_strided_slice %295 {offsets = [4, 0, 0], sizes = [8, 8, 128], strides = [1, 1, 1]} : vector<16x8x128xf32> to vector<8x8x128xf32>
    %314 = vector.broadcast %312 : vector<1x1x128xf32> to vector<8x8x128xf32>
    %315 = arith.mulf %313, %314 : vector<8x8x128xf32>
    %316 = arith.addf %309, %315 : vector<8x8x128xf32>
    %c0_144 = arith.constant 0 : index
    %c16_145 = arith.constant 16 : index
    %c0_146 = arith.constant 0 : index
    %317 = vector.load %arg13[%c0_144, %c16_145, %c0_146] : memref<1x25x128xf32, #tpu.memory_space<vmem>>, vector<1x1x128xf32>
    %318 = vector.shape_cast %317 : vector<1x1x128xf32> to vector<1x128xf32>
    %319 = vector.shape_cast %318 : vector<1x128xf32> to vector<1x1x128xf32>
    %320 = vector.extract_strided_slice %295 {offsets = [6, 0, 0], sizes = [8, 8, 128], strides = [1, 1, 1]} : vector<16x8x128xf32> to vector<8x8x128xf32>
    %321 = vector.broadcast %319 : vector<1x1x128xf32> to vector<8x8x128xf32>
    %322 = arith.mulf %320, %321 : vector<8x8x128xf32>
    %323 = arith.addf %316, %322 : vector<8x8x128xf32>
    %c0_147 = arith.constant 0 : index
    %c21_148 = arith.constant 21 : index
    %c0_149 = arith.constant 0 : index
    %324 = vector.load %arg13[%c0_147, %c21_148, %c0_149] : memref<1x25x128xf32, #tpu.memory_space<vmem>>, vector<1x1x128xf32>
    %325 = vector.shape_cast %324 : vector<1x1x128xf32> to vector<1x128xf32>
    %326 = vector.shape_cast %325 : vector<1x128xf32> to vector<1x1x128xf32>
    %327 = vector.extract_strided_slice %295 {offsets = [8, 0, 0], sizes = [8, 8, 128], strides = [1, 1, 1]} : vector<16x8x128xf32> to vector<8x8x128xf32>
    %328 = vector.broadcast %326 : vector<1x1x128xf32> to vector<8x8x128xf32>
    %329 = arith.mulf %327, %328 : vector<8x8x128xf32>
    %330 = arith.addf %323, %329 : vector<8x8x128xf32>
    %c0_150 = arith.constant 0 : index
    %c8_151 = arith.constant 8 : index
    %c0_152 = arith.constant 0 : index
    %331 = vector.load %arg22[%c0_150, %c8_151, %c0_152] : memref<16x20x128xf32, #tpu.memory_space<vmem>>, vector<16x8x128xf32>
    %c0_153 = arith.constant 0 : index
    %c2_154 = arith.constant 2 : index
    %c0_155 = arith.constant 0 : index
    %332 = vector.load %arg13[%c0_153, %c2_154, %c0_155] : memref<1x25x128xf32, #tpu.memory_space<vmem>>, vector<1x1x128xf32>
    %333 = vector.shape_cast %332 : vector<1x1x128xf32> to vector<1x128xf32>
    %334 = vector.shape_cast %333 : vector<1x128xf32> to vector<1x1x128xf32>
    %335 = vector.extract_strided_slice %331 {offsets = [0, 0, 0], sizes = [8, 8, 128], strides = [1, 1, 1]} : vector<16x8x128xf32> to vector<8x8x128xf32>
    %336 = vector.broadcast %334 : vector<1x1x128xf32> to vector<8x8x128xf32>
    %337 = arith.mulf %335, %336 : vector<8x8x128xf32>
    %338 = arith.addf %330, %337 : vector<8x8x128xf32>
    %c0_156 = arith.constant 0 : index
    %c7_157 = arith.constant 7 : index
    %c0_158 = arith.constant 0 : index
    %339 = vector.load %arg13[%c0_156, %c7_157, %c0_158] : memref<1x25x128xf32, #tpu.memory_space<vmem>>, vector<1x1x128xf32>
    %340 = vector.shape_cast %339 : vector<1x1x128xf32> to vector<1x128xf32>
    %341 = vector.shape_cast %340 : vector<1x128xf32> to vector<1x1x128xf32>
    %342 = vector.extract_strided_slice %331 {offsets = [2, 0, 0], sizes = [8, 8, 128], strides = [1, 1, 1]} : vector<16x8x128xf32> to vector<8x8x128xf32>
    %343 = vector.broadcast %341 : vector<1x1x128xf32> to vector<8x8x128xf32>
    %344 = arith.mulf %342, %343 : vector<8x8x128xf32>
    %345 = arith.addf %338, %344 : vector<8x8x128xf32>
    %c0_159 = arith.constant 0 : index
    %c12_160 = arith.constant 12 : index
    %c0_161 = arith.constant 0 : index
    %346 = vector.load %arg13[%c0_159, %c12_160, %c0_161] : memref<1x25x128xf32, #tpu.memory_space<vmem>>, vector<1x1x128xf32>
    %347 = vector.shape_cast %346 : vector<1x1x128xf32> to vector<1x128xf32>
    %348 = vector.shape_cast %347 : vector<1x128xf32> to vector<1x1x128xf32>
    %349 = vector.extract_strided_slice %331 {offsets = [4, 0, 0], sizes = [8, 8, 128], strides = [1, 1, 1]} : vector<16x8x128xf32> to vector<8x8x128xf32>
    %350 = vector.broadcast %348 : vector<1x1x128xf32> to vector<8x8x128xf32>
    %351 = arith.mulf %349, %350 : vector<8x8x128xf32>
    %352 = arith.addf %345, %351 : vector<8x8x128xf32>
    %c0_162 = arith.constant 0 : index
    %c17_163 = arith.constant 17 : index
    %c0_164 = arith.constant 0 : index
    %353 = vector.load %arg13[%c0_162, %c17_163, %c0_164] : memref<1x25x128xf32, #tpu.memory_space<vmem>>, vector<1x1x128xf32>
    %354 = vector.shape_cast %353 : vector<1x1x128xf32> to vector<1x128xf32>
    %355 = vector.shape_cast %354 : vector<1x128xf32> to vector<1x1x128xf32>
    %356 = vector.extract_strided_slice %331 {offsets = [6, 0, 0], sizes = [8, 8, 128], strides = [1, 1, 1]} : vector<16x8x128xf32> to vector<8x8x128xf32>
    %357 = vector.broadcast %355 : vector<1x1x128xf32> to vector<8x8x128xf32>
    %358 = arith.mulf %356, %357 : vector<8x8x128xf32>
    %359 = arith.addf %352, %358 : vector<8x8x128xf32>
    %c0_165 = arith.constant 0 : index
    %c22_166 = arith.constant 22 : index
    %c0_167 = arith.constant 0 : index
    %360 = vector.load %arg13[%c0_165, %c22_166, %c0_167] : memref<1x25x128xf32, #tpu.memory_space<vmem>>, vector<1x1x128xf32>
    %361 = vector.shape_cast %360 : vector<1x1x128xf32> to vector<1x128xf32>
    %362 = vector.shape_cast %361 : vector<1x128xf32> to vector<1x1x128xf32>
    %363 = vector.extract_strided_slice %331 {offsets = [8, 0, 0], sizes = [8, 8, 128], strides = [1, 1, 1]} : vector<16x8x128xf32> to vector<8x8x128xf32>
    %364 = vector.broadcast %362 : vector<1x1x128xf32> to vector<8x8x128xf32>
    %365 = arith.mulf %363, %364 : vector<8x8x128xf32>
    %366 = arith.addf %359, %365 : vector<8x8x128xf32>
    %c0_168 = arith.constant 0 : index
    %c10_169 = arith.constant 10 : index
    %c0_170 = arith.constant 0 : index
    %367 = vector.load %arg22[%c0_168, %c10_169, %c0_170] : memref<16x20x128xf32, #tpu.memory_space<vmem>>, vector<16x8x128xf32>
    %c0_171 = arith.constant 0 : index
    %c3_172 = arith.constant 3 : index
    %c0_173 = arith.constant 0 : index
    %368 = vector.load %arg13[%c0_171, %c3_172, %c0_173] : memref<1x25x128xf32, #tpu.memory_space<vmem>>, vector<1x1x128xf32>
    %369 = vector.shape_cast %368 : vector<1x1x128xf32> to vector<1x128xf32>
    %370 = vector.shape_cast %369 : vector<1x128xf32> to vector<1x1x128xf32>
    %371 = vector.extract_strided_slice %367 {offsets = [0, 0, 0], sizes = [8, 8, 128], strides = [1, 1, 1]} : vector<16x8x128xf32> to vector<8x8x128xf32>
    %372 = vector.broadcast %370 : vector<1x1x128xf32> to vector<8x8x128xf32>
    %373 = arith.mulf %371, %372 : vector<8x8x128xf32>
    %374 = arith.addf %366, %373 : vector<8x8x128xf32>
    %c0_174 = arith.constant 0 : index
    %c8_175 = arith.constant 8 : index
    %c0_176 = arith.constant 0 : index
    %375 = vector.load %arg13[%c0_174, %c8_175, %c0_176] : memref<1x25x128xf32, #tpu.memory_space<vmem>>, vector<1x1x128xf32>
    %376 = vector.shape_cast %375 : vector<1x1x128xf32> to vector<1x128xf32>
    %377 = vector.shape_cast %376 : vector<1x128xf32> to vector<1x1x128xf32>
    %378 = vector.extract_strided_slice %367 {offsets = [2, 0, 0], sizes = [8, 8, 128], strides = [1, 1, 1]} : vector<16x8x128xf32> to vector<8x8x128xf32>
    %379 = vector.broadcast %377 : vector<1x1x128xf32> to vector<8x8x128xf32>
    %380 = arith.mulf %378, %379 : vector<8x8x128xf32>
    %381 = arith.addf %374, %380 : vector<8x8x128xf32>
    %c0_177 = arith.constant 0 : index
    %c13_178 = arith.constant 13 : index
    %c0_179 = arith.constant 0 : index
    %382 = vector.load %arg13[%c0_177, %c13_178, %c0_179] : memref<1x25x128xf32, #tpu.memory_space<vmem>>, vector<1x1x128xf32>
    %383 = vector.shape_cast %382 : vector<1x1x128xf32> to vector<1x128xf32>
    %384 = vector.shape_cast %383 : vector<1x128xf32> to vector<1x1x128xf32>
    %385 = vector.extract_strided_slice %367 {offsets = [4, 0, 0], sizes = [8, 8, 128], strides = [1, 1, 1]} : vector<16x8x128xf32> to vector<8x8x128xf32>
    %386 = vector.broadcast %384 : vector<1x1x128xf32> to vector<8x8x128xf32>
    %387 = arith.mulf %385, %386 : vector<8x8x128xf32>
    %388 = arith.addf %381, %387 : vector<8x8x128xf32>
    %c0_180 = arith.constant 0 : index
    %c18_181 = arith.constant 18 : index
    %c0_182 = arith.constant 0 : index
    %389 = vector.load %arg13[%c0_180, %c18_181, %c0_182] : memref<1x25x128xf32, #tpu.memory_space<vmem>>, vector<1x1x128xf32>
    %390 = vector.shape_cast %389 : vector<1x1x128xf32> to vector<1x128xf32>
    %391 = vector.shape_cast %390 : vector<1x128xf32> to vector<1x1x128xf32>
    %392 = vector.extract_strided_slice %367 {offsets = [6, 0, 0], sizes = [8, 8, 128], strides = [1, 1, 1]} : vector<16x8x128xf32> to vector<8x8x128xf32>
    %393 = vector.broadcast %391 : vector<1x1x128xf32> to vector<8x8x128xf32>
    %394 = arith.mulf %392, %393 : vector<8x8x128xf32>
    %395 = arith.addf %388, %394 : vector<8x8x128xf32>
    %c0_183 = arith.constant 0 : index
    %c23_184 = arith.constant 23 : index
    %c0_185 = arith.constant 0 : index
    %396 = vector.load %arg13[%c0_183, %c23_184, %c0_185] : memref<1x25x128xf32, #tpu.memory_space<vmem>>, vector<1x1x128xf32>
    %397 = vector.shape_cast %396 : vector<1x1x128xf32> to vector<1x128xf32>
    %398 = vector.shape_cast %397 : vector<1x128xf32> to vector<1x1x128xf32>
    %399 = vector.extract_strided_slice %367 {offsets = [8, 0, 0], sizes = [8, 8, 128], strides = [1, 1, 1]} : vector<16x8x128xf32> to vector<8x8x128xf32>
    %400 = vector.broadcast %398 : vector<1x1x128xf32> to vector<8x8x128xf32>
    %401 = arith.mulf %399, %400 : vector<8x8x128xf32>
    %402 = arith.addf %395, %401 : vector<8x8x128xf32>
    %c0_186 = arith.constant 0 : index
    %c12_187 = arith.constant 12 : index
    %c0_188 = arith.constant 0 : index
    %403 = vector.load %arg22[%c0_186, %c12_187, %c0_188] : memref<16x20x128xf32, #tpu.memory_space<vmem>>, vector<16x8x128xf32>
    %c0_189 = arith.constant 0 : index
    %c4_190 = arith.constant 4 : index
    %c0_191 = arith.constant 0 : index
    %404 = vector.load %arg13[%c0_189, %c4_190, %c0_191] : memref<1x25x128xf32, #tpu.memory_space<vmem>>, vector<1x1x128xf32>
    %405 = vector.shape_cast %404 : vector<1x1x128xf32> to vector<1x128xf32>
    %406 = vector.shape_cast %405 : vector<1x128xf32> to vector<1x1x128xf32>
    %407 = vector.extract_strided_slice %403 {offsets = [0, 0, 0], sizes = [8, 8, 128], strides = [1, 1, 1]} : vector<16x8x128xf32> to vector<8x8x128xf32>
    %408 = vector.broadcast %406 : vector<1x1x128xf32> to vector<8x8x128xf32>
    %409 = arith.mulf %407, %408 : vector<8x8x128xf32>
    %410 = arith.addf %402, %409 : vector<8x8x128xf32>
    %c0_192 = arith.constant 0 : index
    %c9_193 = arith.constant 9 : index
    %c0_194 = arith.constant 0 : index
    %411 = vector.load %arg13[%c0_192, %c9_193, %c0_194] : memref<1x25x128xf32, #tpu.memory_space<vmem>>, vector<1x1x128xf32>
    %412 = vector.shape_cast %411 : vector<1x1x128xf32> to vector<1x128xf32>
    %413 = vector.shape_cast %412 : vector<1x128xf32> to vector<1x1x128xf32>
    %414 = vector.extract_strided_slice %403 {offsets = [2, 0, 0], sizes = [8, 8, 128], strides = [1, 1, 1]} : vector<16x8x128xf32> to vector<8x8x128xf32>
    %415 = vector.broadcast %413 : vector<1x1x128xf32> to vector<8x8x128xf32>
    %416 = arith.mulf %414, %415 : vector<8x8x128xf32>
    %417 = arith.addf %410, %416 : vector<8x8x128xf32>
    %c0_195 = arith.constant 0 : index
    %c14_196 = arith.constant 14 : index
    %c0_197 = arith.constant 0 : index
    %418 = vector.load %arg13[%c0_195, %c14_196, %c0_197] : memref<1x25x128xf32, #tpu.memory_space<vmem>>, vector<1x1x128xf32>
    %419 = vector.shape_cast %418 : vector<1x1x128xf32> to vector<1x128xf32>
    %420 = vector.shape_cast %419 : vector<1x128xf32> to vector<1x1x128xf32>
    %421 = vector.extract_strided_slice %403 {offsets = [4, 0, 0], sizes = [8, 8, 128], strides = [1, 1, 1]} : vector<16x8x128xf32> to vector<8x8x128xf32>
    %422 = vector.broadcast %420 : vector<1x1x128xf32> to vector<8x8x128xf32>
    %423 = arith.mulf %421, %422 : vector<8x8x128xf32>
    %424 = arith.addf %417, %423 : vector<8x8x128xf32>
    %c0_198 = arith.constant 0 : index
    %c19_199 = arith.constant 19 : index
    %c0_200 = arith.constant 0 : index
    %425 = vector.load %arg13[%c0_198, %c19_199, %c0_200] : memref<1x25x128xf32, #tpu.memory_space<vmem>>, vector<1x1x128xf32>
    %426 = vector.shape_cast %425 : vector<1x1x128xf32> to vector<1x128xf32>
    %427 = vector.shape_cast %426 : vector<1x128xf32> to vector<1x1x128xf32>
    %428 = vector.extract_strided_slice %403 {offsets = [6, 0, 0], sizes = [8, 8, 128], strides = [1, 1, 1]} : vector<16x8x128xf32> to vector<8x8x128xf32>
    %429 = vector.broadcast %427 : vector<1x1x128xf32> to vector<8x8x128xf32>
    %430 = arith.mulf %428, %429 : vector<8x8x128xf32>
    %431 = arith.addf %424, %430 : vector<8x8x128xf32>
    %c0_201 = arith.constant 0 : index
    %c24_202 = arith.constant 24 : index
    %c0_203 = arith.constant 0 : index
    %432 = vector.load %arg13[%c0_201, %c24_202, %c0_203] : memref<1x25x128xf32, #tpu.memory_space<vmem>>, vector<1x1x128xf32>
    %433 = vector.shape_cast %432 : vector<1x1x128xf32> to vector<1x128xf32>
    %434 = vector.shape_cast %433 : vector<1x128xf32> to vector<1x1x128xf32>
    %435 = vector.extract_strided_slice %403 {offsets = [8, 0, 0], sizes = [8, 8, 128], strides = [1, 1, 1]} : vector<16x8x128xf32> to vector<8x8x128xf32>
    %436 = vector.broadcast %434 : vector<1x1x128xf32> to vector<8x8x128xf32>
    %437 = arith.mulf %435, %436 : vector<8x8x128xf32>
    %438 = arith.addf %431, %437 : vector<8x8x128xf32>
    %439 = vector.shape_cast %259 : vector<8x8x128xf32> to vector<64x128xf32>
    %440 = arith.truncf %439 : vector<64x128xf32> to vector<64x128xbf16>
    %441 = vector.shape_cast %438 : vector<8x8x128xf32> to vector<64x128xf32>
    %442 = arith.truncf %441 : vector<64x128xf32> to vector<64x128xbf16>
    %443 = tpu.concatenate %440, %442 in 1 : vector<64x128xbf16>, vector<64x128xbf16> -> vector<64x256xbf16>
    %c0_204 = arith.constant 0 : index
    %c0_205 = arith.constant 0 : index
    %c0_206 = arith.constant 0 : index
    %444 = vector.load %arg15[%c0_204, %c0_205, %c0_206] : memref<1x256x192xbf16, #tpu.memory_space<vmem>>, vector<1x256x192xbf16>
    %445 = vector.shape_cast %444 : vector<1x256x192xbf16> to vector<256x192xbf16>
    %cst_207 = arith.constant dense<0.000000e+00> : vector<64x192xf32>
    %446 = tpu.matmul %443, %445, %cst_207 {dimension_numbers = #tpu.dot_dimension_numbers<[1], [0], [0], [1], [0, 0, 1, 1], [], []>} : vector<64x256xbf16>, vector<256x192xbf16>, vector<64x192xf32> -> vector<64x192xf32>
    %c0_208 = arith.constant 0 : index
    %c0_209 = arith.constant 0 : index
    %c0_210 = arith.constant 0 : index
    %447 = vector.load %arg16[%c0_208, %c0_209, %c0_210] : memref<1x1x192xf32, #tpu.memory_space<vmem>>, vector<1x1x192xf32>
    %448 = vector.shape_cast %447 : vector<1x1x192xf32> to vector<1x192xf32>
    %449 = vector.broadcast %448 : vector<1x192xf32> to vector<64x192xf32>
    %450 = arith.addf %446, %449 : vector<64x192xf32>
    %451 = vector.extract_strided_slice %450 {offsets = [0, 128], sizes = [64, 64], strides = [1, 1]} : vector<64x192xf32> to vector<64x64xf32>
    %452 = vector.shape_cast %451 : vector<64x64xf32> to vector<8x8x64xf32>
    %453 = vector.extract_strided_slice %450 {offsets = [0, 0], sizes = [64, 128], strides = [1, 1]} : vector<64x192xf32> to vector<64x128xf32>
    %cst_211 = arith.constant 0.000000e+00 : f32
    %454 = vector.broadcast %cst_211 : f32 to vector<64x128xf32>
    %455 = arith.maximumf %453, %454 : vector<64x128xf32>
    %456 = vector.shape_cast %455 : vector<64x128xf32> to vector<8x8x128xf32>
    %c4_212 = arith.constant 4 : index
    %c8_213 = arith.constant 8 : index
    %c0_214 = arith.constant 0 : index
    %457 = vector.load %arg22[%c4_212, %c8_213, %c0_214] : memref<16x20x128xf32, #tpu.memory_space<vmem>>, vector<8x8x128xf32>
    tpu.vector_store %arg22[%c4_212, %c8_213, %c0_214], %456 {strides = array<i32>} : memref<16x20x128xf32, #tpu.memory_space<vmem>>, vector<8x8x128xf32>,
    %c2_215 = arith.constant 2 : index
    %c6_216 = arith.constant 6 : index
    %c0_217 = arith.constant 0 : index
    %458 = vector.load %arg22[%c2_215, %c6_216, %c0_217] : memref<16x20x128xf32, #tpu.memory_space<vmem>>, vector<12x8x128xf32>
    %c0_218 = arith.constant 0 : index
    %c0_219 = arith.constant 0 : index
    %c0_220 = arith.constant 0 : index
    %459 = vector.load %arg14[%c0_218, %c0_219, %c0_220] : memref<1x25x128xf32, #tpu.memory_space<vmem>>, vector<1x1x128xf32>
    %460 = vector.shape_cast %459 : vector<1x1x128xf32> to vector<1x128xf32>
    %461 = vector.shape_cast %460 : vector<1x128xf32> to vector<1x1x128xf32>
    %462 = vector.extract_strided_slice %458 {offsets = [0, 0, 0], sizes = [8, 8, 128], strides = [1, 1, 1]} : vector<12x8x128xf32> to vector<8x8x128xf32>
    %463 = vector.broadcast %461 : vector<1x1x128xf32> to vector<8x8x128xf32>
    %464 = arith.mulf %462, %463 : vector<8x8x128xf32>
    %c0_221 = arith.constant 0 : index
    %c5_222 = arith.constant 5 : index
    %c0_223 = arith.constant 0 : index
    %465 = vector.load %arg14[%c0_221, %c5_222, %c0_223] : memref<1x25x128xf32, #tpu.memory_space<vmem>>, vector<1x1x128xf32>
    %466 = vector.shape_cast %465 : vector<1x1x128xf32> to vector<1x128xf32>
    %467 = vector.shape_cast %466 : vector<1x128xf32> to vector<1x1x128xf32>
    %468 = vector.extract_strided_slice %458 {offsets = [1, 0, 0], sizes = [8, 8, 128], strides = [1, 1, 1]} : vector<12x8x128xf32> to vector<8x8x128xf32>
    %469 = vector.broadcast %467 : vector<1x1x128xf32> to vector<8x8x128xf32>
    %470 = arith.mulf %468, %469 : vector<8x8x128xf32>
    %471 = arith.addf %464, %470 : vector<8x8x128xf32>
    %c0_224 = arith.constant 0 : index
    %c10_225 = arith.constant 10 : index
    %c0_226 = arith.constant 0 : index
    %472 = vector.load %arg14[%c0_224, %c10_225, %c0_226] : memref<1x25x128xf32, #tpu.memory_space<vmem>>, vector<1x1x128xf32>
    %473 = vector.shape_cast %472 : vector<1x1x128xf32> to vector<1x128xf32>
    %474 = vector.shape_cast %473 : vector<1x128xf32> to vector<1x1x128xf32>
    %475 = vector.extract_strided_slice %458 {offsets = [2, 0, 0], sizes = [8, 8, 128], strides = [1, 1, 1]} : vector<12x8x128xf32> to vector<8x8x128xf32>
    %476 = vector.broadcast %474 : vector<1x1x128xf32> to vector<8x8x128xf32>
    %477 = arith.mulf %475, %476 : vector<8x8x128xf32>
    %478 = arith.addf %471, %477 : vector<8x8x128xf32>
    %c0_227 = arith.constant 0 : index
    %c15_228 = arith.constant 15 : index
    %c0_229 = arith.constant 0 : index
    %479 = vector.load %arg14[%c0_227, %c15_228, %c0_229] : memref<1x25x128xf32, #tpu.memory_space<vmem>>, vector<1x1x128xf32>
    %480 = vector.shape_cast %479 : vector<1x1x128xf32> to vector<1x128xf32>
    %481 = vector.shape_cast %480 : vector<1x128xf32> to vector<1x1x128xf32>
    %482 = vector.extract_strided_slice %458 {offsets = [3, 0, 0], sizes = [8, 8, 128], strides = [1, 1, 1]} : vector<12x8x128xf32> to vector<8x8x128xf32>
    %483 = vector.broadcast %481 : vector<1x1x128xf32> to vector<8x8x128xf32>
    %484 = arith.mulf %482, %483 : vector<8x8x128xf32>
    %485 = arith.addf %478, %484 : vector<8x8x128xf32>
    %c0_230 = arith.constant 0 : index
    %c20_231 = arith.constant 20 : index
    %c0_232 = arith.constant 0 : index
    %486 = vector.load %arg14[%c0_230, %c20_231, %c0_232] : memref<1x25x128xf32, #tpu.memory_space<vmem>>, vector<1x1x128xf32>
    %487 = vector.shape_cast %486 : vector<1x1x128xf32> to vector<1x128xf32>
    %488 = vector.shape_cast %487 : vector<1x128xf32> to vector<1x1x128xf32>
    %489 = vector.extract_strided_slice %458 {offsets = [4, 0, 0], sizes = [8, 8, 128], strides = [1, 1, 1]} : vector<12x8x128xf32> to vector<8x8x128xf32>
    %490 = vector.broadcast %488 : vector<1x1x128xf32> to vector<8x8x128xf32>
    %491 = arith.mulf %489, %490 : vector<8x8x128xf32>
    %492 = arith.addf %485, %491 : vector<8x8x128xf32>
    %c2_233 = arith.constant 2 : index
    %c7_234 = arith.constant 7 : index
    %c0_235 = arith.constant 0 : index
    %493 = vector.load %arg22[%c2_233, %c7_234, %c0_235] : memref<16x20x128xf32, #tpu.memory_space<vmem>>, vector<12x8x128xf32>
    %c0_236 = arith.constant 0 : index
    %c1_237 = arith.constant 1 : index
    %c0_238 = arith.constant 0 : index
    %494 = vector.load %arg14[%c0_236, %c1_237, %c0_238] : memref<1x25x128xf32, #tpu.memory_space<vmem>>, vector<1x1x128xf32>
    %495 = vector.shape_cast %494 : vector<1x1x128xf32> to vector<1x128xf32>
    %496 = vector.shape_cast %495 : vector<1x128xf32> to vector<1x1x128xf32>
    %497 = vector.extract_strided_slice %493 {offsets = [0, 0, 0], sizes = [8, 8, 128], strides = [1, 1, 1]} : vector<12x8x128xf32> to vector<8x8x128xf32>
    %498 = vector.broadcast %496 : vector<1x1x128xf32> to vector<8x8x128xf32>
    %499 = arith.mulf %497, %498 : vector<8x8x128xf32>
    %500 = arith.addf %492, %499 : vector<8x8x128xf32>
    %c0_239 = arith.constant 0 : index
    %c6_240 = arith.constant 6 : index
    %c0_241 = arith.constant 0 : index
    %501 = vector.load %arg14[%c0_239, %c6_240, %c0_241] : memref<1x25x128xf32, #tpu.memory_space<vmem>>, vector<1x1x128xf32>
    %502 = vector.shape_cast %501 : vector<1x1x128xf32> to vector<1x128xf32>
    %503 = vector.shape_cast %502 : vector<1x128xf32> to vector<1x1x128xf32>
    %504 = vector.extract_strided_slice %493 {offsets = [1, 0, 0], sizes = [8, 8, 128], strides = [1, 1, 1]} : vector<12x8x128xf32> to vector<8x8x128xf32>
    %505 = vector.broadcast %503 : vector<1x1x128xf32> to vector<8x8x128xf32>
    %506 = arith.mulf %504, %505 : vector<8x8x128xf32>
    %507 = arith.addf %500, %506 : vector<8x8x128xf32>
    %c0_242 = arith.constant 0 : index
    %c11_243 = arith.constant 11 : index
    %c0_244 = arith.constant 0 : index
    %508 = vector.load %arg14[%c0_242, %c11_243, %c0_244] : memref<1x25x128xf32, #tpu.memory_space<vmem>>, vector<1x1x128xf32>
    %509 = vector.shape_cast %508 : vector<1x1x128xf32> to vector<1x128xf32>
    %510 = vector.shape_cast %509 : vector<1x128xf32> to vector<1x1x128xf32>
    %511 = vector.extract_strided_slice %493 {offsets = [2, 0, 0], sizes = [8, 8, 128], strides = [1, 1, 1]} : vector<12x8x128xf32> to vector<8x8x128xf32>
    %512 = vector.broadcast %510 : vector<1x1x128xf32> to vector<8x8x128xf32>
    %513 = arith.mulf %511, %512 : vector<8x8x128xf32>
    %514 = arith.addf %507, %513 : vector<8x8x128xf32>
    %c0_245 = arith.constant 0 : index
    %c16_246 = arith.constant 16 : index
    %c0_247 = arith.constant 0 : index
    %515 = vector.load %arg14[%c0_245, %c16_246, %c0_247] : memref<1x25x128xf32, #tpu.memory_space<vmem>>, vector<1x1x128xf32>
    %516 = vector.shape_cast %515 : vector<1x1x128xf32> to vector<1x128xf32>
    %517 = vector.shape_cast %516 : vector<1x128xf32> to vector<1x1x128xf32>
    %518 = vector.extract_strided_slice %493 {offsets = [3, 0, 0], sizes = [8, 8, 128], strides = [1, 1, 1]} : vector<12x8x128xf32> to vector<8x8x128xf32>
    %519 = vector.broadcast %517 : vector<1x1x128xf32> to vector<8x8x128xf32>
    %520 = arith.mulf %518, %519 : vector<8x8x128xf32>
    %521 = arith.addf %514, %520 : vector<8x8x128xf32>
    %c0_248 = arith.constant 0 : index
    %c21_249 = arith.constant 21 : index
    %c0_250 = arith.constant 0 : index
    %522 = vector.load %arg14[%c0_248, %c21_249, %c0_250] : memref<1x25x128xf32, #tpu.memory_space<vmem>>, vector<1x1x128xf32>
    %523 = vector.shape_cast %522 : vector<1x1x128xf32> to vector<1x128xf32>
    %524 = vector.shape_cast %523 : vector<1x128xf32> to vector<1x1x128xf32>
    %525 = vector.extract_strided_slice %493 {offsets = [4, 0, 0], sizes = [8, 8, 128], strides = [1, 1, 1]} : vector<12x8x128xf32> to vector<8x8x128xf32>
    %526 = vector.broadcast %524 : vector<1x1x128xf32> to vector<8x8x128xf32>
    %527 = arith.mulf %525, %526 : vector<8x8x128xf32>
    %528 = arith.addf %521, %527 : vector<8x8x128xf32>
    %c2_251 = arith.constant 2 : index
    %c8_252 = arith.constant 8 : index
    %c0_253 = arith.constant 0 : index
    %529 = vector.load %arg22[%c2_251, %c8_252, %c0_253] : memref<16x20x128xf32, #tpu.memory_space<vmem>>, vector<12x8x128xf32>
    %c0_254 = arith.constant 0 : index
    %c2_255 = arith.constant 2 : index
    %c0_256 = arith.constant 0 : index
    %530 = vector.load %arg14[%c0_254, %c2_255, %c0_256] : memref<1x25x128xf32, #tpu.memory_space<vmem>>, vector<1x1x128xf32>
    %531 = vector.shape_cast %530 : vector<1x1x128xf32> to vector<1x128xf32>
    %532 = vector.shape_cast %531 : vector<1x128xf32> to vector<1x1x128xf32>
    %533 = vector.extract_strided_slice %529 {offsets = [0, 0, 0], sizes = [8, 8, 128], strides = [1, 1, 1]} : vector<12x8x128xf32> to vector<8x8x128xf32>
    %534 = vector.broadcast %532 : vector<1x1x128xf32> to vector<8x8x128xf32>
    %535 = arith.mulf %533, %534 : vector<8x8x128xf32>
    %536 = arith.addf %528, %535 : vector<8x8x128xf32>
    %c0_257 = arith.constant 0 : index
    %c7_258 = arith.constant 7 : index
    %c0_259 = arith.constant 0 : index
    %537 = vector.load %arg14[%c0_257, %c7_258, %c0_259] : memref<1x25x128xf32, #tpu.memory_space<vmem>>, vector<1x1x128xf32>
    %538 = vector.shape_cast %537 : vector<1x1x128xf32> to vector<1x128xf32>
    %539 = vector.shape_cast %538 : vector<1x128xf32> to vector<1x1x128xf32>
    %540 = vector.extract_strided_slice %529 {offsets = [1, 0, 0], sizes = [8, 8, 128], strides = [1, 1, 1]} : vector<12x8x128xf32> to vector<8x8x128xf32>
    %541 = vector.broadcast %539 : vector<1x1x128xf32> to vector<8x8x128xf32>
    %542 = arith.mulf %540, %541 : vector<8x8x128xf32>
    %543 = arith.addf %536, %542 : vector<8x8x128xf32>
    %c0_260 = arith.constant 0 : index
    %c12_261 = arith.constant 12 : index
    %c0_262 = arith.constant 0 : index
    %544 = vector.load %arg14[%c0_260, %c12_261, %c0_262] : memref<1x25x128xf32, #tpu.memory_space<vmem>>, vector<1x1x128xf32>
    %545 = vector.shape_cast %544 : vector<1x1x128xf32> to vector<1x128xf32>
    %546 = vector.shape_cast %545 : vector<1x128xf32> to vector<1x1x128xf32>
    %547 = vector.extract_strided_slice %529 {offsets = [2, 0, 0], sizes = [8, 8, 128], strides = [1, 1, 1]} : vector<12x8x128xf32> to vector<8x8x128xf32>
    %548 = vector.broadcast %546 : vector<1x1x128xf32> to vector<8x8x128xf32>
    %549 = arith.mulf %547, %548 : vector<8x8x128xf32>
    %550 = arith.addf %543, %549 : vector<8x8x128xf32>
    %c0_263 = arith.constant 0 : index
    %c17_264 = arith.constant 17 : index
    %c0_265 = arith.constant 0 : index
    %551 = vector.load %arg14[%c0_263, %c17_264, %c0_265] : memref<1x25x128xf32, #tpu.memory_space<vmem>>, vector<1x1x128xf32>
    %552 = vector.shape_cast %551 : vector<1x1x128xf32> to vector<1x128xf32>
    %553 = vector.shape_cast %552 : vector<1x128xf32> to vector<1x1x128xf32>
    %554 = vector.extract_strided_slice %529 {offsets = [3, 0, 0], sizes = [8, 8, 128], strides = [1, 1, 1]} : vector<12x8x128xf32> to vector<8x8x128xf32>
    %555 = vector.broadcast %553 : vector<1x1x128xf32> to vector<8x8x128xf32>
    %556 = arith.mulf %554, %555 : vector<8x8x128xf32>
    %557 = arith.addf %550, %556 : vector<8x8x128xf32>
    %c0_266 = arith.constant 0 : index
    %c22_267 = arith.constant 22 : index
    %c0_268 = arith.constant 0 : index
    %558 = vector.load %arg14[%c0_266, %c22_267, %c0_268] : memref<1x25x128xf32, #tpu.memory_space<vmem>>, vector<1x1x128xf32>
    %559 = vector.shape_cast %558 : vector<1x1x128xf32> to vector<1x128xf32>
    %560 = vector.shape_cast %559 : vector<1x128xf32> to vector<1x1x128xf32>
    %561 = vector.extract_strided_slice %529 {offsets = [4, 0, 0], sizes = [8, 8, 128], strides = [1, 1, 1]} : vector<12x8x128xf32> to vector<8x8x128xf32>
    %562 = vector.broadcast %560 : vector<1x1x128xf32> to vector<8x8x128xf32>
    %563 = arith.mulf %561, %562 : vector<8x8x128xf32>
    %564 = arith.addf %557, %563 : vector<8x8x128xf32>
    %c2_269 = arith.constant 2 : index
    %c9_270 = arith.constant 9 : index
    %c0_271 = arith.constant 0 : index
    %565 = vector.load %arg22[%c2_269, %c9_270, %c0_271] : memref<16x20x128xf32, #tpu.memory_space<vmem>>, vector<12x8x128xf32>
    %c0_272 = arith.constant 0 : index
    %c3_273 = arith.constant 3 : index
    %c0_274 = arith.constant 0 : index
    %566 = vector.load %arg14[%c0_272, %c3_273, %c0_274] : memref<1x25x128xf32, #tpu.memory_space<vmem>>, vector<1x1x128xf32>
    %567 = vector.shape_cast %566 : vector<1x1x128xf32> to vector<1x128xf32>
    %568 = vector.shape_cast %567 : vector<1x128xf32> to vector<1x1x128xf32>
    %569 = vector.extract_strided_slice %565 {offsets = [0, 0, 0], sizes = [8, 8, 128], strides = [1, 1, 1]} : vector<12x8x128xf32> to vector<8x8x128xf32>
    %570 = vector.broadcast %568 : vector<1x1x128xf32> to vector<8x8x128xf32>
    %571 = arith.mulf %569, %570 : vector<8x8x128xf32>
    %572 = arith.addf %564, %571 : vector<8x8x128xf32>
    %c0_275 = arith.constant 0 : index
    %c8_276 = arith.constant 8 : index
    %c0_277 = arith.constant 0 : index
    %573 = vector.load %arg14[%c0_275, %c8_276, %c0_277] : memref<1x25x128xf32, #tpu.memory_space<vmem>>, vector<1x1x128xf32>
    %574 = vector.shape_cast %573 : vector<1x1x128xf32> to vector<1x128xf32>
    %575 = vector.shape_cast %574 : vector<1x128xf32> to vector<1x1x128xf32>
    %576 = vector.extract_strided_slice %565 {offsets = [1, 0, 0], sizes = [8, 8, 128], strides = [1, 1, 1]} : vector<12x8x128xf32> to vector<8x8x128xf32>
    %577 = vector.broadcast %575 : vector<1x1x128xf32> to vector<8x8x128xf32>
    %578 = arith.mulf %576, %577 : vector<8x8x128xf32>
    %579 = arith.addf %572, %578 : vector<8x8x128xf32>
    %c0_278 = arith.constant 0 : index
    %c13_279 = arith.constant 13 : index
    %c0_280 = arith.constant 0 : index
    %580 = vector.load %arg14[%c0_278, %c13_279, %c0_280] : memref<1x25x128xf32, #tpu.memory_space<vmem>>, vector<1x1x128xf32>
    %581 = vector.shape_cast %580 : vector<1x1x128xf32> to vector<1x128xf32>
    %582 = vector.shape_cast %581 : vector<1x128xf32> to vector<1x1x128xf32>
    %583 = vector.extract_strided_slice %565 {offsets = [2, 0, 0], sizes = [8, 8, 128], strides = [1, 1, 1]} : vector<12x8x128xf32> to vector<8x8x128xf32>
    %584 = vector.broadcast %582 : vector<1x1x128xf32> to vector<8x8x128xf32>
    %585 = arith.mulf %583, %584 : vector<8x8x128xf32>
    %586 = arith.addf %579, %585 : vector<8x8x128xf32>
    %c0_281 = arith.constant 0 : index
    %c18_282 = arith.constant 18 : index
    %c0_283 = arith.constant 0 : index
    %587 = vector.load %arg14[%c0_281, %c18_282, %c0_283] : memref<1x25x128xf32, #tpu.memory_space<vmem>>, vector<1x1x128xf32>
    %588 = vector.shape_cast %587 : vector<1x1x128xf32> to vector<1x128xf32>
    %589 = vector.shape_cast %588 : vector<1x128xf32> to vector<1x1x128xf32>
    %590 = vector.extract_strided_slice %565 {offsets = [3, 0, 0], sizes = [8, 8, 128], strides = [1, 1, 1]} : vector<12x8x128xf32> to vector<8x8x128xf32>
    %591 = vector.broadcast %589 : vector<1x1x128xf32> to vector<8x8x128xf32>
    %592 = arith.mulf %590, %591 : vector<8x8x128xf32>
    %593 = arith.addf %586, %592 : vector<8x8x128xf32>
    %c0_284 = arith.constant 0 : index
    %c23_285 = arith.constant 23 : index
    %c0_286 = arith.constant 0 : index
    %594 = vector.load %arg14[%c0_284, %c23_285, %c0_286] : memref<1x25x128xf32, #tpu.memory_space<vmem>>, vector<1x1x128xf32>
    %595 = vector.shape_cast %594 : vector<1x1x128xf32> to vector<1x128xf32>
    %596 = vector.shape_cast %595 : vector<1x128xf32> to vector<1x1x128xf32>
    %597 = vector.extract_strided_slice %565 {offsets = [4, 0, 0], sizes = [8, 8, 128], strides = [1, 1, 1]} : vector<12x8x128xf32> to vector<8x8x128xf32>
    %598 = vector.broadcast %596 : vector<1x1x128xf32> to vector<8x8x128xf32>
    %599 = arith.mulf %597, %598 : vector<8x8x128xf32>
    %600 = arith.addf %593, %599 : vector<8x8x128xf32>
    %c2_287 = arith.constant 2 : index
    %c10_288 = arith.constant 10 : index
    %c0_289 = arith.constant 0 : index
    %601 = vector.load %arg22[%c2_287, %c10_288, %c0_289] : memref<16x20x128xf32, #tpu.memory_space<vmem>>, vector<12x8x128xf32>
    %c0_290 = arith.constant 0 : index
    %c4_291 = arith.constant 4 : index
    %c0_292 = arith.constant 0 : index
    %602 = vector.load %arg14[%c0_290, %c4_291, %c0_292] : memref<1x25x128xf32, #tpu.memory_space<vmem>>, vector<1x1x128xf32>
    %603 = vector.shape_cast %602 : vector<1x1x128xf32> to vector<1x128xf32>
    %604 = vector.shape_cast %603 : vector<1x128xf32> to vector<1x1x128xf32>
    %605 = vector.extract_strided_slice %601 {offsets = [0, 0, 0], sizes = [8, 8, 128], strides = [1, 1, 1]} : vector<12x8x128xf32> to vector<8x8x128xf32>
    %606 = vector.broadcast %604 : vector<1x1x128xf32> to vector<8x8x128xf32>
    %607 = arith.mulf %605, %606 : vector<8x8x128xf32>
    %608 = arith.addf %600, %607 : vector<8x8x128xf32>
    %c0_293 = arith.constant 0 : index
    %c9_294 = arith.constant 9 : index
    %c0_295 = arith.constant 0 : index
    %609 = vector.load %arg14[%c0_293, %c9_294, %c0_295] : memref<1x25x128xf32, #tpu.memory_space<vmem>>, vector<1x1x128xf32>
    %610 = vector.shape_cast %609 : vector<1x1x128xf32> to vector<1x128xf32>
    %611 = vector.shape_cast %610 : vector<1x128xf32> to vector<1x1x128xf32>
    %612 = vector.extract_strided_slice %601 {offsets = [1, 0, 0], sizes = [8, 8, 128], strides = [1, 1, 1]} : vector<12x8x128xf32> to vector<8x8x128xf32>
    %613 = vector.broadcast %611 : vector<1x1x128xf32> to vector<8x8x128xf32>
    %614 = arith.mulf %612, %613 : vector<8x8x128xf32>
    %615 = arith.addf %608, %614 : vector<8x8x128xf32>
    %c0_296 = arith.constant 0 : index
    %c14_297 = arith.constant 14 : index
    %c0_298 = arith.constant 0 : index
    %616 = vector.load %arg14[%c0_296, %c14_297, %c0_298] : memref<1x25x128xf32, #tpu.memory_space<vmem>>, vector<1x1x128xf32>
    %617 = vector.shape_cast %616 : vector<1x1x128xf32> to vector<1x128xf32>
    %618 = vector.shape_cast %617 : vector<1x128xf32> to vector<1x1x128xf32>
    %619 = vector.extract_strided_slice %601 {offsets = [2, 0, 0], sizes = [8, 8, 128], strides = [1, 1, 1]} : vector<12x8x128xf32> to vector<8x8x128xf32>
    %620 = vector.broadcast %618 : vector<1x1x128xf32> to vector<8x8x128xf32>
    %621 = arith.mulf %619, %620 : vector<8x8x128xf32>
    %622 = arith.addf %615, %621 : vector<8x8x128xf32>
    %c0_299 = arith.constant 0 : index
    %c19_300 = arith.constant 19 : index
    %c0_301 = arith.constant 0 : index
    %623 = vector.load %arg14[%c0_299, %c19_300, %c0_301] : memref<1x25x128xf32, #tpu.memory_space<vmem>>, vector<1x1x128xf32>
    %624 = vector.shape_cast %623 : vector<1x1x128xf32> to vector<1x128xf32>
    %625 = vector.shape_cast %624 : vector<1x128xf32> to vector<1x1x128xf32>
    %626 = vector.extract_strided_slice %601 {offsets = [3, 0, 0], sizes = [8, 8, 128], strides = [1, 1, 1]} : vector<12x8x128xf32> to vector<8x8x128xf32>
    %627 = vector.broadcast %625 : vector<1x1x128xf32> to vector<8x8x128xf32>
    %628 = arith.mulf %626, %627 : vector<8x8x128xf32>
    %629 = arith.addf %622, %628 : vector<8x8x128xf32>
    %c0_302 = arith.constant 0 : index
    %c24_303 = arith.constant 24 : index
    %c0_304 = arith.constant 0 : index
    %630 = vector.load %arg14[%c0_302, %c24_303, %c0_304] : memref<1x25x128xf32, #tpu.memory_space<vmem>>, vector<1x1x128xf32>
    %631 = vector.shape_cast %630 : vector<1x1x128xf32> to vector<1x128xf32>
    %632 = vector.shape_cast %631 : vector<1x128xf32> to vector<1x1x128xf32>
    %633 = vector.extract_strided_slice %601 {offsets = [4, 0, 0], sizes = [8, 8, 128], strides = [1, 1, 1]} : vector<12x8x128xf32> to vector<8x8x128xf32>
    %634 = vector.broadcast %632 : vector<1x1x128xf32> to vector<8x8x128xf32>
    %635 = arith.mulf %633, %634 : vector<8x8x128xf32>
    %636 = arith.addf %629, %635 : vector<8x8x128xf32>
    %637 = vector.shape_cast %636 : vector<8x8x128xf32> to vector<64x128xf32>
    %638 = arith.truncf %637 : vector<64x128xf32> to vector<64x128xbf16>
    %c0_305 = arith.constant 0 : index
    %c0_306 = arith.constant 0 : index
    %c0_307 = arith.constant 0 : index
    %639 = vector.load %arg17[%c0_305, %c0_306, %c0_307] : memref<1x128x64xbf16, #tpu.memory_space<vmem>>, vector<1x128x64xbf16>
    %640 = vector.shape_cast %639 : vector<1x128x64xbf16> to vector<128x64xbf16>
    %cst_308 = arith.constant dense<0.000000e+00> : vector<64x64xf32>
    %641 = tpu.matmul %638, %640, %cst_308 {dimension_numbers = #tpu.dot_dimension_numbers<[1], [0], [0], [1], [0, 0, 1, 1], [], []>} : vector<64x128xbf16>, vector<128x64xbf16>, vector<64x64xf32> -> vector<64x64xf32>
    %c0_309 = arith.constant 0 : index
    %c0_310 = arith.constant 0 : index
    %c0_311 = arith.constant 0 : index
    %642 = vector.load %arg18[%c0_309, %c0_310, %c0_311] : memref<1x1x64xf32, #tpu.memory_space<vmem>>, vector<1x1x64xf32>
    %643 = vector.shape_cast %642 : vector<1x1x64xf32> to vector<1x64xf32>
    %644 = vector.broadcast %643 : vector<1x64xf32> to vector<64x64xf32>
    %645 = arith.addf %641, %644 : vector<64x64xf32>
    %646 = vector.shape_cast %645 : vector<64x64xf32> to vector<8x8x64xf32>
    %647 = vector.broadcast %8 : f32 to vector<8x8x64xf32>
    %648 = arith.mulf %647, %11 : vector<8x8x64xf32>
    %649 = arith.addf %648, %76 : vector<8x8x64xf32>
    %650 = arith.addf %649, %452 : vector<8x8x64xf32>
    %651 = arith.addf %650, %646 : vector<8x8x64xf32>
    %652 = arith.index_cast %6 : i32 to index
    %c0_312 = arith.constant 0 : index
    %c0_313 = arith.constant 0 : index
    %c0_314 = arith.constant 0 : index
    %653 = vector.load %arg21[%652, %c0_312, %c0_313, %c0_314] : memref<4x8x8x64xf32, #tpu.memory_space<vmem>>, vector<1x8x8x64xf32>
    %654 = vector.shape_cast %651 : vector<8x8x64xf32> to vector<1x8x8x64xf32>
    %655 = arith.addf %653, %654 : vector<1x8x8x64xf32>
    %656 = arith.index_cast %6 : i32 to index
    %c0_315 = arith.constant 0 : index
    %c0_316 = arith.constant 0 : index
    %c0_317 = arith.constant 0 : index
    %657 = vector.load %arg21[%656, %c0_315, %c0_316, %c0_317] : memref<4x8x8x64xf32, #tpu.memory_space<vmem>>, vector<1x8x8x64xf32>
    tpu.vector_store %arg21[%656, %c0_315, %c0_316, %c0_317], %655 {strides = array<i32>} : memref<4x8x8x64xf32, #tpu.memory_space<vmem>>, vector<1x8x8x64xf32>,
    %c4_i32 = arith.constant 4 : i32
    %658 = arith.cmpi eq, %arg1, %c4_i32 : i32
    %659 = arith.extui %658 : i1 to i32
    %c0_i32_318 = arith.constant 0 : i32
    %660 = arith.cmpi ne, %659, %c0_i32_318 : i32
    scf.if %660 {
      %c2_319 = arith.constant 2 : index
      %c0_320 = arith.constant 0 : index
      %c0_321 = arith.constant 0 : index
      %c0_322 = arith.constant 0 : index
      %661 = vector.load %arg21[%c2_319, %c0_320, %c0_321, %c0_322] : memref<4x8x8x64xf32, #tpu.memory_space<vmem>>, vector<1x8x8x64xf32>
      %662 = vector.shape_cast %661 : vector<1x8x8x64xf32> to vector<8x8x64xf32>
      %c3_323 = arith.constant 3 : index
      %c0_324 = arith.constant 0 : index
      %c0_325 = arith.constant 0 : index
      %c0_326 = arith.constant 0 : index
      %663 = vector.load %arg21[%c3_323, %c0_324, %c0_325, %c0_326] : memref<4x8x8x64xf32, #tpu.memory_space<vmem>>, vector<1x8x8x64xf32>
      %664 = vector.shape_cast %663 : vector<1x8x8x64xf32> to vector<8x8x64xf32>
      %665 = tpu.concatenate %662, %664 in 2 : vector<8x8x64xf32>, vector<8x8x64xf32> -> vector<8x8x128xf32>
      %c0_327 = arith.constant 0 : index
      %c0_328 = arith.constant 0 : index
      %c0_329 = arith.constant 0 : index
      %c0_330 = arith.constant 0 : index
      %666 = vector.load %arg20[%c0_327, %c0_328, %c0_329, %c0_330] : memref<1x8x8x128xf32, #tpu.memory_space<vmem>>, vector<1x8x8x128xf32>
      %667 = vector.shape_cast %666 : vector<1x8x8x128xf32> to vector<8x8x128xf32>
      %668 = vector.shape_cast %665 : vector<8x8x128xf32> to vector<1x8x8x128xf32>
      tpu.vector_store %arg20[%c0_327, %c0_328, %c0_329, %c0_330], %668 {strides = array<i32>} : memref<1x8x8x128xf32, #tpu.memory_space<vmem>>, vector<1x8x8x128xf32>,
    } else {
    }
    return
  }
  func.func @transform_0(%arg0: i32, %arg1: i32) -> (i32, i32) {
    %c0_i32 = arith.constant 0 : i32
    %c0_i32_0 = arith.constant 0 : i32
    %c0_i32_1 = arith.constant 0 : i32
    return %c0_i32, %c0_i32_0 : i32, i32
  }
  func.func @transform_1(%arg0: i32, %arg1: i32) -> (i32, i32) {
    %c0_i32 = arith.constant 0 : i32
    %c0_i32_0 = arith.constant 0 : i32
    %c0_i32_1 = arith.constant 0 : i32
    return %c0_i32, %c0_i32_0 : i32, i32
  }
  func.func @transform_2(%arg0: i32, %arg1: i32) -> (i32, i32) {
    %c0_i32 = arith.constant 0 : i32
    %c0_i32_0 = arith.constant 0 : i32
    %c0_i32_1 = arith.constant 0 : i32
    return %c0_i32, %c0_i32_0 : i32, i32
  }
  func.func @transform_3(%arg0: i32, %arg1: i32) -> (i32, i32, i32, i32) {
    %c0_i32 = arith.constant 0 : i32
    %c0_i32_0 = arith.constant 0 : i32
    %c0_i32_1 = arith.constant 0 : i32
    %c0_i32_2 = arith.constant 0 : i32
    return %arg0, %c0_i32, %c0_i32_0, %c0_i32_1 : i32, i32, i32, i32
  }
  func.func @transform_4(%arg0: i32, %arg1: i32) -> (i32, i32, i32, i32) {
    %c0_i32 = arith.constant 0 : i32
    %c0_i32_0 = arith.constant 0 : i32
    %c0_i32_1 = arith.constant 0 : i32
    %c0_i32_2 = arith.constant 0 : i32
    return %arg0, %c0_i32, %c0_i32_0, %c0_i32_1 : i32, i32, i32, i32
  }
  func.func @transform_5(%arg0: i32, %arg1: i32) -> (i32, i32) {
    %c0_i32 = arith.constant 0 : i32
    %c0_i32_0 = arith.constant 0 : i32
    %c0_i32_1 = arith.constant 0 : i32
    return %c0_i32, %c0_i32_0 : i32, i32
  }
  func.func @transform_6(%arg0: i32, %arg1: i32) -> (i32, i32) {
    %c0_i32 = arith.constant 0 : i32
    %c0_i32_0 = arith.constant 0 : i32
    %c0_i32_1 = arith.constant 0 : i32
    return %c0_i32, %c0_i32_0 : i32, i32
  }
  func.func @transform_7(%arg0: i32, %arg1: i32) -> (i32, i32) {
    %c0_i32 = arith.constant 0 : i32
    %c0_i32_0 = arith.constant 0 : i32
    %c0_i32_1 = arith.constant 0 : i32
    return %c0_i32, %c0_i32_0 : i32, i32
  }
  func.func @transform_8(%arg0: i32, %arg1: i32) -> (i32, i32) {
    %c0_i32 = arith.constant 0 : i32
    %c0_i32_0 = arith.constant 0 : i32
    %c0_i32_1 = arith.constant 0 : i32
    return %c0_i32, %c0_i32_0 : i32, i32
  }
  func.func @transform_9(%arg0: i32, %arg1: i32) -> (i32, i32, i32) {
    %c0_i32 = arith.constant 0 : i32
    %c0_i32_0 = arith.constant 0 : i32
    %c0_i32_1 = arith.constant 0 : i32
    %c0_i32_2 = arith.constant 0 : i32
    return %c0_i32, %c0_i32_0, %c0_i32_1 : i32, i32, i32
  }
  func.func @transform_10(%arg0: i32, %arg1: i32) -> (i32, i32, i32) {
    %c0_i32 = arith.constant 0 : i32
    %c0_i32_0 = arith.constant 0 : i32
    %c0_i32_1 = arith.constant 0 : i32
    return %arg1, %c0_i32, %c0_i32_0 : i32, i32, i32
  }
  func.func @transform_11(%arg0: i32, %arg1: i32) -> (i32, i32, i32) {
    %c0_i32 = arith.constant 0 : i32
    %c0_i32_0 = arith.constant 0 : i32
    %c0_i32_1 = arith.constant 0 : i32
    return %arg1, %c0_i32, %c0_i32_0 : i32, i32, i32
  }
  func.func @transform_12(%arg0: i32, %arg1: i32) -> (i32, i32, i32) {
    %c0_i32 = arith.constant 0 : i32
    %c0_i32_0 = arith.constant 0 : i32
    %c0_i32_1 = arith.constant 0 : i32
    return %arg1, %c0_i32, %c0_i32_0 : i32, i32, i32
  }
  func.func @transform_13(%arg0: i32, %arg1: i32) -> (i32, i32, i32) {
    %c0_i32 = arith.constant 0 : i32
    %c0_i32_0 = arith.constant 0 : i32
    %c0_i32_1 = arith.constant 0 : i32
    return %arg1, %c0_i32, %c0_i32_0 : i32, i32, i32
  }
  func.func @transform_14(%arg0: i32, %arg1: i32) -> (i32, i32, i32) {
    %c0_i32 = arith.constant 0 : i32
    %c0_i32_0 = arith.constant 0 : i32
    %c0_i32_1 = arith.constant 0 : i32
    return %arg1, %c0_i32, %c0_i32_0 : i32, i32, i32
  }
  func.func @transform_15(%arg0: i32, %arg1: i32) -> (i32, i32, i32) {
    %c0_i32 = arith.constant 0 : i32
    %c0_i32_0 = arith.constant 0 : i32
    %c0_i32_1 = arith.constant 0 : i32
    return %arg1, %c0_i32, %c0_i32_0 : i32, i32, i32
  }
  func.func @transform_16(%arg0: i32, %arg1: i32) -> (i32, i32, i32) {
    %c0_i32 = arith.constant 0 : i32
    %c0_i32_0 = arith.constant 0 : i32
    %c0_i32_1 = arith.constant 0 : i32
    return %arg1, %c0_i32, %c0_i32_0 : i32, i32, i32
  }
  func.func @transform_17(%arg0: i32, %arg1: i32) -> (i32, i32, i32) {
    %c0_i32 = arith.constant 0 : i32
    %c0_i32_0 = arith.constant 0 : i32
    %c0_i32_1 = arith.constant 0 : i32
    return %arg1, %c0_i32, %c0_i32_0 : i32, i32, i32
  }
  func.func @transform_18(%arg0: i32, %arg1: i32) -> (i32, i32, i32, i32) {
    %c0_i32 = arith.constant 0 : i32
    %c0_i32_0 = arith.constant 0 : i32
    %c0_i32_1 = arith.constant 0 : i32
    %c0_i32_2 = arith.constant 0 : i32
    return %arg0, %c0_i32, %c0_i32_0, %c0_i32_1 : i32, i32, i32, i32
  }
}

</mosaic_0001>

<bundles_post_ra>
// kernel: cell_forward.1
= control target key start
LH: loop header
LB: loop body
LE: loop exit
PB: predicated region body
PF: predicated region fallthrough
CT: control target
= control target key end

     0   :  { %s7737_s0 = inlined_call_operand.vmem [shape: s32[1,5], index: 0, kind: input, shape index: {}]   ;;  %s7738_s1 = inlined_call_operand.vmem [shape: s32[1,5], index: 1, kind: input, shape index: {}]   ;;  %s7739_s2 = inlined_call_operand.vmem [shape: f32[1,5], index: 2, kind: input, shape index: {}]   ;;  %s7740_s3 = inlined_call_operand.vmem [shape: f32[2,8,8,32], index: 3, kind: input, shape index: {}]   ;;  %s7741_s4 = inlined_call_operand.vmem [shape: f32[2,8,8,32], index: 4, kind: input, shape index: {}]   ;;  %s7742_s5 = inlined_call_operand.vmem [shape: bf16[32,64], index: 5, kind: input, shape index: {}]   ;;  %s7743_s6 = inlined_call_operand.vmem [shape: f32[1,64], index: 6, kind: input, shape index: {}]   ;;  %s7744_s7 = inlined_call_operand.vmem [shape: bf16[32,64], index: 7, kind: input, shape index: {}]   ;;  %s7745_s8 = inlined_call_operand.vmem [shape: f32[1,64], index: 8, kind: input, shape index: {}]   ;;  %s7746_s9 = inlined_call_operand.vmem [shape: f32[8,8,64], index: 9, kind: input, shape index: {}]   ;;  %s7747_s10 = inlined_call_operand.vmem [shape: f32[5,25,128], index: 10, kind: input, shape index: {}]   ;;  %s7748_s11 = inlined_call_operand.vmem [shape: f32[5,25,128], index: 11, kind: input, shape index: {}]   ;;  %s7749_s12 = inlined_call_operand.vmem [shape: f32[5,25,128], index: 12, kind: input, shape index: {}]   ;;  %s7750_s13 = inlined_call_operand.vmem [shape: bf16[5,256,192], index: 13, kind: input, shape index: {}]   ;;  %s7751_s14 = inlined_call_operand.vmem [shape: f32[5,1,192], index: 14, kind: input, shape index: {}]   ;;  %s7752_s15 = inlined_call_operand.vmem [shape: bf16[5,128,64], index: 15, kind: input, shape index: {}]   ;;  %s7753_s16 = inlined_call_operand.vmem [shape: f32[5,1,64], index: 16, kind: input, shape index: {}]   ;;  %s7754_s17 = inlined_call_operand.vmem [shape: f32[5,4,64], index: 17, kind: input, shape index: {}]   ;;  %s7755_s18 = inlined_call_operand.hbm [shape: f32[2,8,8,128], index: 18, kind: output, shape index: {}]  }
   0x1   :  { %7924 = sst [smem:[#allocation168_spill]] %s7737_s0 }
   0x2   :  { %7925 = sst [smem:[#allocation169_spill]] %s7738_s1 }
   0x3   :  { %7926 = sst [smem:[#allocation170_spill]] %s7739_s2 }
   0x4   :  { %7927 = sst [smem:[#allocation171_spill]] %s7740_s3 }
   0x5   :  { %7928 = sst [smem:[#allocation172_spill]] %s7741_s4 }
   0x6   :  { %7929 = sst [smem:[#allocation173_spill]] %s7743_s6 }
   0x7   :  { %7930 = sst [smem:[#allocation174_spill]] %s7745_s8 }
   0x8   :  { %7931 = sst [smem:[#allocation175_spill]] %s7746_s9 }
   0x9   :  { %7932 = sst [smem:[#allocation176_spill]] %s7747_s10 }
   0xa   :  { %7933 = sst [smem:[#allocation177_spill]] %s7748_s11 }
   0xb   :  { %7934 = sst [smem:[#allocation178_spill]] %s7749_s12 }
   0xc   :  { %7935 = sst [smem:[#allocation179_spill]] %s7750_s13 }
   0xd   :  { %7936 = sst [smem:[#allocation180_spill]] %s7755_s18 }
   0xe   :  { %23 = vsyncpa [#allocation8], 0 }
   0xf   :  { %24 = vsyncpa [#allocation10], 0 }
  0x10   :  { %25 = vsyncpa [#allocation7], 0 }
  0x11   :  { %27 = vsyncpa [#allocation7 + $0x1], 0  ;;  %s4821_s27 = smov 0   ;;  %s4823_s28 = smov 0  }
  0x12   :  { %s4825_s29 = smov 0   ;;  %s4827_s30 = smov 0  }
  0x13   :  { %s4829_s0 = smov 0   ;;  %s4831_s19 = smov 0  }
  0x14   :  { %s4833_s1 = smov 0   ;;  %s4835_s20 = smov 0  }
  0x15 LB: > { %7937 = sst [smem:[#allocation16_spill]] %s4686_s27  ;;  %s4100_s21 = sadd.s32 4294967295, %s4714_s20   ;;  %s4714_s20 = sphi %s4835_s20, %s33_s20   ;;  %s4710_s1 = sphi %s4833_s1, %s8388_s1   ;;  %s4706_s19 = sphi %s4831_s19, %s8387_s19   ;;  %s4702_s0 = sphi %s4829_s0, %s8386_s0   ;;  %s4698_s30 = sphi %s4827_s30, %s8385_s30   ;;  %s4694_s29 = sphi %s4825_s29, %s8384_s29   ;;  %s4690_s28 = sphi %s4823_s28, %s8383_s28   ;;  %s4686_s27 = sphi %s4821_s27, %s8382_s27  }
  0x16   : > { %7938 = sst [smem:[#allocation17_spill]] %s4690_s28  ;;  %s4101_s22 = sadd.s32 4294967294, %s4714_s20  }
  0x17   : > { %7939 = sst [smem:[#allocation18_spill]] %s4694_s29  ;;  %s42_s2 = sadd.s32 1, %s4706_s19 }
  0x18   : > { %7940 = sst [smem:[#allocation19_spill]] %s4702_s0  ;;  %s45_s23 = sadd.s32 1, %s4710_s1 }
  0x19   : > { %7941 = sst [smem:[#allocation20_spill]] %s4706_s19  ;;  %p43_p0 = scmp.ge.s32.totalorder %s42_s2, 5 }
  0x1a   : > { %7942 = sst [smem:[#allocation21_spill]] %s4710_s1  ;;  %s480_s24 = sadd.s32 1, %s4694_s29 }
  0x1b   : > { %7943 = sst [smem:[#allocation22_spill]] %s4714_s20  ;;  %p490_p1 = scmp.ne.s32.totalorder %s4694_s29, %s4690_s28 }
  0x1c   : > { %p491_p2 = scmp.eq.s32.totalorder %s4100_s21, 9  ;;  %s8390_s2 = smov (%p43_p0, %s42_s2), 0 }
  0x1d   : > { %7944 = sst [smem:[#allocation23_spill]] %s8390_s2  ;;  %s8392_s23 = smov (!%p43_p0, %s45_s23), %s4710_s1 }
  0x1e   : > { %p4871_p3 = por %p491_p2, %p490_p1  ;;  %p496_p4 = scmp.ne.s32.totalorder %s4690_s28, %s4686_s27 }
  0x1f   : > { %p47_p5 = scmp.ge.s32.totalorder %s8392_s23, 2  ;;  %p497_p6 = scmp.eq.s32.totalorder %s4101_s22, 9 }
  0x20   : > { %s7945_s25 = scalar_select %p4871_p3, 1, 0 }
  0x21   : > { %p4102_p7 = scmp.ge.s32.totalorder %s4714_s20, 1  ;;  %p504_p8 = scmp.lt.s32.totalorder %s4714_s20, 11 }
  0x22   : > { %7946 = sst [smem:[#allocation24_spill]] %s7945_s25  ;;  %s8394_s23 = smov (%p47_p5, %s8392_s23), 0 }
  0x23   : > { %7947 = sst [smem:[#allocation25_spill]] %s8394_s23  ;;  %p4881_p9 = por %p497_p6, %p496_p4 }
  0x24   : > { %p4885_p10 = pnand %p4102_p7, %p504_p8  ;;  %s477_s19 = ssub.s32 %s4710_s1, %s8394_s23 }
  0x25   : > { %s7948_s26 = scalar_select %p4881_p9, 1, 0 }
  0x26   : > { %s7950_s2 = scalar_select %p4885_p10, 1, 0 }
  0x27   : > { %7949 = sst [smem:[#allocation26_spill]] %s7948_s26  ;;  %p478_p11 = scmp.eq.s32.totalorder %s477_s19, 0 }
  0x28   : > { %p4365_p12 = pneg %p4885_p10  ;;  %p4893_p13 = scmp.eq.s32.totalorder %s4100_s21, 0 }
  0x29   : > { %s7952_s18 = sld [smem:[#allocation169_spill]] }
  0x2a   : > { %s7951_s22 = scalar_select %p4893_p13, 1, 0 }
  0x2b   : > { %s4901_s9 = scalar_select %p478_p11, %s4694_s29, %s480_s24  }
  0x2c   : > { %p4905_p0 = pnand %p4893_p13, %p4365_p12 }
  0x2d   : > { %7953 = sst [smem:[#allocation27_spill]] %s4901_s9 }
  0x2e   : > { %p4571_p2 = pneg %p4905_p0 }
  0x2f   : > { %s528_s25 = sshll.u32 %s7952_s18, 4  ;;  %s529_s25 = int_to_ptr.vmem [resolvable:$true] %s528_s25 }
  0x30   : > { %s4569_s19 = scalar_lea.vmem %s529_s25, 16  ;;  %p4577_p6 = scmp.lt.s32.totalorder %s529_s25, %s529_s25 }
  0x31   : > { %p4570_p1 = scmp.ne.s32.totalorder %s529_s25, %s4569_s19  ;;  %p4578_p7 = scmp.lt.s32.totalorder %s4569_s19, %s4569_s19 }
  0x33   : > { %p4572_p4 = pnand %p4571_p2, %p4570_p1  ;;  %p4579_p8 = por %p4578_p7, %p4577_p6 }
  0x35   : > { %p4573_p5 = pneg %p4572_p4 }
  0x37   : > { %p4580_p11 = pnand %p4579_p8, %p4573_p5 }
  0x39   : > { %4583 = shalt.err (!%p4580_p11)
}
  0x3a   : > { %s4716_s18 = smov [#allocation9]   ;;  %s7955_s21 = sld [smem:[#allocation168_spill]] }
  0x3b   : > { %4371 = dma.vmem_to_smem (!%p4905_p0), %s529_s25, 16, %s4716_s18, [#allocation10]  }
  0x3c   : > { %s7956_s9 = sld [smem:[#allocation170_spill]] }
  0x40   : > { %s517_s24 = sshll.u32 %s7955_s21, 4  ;;  %s518_s24 = int_to_ptr.vmem [resolvable:$true] %s517_s24 }
  0x41   : > { %s4584_s8 = scalar_lea.vmem %s518_s24, 16  ;;  %p4592_p5 = scmp.lt.s32.totalorder %s518_s24, %s518_s24 }
  0x42   : > { %s539_s29 = sshll.u32 %s7956_s9, 4  ;;  %p4585_p12 = scmp.ne.s32.totalorder %s518_s24, %s4584_s8  ;;  %s540_s29 = int_to_ptr.vmem [resolvable:$true] %s539_s29 }
  0x43   : > { %p4593_p6 = scmp.lt.s32.totalorder %s4584_s8, %s4584_s8 }
  0x44   : > { %p4587_p1 = pnand %p4585_p12, %p4571_p2 }
  0x45   : > { %p4594_p7 = por %p4593_p6, %p4592_p5 }
  0x46   : > { %p4588_p4 = pneg %p4587_p1 }
  0x48   : > { %p4595_p8 = pnand %p4594_p7, %p4588_p4 }
  0x4a   : > { %4598 = shalt.err (!%p4595_p8)
}
  0x4b   : > { %s4717_s25 = smov [#allocation6]   ;;  %s4599_s19 = scalar_lea.vmem %s540_s29, 16 }
  0x4c   : > { %4368 = dma.vmem_to_smem (!%p4905_p0), %s518_s24, 16, %s4717_s25, [#allocation8]  }
  0x4d   : > { %p4600_p11 = scmp.ne.s32.totalorder %s540_s29, %s4599_s19  ;;  %p4607_p13 = scmp.lt.s32.totalorder %s540_s29, %s540_s29 }
  0x4e   : > { %p4608_p12 = scmp.lt.s32.totalorder %s4599_s19, %s4599_s19 }
  0x4f   : > { %p4602_p9 = pnand %p4600_p11, %p4571_p2 }
  0x50   : > { %p4609_p1 = por %p4608_p12, %p4607_p13 }
  0x51   : > { %p4603_p3 = pneg %p4602_p9 }
  0x53   : > { %p4610_p10 = pnand %p4609_p1, %p4603_p3 }
  0x55   : > { %4613 = shalt.err (!%p4610_p10)
}
  0x56   : > { %s4718_s8 = smov [#allocation11]   ;;  %p7957_p4 = scmp.ne.s32.totalorder %s7950_s2, 0 }
  0x57   : > { %4374 = dma.vmem_to_smem (!%p4905_p0), %s540_s29, 16, %s4718_s8, [#allocation10]  }
  0x58   : > { %643 = sbr.rel (%p7957_p4) target bundleno = 1324 (0x52c), region = 92 }
  0x5d   : > { %p7958_p5 = scmp.ne.s32.totalorder %s7951_s22, 0 }
  0x5f   : > { %4673 = dma.done.wait (%p7958_p5), [#allocation8], 16  }
  0x60   : > { %4675 = vsyncadd (%p7958_p5), [#allocation8], 4294967280 }
  0x61   : > { %4677 = dma.done.wait (%p7958_p5), [#allocation10], 32  }
  0x62   : > { %4679 = vsyncadd (%p7958_p5), [#allocation10], 4294967264 }
  0x63   : > { %657 = sfence }
  0x64   : > { %s7772_s9 = sand.u32 1, %s4690_s28   ;;  %p747_p3 = scmp.lt.s32.totalorder %s4702_s0, 1 }
  0x65   : > { %s4111_s29 = sshll.u32 %s7772_s9, 6  ;;  %p757_p9 = scmp.lt.s32.totalorder %s4698_s30, 4 }
  0x66   : > { %s748_s1 = scalar_select %p747_p3, %s4702_s0, 1 }
  0x67   : > { %s4949_s2 = scalar_select %p757_p9, %s4698_s30, 4 }
  0x68   : > { %s4271_s23 = sshll.u32 %s748_s1, 6  ;;  %s7959_s3 = sld [smem:[#allocation171_spill]] }
  0x69   : > { %s7960_s4 = sld [smem:[#allocation172_spill]]  ;;  %s4273_s24 = sshll.u32 %s4949_s2, 5 }
  0x6a   : > { %s4276_s25 = sshll.u32 %s4949_s2, 8  ;;  %s7961_s10 = sld [smem:[#allocation176_spill]] }
  0x6b   : > { %s7962_s11 = sld [smem:[#allocation177_spill]]  ;;  %s4277_s6 = sshll.u32 %s4949_s2, 6 }
  0x6c   : > { %s7963_s12 = sld [smem:[#allocation178_spill]]  ;;  %s788_s22 = scalar_lea.vmem %s7753_s16, %s4949_s2 }
  0x6d   : > { %s7964_s13 = sld [smem:[#allocation179_spill]]  ;;  %p4128_p10 = scmp.ne.s32.totalorder %s4698_s30, 0 }
  0x6e   : > { %s4954_s18 = scalar_lea.vmem %s7959_s3, %s4271_s23  ;;  %s7965_s26 = sld [smem:[#allocation173_spill]] (!%p4128_p10) }
  0x6f   : > { %s4959_s21 = scalar_lea.vmem %s7960_s4, %s4271_s23  ;;  %s4124_s4 = sshll.u32 %s4949_s2, 1 }
  0x70   : > { %s4966_s9 = scalar_lea.vmem %s7961_s10, %s4273_s24  ;;  %s4988_s10 = scalar_lea.vmem %s7751_s14, %s4124_s4 }
  0x71   : > { %s4971_s1 = scalar_lea.vmem %s7962_s11, %s4273_s24  ;;  %s4993_s11 = scalar_lea.vmem %s7752_s15, %s4277_s6 }
  0x72   : > { %s4976_s3 = scalar_lea.vmem %s7963_s12, %s4273_s24  ;;  %s4127_s12 = sshll.u32 %s4949_s2, 2 }
  0x73   : > { %s4981_s20 = scalar_lea.vmem %s7964_s13, %s4276_s25  ;;  %s5003_s23 = scalar_lea.vmem %s7754_s17, %s4127_s12 }
  0x74   : > { %s5005_s13 = scalar_lea.vmem [#allocation12], %s4111_s29  ;;  %797 = sbr.rel (%p4128_p10) target bundleno = 342 (0x156), region = 108 }
  0x75   : > { %s7966_s25 = sld [smem:[#allocation174_spill]] (!%p4128_p10) }
  0x79   : > { %v4459_v0 = vld [vmem:[%s7742_s5 + $0x8] sm:$0xff]   ;;  %v5019_v2 = vld [vmem:[%s7742_s5] sm:$0xff]   ;;  %v4719_v3 = vmov 0.0   ;;  %vm846_vm0 = vcmask 523264   ;;  %vm983_vm1 = vcmask 261120   ;;  %v4720_v8 = vmov -inf  }
  0x7a   : > { %v5014_v1 = vld [vmem:[%s7744_s7 + $0x8] sm:$0xff]   ;;  %4303 = vmatprep.subr.bf16.mxu0 %v4459_v0  ;;  %798 = vst [vmem:[#allocation3] sm:$0xff] %v4719_v3  ;;  %799 = vst [vmem:[#allocation3 + $0x8] sm:$0xff] %v4719_v3  ;;  %v5073_v4 = vld [vmem:[%s7744_s7] sm:$0xff]   ;;  %vm849_vm2 = vcmask 516096  }
  0x7b   : > { %800 = vst [vmem:[#allocation3 + $0x10] sm:$0xf] %v4719_v3  ;;  %801 = vst [vmem:[#allocation3 + $0x18] sm:$0xff] %v4719_v3  ;;  %4315 = vmatprep.subr.bf16.mxu1 %v5014_v1  ;;  %4304 = vmatpush3.bf16.msra.mxu0 %v4459_v0  ;;  %v940_v5 = vld [vmem:[%s4954_s18] sm:$0xff]  ;;  %v941_v6 = vld [vmem:[%s4954_s18 + $0x8] sm:$0xff] }
  0x7c   : > { %802 = vst [vmem:[#allocation3 + $0x20] sm:$0xff] %v4719_v3  ;;  %803 = vst [vmem:[#allocation3 + $0x28] sm:$0xf] %v4719_v3  ;;  %4316 = vmatpush3.bf16.msra.mxu1 %v5014_v1  ;;  %4305 = vmatprep.subr.bf16.mxu0 %v5019_v2  ;;  %v5184_v7 = vld [vmem:[%s4959_s21] sm:$0xff]  ;;  %v948_v9 = vmax.f32 %v940_v5, 0.0  ;;  %v949_v10 = vmax.f32 %v941_v6, 0.0 }
  0x7d   : > { %804 = vst [vmem:[#allocation3 + $0x30] sm:$0xff] %v4719_v3  ;;  %805 = vst [vmem:[#allocation3 + $0x38] sm:$0xff] %v4719_v3  ;;  %4317 = vmatprep.subr.bf16.mxu1 %v5073_v4  ;;  %v1070_v11 = vld [vmem:[%s4959_s21 + $0x8] sm:$0xff]  ;;  %v1077_v12 = vmax.f32 %v5184_v7, 0.0  ;;  %v942_v13 = vld [vmem:[%s4954_s18 + $0x10] sm:$0xff] }
  0x7e   : > { %806 = vst [vmem:[#allocation3 + $0x40] sm:$0xf] %v4719_v3  ;;  %807 = vst [vmem:[#allocation3 + $0x48] sm:$0xff] %v4719_v3  ;;  %v943_v14 = vld [vmem:[%s4954_s18 + $0x18] sm:$0xff]  ;;  %v1078_v15 = vmax.f32 %v1070_v11, 0.0  ;;  %v950_v16 = vmax.f32 %v942_v13, 0.0  ;;  %v956_v21 = vpack.c.bf16 %v949_v10, %v948_v9 }
  0x7f   : > { %808 = vst [vmem:[#allocation3 + $0x50] sm:$0xff] %v4719_v3  ;;  %809 = vst [vmem:[#allocation3 + $0x58] sm:$0xf] %v4719_v3  ;;  %v951_v17 = vmax.f32 %v943_v14, 0.0  ;;  %v1071_v18 = vld [vmem:[%s4959_s21 + $0x10] sm:$0xff]  ;;  %v1072_v19 = vld [vmem:[%s4959_s21 + $0x18] sm:$0xff]  ;;  %4306 = vmatpush3.bf16.msra.mxu0 %v5019_v2 }
  0x80   : > { %810 = vst [vmem:[#allocation3 + $0x60] sm:$0xff] %v4719_v3  ;;  %811 = vst [vmem:[#allocation3 + $0x68] sm:$0xff] %v4719_v3  ;;  %v944_v20 = vld [vmem:[%s4954_s18 + $0x20] sm:$0xff]  ;;  %v1079_v22 = vmax.f32 %v1071_v18, 0.0  ;;  %v1080_v23 = vmax.f32 %v1072_v19, 0.0  ;;  %v945_v24 = vld [vmem:[%s4954_s18 + $0x28] sm:$0xff]  ;;  %4318 = vmatpush3.bf16.msra.mxu1 %v5073_v4  ;;  %v1085_v28 = vpack.c.bf16 %v1078_v15, %v1077_v12  ;;  %4307 = vmatprep.mubr.msk.bf16.mxu0 %vm983_vm1, %v956_v21 }
  0x81   : > { %812 = vst [vmem:[#allocation3 + $0x70] sm:$0xf] %v4719_v3  ;;  %813 = vst [vmem:[#allocation3 + $0x78] sm:$0xff] %v4719_v3  ;;  %v952_v25 = vmax.f32 %v944_v20, 0.0  ;;  %v1073_v26 = vld [vmem:[%s4959_s21 + $0x20] sm:$0xff]  ;;  %v1074_v27 = vld [vmem:[%s4959_s21 + $0x28] sm:$0xff]  ;;  %v957_v29 = vpack.c.bf16 %v951_v17, %v950_v16 }
  0x82   : > { %814 = vst [vmem:[#allocation3 + $0x80] sm:$0xff] %v4719_v3  ;;  %815 = vst [vmem:[#allocation3 + $0x88] sm:$0xf] %v4719_v3  ;;  %v953_v30 = vmax.f32 %v945_v24, 0.0  ;;  %v1081_v31 = vmax.f32 %v1073_v26, 0.0  ;;  %v946_v32 = vld [vmem:[%s4954_s18 + $0x30] sm:$0xff]  ;;  %v1086_v35 = vpack.c.bf16 %v1080_v23, %v1079_v22  ;;  %4319 = vmatprep.mubr.msk.bf16.mxu1 %vm983_vm1, %v1085_v28 }
  0x83   : > { %816 = vst [vmem:[#allocation3 + $0x90] sm:$0xff] %v4719_v3  ;;  %817 = vst [vmem:[#allocation3 + $0x98] sm:$0xff] %v4719_v3  ;;  %v947_v33 = vld [vmem:[%s4954_s18 + $0x38] sm:$0xff]  ;;  %v1075_v34 = vld [vmem:[%s4959_s21 + $0x30] sm:$0xff]  ;;  %v1082_v36 = vmax.f32 %v1074_v27, 0.0  ;;  %4308 = vmatmul.mubr.msk.bf16.vlgmr.msra.gmra.mxu0 %vm983_vm1, %v957_v29  ;;  %v954_v39 = vmax.f32 %v946_v32, 0.0 }
  0x84   : > { %818 = vst [vmem:[#allocation3 + $0xa0] sm:$0xf] %v4719_v3  ;;  %819 = vst [vmem:[#allocation3 + $0xa8] sm:$0xff] %v4719_v3  ;;  %v1076_v37 = vld [vmem:[%s4959_s21 + $0x38] sm:$0xff]  ;;  %v958_v38 = vpack.c.bf16 %v953_v30, %v952_v25  ;;  %v955_v40 = vmax.f32 %v947_v33, 0.0  ;;  %4320 = vmatmul.mubr.msk.bf16.vlgmr.msra.gmra.mxu1 %vm983_vm1, %v1086_v35  ;;  %v1083_v42 = vmax.f32 %v1075_v34, 0.0 }
  0x85   : > { %820 = vst [vmem:[#allocation3 + $0xb0] sm:$0xff] %v4719_v3  ;;  %821 = vst [vmem:[#allocation3 + $0xb8] sm:$0xf] %v4719_v3  ;;  %v1087_v41 = vpack.c.bf16 %v1082_v36, %v1081_v31  ;;  %v1084_v43 = vmax.f32 %v1076_v37, 0.0  ;;  %v4129_v46 = vld [vmem:[%s7965_s26] ss:$0 sm:$0xff] }
  0x86   : > { %822 = vst [vmem:[#allocation3 + $0xc0] sm:$0xff] %v4719_v3  ;;  %823 = vst [vmem:[#allocation3 + $0xc8] sm:$0xff] %v4719_v3  ;;  %4311 = vmatprep.mubr.msk.bf16.mxu0 %vm983_vm1, %v958_v38  ;;  %v959_v44 = vpack.c.bf16 %v955_v40, %v954_v39  ;;  %v4136_v47 = vld [vmem:[%s7966_s25] ss:$0 sm:$0xff] }
  0x87   : > { %824 = vst [vmem:[#allocation3 + $0xd0] sm:$0xf] %v4719_v3  ;;  %825 = vst [vmem:[#allocation3 + $0xd8] sm:$0xff] %v4719_v3  ;;  %4323 = vmatprep.mubr.msk.bf16.mxu1 %vm983_vm1, %v1087_v41  ;;  %v1088_v45 = vpack.c.bf16 %v1084_v43, %v1083_v42 }
  0x88   : > { %826 = vst [vmem:[#allocation3 + $0xe0] sm:$0xff] %v4719_v3  ;;  %827 = vst [vmem:[#allocation3 + $0xe8] sm:$0xf] %v4719_v3 }
  0x89   : > { %828 = vst [vmem:[#allocation3 + $0xf0] sm:$0xff] %v4719_v3  ;;  %829 = vst [vmem:[#allocation3 + $0xf8] sm:$0xff] %v4719_v3 }
  0x8a   : > { %830 = vst [vmem:[#allocation3 + $0x100] sm:$0xf] %v4719_v3  ;;  %831 = vst [vmem:[#allocation3 + $0x108] sm:$0xff] %v4719_v3 }
  0x8b   : > { %832 = vst [vmem:[#allocation3 + $0x110] sm:$0xff] %v4719_v3  ;;  %833 = vst [vmem:[#allocation3 + $0x118] sm:$0xf] %v4719_v3  ;;  %4312 = vmatmul.mubr.msk.bf16.gmra.mxu0 %vm983_vm1, %v959_v44 }
  0x8c   : > { %834 = vst [vmem:[#allocation3 + $0x120] sm:$0xff] %v4719_v3  ;;  %835 = vst [vmem:[#allocation3 + $0x128] sm:$0xff] %v4719_v3  ;;  %4324 = vmatmul.mubr.msk.bf16.gmra.mxu1 %vm983_vm1, %v1088_v45 }
  0x8d   : > { %836 = vst [vmem:[#allocation3 + $0x130] sm:$0xf] %v4719_v3  ;;  %837 = vst [vmem:[#allocation3 + $0x138] sm:$0xff] %v4719_v3 }
  0x8e   : > { %838 = vst [vmem:[#allocation3 + $0x140] sm:$0xff] %v4719_v3  ;;  %839 = vst [vmem:[#allocation3 + $0x148] sm:$0xf] %v4719_v3 }
  0x8f   : > { %840 = vst [vmem:[#allocation3 + $0x150] sm:$0xff] %v4719_v3  ;;  %841 = vst [vmem:[#allocation3 + $0x158] sm:$0xff] %v4719_v3 }
  0x90   : > { %842 = vst [vmem:[#allocation3 + $0x160] sm:$0xf] %v4719_v3  ;;  %843 = vst [vmem:[#allocation3 + $0x168] sm:$0xff] %v4719_v3 }
  0x91   : > { %844 = vst [vmem:[#allocation3 + $0x170] sm:$0xff] %v4719_v3  ;;  %845 = vst [vmem:[#allocation3 + $0x178] sm:$0xf] %v4719_v3 }
  0x92   : > { %878 = vst.msk [vmem:[#allocation5] sm:$0xff] %vm846_vm0, %v4719_v3  ;;  %879 = vst.msk [vmem:[#allocation5 + $0x8] sm:$0xff] %vm846_vm0, %v4719_v3 }
  0x93   : > { %881 = vst.msk [vmem:[#allocation5 + $0x18] sm:$0xff] %vm846_vm0, %v4719_v3  ;;  %882 = vst.msk [vmem:[#allocation5 + $0x20] sm:$0xff] %vm846_vm0, %v4719_v3 }
  0x94   : > { %884 = vst.msk [vmem:[#allocation5 + $0x30] sm:$0xff] %vm846_vm0, %v4719_v3  ;;  %885 = vst.msk [vmem:[#allocation5 + $0x38] sm:$0xff] %vm846_vm0, %v4719_v3 }
  0x95   : > { %887 = vst.msk [vmem:[#allocation5 + $0x48] sm:$0xff] %vm846_vm0, %v4719_v3  ;;  %888 = vst.msk [vmem:[#allocation5 + $0x50] sm:$0xff] %vm846_vm0, %v4719_v3 }
  0x96   : > { %890 = vst.msk [vmem:[#allocation5 + $0x60] sm:$0xff] %vm846_vm0, %v4719_v3  ;;  %891 = vst.msk [vmem:[#allocation5 + $0x68] sm:$0xff] %vm846_vm0, %v4719_v3 }
  0x97   : > { %893 = vst.msk [vmem:[#allocation5 + $0x78] sm:$0xff] %vm846_vm0, %v4719_v3  ;;  %894 = vst.msk [vmem:[#allocation5 + $0x80] sm:$0xff] %vm846_vm0, %v4719_v3 }
  0x98   : > { %896 = vst.msk [vmem:[#allocation5 + $0x90] sm:$0xff] %vm846_vm0, %v4719_v3  ;;  %897 = vst.msk [vmem:[#allocation5 + $0x98] sm:$0xff] %vm846_vm0, %v4719_v3 }
  0x99   : > { %899 = vst.msk [vmem:[#allocation5 + $0xa8] sm:$0xff] %vm846_vm0, %v4719_v3  ;;  %900 = vst.msk [vmem:[#allocation5 + $0xb0] sm:$0xff] %vm846_vm0, %v4719_v3 }
  0x9a   : > { %902 = vst.msk [vmem:[#allocation5 + $0xc0] sm:$0xff] %vm846_vm0, %v4719_v3  ;;  %903 = vst.msk [vmem:[#allocation5 + $0xc8] sm:$0xff] %vm846_vm0, %v4719_v3 }
  0x9b   : > { %905 = vst.msk [vmem:[#allocation5 + $0xd8] sm:$0xff] %vm846_vm0, %v4719_v3  ;;  %906 = vst.msk [vmem:[#allocation5 + $0xe0] sm:$0xff] %vm846_vm0, %v4719_v3 }
  0x9c   : > { %910 = vst.msk [vmem:[#allocation2 + $0x10] sm:$0xff] %vm846_vm0, %v4719_v3  ;;  %924 = vst.msk [vmem:[#allocation2 + $0x80] sm:$0xff] %vm846_vm0, %v4719_v3 }
  0x9d   : > { %925 = vst.msk [vmem:[#allocation2 + $0x88] sm:$0xff] %vm846_vm0, %v4719_v3  ;;  %926 = vst.msk [vmem:[#allocation2 + $0x90] sm:$0xff] %vm846_vm0, %v4719_v3 }
  0x9e   : > { %927 = vst.msk [vmem:[#allocation2 + $0x98] sm:$0xff] %vm846_vm0, %v4719_v3  ;;  %928 = vst.msk [vmem:[#allocation2 + $0xa0] sm:$0xff] %vm846_vm0, %v4719_v3 }
  0x9f   : > { %929 = vst.msk [vmem:[#allocation2 + $0xa8] sm:$0xff] %vm846_vm0, %v4719_v3  ;;  %930 = vst.msk [vmem:[#allocation2 + $0xb0] sm:$0xff] %vm846_vm0, %v4719_v3 }
  0xa0   : > { %931 = vst.msk [vmem:[#allocation2 + $0xb8] sm:$0xff] %vm846_vm0, %v4719_v3  ;;  %932 = vst.msk [vmem:[#allocation2 + $0xc0] sm:$0xff] %vm846_vm0, %v4719_v3 }
  0xa1   : > { %933 = vst.msk [vmem:[#allocation2 + $0xc8] sm:$0xff] %vm846_vm0, %v4719_v3  ;;  %934 = vst.msk [vmem:[#allocation2 + $0xd0] sm:$0xff] %vm846_vm0, %v4719_v3 }
  0xa2   : > { %935 = vst.msk [vmem:[#allocation2 + $0xd8] sm:$0xff] %vm846_vm0, %v4719_v3  ;;  %936 = vst.msk [vmem:[#allocation2 + $0xe0] sm:$0xff] %vm846_vm0, %v4719_v3 }
  0xa3   : > { %937 = vst.msk [vmem:[#allocation2 + $0xe8] sm:$0xff] %vm846_vm0, %v4719_v3  ;;  %938 = vst.msk [vmem:[#allocation2 + $0xf0] sm:$0xff] %vm846_vm0, %v4719_v3 }
  0xa4   : > { %939 = vst.msk [vmem:[#allocation2 + $0xf8] sm:$0xff] %vm846_vm0, %v4719_v3  ;;  %908 = vst.msk [vmem:[#allocation2] sm:$0xff] %vm846_vm0, %v4719_v3 }
  0xa5   : > { %909 = vst.msk [vmem:[#allocation2 + $0x8] sm:$0xff] %vm846_vm0, %v4719_v3  ;;  %911 = vst.msk [vmem:[#allocation2 + $0x18] sm:$0xff] %vm846_vm0, %v4719_v3 }
  0xa6   : > { %912 = vst.msk [vmem:[#allocation2 + $0x20] sm:$0xff] %vm846_vm0, %v4719_v3  ;;  %913 = vst.msk [vmem:[#allocation2 + $0x28] sm:$0xff] %vm846_vm0, %v4719_v3 }
  0xa7   : > { %914 = vst.msk [vmem:[#allocation2 + $0x30] sm:$0xff] %vm846_vm0, %v4719_v3  ;;  %915 = vst.msk [vmem:[#allocation2 + $0x38] sm:$0xff] %vm846_vm0, %v4719_v3 }
  0xa8   : > { %916 = vst.msk [vmem:[#allocation2 + $0x40] sm:$0xff] %vm846_vm0, %v4719_v3  ;;  %917 = vst.msk [vmem:[#allocation2 + $0x48] sm:$0xff] %vm846_vm0, %v4719_v3 }
  0xa9   : > { %918 = vst.msk [vmem:[#allocation2 + $0x50] sm:$0xff] %vm846_vm0, %v4719_v3  ;;  %919 = vst.msk [vmem:[#allocation2 + $0x58] sm:$0xff] %vm846_vm0, %v4719_v3 }
  0xaa   : > { %920 = vst.msk [vmem:[#allocation2 + $0x60] sm:$0xff] %vm846_vm0, %v4719_v3  ;;  %921 = vst.msk [vmem:[#allocation2 + $0x68] sm:$0xff] %vm846_vm0, %v4719_v3 }
  0xab   : > { %922 = vst.msk [vmem:[#allocation2 + $0x70] sm:$0xff] %vm846_vm0, %v4719_v3  ;;  %923 = vst.msk [vmem:[#allocation2 + $0x78] sm:$0xff] %vm846_vm0, %v4719_v3 }
  0xac   : > { %847 = vst.msk [vmem:[#allocation4] sm:$0xff] %vm846_vm0, %v4720_v8  ;;  %848 = vst.msk [vmem:[#allocation4 + $0x8] sm:$0xff] %vm846_vm0, %v4720_v8 }
  0xad   : > { %851 = vst.msk [vmem:[#allocation4 + $0x18] sm:$0xff] %vm846_vm0, %v4720_v8  ;;  %852 = vst.msk [vmem:[#allocation4 + $0x20] sm:$0xff] %vm846_vm0, %v4720_v8 }
  0xae   : > { %854 = vst.msk [vmem:[#allocation4 + $0x30] sm:$0xff] %vm846_vm0, %v4720_v8  ;;  %855 = vst.msk [vmem:[#allocation4 + $0x38] sm:$0xff] %vm846_vm0, %v4720_v8 }
  0xaf   : > { %857 = vst.msk [vmem:[#allocation4 + $0x48] sm:$0xff] %vm846_vm0, %v4720_v8  ;;  %858 = vst.msk [vmem:[#allocation4 + $0x50] sm:$0xff] %vm846_vm0, %v4720_v8 }
  0xb0   : > { %860 = vst.msk [vmem:[#allocation4 + $0x60] sm:$0xff] %vm846_vm0, %v4720_v8  ;;  %861 = vst.msk [vmem:[#allocation4 + $0x68] sm:$0xff] %vm846_vm0, %v4720_v8 }
  0xb1   : > { %863 = vst.msk [vmem:[#allocation4 + $0x78] sm:$0xff] %vm846_vm0, %v4720_v8  ;;  %864 = vst.msk [vmem:[#allocation4 + $0x80] sm:$0xff] %vm846_vm0, %v4720_v8 }
  0xb2   : > { %866 = vst.msk [vmem:[#allocation4 + $0x90] sm:$0xff] %vm846_vm0, %v4720_v8  ;;  %867 = vst.msk [vmem:[#allocation4 + $0x98] sm:$0xff] %vm846_vm0, %v4720_v8 }
  0xb3   : > { %869 = vst.msk [vmem:[#allocation4 + $0xa8] sm:$0xff] %vm846_vm0, %v4720_v8  ;;  %870 = vst.msk [vmem:[#allocation4 + $0xb0] sm:$0xff] %vm846_vm0, %v4720_v8 }
  0xb4   : > { %872 = vst.msk [vmem:[#allocation4 + $0xc0] sm:$0xff] %vm846_vm0, %v4720_v8  ;;  %873 = vst.msk [vmem:[#allocation4 + $0xc8] sm:$0xff] %vm846_vm0, %v4720_v8 }
  0xb5   : > { %875 = vst.msk [vmem:[#allocation4 + $0xd8] sm:$0xff] %vm846_vm0, %v4720_v8  ;;  %876 = vst.msk [vmem:[#allocation4 + $0xe0] sm:$0xff] %vm846_vm0, %v4720_v8 }
  0xb6   : > { %850 = vst.msk [vmem:[#allocation4 + $0x10] sm:$0x1] %vm849_vm2, %v4720_v8  ;;  %853 = vst.msk [vmem:[#allocation4 + $0x28] sm:$0x1] %vm849_vm2, %v4720_v8 }
  0xb7   : > { %856 = vst.msk [vmem:[#allocation4 + $0x40] sm:$0x1] %vm849_vm2, %v4720_v8  ;;  %859 = vst.msk [vmem:[#allocation4 + $0x58] sm:$0x1] %vm849_vm2, %v4720_v8 }
  0xb8   : > { %862 = vst.msk [vmem:[#allocation4 + $0x70] sm:$0x1] %vm849_vm2, %v4720_v8  ;;  %865 = vst.msk [vmem:[#allocation4 + $0x88] sm:$0x1] %vm849_vm2, %v4720_v8 }
  0xb9   : > { %868 = vst.msk [vmem:[#allocation4 + $0xa0] sm:$0x1] %vm849_vm2, %v4720_v8  ;;  %871 = vst.msk [vmem:[#allocation4 + $0xb8] sm:$0x1] %vm849_vm2, %v4720_v8 }
  0xba   : > { %874 = vst.msk [vmem:[#allocation4 + $0xd0] sm:$0x1] %vm849_vm2, %v4720_v8  ;;  %877 = vst.msk [vmem:[#allocation4 + $0xe8] sm:$0x1] %vm849_vm2, %v4720_v8 }
  0xbb   : > { %880 = vst.msk [vmem:[#allocation5 + $0x10] sm:$0x1] %vm849_vm2, %v4719_v3  ;;  %883 = vst.msk [vmem:[#allocation5 + $0x28] sm:$0x1] %vm849_vm2, %v4719_v3 }
  0xbc   : > { %886 = vst.msk [vmem:[#allocation5 + $0x40] sm:$0x1] %vm849_vm2, %v4719_v3  ;;  %889 = vst.msk [vmem:[#allocation5 + $0x58] sm:$0x1] %vm849_vm2, %v4719_v3 }
  0xbd   : > { %892 = vst.msk [vmem:[#allocation5 + $0x70] sm:$0x1] %vm849_vm2, %v4719_v3  ;;  %895 = vst.msk [vmem:[#allocation5 + $0x88] sm:$0x1] %vm849_vm2, %v4719_v3 }
  0xbe   : > { %898 = vst.msk [vmem:[#allocation5 + $0xa0] sm:$0x1] %vm849_vm2, %v4719_v3  ;;  %901 = vst.msk [vmem:[#allocation5 + $0xb8] sm:$0x1] %vm849_vm2, %v4719_v3 }
  0xbf   : > { %904 = vst.msk [vmem:[#allocation5 + $0xd0] sm:$0x1] %vm849_vm2, %v4719_v3  ;;  %907 = vst.msk [vmem:[#allocation5 + $0xe8] sm:$0x1] %vm849_vm2, %v4719_v3 }
 0x143   : > { %v4309_v48 = vpop.f32.mrf.mxu0 }
 0x144   : > { %v1039_v49 = vadd.f32 %v4309_v48, %v4129_v46  ;;  %v4321_v50 = vpop.f32.mrf.mxu1 }
 0x145   : > { %v1167_v51 = vadd.f32 %v4321_v50, %v4136_v47  ;;  %v1030_v52 = vpop.f32.mrf.mxu0 }
 0x146   : > { %1063 = vst.msk [vmem:[#allocation2 + $0x10] sm:$0xff] %vm846_vm0, %v1039_v49  ;;  %v1031_v53 = vadd.f32 %v4129_v46, %v1030_v52  ;;  %v1158_v54 = vpop.f32.mrf.mxu1 }
 0x147   : > { %1192 = vst.msk [vmem:[#allocation2 + $0x50] sm:$0xff] %vm846_vm0, %v1167_v51  ;;  %v1159_v55 = vadd.f32 %v4136_v47, %v1158_v54  ;;  %v4310_v56 = vpop.f32.mrf.mxu0 }
 0x148   : > { %1061 = vst.msk [vmem:[#allocation2] sm:$0xff] %vm846_vm0, %v1031_v53  ;;  %v1042_v57 = vadd.f32 %v4310_v56, %v4129_v46  ;;  %v4322_v58 = vpop.f32.mrf.mxu1 }
 0x149   : > { %1190 = vst.msk [vmem:[#allocation2 + $0x40] sm:$0xff] %vm846_vm0, %v1159_v55  ;;  %v1170_v59 = vadd.f32 %v4322_v58, %v4136_v47  ;;  %v1033_v60 = vpop.f32.mrf.mxu0 }
 0x14a   : > { %1064 = vst.msk [vmem:[#allocation2 + $0x18] sm:$0xff] %vm846_vm0, %v1042_v57  ;;  %v1034_v61 = vadd.f32 %v4129_v46, %v1033_v60  ;;  %v1161_v62 = vpop.f32.mrf.mxu1 }
 0x14b   : > { %1193 = vst.msk [vmem:[#allocation2 + $0x58] sm:$0xff] %vm846_vm0, %v1170_v59  ;;  %v1162_v63 = vadd.f32 %v4136_v47, %v1161_v62  ;;  %v4313_v0 = vpop.f32.mrf.mxu0 }
 0x14c   : > { %1062 = vst.msk [vmem:[#allocation2 + $0x8] sm:$0xff] %vm846_vm0, %v1034_v61  ;;  %v1055_v1 = vadd.f32 %v4313_v0, %v4129_v46  ;;  %v4325_v2 = vpop.f32.mrf.mxu1 }
 0x14d   : > { %1191 = vst.msk [vmem:[#allocation2 + $0x48] sm:$0xff] %vm846_vm0, %v1162_v63  ;;  %v1183_v3 = vadd.f32 %v4325_v2, %v4136_v47  ;;  %v1046_v4 = vpop.f32.mrf.mxu0 }
 0x14e   : > { %1067 = vst.msk [vmem:[#allocation2 + $0x30] sm:$0xff] %vm846_vm0, %v1055_v1  ;;  %v1047_v5 = vadd.f32 %v4129_v46, %v1046_v4  ;;  %v1174_v6 = vpop.f32.mrf.mxu1 }
 0x14f   : > { %1196 = vst.msk [vmem:[#allocation2 + $0x70] sm:$0xff] %vm846_vm0, %v1183_v3  ;;  %v1175_v7 = vadd.f32 %v4136_v47, %v1174_v6  ;;  %v4314_v8 = vpop.f32.mrf.mxu0 }
 0x150   : > { %1065 = vst.msk [vmem:[#allocation2 + $0x20] sm:$0xff] %vm846_vm0, %v1047_v5  ;;  %v1058_v9 = vadd.f32 %v4314_v8, %v4129_v46  ;;  %v4326_v10 = vpop.f32.mrf.mxu1 }
 0x151   : > { %1194 = vst.msk [vmem:[#allocation2 + $0x60] sm:$0xff] %vm846_vm0, %v1175_v7  ;;  %v1186_v11 = vadd.f32 %v4326_v10, %v4136_v47  ;;  %v1049_v12 = vpop.f32.mrf.mxu0 }
 0x152   : > { %1068 = vst.msk [vmem:[#allocation2 + $0x38] sm:$0xff] %vm846_vm0, %v1058_v9  ;;  %v1050_v13 = vadd.f32 %v4129_v46, %v1049_v12  ;;  %v1177_v14 = vpop.f32.mrf.mxu1 }
 0x153   : > { %1197 = vst.msk [vmem:[#allocation2 + $0x78] sm:$0xff] %vm846_vm0, %v1186_v11  ;;  %v1178_v15 = vadd.f32 %v4136_v47, %v1177_v14 }
 0x154   : > { %1066 = vst.msk [vmem:[#allocation2 + $0x28] sm:$0xff] %vm846_vm0, %v1050_v13 }
 0x155   : > { %1195 = vst.msk [vmem:[#allocation2 + $0x68] sm:$0xff] %vm846_vm0, %v1178_v15 }
 0x156 PF: > { %s1198_s4 = sld [smem:[#allocation6 + %s4698_s30]]  ;;  %v4463_v16 = vld [vmem:[%s4981_s20 + $0x74] ss:$8 sps:$4 sm:$0xff]   ;;  %v4465_v17 = vld [vmem:[%s4981_s20 + $0x70] ss:$8 sps:$4 sm:$0xff]   ;;  %vm1212_vm3 = vcmask 523264  }
 0x157   : > { %2938 = vmatprep.subr.bf16.mxu0 %v4463_v16  ;;  %s4721_s8 = smov 64   ;;  %v4466_v30 = vld [vmem:[%s4981_s20 + $0x64] ss:$8 sps:$4 sm:$0xff]   ;;  %v4468_v31 = vld [vmem:[%s4981_s20 + $0x60] ss:$8 sps:$4 sm:$0xff]   ;;  %v1552_v4 = vld [vmem:[#allocation3 + $0x36] sm:$0xff] }
 0x158   : > { %2939 = vmatpush1.bf16.msra.mxu0 %v4465_v17  ;;  %v4469_v36 = vld [vmem:[%s4981_s20 + $0x54] ss:$8 sps:$4 sm:$0xff]   ;;  %v4471_v37 = vld [vmem:[%s4981_s20 + $0x50] ss:$8 sps:$4 sm:$0xff]   ;;  %v4472_v38 = vld [vmem:[%s4981_s20 + $0x44] ss:$8 sps:$4 sm:$0xff]  }
 0x159   : > { %2940 = vmatprep.subr.bf16.mxu0 %v4466_v30  ;;  %v4474_v39 = vld [vmem:[%s4981_s20 + $0x40] ss:$8 sps:$4 sm:$0xff]   ;;  %v4475_v40 = vld [vmem:[%s4981_s20 + $0x34] ss:$8 sps:$4 sm:$0xff]   ;;  %v4477_v41 = vld [vmem:[%s4981_s20 + $0x30] ss:$8 sps:$4 sm:$0xff]  }
 0x15a   : > { %v4478_v42 = vld [vmem:[%s4981_s20 + $0x24] ss:$8 sps:$4 sm:$0xff]   ;;  %v4480_v43 = vld [vmem:[%s4981_s20 + $0x20] ss:$8 sps:$4 sm:$0xff]   ;;  %v4481_v44 = vld [vmem:[%s4981_s20 + $0x14] ss:$8 sps:$4 sm:$0xff]  }
 0x15b   : > { %v4483_v45 = vld [vmem:[%s4981_s20 + $0x10] ss:$8 sps:$4 sm:$0xff]   ;;  %v4484_v46 = vld [vmem:[%s4981_s20 + $0x4] ss:$8 sps:$4 sm:$0xff]   ;;  %v4486_v47 = vld [vmem:[%s4981_s20] ss:$8 sps:$4 sm:$0xff]  }
 0x15c   : > { %s4143_s19 = sshll.u32 %s1198_s4, 6  ;;  %2941 = vmatpush1.bf16.msra.mxu0 %v4468_v31  ;;  %v4487_v48 = vld [vmem:[%s4981_s20 + $0xf4] ss:$8 sps:$4 sm:$0xff]   ;;  %v4489_v49 = vld [vmem:[%s4981_s20 + $0xf0] ss:$8 sps:$4 sm:$0xff]   ;;  %v2129_v6 = vld [vmem:[#allocation3 + $0x4] sm:$0xff] }
 0x15d   : > { %s1202_s6 = scalar_lea.vmem [#allocation2], %s4143_s19  ;;  %2942 = vmatprep.subr.bf16.mxu0 %v4469_v36  ;;  %v4490_v50 = vld [vmem:[%s4981_s20 + $0xe4] ss:$8 sps:$4 sm:$0xff]   ;;  %v4492_v51 = vld [vmem:[%s4981_s20 + $0xe0] ss:$8 sps:$4 sm:$0xff]   ;;  %v2131_v7 = vld [vmem:[#allocation3 + $0x34] sm:$0xff] }
 0x15e   : > { %v5286_v18 = vld [vmem:[%s1202_s6 + $0x10] sm:$0xff]  ;;  %v5288_v19 = vld [vmem:[%s1202_s6] sm:$0xff]  ;;  %v5290_v20 = vld [vmem:[%s1202_s6 + $0x18] sm:$0xff]  ;;  %s1200_s0 = sld [smem:[#allocation11 + %s4698_s30]]  ;;  %p4265_p13 = scmp.ne.s32.totalorder %s4698_s30, 4 }
 0x15f   : > { %7967 = vst [vmem:[#allocation28_spill] sm:$0xff] %v5286_v18  ;;  %7968 = vst [vmem:[#allocation29_spill] sm:$0xff] %v5288_v19  ;;  %v1496_v21 = vmax.f32 %v5286_v18, 0.0  ;;  %v7781_v22 = vmax.f32 %v5288_v19, 0.0  ;;  %v5294_v23 = vld [vmem:[%s1202_s6 + $0x8] sm:$0xff]  ;;  %v5298_v25 = vld [vmem:[%s1202_s6 + $0x20] sm:$0xff] }
 0x160   : > { %7969 = vst [vmem:[#allocation30_spill] sm:$0xff] %v5290_v20  ;;  %7970 = vst [vmem:[#allocation31_spill] sm:$0xff] %v5294_v23  ;;  %v5296_v24 = vld [vmem:[%s1202_s6 + $0x28] sm:$0xff]  ;;  %v5312_v26 = vld [vmem:[%s1202_s6 + $0x38] sm:$0xff]  ;;  %v7780_v28 = vmax.f32 %v5290_v20, 0.0  ;;  %v7779_v29 = vmax.f32 %v5294_v23, 0.0  ;;  %2943 = vmatpush1.bf16.msra.mxu0 %v4471_v37 }
 0x161   : > { %7971 = vst [vmem:[#allocation32_spill] sm:$0xff] %v5296_v24  ;;  %7972 = vst [vmem:[#allocation33_spill] sm:$0xff] %v5298_v25  ;;  %v5314_v27 = vld [vmem:[%s1202_s6 + $0x30] sm:$0xff]  ;;  %1514 = vrot.lane.b32.xlu1 %v1496_v21, %s4721_s8  ;;  %1510 = vrot.lane.b32.xlu0 %v7781_v22, %s4721_s8  ;;  %v7778_v32 = vmax.f32 %v5296_v24, 0.0  ;;  %v7777_v33 = vmax.f32 %v5298_v25, 0.0  ;;  %v7776_v34 = vmax.f32 %v5312_v26, 0.0 }
 0x162   : > { %1213 = vst.msk [vmem:[#allocation4 + $0x20] sm:$0xff] %vm1212_vm3, %v5288_v19  ;;  %1215 = vst.msk [vmem:[#allocation4 + $0x50] sm:$0xff] %vm1212_vm3, %v5286_v18  ;;  %v7775_v35 = vmax.f32 %v5314_v27, 0.0  ;;  %2944 = vmatprep.subr.bf16.mxu0 %v4472_v38  ;;  %v4493_v52 = vld [vmem:[%s4981_s20 + $0xd4] ss:$8 sps:$4 sm:$0xff]   ;;  %v2132_v9 = vld [vmem:[#allocation3 + $0x4c] sm:$0xff] }
 0x163   : > { %1216 = vst.msk [vmem:[#allocation4 + $0x68] sm:$0xff] %vm1212_vm3, %v5290_v20  ;;  %1222 = vst.msk [vmem:[#allocation5 + $0x20] sm:$0xff] %vm1212_vm3, %v5288_v19  ;;  %v4495_v53 = vld [vmem:[%s4981_s20 + $0xd0] ss:$8 sps:$4 sm:$0xff]   ;;  %v4496_v54 = vld [vmem:[%s4981_s20 + $0xc4] ss:$8 sps:$4 sm:$0xff]  }
 0x164   : > { %1224 = vst.msk [vmem:[#allocation5 + $0x50] sm:$0xff] %vm1212_vm3, %v5286_v18  ;;  %1225 = vst.msk [vmem:[#allocation5 + $0x68] sm:$0xff] %vm1212_vm3, %v5290_v20  ;;  %2945 = vmatpush1.bf16.msra.mxu0 %v4474_v39  ;;  %v4498_v55 = vld [vmem:[%s4981_s20 + $0xc0] ss:$8 sps:$4 sm:$0xff]   ;;  %v4499_v56 = vld [vmem:[%s4981_s20 + $0xb4] ss:$8 sps:$4 sm:$0xff]  }
 0x165   : > { %7973 = vst [vmem:[#allocation34_spill] sm:$0xff] %v5312_v26  ;;  %7974 = vst [vmem:[#allocation35_spill] sm:$0xff] %v5314_v27  ;;  %1516 = vrot.lane.b32.xlu1 %v7780_v28, %s4721_s8  ;;  %1512 = vrot.lane.b32.xlu0 %v7779_v29, %s4721_s8  ;;  %v4501_v57 = vld [vmem:[%s4981_s20 + $0xb0] ss:$8 sps:$4 sm:$0xff]   ;;  %v4502_v58 = vld [vmem:[%s4981_s20 + $0xa4] ss:$8 sps:$4 sm:$0xff]  }
 0x166   : > { %1214 = vst.msk [vmem:[#allocation4 + $0x38] sm:$0xff] %vm1212_vm3, %v5294_v23  ;;  %1217 = vst.msk [vmem:[#allocation4 + $0x80] sm:$0xff] %vm1212_vm3, %v5298_v25  ;;  %2946 = vmatprep.subr.bf16.mxu0 %v4475_v40  ;;  %v4504_v59 = vld [vmem:[%s4981_s20 + $0xa0] ss:$8 sps:$4 sm:$0xff]   ;;  %v4505_v60 = vld [vmem:[%s4981_s20 + $0x94] ss:$8 sps:$4 sm:$0xff]  }
 0x167   : > { %1218 = vst.msk [vmem:[#allocation4 + $0x98] sm:$0xff] %vm1212_vm3, %v5296_v24  ;;  %1223 = vst.msk [vmem:[#allocation5 + $0x38] sm:$0xff] %vm1212_vm3, %v5294_v23  ;;  %v4507_v61 = vld [vmem:[%s4981_s20 + $0x90] ss:$8 sps:$4 sm:$0xff]   ;;  %v4508_v62 = vld [vmem:[%s4981_s20 + $0x84] ss:$8 sps:$4 sm:$0xff]  }
 0x168   : > { %1226 = vst.msk [vmem:[#allocation5 + $0x80] sm:$0xff] %vm1212_vm3, %v5298_v25  ;;  %1227 = vst.msk [vmem:[#allocation5 + $0x98] sm:$0xff] %vm1212_vm3, %v5296_v24  ;;  %2947 = vmatpush1.bf16.msra.mxu0 %v4477_v41  ;;  %v4510_v63 = vld [vmem:[%s4981_s20 + $0x80] ss:$8 sps:$4 sm:$0xff]   ;;  %v5392_v1 = vld [vmem:[%s4966_s9 + $0x5] ss:$0 sm:$0xff] }
 0x169   : > { %1219 = vst.msk [vmem:[#allocation4 + $0xb0] sm:$0xff] %vm1212_vm3, %v5314_v27  ;;  %1220 = vst.msk [vmem:[#allocation4 + $0xc8] sm:$0xff] %vm1212_vm3, %v5312_v26  ;;  %1520 = vrot.lane.b32.xlu1 %v7778_v32, %s4721_s8  ;;  %1518 = vrot.lane.b32.xlu0 %v7777_v33, %s4721_s8  ;;  %v5389_v0 = vld [vmem:[%s4966_s9] ss:$0 sm:$0xff]  ;;  %v5398_v3 = vld [vmem:[%s4971_s1 + $0x5] ss:$0 sm:$0xff] }
 0x16a   : > { %1228 = vst.msk [vmem:[#allocation5 + $0xb0] sm:$0xff] %vm1212_vm3, %v5314_v27  ;;  %1229 = vst.msk [vmem:[#allocation5 + $0xc8] sm:$0xff] %vm1212_vm3, %v5312_v26  ;;  %2948 = vmatprep.subr.bf16.mxu0 %v4478_v42  ;;  %v5395_v2 = vld [vmem:[%s4971_s1] ss:$0 sm:$0xff]  ;;  %v1553_v5 = vld [vmem:[#allocation3 + $0x4e] sm:$0xff]  ;;  %v1569_v10 = vmul.f32 %v5389_v0, %v1552_v4  ;;  %v2163_v13 = vmul.f32 %v5398_v3, %v2131_v7  ;;  %v2164_v15 = vmul.f32 %v5398_v3, %v2132_v9  ;;  %s7531_s18 = sld [smem:[#allocation9 + %s4698_s30]] }
 0x16b   : > { %v2130_v8 = vld [vmem:[#allocation3 + $0x1c] sm:$0xff]  ;;  %v1582_v11 = vmul.f32 %v5392_v1, %v1553_v5  ;;  %v2150_v12 = vmul.f32 %v5395_v2, %v2129_v6  ;;  %v5407_v16 = vld [vmem:[%s4971_s1 + $0xf] ss:$0 sm:$0xff]  ;;  %v5413_v36 = vmul.f32 %v5389_v0, %v1553_v5  ;;  %v1562_v37 = vld [vmem:[#allocation3 + $0x126] sm:$0xff]  ;;  %v5418_v41 = vmul.f32 %v5395_v2, %v2131_v7 }
 0x16c   : > { %2949 = vmatpush1.bf16.msra.mxu0 %v4480_v43  ;;  %v2151_v14 = vmul.f32 %v5395_v2, %v2130_v8  ;;  %v2142_v17 = vld [vmem:[#allocation3 + $0x13c] sm:$0xff]  ;;  %v2144_v30 = vld [vmem:[#allocation3 + $0x16c] sm:$0xff]  ;;  %v2141_v38 = vld [vmem:[#allocation3 + $0x124] sm:$0xff]  ;;  %v5423_v43 = vmul.f32 %v5395_v2, %v2132_v9 }
 0x16d   : > { %1524 = vrot.lane.b32.xlu1 %v7776_v34, %s4721_s8  ;;  %1522 = vrot.lane.b32.xlu0 %v7775_v35, %s4721_s8  ;;  %v5410_v31 = vld [vmem:[%s4966_s9 + $0xf] ss:$0 sm:$0xff]  ;;  %v2143_v39 = vld [vmem:[#allocation3 + $0x154] sm:$0xff]  ;;  %v5415_v40 = vadd.f32 %v1582_v11, %v1569_v10  ;;  %v5420_v42 = vadd.f32 %v2163_v13, %v2150_v12  ;;  %v5476_v9 = vld [vmem:[%s4971_s1 + $0x2] ss:$0 sm:$0xff] }
 0x16e   : > { %2950 = vmatprep.subr.bf16.mxu0 %v4481_v44  ;;  %v5426_v44 = vld [vmem:[%s4971_s1 + $0x14] ss:$0 sm:$0xff]  ;;  %v5479_v10 = vld [vmem:[%s4971_s1 + $0x7] ss:$0 sm:$0xff]  ;;  %v2484_v11 = vld [vmem:[#allocation3 + $0xa] sm:$0xff] }
 0x16f   : > { %v5504_v35 = vld [vmem:[%s4971_s1 + $0x8] ss:$0 sm:$0xff]  ;;  %v2605_v28 = vld [vmem:[#allocation3 + $0xc] sm:$0xff] }
 0x170   : > { %2951 = vmatpush1.bf16.msra.mxu0 %v4483_v45  ;;  %v2242_v45 = vld [vmem:[#allocation3 + $0x6] sm:$0xff]  ;;  %7990 = vst [vmem:[#allocation51_spill] sm:$0xff] %v5504_v35  ;;  %s4264_s21 = sshll.u32 %s7531_s18, 6 }
 0x171   : > { %2952 = vmatprep.subr.bf16.mxu0 %v4484_v46  ;;  %v2243_v46 = vld [vmem:[#allocation3 + $0x1e] sm:$0xff]  ;;  %s7568_s2 = scalar_lea.vmem [#allocation2], %s4264_s21 }
 0x172   : > { %v2606_v22 = vld [vmem:[#allocation3 + $0x24] sm:$0xff] }
 0x174   : > { %2953 = vmatpush1.bf16.msra.mxu0 %v4486_v47  ;;  %v5429_v47 = vld [vmem:[%s4966_s9 + $0x1] ss:$0 sm:$0xff] }
 0x175   : > { %2954 = vmatprep.subr.bf16.mxu0 %v4487_v48  ;;  %v5432_v48 = vld [vmem:[%s4971_s1 + $0x1] ss:$0 sm:$0xff] }
 0x176   : > { %v5467_v6 = vmul.f32 %v5432_v48, %v2243_v46  ;;  %v5482_v12 = vmul.f32 %v5432_v48, %v1552_v4  ;;  %v5485_v13 = vmul.f32 %v5432_v48, %v1553_v5  ;;  %v2487_v46 = vld [vmem:[#allocation3 + $0x52] sm:$0xff] }
 0x178   : > { %2955 = vmatpush2.bf16.msra.mxu0 %v4489_v49  ;;  %v5434_v49 = vadd.f32 %v2164_v15, %v2151_v14  ;;  %7983 = vst [vmem:[#allocation44_spill] sm:$0xff] %v5482_v12  ;;  %7984 = vst [vmem:[#allocation45_spill] sm:$0xff] %v5485_v13  ;;  %v2365_v14 = vld [vmem:[#allocation3 + $0x38] sm:$0xff]  ;;  %v2485_v15 = vld [vmem:[#allocation3 + $0x22] sm:$0xff] }
 0x179   : > { %2956 = vmatprep.subr.bf16.mxu0 %v4490_v50  ;;  %v5437_v50 = vmul.f32 %v5407_v16, %v2142_v17  ;;  %v5536_v13 = vld [vmem:[%s4966_s9 + $0x2] ss:$0 sm:$0xff] }
 0x17a   : > { %v5558_v18 = vmul.f32 %v5536_v13, %v2365_v14 }
 0x17b   : > { %7975 = vst [vmem:[#allocation36_spill] sm:$0xff] %v5437_v50 }
 0x17c   : > { %2957 = vmatpush2.bf16.msra.mxu0 %v4492_v51  ;;  %v5440_v51 = vmul.f32 %v5426_v44, %v2142_v17  ;;  %v4188_v17 = vld [vmem:[%s4971_s1 + $0x3] ss:$0 sm:$0xff]  ;;  %8004 = vst [vmem:[#allocation64_spill] sm:$0xff] %v5558_v18 }
 0x17d   : > { %2958 = vmatprep.subr.bf16.mxu0 %v4493_v52  ;;  %v5443_v52 = vmul.f32 %v5426_v44, %v2144_v30  ;;  %v5518_v29 = vmul.f32 %v4188_v17, %v2484_v11  ;;  %v2607_v11 = vld [vmem:[#allocation3 + $0x3c] sm:$0xff] }
 0x17e   : > { %7976 = vst [vmem:[#allocation37_spill] sm:$0xff] %v5440_v51 }
 0x17f   : > { %7977 = vst [vmem:[#allocation38_spill] sm:$0xff] %v5443_v52  ;;  %7995 = vst [vmem:[#allocation56_spill] sm:$0xff] %v5518_v29  ;;  %v2608_v29 = vld [vmem:[#allocation3 + $0x54] sm:$0xff] }
 0x180   : > { %2959 = vmatpush2.bf16.msra.mxu0 %v4495_v53  ;;  %v1661_v53 = vld [vmem:[#allocation3 + $0x37] sm:$0xff] }
 0x181   : > { %2960 = vmatprep.subr.bf16.mxu0 %v4496_v54  ;;  %v1662_v54 = vld [vmem:[#allocation3 + $0x4f] sm:$0xff]  ;;  %v5489_v30 = vmul.f32 %v5429_v47, %v1661_v53 }
 0x183   : > { %7985 = vst [vmem:[#allocation46_spill] sm:$0xff] %v5489_v30 }
 0x184   : > { %2961 = vmatpush2.bf16.msra.mxu0 %v4498_v55  ;;  %v5446_v55 = vld [vmem:[%s4966_s9 + $0x6] ss:$0 sm:$0xff] }
 0x185   : > { %2962 = vmatprep.subr.bf16.mxu0 %v4499_v56  ;;  %v5449_v56 = vld [vmem:[%s4971_s1 + $0x6] ss:$0 sm:$0xff]  ;;  %v5507_v53 = vmul.f32 %v5446_v55, %v1662_v54 }
 0x186   : > { %v5470_v7 = vmul.f32 %v5449_v56, %v1552_v4  ;;  %v5473_v8 = vmul.f32 %v5449_v56, %v1553_v5  ;;  %v5501_v5 = vmul.f32 %v5476_v9, %v2365_v14 }
 0x187   : > { %7991 = vst [vmem:[#allocation52_spill] sm:$0xff] %v5507_v53 }
 0x188   : > { %2963 = vmatpush2.bf16.msra.mxu0 %v4501_v57  ;;  %v5452_v57 = vmul.f32 %v5410_v31, %v1562_v37  ;;  %7982 = vst [vmem:[#allocation43_spill] sm:$0xff] %v5473_v8  ;;  %v5492_v37 = vmul.f32 %v5429_v47, %v1662_v54  ;;  %7989 = vst [vmem:[#allocation50_spill] sm:$0xff] %v5501_v5  ;;  %v4193_v54 = vld [vmem:[%s4971_s1 + $0x4] ss:$0 sm:$0xff] }
 0x189   : > { %2964 = vmatprep.subr.bf16.mxu0 %v4502_v58  ;;  %v5455_v58 = vmul.f32 %v5407_v16, %v2141_v38  ;;  %v5560_v12 = vmul.f32 %v4193_v54, %v2605_v28 }
 0x18a   : > { %7978 = vst [vmem:[#allocation39_spill] sm:$0xff] %v5452_v57  ;;  %7986 = vst [vmem:[#allocation47_spill] sm:$0xff] %v5492_v37 }
 0x18b   : > { %7979 = vst [vmem:[#allocation40_spill] sm:$0xff] %v5455_v58  ;;  %8005 = vst [vmem:[#allocation65_spill] sm:$0xff] %v5560_v12  ;;  %v5562_v58 = vmul.f32 %v4193_v54, %v2606_v22  ;;  %v2254_v12 = vld [vmem:[#allocation3 + $0x126] sm:$0xff] }
 0x18c   : > { %2965 = vmatpush2.bf16.msra.mxu0 %v4504_v59  ;;  %v5458_v59 = vmul.f32 %v5426_v44, %v2141_v38  ;;  %v2366_v38 = vld [vmem:[#allocation3 + $0x50] sm:$0xff] }
 0x18d   : > { %2966 = vmatprep.subr.bf16.mxu0 %v4505_v60  ;;  %v5461_v60 = vmul.f32 %v5426_v44, %v2143_v39  ;;  %v5510_v32 = vmul.f32 %v5476_v9, %v2366_v38  ;;  %8006 = vst [vmem:[#allocation66_spill] sm:$0xff] %v5562_v58  ;;  %v5593_v58 = vld [vmem:[%s4966_s9 + $0x3] ss:$0 sm:$0xff] }
 0x18e   : > { %7980 = vst [vmem:[#allocation41_spill] sm:$0xff] %v5458_v59  ;;  %8015 = vst [vmem:[#allocation75_spill] sm:$0xff] %v5593_v58 }
 0x18f   : > { %7981 = vst [vmem:[#allocation42_spill] sm:$0xff] %v5461_v60  ;;  %7992 = vst [vmem:[#allocation53_spill] sm:$0xff] %v5510_v32  ;;  %v7996_v60 = vmax.f32 %v5288_v19, 0.0  ;;  %v5531_v32 = vmul.f32 %v4188_v17, %v2485_v15  ;;  %v5552_v15 = vmul.f32 %v5504_v35, %v2487_v46  ;;  %v5555_v19 = vld [vmem:[%s4971_s1 + $0x9] ss:$0 sm:$0xff] }
 0x190   : > { %2967 = vmatpush2.bf16.msra.mxu0 %v4507_v61  ;;  %v2363_v61 = vld [vmem:[#allocation3 + $0x8] sm:$0xff]  ;;  %8003 = vst [vmem:[#allocation63_spill] sm:$0xff] %v5555_v19  ;;  %v5578_v28 = vmul.f32 %v5555_v19, %v2607_v11  ;;  %v5581_v22 = vmul.f32 %v5555_v19, %v2608_v29 }
 0x191   : > { %2968 = vmatprep.subr.bf16.mxu0 %v4508_v62  ;;  %v2364_v62 = vld [vmem:[#allocation3 + $0x20] sm:$0xff]  ;;  %v5495_v39 = vmul.f32 %v5476_v9, %v2363_v61  ;;  %v5513_v61 = vmul.f32 %v5479_v10, %v2365_v14  ;;  %7997 = vst [vmem:[#allocation57_spill] sm:$0xff] %v5531_v32  ;;  %8002 = vst [vmem:[#allocation62_spill] sm:$0xff] %v5552_v15  ;;  %v1896_v32 = vld [vmem:[#allocation3 + $0x51] sm:$0xff] }
 0x192   : > { %v5498_v4 = vmul.f32 %v5476_v9, %v2364_v62  ;;  %v5516_v62 = vmul.f32 %v5479_v10, %v2366_v38  ;;  %v5575_v14 = vld [vmem:[%s4966_s9 + $0x11] ss:$0 sm:$0xff]  ;;  %8010 = vst [vmem:[#allocation70_spill] sm:$0xff] %v5578_v28  ;;  %8011 = vst [vmem:[#allocation71_spill] sm:$0xff] %v5581_v22  ;;  %v8017_v28 = vmax.f32 %v5294_v23, 0.0  ;;  %v5605_v22 = vmul.f32 %v5593_v58, %v1896_v32 }
 0x193   : > { %7987 = vst [vmem:[#allocation48_spill] sm:$0xff] %v5495_v39  ;;  %7993 = vst [vmem:[#allocation54_spill] sm:$0xff] %v5513_v61 }
 0x194   : > { %2969 = vmatpush2.bf16.msra.mxu0 %v4510_v63  ;;  %v5464_v63 = vmul.f32 %v5432_v48, %v2242_v45  ;;  %7988 = vst [vmem:[#allocation49_spill] sm:$0xff] %v5498_v4  ;;  %v2486_v45 = vld [vmem:[#allocation3 + $0x3a] sm:$0xff]  ;;  %7994 = vst [vmem:[#allocation55_spill] sm:$0xff] %v5516_v62  ;;  %v8016_v62 = vmax.f32 %v5290_v20, 0.0  ;;  %v5617_v20 = vld [vmem:[%s4971_s1 + $0x15] ss:$0 sm:$0xff] }
 0x195   : > { %v5533_v5 = vmul.f32 %v4188_v17, %v2486_v45  ;;  %8009 = vst [vmem:[#allocation69_spill] sm:$0xff] %v5575_v14  ;;  %8019 = vst [vmem:[#allocation77_spill] sm:$0xff] %v5605_v22 }
 0x197   : > { %7998 = vst [vmem:[#allocation58_spill] sm:$0xff] %v5533_v5  ;;  %v1895_v5 = vld [vmem:[#allocation3 + $0x39] sm:$0xff] }
 0x198   : > { %v5602_v19 = vmul.f32 %v5593_v58, %v1895_v5 }
 0x19a   : > { %8018 = vst [vmem:[#allocation76_spill] sm:$0xff] %v5602_v19 }
 0x1d3   : > { %v1515_v34 = vpop.permute.xlu1 %1514  ;;  %v1511_v33 = vpop.permute.xlu0 %1510 }
 0x1d4   : > { %v5524_v57 = vsel %vm1212_vm3, %v1496_v21, %v1515_v34  ;;  %v5529_v59 = vsel %vm1212_vm3, %v7996_v60, %v1511_v33  ;;  %v5541_v21 = vld [vmem:[%s4971_s1 + $0xc] ss:$0 sm:$0xff]  ;;  %v5544_v34 = vld [vmem:[%s4971_s1 + $0x11] ss:$0 sm:$0xff]  ;;  %v5546_v33 = vmul.f32 %v4188_v17, %v2487_v46  ;;  %v5549_v60 = vmul.f32 %v5504_v35, %v2486_v45 }
 0x1d5   : > { %1545 = vst [vmem:[#allocation3 + $0x98] sm:$0xff] %v5524_v57  ;;  %1543 = vst [vmem:[#allocation3 + $0x68] sm:$0xff] %v5529_v59  ;;  %v5564_v17 = vmul.f32 %v4193_v54, %v2607_v11  ;;  %v5572_v35 = vld [vmem:[%s4966_s9 + $0xc] ss:$0 sm:$0xff]  ;;  %v5633_v23 = vmul.f32 %v5541_v21, %v5529_v59  ;;  %v5637_v58 = vmul.f32 %v5544_v34, %v5524_v57 }
 0x1d6   : > { %7999 = vst [vmem:[#allocation59_spill] sm:$0xff] %v5544_v34  ;;  %8000 = vst [vmem:[#allocation60_spill] sm:$0xff] %v5546_v33  ;;  %v5566_v33 = vmul.f32 %v4193_v54, %v2608_v29  ;;  %v5584_v54 = vmul.f32 %v5536_v13, %v2366_v38  ;;  %v5673_v22 = vmul.f32 %v5479_v10, %v5529_v59 }
 0x1d7   : > { %8001 = vst [vmem:[#allocation61_spill] sm:$0xff] %v5549_v60  ;;  %8007 = vst [vmem:[#allocation67_spill] sm:$0xff] %v5564_v17  ;;  %v5569_v60 = vld [vmem:[%s4966_s9 + $0x7] ss:$0 sm:$0xff]  ;;  %v1517_v15 = vpop.permute.xlu1 %1516  ;;  %v1513_v18 = vpop.permute.xlu0 %1512  ;;  %v5590_v17 = vld [vmem:[%s4966_s9 + $0x16] ss:$0 sm:$0xff]  ;;  %v5677_v19 = vmul.f32 %v5541_v21, %v5524_v57 }
 0x1d8   : > { %8008 = vst [vmem:[#allocation68_spill] sm:$0xff] %v5566_v33  ;;  %8012 = vst [vmem:[#allocation72_spill] sm:$0xff] %v5584_v54  ;;  %v5587_v33 = vmul.f32 %v5569_v60, %v2366_v38  ;;  %v1537_v11 = vsel %vm1212_vm3, %v8016_v62, %v1517_v15  ;;  %v1535_v29 = vsel %vm1212_vm3, %v8017_v28, %v1513_v18  ;;  %v5608_v38 = vld [vmem:[%s4966_s9 + $0x8] ss:$0 sm:$0xff]  ;;  %v5614_v54 = vld [vmem:[%s4966_s9 + $0x9] ss:$0 sm:$0xff] }
 0x1d9   : > { %8014 = vst [vmem:[#allocation74_spill] sm:$0xff] %v5590_v17  ;;  %8020 = vst [vmem:[#allocation78_spill] sm:$0xff] %v5608_v38  ;;  %v5620_v62 = vmul.f32 %v5608_v38, %v1896_v32  ;;  %v5629_v15 = vmul.f32 %v5614_v54, %v2487_v46  ;;  %v2255_v28 = vld [vmem:[#allocation3 + $0x13e] sm:$0xff]  ;;  %v5640_v32 = vmul.f32 %v5617_v20, %v2254_v12 }
 0x1da   : > { %8013 = vst [vmem:[#allocation73_spill] sm:$0xff] %v5587_v33  ;;  %v5611_v33 = vld [vmem:[%s4966_s9 + $0x4] ss:$0 sm:$0xff]  ;;  %8022 = vst [vmem:[#allocation80_spill] sm:$0xff] %v5614_v54  ;;  %v5659_v12 = vmul.f32 %v5590_v17, %v5524_v57 }
 0x1db   : > { %8021 = vst [vmem:[#allocation79_spill] sm:$0xff] %v5611_v33  ;;  %1546 = vst [vmem:[#allocation3 + $0xb0] sm:$0xff] %v1537_v11  ;;  %v5623_v18 = vmul.f32 %v5611_v33, %v2486_v45  ;;  %v5626_v5 = vmul.f32 %v5611_v33, %v2487_v46  ;;  %v5643_v45 = vmul.f32 %v5617_v20, %v2255_v28  ;;  %v1521_v33 = vpop.permute.xlu1 %1520  ;;  %v8035_v28 = vmax.f32 %v5296_v24, 0.0 }
 0x1dc   : > { %1544 = vst [vmem:[#allocation3 + $0x80] sm:$0xff] %v1535_v29  ;;  %8023 = vst [vmem:[#allocation81_spill] sm:$0xff] %v5620_v62  ;;  %v5647_v46 = vmul.f32 %v5569_v60, %v5529_v59  ;;  %v5698_v24 = vmul.f32 %v5541_v21, %v1535_v29  ;;  %v2133_v54 = vld [vmem:[#allocation3 + $0x64] sm:$0xff] }
 0x1dd   : > { %8024 = vst [vmem:[#allocation82_spill] sm:$0xff] %v5623_v18  ;;  %8025 = vst [vmem:[#allocation83_spill] sm:$0xff] %v5626_v5  ;;  %v1519_v5 = vpop.permute.xlu0 %1518  ;;  %v5655_v18 = vmul.f32 %v5575_v14, %v5524_v57 }
 0x1de   : > { %8026 = vst [vmem:[#allocation84_spill] sm:$0xff] %v5629_v15  ;;  %8027 = vst [vmem:[#allocation85_spill] sm:$0xff] %v5633_v23  ;;  %v5651_v15 = vmul.f32 %v5572_v35, %v5529_v59 }
 0x1df   : > { %8028 = vst [vmem:[#allocation86_spill] sm:$0xff] %v5637_v58  ;;  %8029 = vst [vmem:[#allocation87_spill] sm:$0xff] %v5640_v32  ;;  %v8037_v32 = vmax.f32 %v5298_v25, 0.0  ;;  %v5701_v25 = vmul.f32 %v5544_v34, %v1537_v11  ;;  %v5723_v34 = vmul.f32 %v5575_v14, %v1535_v29 }
 0x1e0   : > { %8030 = vst [vmem:[#allocation88_spill] sm:$0xff] %v5643_v45  ;;  %8031 = vst [vmem:[#allocation89_spill] sm:$0xff] %v5647_v46  ;;  %v5664_v45 = vsel %vm1212_vm3, %v8035_v28, %v1521_v33  ;;  %v5683_v33 = vmul.f32 %v5536_v13, %v5529_v59  ;;  %v5695_v28 = vmul.f32 %v5476_v9, %v5529_v59  ;;  %v5715_v59 = vld [vmem:[%s4966_s9 + $0x14] ss:$0 sm:$0xff] }
 0x1e1   : > { %8032 = vst [vmem:[#allocation90_spill] sm:$0xff] %v5651_v15  ;;  %8033 = vst [vmem:[#allocation91_spill] sm:$0xff] %v5655_v18  ;;  %v5669_v62 = vsel %vm1212_vm3, %v8037_v32, %v1519_v5  ;;  %v5687_v5 = vmul.f32 %v5569_v60, %v5524_v57  ;;  %v5691_v32 = vmul.f32 %v5572_v35, %v5524_v57  ;;  %v5736_v18 = vld [vmem:[%s4971_s1 + $0x16] ss:$0 sm:$0xff] }
 0x1e2   : > { %8034 = vst [vmem:[#allocation92_spill] sm:$0xff] %v5659_v12  ;;  %8036 = vst [vmem:[#allocation93_spill] sm:$0xff] %v5664_v45  ;;  %v5726_v12 = vmul.f32 %v5590_v17, %v1537_v11  ;;  %v5739_v15 = vmul.f32 %v5541_v21, %v1537_v11  ;;  %v5748_v17 = vmul.f32 %v5572_v35, %v1537_v11  ;;  %v5822_v61 = vld [vmem:[#allocation3 + $0xae] sm:$0xff] }
 0x1e3   : > { %8038 = vst [vmem:[#allocation94_spill] sm:$0xff] %v5669_v62  ;;  %8039 = vst [vmem:[#allocation95_spill] sm:$0xff] %v5673_v22  ;;  %v5720_v22 = vmul.f32 %v5572_v35, %v1535_v29  ;;  %v5754_v46 = vmul.f32 %v5575_v14, %v1537_v11  ;;  %v5757_v21 = vmul.f32 %v5476_v9, %v1535_v29  ;;  %v1663_v14 = vld [vmem:[#allocation3 + $0x67] sm:$0xff] }
 0x1e4   : > { %8040 = vst [vmem:[#allocation96_spill] sm:$0xff] %v5677_v19  ;;  %1548 = vst [vmem:[#allocation3 + $0xe0] sm:$0xff] %v5664_v45  ;;  %v5705_v19 = vmul.f32 %v5479_v10, %v5524_v57 }
 0x1e5   : > { %1547 = vst [vmem:[#allocation3 + $0xc8] sm:$0xff] %v5669_v62  ;;  %8041 = vst [vmem:[#allocation97_spill] sm:$0xff] %v5683_v33  ;;  %v2375_v33 = vld [vmem:[#allocation3 + $0x128] sm:$0xff] }
 0x1e6   : > { %8042 = vst [vmem:[#allocation98_spill] sm:$0xff] %v5687_v5  ;;  %8043 = vst [vmem:[#allocation99_spill] sm:$0xff] %v5691_v32  ;;  %v5709_v32 = vmul.f32 %v5536_v13, %v5524_v57  ;;  %v5712_v5 = vld [vmem:[%s4966_s9 + $0xa] ss:$0 sm:$0xff]  ;;  %v5731_v57 = vld [vmem:[#allocation3 + $0x97] sm:$0xff] }
 0x1e7   : > { %8044 = vst [vmem:[#allocation100_spill] sm:$0xff] %v5695_v28  ;;  %8045 = vst [vmem:[#allocation101_spill] sm:$0xff] %v5698_v24  ;;  %v5717_v28 = vld [vmem:[#allocation3 + $0x96] sm:$0xff] }
 0x1e8   : > { %8046 = vst [vmem:[#allocation102_spill] sm:$0xff] %v5701_v25  ;;  %8047 = vst [vmem:[#allocation103_spill] sm:$0xff] %v5705_v19  ;;  %v5729_v19 = vmul.f32 %v5479_v10, %v1535_v29  ;;  %v1573_v35 = vmul.f32 %v5389_v0, %v5717_v28  ;;  %v5775_v9 = vmul.f32 %v5410_v31, %v5717_v28 }
 0x1e9   : > { %8048 = vst [vmem:[#allocation104_spill] sm:$0xff] %v5709_v32  ;;  %8049 = vst [vmem:[#allocation105_spill] sm:$0xff] %v5720_v22  ;;  %v5733_v32 = vld [vmem:[#allocation3 + $0x66] sm:$0xff]  ;;  %v5742_v22 = vmul.f32 %v5536_v13, %v1535_v29  ;;  %v5760_v13 = vmul.f32 %v5479_v10, %v1537_v11  ;;  %v5782_v10 = vmul.f32 %v5715_v59, %v5717_v28 }
 0x1ea   : > { %8050 = vst [vmem:[#allocation106_spill] sm:$0xff] %v5723_v34  ;;  %8051 = vst [vmem:[#allocation107_spill] sm:$0xff] %v5726_v12  ;;  %v5745_v34 = vmul.f32 %v5569_v60, %v1535_v29  ;;  %v2135_v12 = vld [vmem:[#allocation3 + $0x94] sm:$0xff]  ;;  %v5763_v60 = vmul.f32 %v5736_v18, %v2375_v33  ;;  %v5778_v29 = vld [vmem:[%s4971_s1 + $0xb] ss:$0 sm:$0xff]  ;;  %v5786_v11 = vmul.f32 %v5429_v47, %v5731_v57 }
 0x1eb   : > { %8052 = vst [vmem:[#allocation108_spill] sm:$0xff] %v5729_v19  ;;  %8053 = vst [vmem:[#allocation109_spill] sm:$0xff] %v5731_v57  ;;  %v5751_v19 = vld [vmem:[%s4971_s1 + $0xa] ss:$0 sm:$0xff]  ;;  %v5790_v33 = vmul.f32 %v5446_v55, %v5731_v57  ;;  %v2205_v25 = vmul.f32 %v5407_v16, %v2135_v12  ;;  %v5809_v58 = vmul.f32 %v5432_v48, %v5717_v28 }
 0x1ec   : > { %8054 = vst [vmem:[#allocation110_spill] sm:$0xff] %v5736_v18  ;;  %8055 = vst [vmem:[#allocation111_spill] sm:$0xff] %v5739_v15  ;;  %v2167_v15 = vmul.f32 %v5398_v3, %v2135_v12  ;;  %v5813_v38 = vmul.f32 %v5449_v56, %v5717_v28  ;;  %v5817_v24 = vmul.f32 %v5778_v29, %v5717_v28 }
 0x1ed   : > { %8056 = vst [vmem:[#allocation112_spill] sm:$0xff] %v5742_v22  ;;  %8057 = vst [vmem:[#allocation113_spill] sm:$0xff] %v5745_v34  ;;  %v5771_v34 = vmul.f32 %v5712_v5, %v5717_v28  ;;  %v2165_v22 = vmul.f32 %v5398_v3, %v2133_v54  ;;  %v1571_v23 = vmul.f32 %v5389_v0, %v5733_v32 }
 0x1ee   : > { %8058 = vst [vmem:[#allocation114_spill] sm:$0xff] %v5748_v17  ;;  %8059 = vst [vmem:[#allocation115_spill] sm:$0xff] %v5754_v46  ;;  %v1585_v17 = vmul.f32 %v5392_v1, %v5717_v28  ;;  %v1603_v46 = vmul.f32 %v5712_v5, %v5733_v32  ;;  %v2154_v57 = vmul.f32 %v5395_v2, %v2133_v54 }
 0x1ef   : > { %8060 = vst [vmem:[#allocation116_spill] sm:$0xff] %v5757_v21  ;;  %8061 = vst [vmem:[#allocation117_spill] sm:$0xff] %v5760_v13  ;;  %v5795_v13 = vmul.f32 %v5395_v2, %v2135_v12  ;;  %v5798_v21 = vld [vmem:[%s4966_s9 + $0xb] ss:$0 sm:$0xff]  ;;  %v2173_v39 = vadd.f32 %v2165_v22, %v5418_v41  ;;  %v5841_v37 = vmul.f32 %v5432_v48, %v5733_v32 }
 0x1f0   : > { %8062 = vst [vmem:[#allocation118_spill] sm:$0xff] %v5763_v60  ;;  %8063 = vst [vmem:[#allocation119_spill] sm:$0xff] %v5786_v11  ;;  %v1583_v60 = vmul.f32 %v5392_v1, %v5733_v32  ;;  %v2184_v11 = vmul.f32 %v5751_v19, %v2133_v54  ;;  %v5834_v4 = vmul.f32 %v5798_v21, %v1663_v14 }
 0x1f1   : > { %8064 = vst [vmem:[#allocation120_spill] sm:$0xff] %v5790_v33  ;;  %8065 = vst [vmem:[#allocation121_spill] sm:$0xff] %v5798_v21  ;;  %v2186_v33 = vmul.f32 %v5751_v19, %v2135_v12  ;;  %v5824_v12 = vld [vmem:[#allocation3 + $0x7e] sm:$0xff]  ;;  %v5857_v22 = vadd.f32 %v2167_v15, %v2154_v57 }
 0x1f2   : > { %8066 = vst [vmem:[#allocation122_spill] sm:$0xff] %v5809_v58  ;;  %8067 = vst [vmem:[#allocation123_spill] sm:$0xff] %v5813_v38  ;;  %v1591_v53 = vadd.f32 %v1583_v60, %v5413_v36  ;;  %v5828_v58 = vmul.f32 %v5429_v47, %v1663_v14  ;;  %v5831_v38 = vmul.f32 %v5446_v55, %v1663_v14  ;;  %v5843_v36 = vld [vmem:[#allocation3 + $0xaf] sm:$0xff] }
 0x1f3   : > { %8068 = vst [vmem:[#allocation124_spill] sm:$0xff] %v5817_v24  ;;  %8071 = vst [vmem:[#allocation127_spill] sm:$0xff] %v5834_v4  ;;  %v1611_v24 = vadd.f32 %v1603_v46, %v5415_v40  ;;  %v2192_v54 = vadd.f32 %v2184_v11, %v5420_v42  ;;  %v5847_v60 = vmul.f32 %v5449_v56, %v5733_v32  ;;  %v2134_v42 = vld [vmem:[#allocation3 + $0x7c] sm:$0xff]  ;;  %v2136_v11 = vld [vmem:[#allocation3 + $0xac] sm:$0xff] }
 0x1f4   : > { %8069 = vst [vmem:[#allocation125_spill] sm:$0xff] %v5828_v58  ;;  %8070 = vst [vmem:[#allocation126_spill] sm:$0xff] %v5831_v38  ;;  %v5851_v14 = vmul.f32 %v5389_v0, %v5822_v61  ;;  %v1586_v40 = vmul.f32 %v5392_v1, %v5822_v61  ;;  %v1584_v41 = vmul.f32 %v5392_v1, %v5824_v12 }
 0x1f5   : > { %8072 = vst [vmem:[#allocation128_spill] sm:$0xff] %v5841_v37  ;;  %8073 = vst [vmem:[#allocation129_spill] sm:$0xff] %v5843_v36  ;;  %v1606_v46 = vmul.f32 %v5712_v5, %v5822_v61  ;;  %v1572_v37 = vmul.f32 %v5389_v0, %v5824_v12  ;;  %v1604_v58 = vmul.f32 %v5712_v5, %v5824_v12 }
 0x1f6   : > { %8074 = vst [vmem:[#allocation130_spill] sm:$0xff] %v5847_v60  ;;  %v1626_v60 = vmul.f32 %v5410_v31, %v5822_v61  ;;  %v5869_v4 = vmul.f32 %v5715_v59, %v5822_v61  ;;  %v5873_v15 = vmul.f32 %v5429_v47, %v5843_v36  ;;  %v1624_v57 = vmul.f32 %v5410_v31, %v5824_v12 }
 0x1f7   : > { %v5877_v38 = vadd.f32 %v2186_v33, %v2173_v39  ;;  %v5879_v52 = vadd.f32 %v2205_v25, %v2192_v54  ;;  %v1592_v30 = vadd.f32 %v1584_v41, %v1571_v23  ;;  %v2166_v51 = vmul.f32 %v5398_v3, %v2134_v42  ;;  %v5891_v33 = vld [vmem:[#allocation3 + $0x7f] sm:$0xff] }
 0x1f8   : > { %8075 = vst [vmem:[#allocation131_spill] sm:$0xff] %v5869_v4  ;;  %8076 = vst [vmem:[#allocation132_spill] sm:$0xff] %v5873_v15  ;;  %v1594_v50 = vadd.f32 %v1586_v40, %v1573_v35  ;;  %v5884_v8 = vmul.f32 %v5446_v55, %v5843_v36  ;;  %v5887_v4 = vmul.f32 %v5395_v2, %v2136_v11 }
 0x1f9   : > { %v2185_v15 = vmul.f32 %v5751_v19, %v2134_v42  ;;  %v2168_v45 = vmul.f32 %v5398_v3, %v2136_v11  ;;  %v1593_v18 = vadd.f32 %v1585_v17, %v1572_v37  ;;  %v1612_v39 = vadd.f32 %v1604_v58, %v1591_v53  ;;  %v5910_v53 = vld [vmem:[#allocation3 + $0xde] sm:$0xff] }
 0x1fa   : > { %8077 = vst [vmem:[#allocation133_spill] sm:$0xff] %v5884_v8  ;;  %v2155_v23 = vmul.f32 %v5395_v2, %v2134_v42  ;;  %v2187_v25 = vmul.f32 %v5751_v19, %v2136_v11  ;;  %v2206_v35 = vmul.f32 %v5407_v16, %v2136_v11  ;;  %v5898_v54 = vmul.f32 %v5432_v48, %v5822_v61 }
 0x1fb   : > { %v1632_v40 = vadd.f32 %v1624_v57, %v1611_v24  ;;  %v5902_v41 = vmul.f32 %v5449_v56, %v5822_v61  ;;  %v5906_v58 = vmul.f32 %v5778_v29, %v5822_v61  ;;  %v1613_v37 = vadd.f32 %v5771_v34, %v1592_v30  ;;  %v5925_v57 = vld [vmem:[#allocation3 + $0xc6] sm:$0xff]  ;;  %v2138_v34 = vld [vmem:[#allocation3 + $0xdc] sm:$0xff] }
 0x1fc   : > { %8078 = vst [vmem:[#allocation134_spill] sm:$0xff] %v5898_v54  ;;  %v2174_v2 = vadd.f32 %v2166_v51, %v5423_v43  ;;  %v5914_v17 = vmul.f32 %v5429_v47, %v5891_v33  ;;  %v5918_v24 = vmul.f32 %v5446_v55, %v5891_v33  ;;  %v5922_v42 = vmul.f32 %v5798_v21, %v5891_v33 }
 0x1fd   : > { %8079 = vst [vmem:[#allocation135_spill] sm:$0xff] %v5902_v41  ;;  %8080 = vst [vmem:[#allocation136_spill] sm:$0xff] %v5906_v58  ;;  %v2193_v11 = vadd.f32 %v2185_v15, %v5434_v49  ;;  %v1614_v30 = vadd.f32 %v1606_v46, %v1593_v18  ;;  %v5928_v43 = vadd.f32 %v5775_v9, %v1612_v39  ;;  %v1525_v15 = vpop.permute.xlu1 %1524 }
 0x1fe   : > { %8081 = vst [vmem:[#allocation137_spill] sm:$0xff] %v5914_v17  ;;  %8082 = vst [vmem:[#allocation138_spill] sm:$0xff] %v5918_v24  ;;  %v2176_v51 = vadd.f32 %v2168_v45, %v2155_v23  ;;  %v5932_v47 = vmul.f32 %v5432_v48, %v5824_v12  ;;  %v5935_v54 = vadd.f32 %v5782_v10, %v1632_v40  ;;  %v2137_v45 = vld [vmem:[#allocation3 + $0xc4] sm:$0xff]  ;;  %v8088_v17 = vmax.f32 %v5312_v26, 0.0 }
 0x1ff   : > { %v5939_v8 = vmul.f32 %v5449_v56, %v5824_v12  ;;  %v5943_v49 = vmul.f32 %v5389_v0, %v5910_v53  ;;  %v1588_v18 = vmul.f32 %v5392_v1, %v5910_v53  ;;  %v1634_v9 = vadd.f32 %v1626_v60, %v1613_v37  ;;  %v5970_v24 = vld [vmem:[#allocation3 + $0xc7] sm:$0xff] }
 0x200   : > { %8083 = vst [vmem:[#allocation139_spill] sm:$0xff] %v5932_v47  ;;  %v2195_v46 = vadd.f32 %v2187_v25, %v2174_v2  ;;  %v1608_v48 = vmul.f32 %v5712_v5, %v5910_v53  ;;  %v1587_v10 = vmul.f32 %v5392_v1, %v5925_v57  ;;  %v2214_v39 = vadd.f32 %v2206_v35, %v2193_v11  ;;  %v1523_v47 = vpop.permute.xlu0 %1522 }
 0x201   : > { %8084 = vst [vmem:[#allocation140_spill] sm:$0xff] %v5939_v8  ;;  %v1628_v23 = vmul.f32 %v5410_v31, %v5910_v53  ;;  %v2227_v40 = vmul.f32 %v5426_v44, %v2138_v34  ;;  %v1607_v41 = vmul.f32 %v5712_v5, %v5925_v57  ;;  %v5958_v60 = vmul.f32 %v5715_v59, %v5910_v53 }
 0x202   : > { %v2170_v25 = vmul.f32 %v5398_v3, %v2138_v34  ;;  %v2189_v37 = vmul.f32 %v5751_v19, %v2138_v34  ;;  %v2226_v2 = vmul.f32 %v5426_v44, %v2137_v45  ;;  %v2208_v35 = vmul.f32 %v5407_v16, %v2138_v34  ;;  %8087 = vst [vmem:[#allocation143_spill] sm:$0xff] %v5970_v24 }
 0x203   : > { %8085 = vst [vmem:[#allocation141_spill] sm:$0xff] %v5958_v60  ;;  %v5966_v11 = vmul.f32 %v5449_v56, %v5910_v53  ;;  %v1627_v21 = vmul.f32 %v5410_v31, %v5925_v57  ;;  %v5975_v60 = vsel %vm1212_vm3, %v8088_v17, %v1525_v15  ;;  %v5979_v58 = vmul.f32 %v5778_v29, %v5910_v53 }
 0x204   : > { %8089 = vst [vmem:[#allocation144_spill] sm:$0xff] %v5975_v60  ;;  %v1575_v34 = vmul.f32 %v5389_v0, %v5925_v57  ;;  %v1595_v8 = vadd.f32 %v1587_v10, %v5851_v14  ;;  %1550 = vst [vmem:[#allocation3 + $0x110] sm:$0xff] %v5975_v60  ;;  %v1615_v36 = vadd.f32 %v1607_v41, %v1594_v50  ;;  %v8091_v26 = vmax.f32 %v5314_v27, 0.0  ;;  %v6015_v41 = vld [vmem:[%s4971_s1 + $0x10] ss:$0 sm:$0xff] }
 0x205   : > { %8086 = vst [vmem:[#allocation142_spill] sm:$0xff] %v5966_v11  ;;  %8090 = vst [vmem:[#allocation145_spill] sm:$0xff] %v5979_v58  ;;  %v1647_v11 = vmul.f32 %v5715_v59, %v5925_v57  ;;  %v2234_v15 = vadd.f32 %v2226_v2, %v5879_v52  ;;  %v2235_v58 = vadd.f32 %v2227_v40, %v2214_v39  ;;  %v6028_v40 = vld [vmem:[%s4971_s1 + $0xd] ss:$0 sm:$0xff] }
 0x206   : > { %v5990_v17 = vsel %vm1212_vm3, %v8091_v26, %v1523_v47  ;;  %v5995_v0 = vmul.f32 %v5446_v55, %v5970_v24  ;;  %v2169_v14 = vmul.f32 %v5398_v3, %v2137_v45  ;;  %v2188_v10 = vmul.f32 %v5751_v19, %v2137_v45  ;;  %8098 = vst [vmem:[#allocation152_spill] sm:$0xff] %v6015_v41 }
 0x207   : > { %8092 = vst [vmem:[#allocation146_spill] sm:$0xff] %v5990_v17  ;;  %v2207_v60 = vmul.f32 %v5407_v16, %v2137_v45  ;;  %1549 = vst [vmem:[#allocation3 + $0xf8] sm:$0xff] %v5990_v17  ;;  %v6001_v50 = vadd.f32 %v1627_v21, %v1614_v30  ;;  %v6003_v26 = vadd.f32 %v1647_v11, %v1634_v9  ;;  %v6079_v11 = vld [vmem:[#allocation3 + $0xca] sm:$0xff] }
 0x208   : > { %8093 = vst [vmem:[#allocation147_spill] sm:$0xff] %v5995_v0  ;;  %v6007_v52 = vmul.f32 %v5449_v56, %v5925_v57  ;;  %v6011_v55 = vmul.f32 %v5778_v29, %v5925_v57  ;;  %v2178_v3 = vadd.f32 %v2170_v25, %v5887_v4  ;;  %v2197_v47 = vadd.f32 %v2189_v37, %v2176_v51  ;;  %v6031_v4 = vld [vmem:[%s4971_s1 + $0x12] ss:$0 sm:$0xff] }
 0x209   : > { %8094 = vst [vmem:[#allocation148_spill] sm:$0xff] %v6001_v50  ;;  %8095 = vst [vmem:[#allocation149_spill] sm:$0xff] %v6003_v26  ;;  %v6017_v45 = vadd.f32 %v2208_v35, %v2195_v46  ;;  %v2271_v21 = vadd.f32 %v5464_v63, %v2234_v15  ;;  %v6020_v30 = vadd.f32 %v1588_v18, %v1575_v34  ;;  %v6046_v18 = vld [vmem:[#allocation3 + $0x9a] sm:$0xff]  ;;  %v6054_v46 = vld [vmem:[%s4971_s1 + $0xe] ss:$0 sm:$0xff] }
 0x20a   : > { %8096 = vst [vmem:[#allocation150_spill] sm:$0xff] %v6007_v52  ;;  %8097 = vst [vmem:[#allocation151_spill] sm:$0xff] %v6011_v55  ;;  %v6022_v9 = vadd.f32 %v1608_v48, %v1595_v8  ;;  %v6024_v56 = vadd.f32 %v1628_v23, %v1615_v36  ;;  %v2272_v39 = vadd.f32 %v5467_v6, %v2235_v58  ;;  %v6044_v36 = vld [vmem:[#allocation3 + $0x6a] sm:$0xff]  ;;  %v6049_v6 = vld [vmem:[%s4971_s1 + $0x17] ss:$0 sm:$0xff] }
 0x20b   : > { %8099 = vst [vmem:[#allocation153_spill] sm:$0xff] %v6028_v40  ;;  %8100 = vst [vmem:[#allocation154_spill] sm:$0xff] %v6031_v4  ;;  %v6034_v25 = vadd.f32 %v2169_v14, %v5795_v13  ;;  %v6037_v51 = vadd.f32 %v2188_v10, %v5857_v22  ;;  %v6040_v63 = vadd.f32 %v2207_v60, %v5877_v38  ;;  %v6051_v58 = vld [vmem:[#allocation3 + $0x6c] sm:$0xff]  ;;  %v6064_v23 = vld [vmem:[#allocation3 + $0x82] sm:$0xff] }
 0x20c   : > { %v2305_v8 = vmul.f32 %v5778_v29, %v5733_v32  ;;  %8101 = vst [vmem:[#allocation155_spill] sm:$0xff] %v6046_v18  ;;  %8102 = vst [vmem:[#allocation156_spill] sm:$0xff] %v6049_v6  ;;  %v2140_v13 = vld [vmem:[#allocation3 + $0x10c] sm:$0xff]  ;;  %v2306_v22 = vmul.f32 %v5778_v29, %v5824_v12  ;;  %v2326_v38 = vmul.f32 %v6015_v41, %v5717_v28  ;;  %v6081_v34 = vld [vmem:[#allocation3 + $0xe2] sm:$0xff] }
 0x20d   : > { %8103 = vst [vmem:[#allocation157_spill] sm:$0xff] %v6051_v58  ;;  %8104 = vst [vmem:[#allocation158_spill] sm:$0xff] %v6054_v46  ;;  %v2327_v32 = vmul.f32 %v6015_v41, %v5822_v61  ;;  %v2347_v48 = vmul.f32 %v5617_v20, %v5925_v57  ;;  %v6066_v60 = vld [vmem:[#allocation3 + $0xb2] sm:$0xff]  ;;  %v2292_v37 = vadd.f32 %v5470_v7, %v2271_v21  ;;  %v8107_v28 = vld [vmem:[#allocation93_spill] sm:$0xff] }
 0x20e   : > { %8105 = vst [vmem:[#allocation159_spill] sm:$0xff] %v6066_v60  ;;  %v2348_v2 = vmul.f32 %v5617_v20, %v5910_v53  ;;  %v8106_v12 = vld [vmem:[#allocation110_spill] sm:$0xff]  ;;  %8108 = vst [vmem:[#allocation160_spill] sm:$0xff] %v6079_v11  ;;  %v6083_v15 = vld [vmem:[#allocation3 + $0x84] sm:$0xff]  ;;  %v2191_v7 = vmul.f32 %v5751_v19, %v2140_v13  ;;  %v2210_v14 = vmul.f32 %v5407_v16, %v2140_v13 }
 0x20f   : > { %v6073_v35 = vmul.f32 %v8106_v12, %v5669_v62  ;;  %v6077_v61 = vmul.f32 %v8106_v12, %v8107_v28  ;;  %8109 = vst [vmem:[#allocation161_spill] sm:$0xff] %v6081_v34  ;;  %v6087_v10 = vld [vmem:[#allocation3 + $0xf6] sm:$0xff]  ;;  %v6092_v52 = vmul.f32 %v6028_v40, %v6044_v36  ;;  %v6098_v55 = vmul.f32 %v6028_v40, %v6064_v23  ;;  %v6113_v50 = vld [vmem:[#allocation3 + $0x10e] sm:$0xff] }
 0x210   : > { %v8110_v21 = vld [vmem:[#allocation43_spill] sm:$0xff]  ;;  %v1589_v0 = vmul.f32 %v5392_v1, %v6087_v10  ;;  %v6102_v24 = vmul.f32 %v6031_v4, %v6046_v18  ;;  %v6106_v26 = vmul.f32 %v6031_v4, %v6066_v60  ;;  %v6117_v1 = vmul.f32 %v6049_v6, %v6079_v11 }
 0x211   : > { %v2293_v27 = vadd.f32 %v8110_v21, %v2272_v39  ;;  %v6108_v39 = vld [vmem:[#allocation3 + $0x9c] sm:$0xff]  ;;  %v6111_v21 = vld [vmem:[%s4971_s1 + $0x13] ss:$0 sm:$0xff]  ;;  %v6121_v40 = vmul.f32 %v6049_v6, %v6081_v34  ;;  %v6123_v12 = vld [vmem:[#allocation3 + $0xb4] sm:$0xff]  ;;  %v6127_v4 = vmul.f32 %v6054_v46, %v6051_v58  ;;  %v6131_v17 = vmul.f32 %v6054_v46, %v6083_v15 }
 0x212   : > { %8111 = vst [vmem:[#allocation43_spill] sm:$0xff] %v6111_v21  ;;  %8113 = vst [vmem:[#allocation163_spill] sm:$0xff] %v6123_v12  ;;  %v2199_v28 = vadd.f32 %v2191_v7, %v2178_v3  ;;  %v2229_v62 = vmul.f32 %v5426_v44, %v2140_v13  ;;  %v1629_v11 = vmul.f32 %v5410_v31, %v6087_v10  ;;  %v2139_v34 = vld [vmem:[#allocation3 + $0xf4] sm:$0xff] }
 0x213   : > { %8112 = vst [vmem:[#allocation162_spill] sm:$0xff] %v6121_v40  ;;  %v2313_v60 = vadd.f32 %v2305_v8, %v2292_v37  ;;  %v2218_v18 = vadd.f32 %v2210_v14, %v2197_v47  ;;  %v1609_v6 = vmul.f32 %v5712_v5, %v6087_v10  ;;  %v2314_v40 = vadd.f32 %v2306_v22, %v2293_v27  ;;  %v8117_v22 = vld [vmem:[#allocation36_spill] sm:$0xff]  ;;  %v8118_v14 = vld [vmem:[#allocation37_spill] sm:$0xff] }
 0x214   : > { %v6140_v58 = vmul.f32 %v6111_v21, %v6108_v39  ;;  %v1610_v46 = vmul.f32 %v5712_v5, %v6113_v50  ;;  %v6146_v3 = vmul.f32 %v5410_v31, %v6113_v50  ;;  %v1597_v13 = vadd.f32 %v1589_v0, %v5943_v49 }
 0x215   : > { %v6151_v47 = vmul.f32 %v6111_v21, %v6123_v12  ;;  %v1650_v27 = vmul.f32 %v5715_v59, %v6113_v50  ;;  %v6157_v8 = vmul.f32 %v5778_v29, %v6113_v50  ;;  %v6161_v5 = vmul.f32 %v6015_v41, %v6113_v50 }
 0x216   : > { %8114 = vst [vmem:[#allocation164_spill] sm:$0xff] %v6146_v3  ;;  %v1649_v31 = vmul.f32 %v5715_v59, %v6087_v10  ;;  %v2220_v49 = vadd.f32 %v8117_v22, %v2199_v28  ;;  %v6167_v0 = vadd.f32 %v2229_v62, %v6017_v45  ;;  %v1637_v37 = vadd.f32 %v1629_v11, %v6022_v9  ;;  %v8122_v45 = vld [vmem:[#allocation131_spill] sm:$0xff]  ;;  %v6204_v11 = vld [vmem:[#allocation3 + $0xcc] sm:$0xff]  ;;  %v6220_v22 = vld [vmem:[%s4966_s9 + $0x15] ss:$0 sm:$0xff] }
 0x217   : > { %8115 = vst [vmem:[#allocation165_spill] sm:$0xff] %v6157_v8  ;;  %8116 = vst [vmem:[#allocation166_spill] sm:$0xff] %v6161_v5  ;;  %v2190_v7 = vmul.f32 %v5751_v19, %v2139_v34  ;;  %v6172_v3 = vadd.f32 %v8118_v14, %v2218_v18  ;;  %v6175_v8 = vadd.f32 %v1609_v6, %v6020_v30  ;;  %v8124_v30 = vld [vmem:[#allocation46_spill] sm:$0xff] }
 0x218   : > { %v2334_v5 = vadd.f32 %v2326_v38, %v2313_v60  ;;  %v2335_v21 = vadd.f32 %v2327_v32, %v2314_v40  ;;  %v6177_v12 = vadd.f32 %v1610_v46, %v1597_v13  ;;  %v2209_v59 = vmul.f32 %v5407_v16, %v2139_v34  ;;  %v8125_v38 = vld [vmem:[#allocation38_spill] sm:$0xff] }
 0x219   : > { %8119 = vst [vmem:[#allocation36_spill] sm:$0xff] %v6172_v3  ;;  %8120 = vst [vmem:[#allocation37_spill] sm:$0xff] %v6175_v8  ;;  %v2228_v62 = vmul.f32 %v5426_v44, %v2139_v34  ;;  %v1654_v9 = vadd.f32 %v8122_v45, %v5928_v43  ;;  %v6184_v19 = vadd.f32 %v1649_v31, %v6024_v56  ;;  %v8128_v44 = vld [vmem:[#allocation47_spill] sm:$0xff]  ;;  %v6196_v60 = vld [vmem:[%s4966_s9 + $0x10] ss:$0 sm:$0xff] }
 0x21a   : > { %8121 = vst [vmem:[#allocation167_spill] sm:$0xff] %v6177_v12  ;;  %v2355_v18 = vadd.f32 %v2347_v48, %v2334_v5  ;;  %v2356_v28 = vadd.f32 %v2348_v2, %v2335_v21  ;;  %v1686_v6 = vadd.f32 %v8124_v30, %v5935_v54  ;;  %v6189_v40 = vadd.f32 %v8125_v38, %v2220_v49  ;;  %v8130_v56 = vld [vmem:[#allocation48_spill] sm:$0xff]  ;;  %v8131_v2 = vld [vmem:[#allocation49_spill] sm:$0xff]  ;;  %v6207_v34 = vld [vmem:[%s4971_s1 + $0x18] ss:$0 sm:$0xff] }
 0x21b   : > { %8123 = vst [vmem:[#allocation131_spill] sm:$0xff] %v6184_v19  ;;  %v6191_v46 = vadd.f32 %v1650_v27, %v1637_v37  ;;  %v2198_v16 = vadd.f32 %v2190_v7, %v6034_v25  ;;  %v1687_v32 = vadd.f32 %v8128_v44, %v1654_v9  ;;  %v6200_v43 = vmul.f32 %v5778_v29, %v6087_v10  ;;  %v8133_v21 = vld [vmem:[#allocation52_spill] sm:$0xff]  ;;  %v8135_v5 = vld [vmem:[#allocation126_spill] sm:$0xff]  ;;  %v8137_v7 = vld [vmem:[#allocation55_spill] sm:$0xff] }
 0x21c   : > { %8126 = vst [vmem:[#allocation46_spill] sm:$0xff] %v6189_v40  ;;  %v2392_v48 = vadd.f32 %v8130_v56, %v2355_v18  ;;  %v2393_v54 = vadd.f32 %v8131_v2, %v2356_v28  ;;  %8132 = vst [vmem:[#allocation48_spill] sm:$0xff] %v6207_v34  ;;  %v1707_v13 = vadd.f32 %v8133_v21, %v1686_v6  ;;  %v8136_v49 = vld [vmem:[#allocation54_spill] sm:$0xff]  ;;  %v6224_v45 = vld [vmem:[#allocation3 + $0xe4] sm:$0xff] }
 0x21d   : > { %8127 = vst [vmem:[#allocation38_spill] sm:$0xff] %v6191_v46  ;;  %8129 = vst [vmem:[#allocation47_spill] sm:$0xff] %v6200_v43  ;;  %v6211_v25 = vadd.f32 %v2209_v59, %v6037_v51  ;;  %v2236_v27 = vadd.f32 %v2228_v62, %v6040_v63  ;;  %v6216_v29 = vmul.f32 %v6015_v41, %v6087_v10  ;;  %v8138_v9 = vld [vmem:[#allocation127_spill] sm:$0xff]  ;;  %v6229_v59 = vld [vmem:[#allocation3 + $0x69] sm:$0xff] }
 0x21e   : > { %v1708_v31 = vadd.f32 %v8135_v5, %v1687_v32  ;;  %v2413_v37 = vadd.f32 %v8136_v49, %v2392_v48  ;;  %v2414_v14 = vadd.f32 %v8137_v7, %v2393_v54  ;;  %v1728_v51 = vadd.f32 %v8138_v9, %v1707_v13  ;;  %v8139_v62 = vld [vmem:[#allocation40_spill] sm:$0xff]  ;;  %v8140_v6 = vld [vmem:[#allocation109_spill] sm:$0xff]  ;;  %v6253_v13 = vld [vmem:[%s4966_s9 + $0x12] ss:$0 sm:$0xff] }
 0x21f   : > { %8134 = vst [vmem:[#allocation49_spill] sm:$0xff] %v6216_v29  ;;  %v1741_v63 = vmul.f32 %v6196_v60, %v5891_v33  ;;  %v6232_v18 = vadd.f32 %v8139_v62, %v2198_v16  ;;  %v6236_v28 = vmul.f32 %v6207_v34, %v6204_v11  ;;  %v1742_v38 = vmul.f32 %v6196_v60, %v8140_v6  ;;  %v6242_v44 = vld [vmem:[%s4966_s9 + $0xd] ss:$0 sm:$0xff]  ;;  %v6248_v54 = vld [vmem:[#allocation3 + $0x81] sm:$0xff]  ;;  %v6250_v21 = vld [vmem:[#allocation3 + $0x99] sm:$0xff] }
 0x220   : > { %v1729_v30 = vadd.f32 %v5922_v42, %v1708_v31  ;;  %8141 = vst [vmem:[#allocation52_spill] sm:$0xff] %v6242_v44  ;;  %v8142_v32 = vld [vmem:[#allocation85_spill] sm:$0xff]  ;;  %v1762_v16 = vmul.f32 %v6220_v22, %v8140_v6  ;;  %8144 = vst [vmem:[#allocation126_spill] sm:$0xff] %v6250_v21  ;;  %v6257_v42 = vmul.f32 %v6207_v34, %v6224_v45  ;;  %v6274_v12 = vld [vmem:[%s4966_s9 + $0x17] ss:$0 sm:$0xff] }
 0x221   : > { %v2434_v56 = vadd.f32 %v8142_v32, %v2413_v37  ;;  %v8143_v48 = vld [vmem:[#allocation101_spill] sm:$0xff]  ;;  %v1749_v2 = vadd.f32 %v1741_v63, %v1728_v51  ;;  %8145 = vst [vmem:[#allocation54_spill] sm:$0xff] %v6253_v13  ;;  %v8147_v37 = vld [vmem:[#allocation78_spill] sm:$0xff]  ;;  %8151 = vst [vmem:[#allocation127_spill] sm:$0xff] %v6274_v12  ;;  %v6282_v8 = vmul.f32 %v6253_v13, %v6248_v54 }
 0x222   : > { %v2435_v33 = vadd.f32 %v8143_v48, %v2414_v14  ;;  %v1750_v5 = vadd.f32 %v1742_v38, %v1729_v30  ;;  %v8146_v31 = vld [vmem:[#allocation129_spill] sm:$0xff]  ;;  %v6263_v7 = vmul.f32 %v8147_v37, %v6229_v59  ;;  %v8148_v14 = vld [vmem:[#allocation86_spill] sm:$0xff]  ;;  %v6271_v48 = vmul.f32 %v6242_v44, %v6229_v59  ;;  %v8161_v3 = vld [vmem:[#allocation80_spill] sm:$0xff] }
 0x223   : > { %v1763_v49 = vmul.f32 %v6220_v22, %v8146_v31  ;;  %v2455_v9 = vadd.f32 %v8148_v14, %v2434_v56  ;;  %v8149_v51 = vld [vmem:[#allocation102_spill] sm:$0xff]  ;;  %v1770_v62 = vadd.f32 %v1762_v16, %v1749_v2  ;;  %v6278_v38 = vmul.f32 %v6242_v44, %v6248_v54  ;;  %v8152_v16 = vld [vmem:[#allocation64_spill] sm:$0xff]  ;;  %v8155_v19 = vld [vmem:[#allocation45_spill] sm:$0xff] }
 0x224   : > { %v2456_v63 = vadd.f32 %v8149_v51, %v2435_v33  ;;  %v6267_v32 = vld [vmem:[#allocation3 + $0xb1] sm:$0xff]  ;;  %v6286_v56 = vmul.f32 %v6253_v13, %v6250_v21  ;;  %v8153_v51 = vld [vmem:[#allocation44_spill] sm:$0xff]  ;;  %v6295_v40 = vmul.f32 %v6274_v12, %v6250_v21  ;;  %v6310_v13 = vmul.f32 %v8161_v3, %v6044_v36 }
 0x225   : > { %8150 = vst [vmem:[#allocation55_spill] sm:$0xff] %v6267_v32  ;;  %v1771_v30 = vadd.f32 %v1763_v49, %v1750_v5  ;;  %v2476_v33 = vadd.f32 %v6073_v35, %v2455_v9  ;;  %v1803_v14 = vadd.f32 %v8152_v16, %v1770_v62  ;;  %v2273_v5 = vadd.f32 %v8153_v51, %v2236_v27  ;;  %v8154_v49 = vld [vmem:[#allocation72_spill] sm:$0xff]  ;;  %v8158_v16 = vld [vmem:[#allocation73_spill] sm:$0xff]  ;;  %v8159_v51 = vld [vmem:[#allocation130_spill] sm:$0xff] }
 0x226   : > { %v2477_v2 = vadd.f32 %v6077_v61, %v2456_v63  ;;  %v6299_v46 = vmul.f32 %v6274_v12, %v6267_v32  ;;  %v2274_v35 = vadd.f32 %v8155_v19, %v6167_v0  ;;  %v8156_v9 = vld [vmem:[#allocation56_spill] sm:$0xff]  ;;  %v8157_v63 = vld [vmem:[#allocation57_spill] sm:$0xff]  ;;  %v2328_v32 = vmul.f32 %v6015_v41, %v5925_v57 }
 0x227   : > { %v1804_v43 = vadd.f32 %v8154_v49, %v1771_v30  ;;  %v2513_v61 = vadd.f32 %v8156_v9, %v2476_v33  ;;  %v1824_v27 = vadd.f32 %v8158_v16, %v1803_v14  ;;  %v2294_v29 = vadd.f32 %v8159_v51, %v2273_v5  ;;  %v8160_v30 = vld [vmem:[#allocation89_spill] sm:$0xff]  ;;  %v8162_v44 = vld [vmem:[#allocation140_spill] sm:$0xff]  ;;  %v8164_v33 = vld [vmem:[#allocation62_spill] sm:$0xff] }
 0x228   : > { %v2514_v62 = vadd.f32 %v8157_v63, %v2477_v2  ;;  %v2295_v12 = vadd.f32 %v8162_v44, %v2274_v35  ;;  %v8163_v0 = vld [vmem:[#allocation61_spill] sm:$0xff]  ;;  %v8165_v2 = vld [vmem:[#allocation90_spill] sm:$0xff]  ;;  %v8167_v5 = vld [vmem:[#allocation124_spill] sm:$0xff]  ;;  %v2329_v44 = vmul.f32 %v6015_v41, %v5910_v53  ;;  %v2349_v57 = vmul.f32 %v5617_v20, %v6087_v10 }
 0x229   : > { %v1825_v49 = vadd.f32 %v8160_v30, %v1804_v43  ;;  %v2534_v19 = vadd.f32 %v8163_v0, %v2513_v61  ;;  %v1845_v63 = vadd.f32 %v8165_v2, %v1824_v27  ;;  %v6319_v14 = vld [vmem:[%s4966_s9 + $0xe] ss:$0 sm:$0xff]  ;;  %v2315_v16 = vadd.f32 %v8167_v5, %v2294_v29  ;;  %v8169_v30 = vld [vmem:[#allocation136_spill] sm:$0xff]  ;;  %v8171_v29 = vld [vmem:[#allocation91_spill] sm:$0xff] }
 0x22a   : > { %v2535_v9 = vadd.f32 %v8164_v33, %v2514_v62  ;;  %8166 = vst [vmem:[#allocation40_spill] sm:$0xff] %v6319_v14  ;;  %v8168_v43 = vld [vmem:[#allocation105_spill] sm:$0xff]  ;;  %v2316_v3 = vadd.f32 %v8169_v30, %v2295_v12  ;;  %v8170_v62 = vld [vmem:[#allocation106_spill] sm:$0xff]  ;;  %v2350_v53 = vmul.f32 %v5617_v20, %v6113_v50 }
 0x22b   : > { %v1846_v51 = vadd.f32 %v8168_v43, %v1825_v49  ;;  %v2555_v35 = vadd.f32 %v6092_v52, %v2534_v19  ;;  %v1866_v27 = vadd.f32 %v8170_v62, %v1845_v63  ;;  %v2336_v0 = vadd.f32 %v2328_v32, %v2315_v16  ;;  %v8172_v52 = vld [vmem:[#allocation92_spill] sm:$0xff]  ;;  %v8175_v63 = vld [vmem:[#allocation107_spill] sm:$0xff]  ;;  %v8178_v30 = vld [vmem:[#allocation50_spill] sm:$0xff] }
 0x22c   : > { %v2556_v61 = vadd.f32 %v6098_v55, %v2535_v9  ;;  %v6334_v49 = vmul.f32 %v6319_v14, %v6044_v36  ;;  %v2337_v12 = vadd.f32 %v2329_v44, %v2316_v3  ;;  %v6342_v55 = vld [vmem:[%s4966_s9 + $0x13] ss:$0 sm:$0xff]  ;;  %v6345_v9 = vld [vmem:[%s4966_s9 + $0x18] ss:$0 sm:$0xff]  ;;  %v6350_v16 = vmul.f32 %v6319_v14, %v6064_v23  ;;  %v8177_v43 = vld [vmem:[#allocation76_spill] sm:$0xff] }
 0x22d   : > { %v1867_v33 = vadd.f32 %v8171_v29, %v1846_v51  ;;  %v2576_v2 = vadd.f32 %v6102_v24, %v2555_v35  ;;  %v1887_v19 = vadd.f32 %v8172_v52, %v1866_v27  ;;  %8173 = vst [vmem:[#allocation109_spill] sm:$0xff] %v6342_v55  ;;  %8174 = vst [vmem:[#allocation85_spill] sm:$0xff] %v6345_v9  ;;  %v8185_v52 = vld [vmem:[#allocation95_spill] sm:$0xff] }
 0x22e   : > { %v2577_v10 = vadd.f32 %v6106_v26, %v2556_v61  ;;  %v2357_v32 = vadd.f32 %v2349_v57, %v2336_v0  ;;  %v6354_v20 = vmul.f32 %v6342_v55, %v6064_v23  ;;  %v2358_v24 = vadd.f32 %v2350_v53, %v2337_v12  ;;  %v8176_v26 = vld [vmem:[#allocation162_spill] sm:$0xff]  ;;  %v8179_v57 = vld [vmem:[#allocation77_spill] sm:$0xff]  ;;  %v8180_v61 = vld [vmem:[#allocation155_spill] sm:$0xff] }
 0x22f   : > { %v1888_v5 = vadd.f32 %v8175_v63, %v1867_v33  ;;  %v2597_v50 = vadd.f32 %v6117_v1, %v2576_v2  ;;  %v1920_v51 = vadd.f32 %v8177_v43, %v1887_v19  ;;  %v6363_v62 = vmul.f32 %v6342_v55, %v8180_v61  ;;  %v8181_v0 = vld [vmem:[#allocation53_spill] sm:$0xff]  ;;  %v8183_v12 = vld [vmem:[#allocation66_spill] sm:$0xff]  ;;  %v8186_v63 = vld [vmem:[#allocation159_spill] sm:$0xff] }
 0x230   : > { %v2598_v3 = vadd.f32 %v8176_v26, %v2577_v10  ;;  %v2394_v44 = vadd.f32 %v8178_v30, %v2357_v32  ;;  %v6367_v27 = vmul.f32 %v6345_v9, %v8180_v61  ;;  %v2395_v29 = vadd.f32 %v8181_v0, %v2358_v24  ;;  %v8182_v33 = vld [vmem:[#allocation65_spill] sm:$0xff]  ;;  %v8187_v26 = vld [vmem:[#allocation108_spill] sm:$0xff]  ;;  %v8188_v30 = vld [vmem:[#allocation94_spill] sm:$0xff] }
 0x231   : > { %v1921_v35 = vadd.f32 %v8179_v57, %v1888_v5  ;;  %v2634_v1 = vadd.f32 %v8182_v33, %v2597_v50  ;;  %v8184_v2 = vld [vmem:[#allocation81_spill] sm:$0xff]  ;;  %v6377_v5 = vmul.f32 %v6345_v9, %v8186_v63  ;;  %v8189_v57 = vld [vmem:[#allocation59_spill] sm:$0xff]  ;;  %v8190_v24 = vld [vmem:[#allocation70_spill] sm:$0xff] }
 0x232   : > { %v2635_v53 = vadd.f32 %v8183_v12, %v2598_v3  ;;  %v1941_v10 = vadd.f32 %v8184_v2, %v1920_v51  ;;  %v2415_v19 = vadd.f32 %v8185_v52, %v2394_v44  ;;  %v2416_v43 = vadd.f32 %v8187_v26, %v2395_v29  ;;  %v8191_v50 = vld [vmem:[#allocation71_spill] sm:$0xff]  ;;  %v8192_v51 = vld [vmem:[#allocation96_spill] sm:$0xff]  ;;  %v8194_v2 = vld [vmem:[#allocation93_spill] sm:$0xff] }
 0x233   : > { %v1942_v32 = vadd.f32 %v6263_v7, %v1921_v35  ;;  %v2449_v41 = vmul.f32 %v8189_v57, %v8188_v30  ;;  %v2655_v0 = vadd.f32 %v8190_v24, %v2634_v1  ;;  %v8193_v7 = vld [vmem:[#allocation111_spill] sm:$0xff]  ;;  %v2450_v52 = vmul.f32 %v8189_v57, %v8194_v2  ;;  %v8195_v9 = vld [vmem:[#allocation146_spill] sm:$0xff] }
 0x234   : > { %v2656_v33 = vadd.f32 %v8191_v50, %v2635_v53  ;;  %v1962_v3 = vadd.f32 %v6271_v48, %v1941_v10  ;;  %v2436_v12 = vadd.f32 %v8192_v51, %v2415_v19  ;;  %v2437_v35 = vadd.f32 %v8193_v7, %v2416_v43  ;;  %v8196_v29 = vld [vmem:[#allocation110_spill] sm:$0xff]  ;;  %v8197_v19 = vld [vmem:[#allocation144_spill] sm:$0xff] }
 0x235   : > { %v1963_v44 = vadd.f32 %v6278_v38, %v1942_v32  ;;  %v2470_v26 = vmul.f32 %v8196_v29, %v8195_v9  ;;  %v2676_v55 = vadd.f32 %v6127_v4, %v2655_v0  ;;  %v2471_v38 = vmul.f32 %v8196_v29, %v8197_v19  ;;  %v8198_v32 = vld [vmem:[#allocation51_spill] sm:$0xff] }
 0x236   : > { %v2677_v1 = vadd.f32 %v6131_v17, %v2656_v33  ;;  %v1983_v53 = vadd.f32 %v6282_v8, %v1962_v3  ;;  %v2457_v24 = vadd.f32 %v2449_v41, %v2436_v12  ;;  %v2458_v10 = vadd.f32 %v2450_v52, %v2437_v35  ;;  %v8200_v12 = vld [vmem:[#allocation82_spill] sm:$0xff]  ;;  %v8205_v35 = vld [vmem:[#allocation60_spill] sm:$0xff] }
 0x237   : > { %v1984_v48 = vadd.f32 %v6286_v56, %v1963_v44  ;;  %v2528_v43 = vmul.f32 %v8198_v32, %v6044_v36  ;;  %v2697_v57 = vadd.f32 %v6140_v58, %v2676_v55  ;;  %v2529_v41 = vmul.f32 %v8198_v32, %v6064_v23  ;;  %v8199_v56 = vld [vmem:[#allocation153_spill] sm:$0xff]  ;;  %v6411_v55 = vld [vmem:[#allocation3 + $0xfa] sm:$0xff] }
 0x238   : > { %v2698_v50 = vadd.f32 %v6151_v47, %v2677_v1  ;;  %v2004_v4 = vadd.f32 %v6295_v40, %v1983_v53  ;;  %v2478_v0 = vadd.f32 %v2470_v26, %v2457_v24  ;;  %v2479_v8 = vadd.f32 %v2471_v38, %v2458_v10  ;;  %8201 = vst [vmem:[#allocation101_spill] sm:$0xff] %v6411_v55  ;;  %v8202_v47 = vld [vmem:[#allocation58_spill] sm:$0xff]  ;;  %v8203_v44 = vld [vmem:[#allocation83_spill] sm:$0xff]  ;;  %v8206_v1 = vld [vmem:[#allocation160_spill] sm:$0xff] }
 0x239   : > { %v2005_v17 = vadd.f32 %v6299_v46, %v1984_v48  ;;  %v2549_v33 = vmul.f32 %v8199_v56, %v8180_v61  ;;  %v2718_v3 = vadd.f32 %v6236_v28, %v2697_v57  ;;  %v6415_v46 = vld [vmem:[#allocation3 + $0x112] sm:$0xff]  ;;  %v2550_v26 = vmul.f32 %v8199_v56, %v8186_v63  ;;  %v8209_v38 = vld [vmem:[#allocation161_spill] sm:$0xff] }
 0x23a   : > { %v2719_v51 = vadd.f32 %v6257_v42, %v2698_v50  ;;  %v2037_v58 = vadd.f32 %v8200_v12, %v2004_v4  ;;  %v2515_v40 = vadd.f32 %v8202_v47, %v2478_v0  ;;  %8204 = vst [vmem:[#allocation129_spill] sm:$0xff] %v6415_v46  ;;  %v2516_v52 = vadd.f32 %v8205_v35, %v2479_v8  ;;  %v8207_v53 = vld [vmem:[#allocation154_spill] sm:$0xff]  ;;  %v8208_v42 = vld [vmem:[#allocation84_spill] sm:$0xff]  ;;  %v8212_v8 = vld [vmem:[#allocation141_spill] sm:$0xff] }
 0x23b   : > { %v2038_v7 = vadd.f32 %v8203_v44, %v2005_v17  ;;  %v2570_v28 = vmul.f32 %v8207_v53, %v8206_v1  ;;  %v2571_v32 = vmul.f32 %v8207_v53, %v8209_v38  ;;  %v8210_v4 = vld [vmem:[#allocation156_spill] sm:$0xff] }
 0x23c   : > { %v2730_v24 = vpack.c.bf16 %v2719_v51, %v2718_v3  ;;  %v2058_v48 = vadd.f32 %v8208_v42, %v2037_v58  ;;  %v2536_v10 = vadd.f32 %v2528_v43, %v2515_v40  ;;  %v2537_v50 = vadd.f32 %v2529_v41, %v2516_v52  ;;  %v8211_v17 = vld [vmem:[#allocation148_spill] sm:$0xff]  ;;  %v8213_v43 = vld [vmem:[#allocation149_spill] sm:$0xff] }
 0x23d   : > { %v2059_v57 = vadd.f32 %v6310_v13, %v2038_v7  ;;  %v2591_v0 = vmul.f32 %v8210_v4, %v6411_v55  ;;  %v1656_v12 = vadd.f32 %v8212_v8, %v8211_v17  ;;  %v2592_v3 = vmul.f32 %v8210_v4, %v6415_v46  ;;  %v8214_v51 = vld [vmem:[#allocation125_spill] sm:$0xff]  ;;  %v8216_v7 = vld [vmem:[#allocation63_spill] sm:$0xff]  ;;  %v8218_v8 = vld [vmem:[#allocation138_spill] sm:$0xff] }
 0x23e   : > { %2970 = vmatprep.mubr.bf16.mxu0 %v2730_v24  ;;  %v2079_v47 = vadd.f32 %v6334_v49, %v2058_v48  ;;  %v2557_v44 = vadd.f32 %v2549_v33, %v2536_v10  ;;  %v1688_v58 = vadd.f32 %v8214_v51, %v8213_v43  ;;  %v2558_v13 = vadd.f32 %v2550_v26, %v2537_v50  ;;  %v8215_v41 = vld [vmem:[#allocation157_spill] sm:$0xff]  ;;  %v8220_v43 = vld [vmem:[#allocation120_spill] sm:$0xff] }
 0x23f   : > { %v2080_v40 = vadd.f32 %v6350_v16, %v2059_v57  ;;  %v2649_v35 = vmul.f32 %v8216_v7, %v8215_v41  ;;  %v8217_v52 = vld [vmem:[#allocation137_spill] sm:$0xff]  ;;  %v6447_v26 = vld [vmem:[#allocation3 + $0xdf] sm:$0xff] }
 0x240   : > { %v1689_v42 = vadd.f32 %v8217_v52, %v1656_v12  ;;  %v2100_v17 = vadd.f32 %v6354_v20, %v2079_v47  ;;  %v2578_v24 = vadd.f32 %v2570_v28, %v2557_v44  ;;  %v1709_v49 = vadd.f32 %v8218_v8, %v1688_v58  ;;  %v8219_v33 = vld [vmem:[#allocation121_spill] sm:$0xff]  ;;  %v8221_v28 = vld [vmem:[#allocation143_spill] sm:$0xff] }
 0x241   : > { %v1722_v48 = vmul.f32 %v8219_v33, %v8140_v6  ;;  %v2101_v10 = vadd.f32 %v6363_v62, %v2080_v40  ;;  %v2579_v4 = vadd.f32 %v2571_v32, %v2558_v13  ;;  %v1723_v16 = vmul.f32 %v8219_v33, %v8146_v31  ;;  %v8222_v44 = vld [vmem:[#allocation67_spill] sm:$0xff] }
 0x242   : > { %v1710_v51 = vadd.f32 %v8220_v43, %v1689_v42  ;;  %v2599_v57 = vadd.f32 %v2591_v0, %v2578_v24  ;;  %v1743_v20 = vmul.f32 %v6196_v60, %v8146_v31  ;;  %v1744_v12 = vmul.f32 %v6196_v60, %v8221_v28  ;;  %v8223_v31 = vld [vmem:[#allocation68_spill] sm:$0xff] }
 0x243   : > { %v1730_v50 = vadd.f32 %v1722_v48, %v1709_v49  ;;  %v2121_v6 = vadd.f32 %v6367_v27, %v2100_v17  ;;  %v2122_v62 = vadd.f32 %v6377_v5, %v2101_v10  ;;  %v2600_v32 = vadd.f32 %v2592_v3, %v2579_v4  ;;  %v8224_v5 = vld [vmem:[#allocation41_spill] sm:$0xff]  ;;  %v6465_v3 = vld [vmem:[#allocation3 + $0xfc] sm:$0xff]  ;;  %v6467_v17 = vld [vmem:[#allocation3 + $0x114] sm:$0xff] }
 0x244   : > { %v1731_v47 = vadd.f32 %v1723_v16, %v1710_v51  ;;  %v2636_v58 = vadd.f32 %v8222_v44, %v2599_v57  ;;  %v2650_v40 = vmul.f32 %v8216_v7, %v6083_v15  ;;  %v1764_v0 = vmul.f32 %v6220_v22, %v8221_v28  ;;  %v8225_v7 = vld [vmem:[#allocation158_spill] sm:$0xff]  ;;  %v8228_v16 = vld [vmem:[#allocation163_spill] sm:$0xff]  ;;  %v8231_v44 = vld [vmem:[#allocation112_spill] sm:$0xff] }
 0x245   : > { %v1751_v13 = vadd.f32 %v1743_v20, %v1730_v50  ;;  %v2726_v52 = vpack.c.bf16 %v2122_v62, %v2121_v6  ;;  %v2637_v42 = vadd.f32 %v8223_v31, %v2600_v32  ;;  %v1765_v27 = vmul.f32 %v6220_v22, %v6447_v26  ;;  %v8226_v10 = vld [vmem:[#allocation42_spill] sm:$0xff]  ;;  %v8229_v20 = vld [vmem:[#allocation43_spill] sm:$0xff]  ;;  %v8230_v6 = vld [vmem:[#allocation97_spill] sm:$0xff] }
 0x246   : > { %v1752_v24 = vadd.f32 %v1744_v12, %v1731_v47  ;;  %v2238_v4 = vadd.f32 %v8224_v5, %v6211_v25  ;;  %v2657_v8 = vadd.f32 %v2649_v35, %v2636_v58  ;;  %v2670_v49 = vmul.f32 %v8225_v7, %v6108_v39  ;;  %v8235_v5 = vld [vmem:[#allocation98_spill] sm:$0xff] }
 0x247   : > { %v1772_v48 = vadd.f32 %v1764_v0, %v1751_v13  ;;  %v6473_v43 = vadd.f32 %v8226_v10, %v6232_v18  ;;  %2971 = vmatmul.mubr.bf16.vlgmr.msra.gmra.mxu0 %v2726_v52  ;;  %v2658_v51 = vadd.f32 %v2650_v40, %v2637_v42  ;;  %v2671_v57 = vmul.f32 %v8225_v7, %v8228_v16  ;;  %v8232_v13 = vld [vmem:[#allocation113_spill] sm:$0xff]  ;;  %v8234_v42 = vld [vmem:[#allocation74_spill] sm:$0xff]  ;;  %v8236_v10 = vld [vmem:[#allocation75_spill] sm:$0xff] }
 0x248   : > { %v1773_v50 = vadd.f32 %v1765_v27, %v1752_v24  ;;  %v2678_v25 = vadd.f32 %v2670_v49, %v2657_v8  ;;  %v2691_v12 = vmul.f32 %v8229_v20, %v6204_v11  ;;  %v2692_v35 = vmul.f32 %v8229_v20, %v6224_v45  ;;  %v8233_v52 = vld [vmem:[#allocation69_spill] sm:$0xff] }
 0x249   : > { %8227 = vst [vmem:[#allocation78_spill] sm:$0xff] %v6473_v43  ;;  %v1805_v62 = vadd.f32 %v8230_v6, %v1772_v48  ;;  %v2679_v32 = vadd.f32 %v2671_v57, %v2658_v51  ;;  %v2712_v18 = vmul.f32 %v6207_v34, %v6465_v3  ;;  %v2713_v47 = vmul.f32 %v6207_v34, %v6467_v17  ;;  %v6495_v48 = vld [vmem:[#allocation3 + $0xc9] sm:$0xff] }
 0x24a   : > { %v1806_v58 = vadd.f32 %v8231_v44, %v1773_v50  ;;  %v2699_v40 = vadd.f32 %v2691_v12, %v2678_v25  ;;  %v1861_v31 = vmul.f32 %v8233_v52, %v8188_v30  ;;  %v1881_v24 = vmul.f32 %v8234_v42, %v8188_v30  ;;  %v8237_v50 = vld [vmem:[#allocation99_spill] sm:$0xff]  ;;  %v6505_v44 = vld [vmem:[#allocation3 + $0xe1] sm:$0xff] }
 0x24b   : > { %v1826_v0 = vadd.f32 %v8232_v13, %v1805_v62  ;;  %v2700_v27 = vadd.f32 %v2692_v35, %v2679_v32  ;;  %v1882_v49 = vmul.f32 %v8234_v42, %v8194_v2  ;;  %v1914_v51 = vmul.f32 %v8236_v10, %v6229_v59  ;;  %v8238_v62 = vld [vmem:[#allocation114_spill] sm:$0xff]  ;;  %8239 = vst [vmem:[#allocation86_spill] sm:$0xff] %v6505_v44  ;;  %v8240_v13 = vld [vmem:[#allocation52_spill] sm:$0xff] }
 0x24c   : > { %v1827_v8 = vadd.f32 %v8235_v5, %v1806_v58  ;;  %v2720_v57 = vadd.f32 %v2712_v18, %v2699_v40  ;;  %v1915_v12 = vmul.f32 %v8236_v10, %v6248_v54  ;;  %v1935_v6 = vmul.f32 %v8147_v37, %v6248_v54  ;;  %v8241_v18 = vld [vmem:[#allocation115_spill] sm:$0xff]  ;;  %v8243_v42 = vld [vmem:[#allocation54_spill] sm:$0xff] }
 0x24d   : > { %v1847_v25 = vadd.f32 %v8237_v50, %v1826_v0  ;;  %v2721_v35 = vadd.f32 %v2713_v47, %v2700_v27  ;;  %v1936_v58 = vmul.f32 %v8147_v37, %v6250_v21  ;;  %v1956_v59 = vmul.f32 %v8240_v13, %v6250_v21  ;;  %v8242_v0 = vld [vmem:[#allocation55_spill] sm:$0xff]  ;;  %v8245_v37 = vld [vmem:[#allocation128_spill] sm:$0xff] }
 0x24e   : > { %v1848_v32 = vadd.f32 %v8238_v62, %v1827_v8  ;;  %v1957_v52 = vmul.f32 %v8240_v13, %v8242_v0  ;;  %v1977_v5 = vmul.f32 %v8243_v42, %v8242_v0  ;;  %v1978_v54 = vmul.f32 %v8243_v42, %v6495_v48  ;;  %v8244_v8 = vld [vmem:[#allocation127_spill] sm:$0xff]  ;;  %v8247_v13 = vld [vmem:[#allocation36_spill] sm:$0xff]  ;;  %v8259_v42 = vld [vmem:[#allocation166_spill] sm:$0xff] }
 0x24f   : > { %v1868_v40 = vadd.f32 %v8241_v18, %v1847_v25  ;;  %v2731_v47 = vpack.c.bf16 %v2721_v35, %v2720_v57  ;;  %v1998_v10 = vmul.f32 %v8244_v8, %v6495_v48  ;;  %v2275_v50 = vadd.f32 %v8245_v37, %v2238_v4  ;;  %v8246_v18 = vld [vmem:[#allocation79_spill] sm:$0xff]  ;;  %v8249_v57 = vld [vmem:[#allocation80_spill] sm:$0xff] }
 0x250   : > { %v1869_v27 = vadd.f32 %v1861_v31, %v1848_v32  ;;  %v1999_v25 = vmul.f32 %v8244_v8, %v6505_v44  ;;  %v2031_v43 = vmul.f32 %v8246_v18, %v6044_v36  ;;  %v8248_v21 = vld [vmem:[#allocation139_spill] sm:$0xff]  ;;  %v2032_v31 = vmul.f32 %v8246_v18, %v6064_v23 }
 0x251   : > { %v1889_v62 = vadd.f32 %v1881_v24, %v1868_v40  ;;  %v2276_v0 = vadd.f32 %v8248_v21, %v8247_v13  ;;  %2980 = vmatprep.mubr.bf16.mxu0 %v2731_v47  ;;  %v2052_v35 = vmul.f32 %v8249_v57, %v6064_v23  ;;  %v8250_v32 = vld [vmem:[#allocation123_spill] sm:$0xff]  ;;  %v2053_v40 = vmul.f32 %v8249_v57, %v8180_v61 }
 0x252   : > { %v1890_v34 = vadd.f32 %v1882_v49, %v1869_v27  ;;  %v2296_v4 = vadd.f32 %v8250_v32, %v2275_v50  ;;  %v6536_v37 = vmul.f32 %v6319_v14, %v8180_v61  ;;  %v8251_v21 = vld [vmem:[#allocation135_spill] sm:$0xff]  ;;  %v6541_v47 = vmul.f32 %v6319_v14, %v8186_v63  ;;  %v8252_v27 = vld [vmem:[#allocation109_spill] sm:$0xff] }
 0x253   : > { %v1922_v24 = vadd.f32 %v1914_v51, %v1889_v62  ;;  %v2297_v13 = vadd.f32 %v8251_v21, %v2276_v0  ;;  %v6545_v50 = vmul.f32 %v8252_v27, %v8186_v63  ;;  %v8253_v51 = vld [vmem:[#allocation151_spill] sm:$0xff]  ;;  %v6550_v57 = vmul.f32 %v8252_v27, %v8206_v1  ;;  %v8254_v32 = vld [vmem:[#allocation85_spill] sm:$0xff]  ;;  %v6557_v21 = vld [vmem:[#allocation3 + $0x140] sm:$0xff] }
 0x254   : > { %v1923_v49 = vadd.f32 %v1915_v12, %v1890_v34  ;;  %v2317_v62 = vadd.f32 %v8253_v51, %v2296_v4  ;;  %v6554_v0 = vmul.f32 %v8254_v32, %v8206_v1  ;;  %v8255_v34 = vld [vmem:[#allocation145_spill] sm:$0xff]  ;;  %8256 = vst [vmem:[#allocation102_spill] sm:$0xff] %v6557_v21  ;;  %v6561_v8 = vmul.f32 %v8254_v32, %v8209_v38  ;;  %v8261_v32 = vld [vmem:[#allocation87_spill] sm:$0xff] }
 0x255   : > { %v1943_v18 = vadd.f32 %v1935_v6, %v1922_v24  ;;  %v2318_v12 = vadd.f32 %v8255_v34, %v2297_v13  ;;  %v8257_v4 = vld [vmem:[#allocation49_spill] sm:$0xff] }
 0x256   : > { %v1944_v14 = vadd.f32 %v1936_v58, %v1923_v49  ;;  %v2338_v6 = vadd.f32 %v8257_v4, %v2317_v62  ;;  %v6565_v24 = vld [vmem:[%s4971_s1 + $0xc] ss:$0 sm:$0xff]  ;;  %v6573_v58 = vld [vmem:[%s4971_s1 + $0x11] ss:$0 sm:$0xff] }
 0x257   : > { %8258 = vst [vmem:[#allocation64_spill] sm:$0xff] %v6565_v24  ;;  %v2430_v51 = vmul.f32 %v6565_v24, %v8188_v30  ;;  %v1964_v27 = vadd.f32 %v1956_v59, %v1943_v18  ;;  %v2339_v44 = vadd.f32 %v8259_v42, %v2318_v12  ;;  %v2431_v13 = vmul.f32 %v6565_v24, %v8194_v2  ;;  %v8262_v42 = vld [vmem:[#allocation88_spill] sm:$0xff] }
 0x258   : > { %8260 = vst [vmem:[#allocation44_spill] sm:$0xff] %v6573_v58  ;;  %v2451_v49 = vmul.f32 %v6573_v58, %v8195_v9  ;;  %v1965_v34 = vadd.f32 %v1957_v52, %v1944_v14  ;;  %v2359_v62 = vadd.f32 %v8261_v32, %v2338_v6  ;;  %v2452_v4 = vmul.f32 %v6573_v58, %v8197_v19  ;;  %v6584_v12 = vld [vmem:[%s4971_s1 + $0x3] ss:$0 sm:$0xff]  ;;  %v6591_v6 = vld [vmem:[#allocation3 + $0x12a] sm:$0xff]  ;;  %v6594_v19 = vld [vmem:[%s4971_s1 + $0x8] ss:$0 sm:$0xff] }
 0x259   : > { %v2473_v30 = vmul.f32 %v8196_v29, %v6557_v21  ;;  %v1985_v59 = vadd.f32 %v1977_v5, %v1964_v27  ;;  %v2360_v18 = vadd.f32 %v8262_v42, %v2339_v44  ;;  %8263 = vst [vmem:[#allocation72_spill] sm:$0xff] %v6584_v12  ;;  %v2509_v2 = vmul.f32 %v6584_v12, %v6044_v36  ;;  %v8264_v52 = vld [vmem:[#allocation100_spill] sm:$0xff]  ;;  %v8271_v58 = vld [vmem:[#allocation131_spill] sm:$0xff] }
 0x25a   : > { %v2510_v24 = vmul.f32 %v6584_v12, %v6064_v23  ;;  %v1986_v14 = vadd.f32 %v1978_v54, %v1965_v34  ;;  %v2396_v32 = vadd.f32 %v8264_v52, %v2359_v62  ;;  %8265 = vst [vmem:[#allocation45_spill] sm:$0xff] %v6591_v6  ;;  %8266 = vst [vmem:[#allocation56_spill] sm:$0xff] %v6594_v19  ;;  %v8267_v27 = vld [vmem:[#allocation116_spill] sm:$0xff]  ;;  %v8268_v62 = vld [vmem:[#allocation103_spill] sm:$0xff] }
 0x25b   : > { %v2530_v29 = vmul.f32 %v6594_v19, %v8180_v61  ;;  %v2531_v44 = vmul.f32 %v6594_v19, %v8186_v63  ;;  %v2006_v5 = vadd.f32 %v1998_v10, %v1985_v59  ;;  %v2397_v42 = vadd.f32 %v8267_v27, %v2360_v18  ;;  %v6601_v36 = vld [vmem:[#allocation3 + $0x142] sm:$0xff] }
 0x25c   : > { %v2551_v23 = vmul.f32 %v8199_v56, %v8206_v1  ;;  %v2552_v54 = vmul.f32 %v8199_v56, %v8209_v38  ;;  %v2007_v34 = vadd.f32 %v1999_v25, %v1986_v14  ;;  %v2417_v52 = vadd.f32 %v8268_v62, %v2396_v32  ;;  %v8269_v18 = vld [vmem:[#allocation117_spill] sm:$0xff]  ;;  %v8270_v19 = vld [vmem:[#allocation156_spill] sm:$0xff]  ;;  %v8272_v56 = vld [vmem:[#allocation119_spill] sm:$0xff] }
 0x25d   : > { %v6610_v12 = vmul.f32 %v8207_v53, %v6411_v55  ;;  %v6614_v10 = vmul.f32 %v8207_v53, %v6415_v46  ;;  %v2039_v59 = vadd.f32 %v2031_v43, %v2006_v5  ;;  %v2418_v27 = vadd.f32 %v8269_v18, %v2397_v42  ;;  %v8273_v55 = vld [vmem:[#allocation38_spill] sm:$0xff]  ;;  %v8274_v38 = vld [vmem:[#allocation132_spill] sm:$0xff]  ;;  %v8275_v42 = vld [vmem:[#allocation133_spill] sm:$0xff] }
 0x25e   : > { %v6619_v21 = vmul.f32 %v8270_v19, %v6591_v6  ;;  %v1690_v25 = vadd.f32 %v8272_v56, %v8271_v58  ;;  %v2040_v14 = vadd.f32 %v2032_v31, %v2007_v34  ;;  %v2438_v32 = vadd.f32 %v2430_v51, %v2417_v52  ;;  %v6629_v46 = vld [vmem:[#allocation3 + $0xf7] sm:$0xff]  ;;  %v6637_v34 = vld [vmem:[#allocation3 + $0x10f] sm:$0xff] }
 0x25f   : > { %v6625_v62 = vmul.f32 %v8270_v19, %v6601_v36  ;;  %v1691_v53 = vadd.f32 %v8274_v38, %v8273_v55  ;;  %v2060_v43 = vadd.f32 %v2052_v35, %v2039_v59  ;;  %v2439_v5 = vadd.f32 %v2431_v13, %v2418_v27  ;;  %v8276_v31 = vld [vmem:[#allocation147_spill] sm:$0xff] }
 0x260   : > { %v1711_v18 = vadd.f32 %v8275_v42, %v1690_v25  ;;  %v1724_v6 = vmul.f32 %v8219_v33, %v8221_v28  ;;  %v2061_v1 = vadd.f32 %v2053_v40, %v2040_v14  ;;  %v2459_v58 = vadd.f32 %v2451_v49, %v2438_v32  ;;  %v8277_v28 = vld [vmem:[#allocation118_spill] sm:$0xff]  ;;  %v6654_v32 = vld [vmem:[%s4971_s1 + $0x4] ss:$0 sm:$0xff] }
 0x261   : > { %v1712_v51 = vadd.f32 %v8276_v31, %v1691_v53  ;;  %v1725_v19 = vmul.f32 %v8219_v33, %v6447_v26  ;;  %v2081_v55 = vadd.f32 %v6536_v37, %v2060_v43  ;;  %v2460_v38 = vadd.f32 %v2452_v4, %v2439_v5  ;;  %v6662_v5 = vld [vmem:[#allocation3 + $0xb0] sm:$0xff] }
 0x262   : > { %v1732_v52 = vadd.f32 %v1724_v6, %v1711_v18  ;;  %v1745_v35 = vmul.f32 %v6196_v60, %v6447_v26  ;;  %v2082_v13 = vadd.f32 %v6541_v47, %v2061_v1  ;;  %v2480_v40 = vadd.f32 %v8277_v28, %v2459_v58  ;;  %v8278_v18 = vld [vmem:[#allocation104_spill] sm:$0xff] }
 0x263   : > { %v1733_v49 = vadd.f32 %v1725_v19, %v1712_v51  ;;  %v1746_v59 = vmul.f32 %v6196_v60, %v6629_v46  ;;  %v2102_v33 = vadd.f32 %v6545_v50, %v2081_v55  ;;  %v2481_v27 = vadd.f32 %v2473_v30, %v2460_v38  ;;  %v6670_v58 = vld [vmem:[%s4966_s9 + $0x7] ss:$0 sm:$0xff]  ;;  %v6674_v19 = vld [vmem:[#allocation3 + $0xc8] sm:$0xff] }
 0x264   : > { %v1753_v56 = vadd.f32 %v1745_v35, %v1732_v52  ;;  %v1766_v37 = vmul.f32 %v6220_v22, %v6629_v46  ;;  %v2103_v4 = vadd.f32 %v6550_v57, %v2082_v13  ;;  %v2517_v6 = vadd.f32 %v2509_v2, %v2480_v40  ;;  %v6660_v2 = vld [vmem:[%s4966_s9 + $0x2] ss:$0 sm:$0xff]  ;;  %v6684_v35 = vld [vmem:[%s4966_s9 + $0xc] ss:$0 sm:$0xff] }
 0x265   : > { %v1754_v25 = vadd.f32 %v1746_v59, %v1733_v49  ;;  %v1767_v1 = vmul.f32 %v6220_v22, %v6637_v34  ;;  %v2123_v47 = vadd.f32 %v6554_v0, %v2102_v33  ;;  %v2518_v14 = vadd.f32 %v2510_v24, %v2481_v27  ;;  %v6698_v33 = vld [vmem:[#allocation3 + $0x110] sm:$0xff] }
 0x266   : > { %v2630_v50 = vmul.f32 %v6654_v32, %v8215_v41  ;;  %v1774_v30 = vadd.f32 %v1766_v37, %v1753_v56  ;;  %v2124_v53 = vadd.f32 %v6561_v8, %v2103_v4  ;;  %v2538_v43 = vadd.f32 %v2530_v29, %v2517_v6  ;;  %v6701_v56 = vld [vmem:[%s4966_s9 + $0x11] ss:$0 sm:$0xff] }
 0x267   : > { %v1775_v57 = vadd.f32 %v1767_v1, %v1754_v25  ;;  %v1800_v0 = vmul.f32 %v6662_v5, %v6660_v2  ;;  %v2539_v24 = vadd.f32 %v2531_v44, %v2518_v14  ;;  %v2631_v42 = vmul.f32 %v6654_v32, %v6083_v15  ;;  %v6679_v44 = vld [vmem:[%s4971_s1 + $0x9] ss:$0 sm:$0xff]  ;;  %v6706_v37 = vld [vmem:[#allocation3 + $0x12c] sm:$0xff] }
 0x268   : > { %v1807_v41 = vadd.f32 %v8278_v18, %v1774_v30  ;;  %v1820_v8 = vmul.f32 %v6670_v58, %v6662_v5  ;;  %v2727_v29 = vpack.c.bf16 %v2124_v53, %v2123_v47  ;;  %v2559_v31 = vadd.f32 %v2551_v23, %v2538_v43  ;;  %v6713_v1 = vld [vmem:[#allocation3 + $0x144] sm:$0xff]  ;;  %v6718_v30 = vld [vmem:[%s4966_s9 + $0x16] ss:$0 sm:$0xff] }
 0x269   : > { %v1808_v51 = vadd.f32 %v1800_v0, %v1775_v57  ;;  %v1821_v55 = vmul.f32 %v6674_v19, %v6670_v58  ;;  %v2560_v38 = vadd.f32 %v2552_v54, %v2539_v24  ;;  %v2651_v15 = vmul.f32 %v6679_v44, %v6108_v39  ;;  %v6691_v54 = vld [vmem:[#allocation3 + $0xe0] sm:$0xff] }
 0x26a   : > { %v1828_v52 = vadd.f32 %v1820_v8, %v1807_v41  ;;  %v1841_v13 = vmul.f32 %v6684_v35, %v6674_v19  ;;  %2981 = vmatmul.mubr.bf16.gmra.mxu0 %v2727_v29  ;;  %v2580_v23 = vadd.f32 %v6610_v12, %v2559_v31  ;;  %v2652_v28 = vmul.f32 %v6679_v44, %v8228_v16  ;;  %v8279_v0 = vld [vmem:[#allocation48_spill] sm:$0xff]  ;;  %v8280_v8 = vld [vmem:[#allocation126_spill] sm:$0xff] }
 0x26b   : > { %v1829_v40 = vadd.f32 %v1821_v55, %v1808_v51  ;;  %v1842_v49 = vmul.f32 %v6691_v54, %v6684_v35  ;;  %v2581_v39 = vadd.f32 %v6614_v10, %v2560_v38  ;;  %v2672_v59 = vmul.f32 %v8225_v7, %v6204_v11  ;;  %v6729_v41 = vld [vmem:[%s4966_s9 + $0x3] ss:$0 sm:$0xff]  ;;  %v8281_v51 = vld [vmem:[#allocation55_spill] sm:$0xff] }
 0x26c   : > { %v1849_v27 = vadd.f32 %v1841_v13, %v1828_v52  ;;  %v1862_v16 = vmul.f32 %v6701_v56, %v6691_v54  ;;  %v2601_v12 = vadd.f32 %v6619_v21, %v2580_v23  ;;  %v2673_v4 = vmul.f32 %v8225_v7, %v6224_v45  ;;  %v6740_v52 = vld [vmem:[%s4966_s9 + $0x8] ss:$0 sm:$0xff] }
 0x26d   : > { %v1850_v10 = vadd.f32 %v1842_v49, %v1829_v40  ;;  %v1863_v6 = vmul.f32 %v6701_v56, %v8195_v9  ;;  %v2602_v25 = vadd.f32 %v6625_v62, %v2581_v39  ;;  %v2693_v47 = vmul.f32 %v8229_v20, %v6465_v3  ;;  %v6746_v40 = vld [vmem:[#allocation3 + $0x111] sm:$0xff]  ;;  %v8283_v39 = vld [vmem:[#allocation52_spill] sm:$0xff] }
 0x26e   : > { %v1870_v14 = vadd.f32 %v1862_v16, %v1849_v27  ;;  %v1883_v21 = vmul.f32 %v6718_v30, %v8195_v9  ;;  %v2638_v53 = vadd.f32 %v2630_v50, %v2601_v12  ;;  %v2694_v7 = vmul.f32 %v8229_v20, %v6467_v17  ;;  %v6735_v20 = vld [vmem:[#allocation3 + $0xf9] sm:$0xff]  ;;  %8282 = vst [vmem:[#allocation57_spill] sm:$0xff] %v6746_v40  ;;  %v8284_v16 = vld [vmem:[#allocation86_spill] sm:$0xff] }
 0x26f   : > { %v1871_v43 = vadd.f32 %v1863_v6, %v1850_v10  ;;  %v1884_v62 = vmul.f32 %v6718_v30, %v6698_v33  ;;  %v2639_v57 = vadd.f32 %v2631_v42, %v2602_v25  ;;  %v2714_v24 = vmul.f32 %v8279_v0, %v6706_v37  ;;  %v8285_v6 = vld [vmem:[#allocation54_spill] sm:$0xff] }
 0x270   : > { %v1891_v18 = vadd.f32 %v1883_v21, %v1870_v14  ;;  %v1916_v29 = vmul.f32 %v6729_v41, %v8280_v8  ;;  %v2659_v9 = vadd.f32 %v2651_v15, %v2638_v53  ;;  %v2715_v50 = vmul.f32 %v8279_v0, %v6713_v1 }
 0x271   : > { %v1892_v31 = vadd.f32 %v1884_v62, %v1871_v43  ;;  %v1917_v55 = vmul.f32 %v6729_v41, %v8281_v51  ;;  %v2660_v42 = vadd.f32 %v2652_v28, %v2639_v57  ;;  %v1937_v13 = vmul.f32 %v6740_v52, %v8281_v51  ;;  %v8287_v62 = vld [vmem:[#allocation78_spill] sm:$0xff] }
 0x272   : > { %v1924_v38 = vadd.f32 %v1916_v29, %v1891_v18  ;;  %v1938_v23 = vmul.f32 %v6740_v52, %v6495_v48  ;;  %v2680_v15 = vadd.f32 %v2672_v59, %v2659_v9  ;;  %v1958_v27 = vmul.f32 %v8283_v39, %v6495_v48  ;;  %v8286_v59 = vld [vmem:[#allocation127_spill] sm:$0xff]  ;;  %v8288_v57 = vld [vmem:[#allocation122_spill] sm:$0xff] }
 0x273   : > { %v1925_v49 = vadd.f32 %v1917_v55, %v1892_v31  ;;  %v1959_v12 = vmul.f32 %v8283_v39, %v8284_v16  ;;  %v2681_v28 = vadd.f32 %v2673_v4, %v2660_v42  ;;  %v1979_v25 = vmul.f32 %v8285_v6, %v8284_v16  ;;  %v2256_v9 = vld [vmem:[#allocation3 + $0x156] sm:$0xff] }
 0x274   : > { %v1945_v10 = vadd.f32 %v1937_v13, %v1924_v38  ;;  %v1980_v14 = vmul.f32 %v8285_v6, %v6735_v20  ;;  %v2701_v21 = vadd.f32 %v2693_v47, %v2680_v15  ;;  %v2000_v43 = vmul.f32 %v8286_v59, %v6735_v20  ;;  %v8289_v31 = vld [vmem:[#allocation46_spill] sm:$0xff]  ;;  %v4535_v15 = vld [vmem:[#allocation3 + $0x126] sm:$0xff] }
 0x275   : > { %v1946_v53 = vadd.f32 %v1938_v23, %v1925_v49  ;;  %v2277_v18 = vadd.f32 %v8288_v57, %v8287_v62  ;;  %v2702_v8 = vadd.f32 %v2694_v7, %v2681_v28  ;;  %v2001_v4 = vmul.f32 %v8286_v59, %v6746_v40  ;;  %v8290_v51 = vld [vmem:[#allocation134_spill] sm:$0xff]  ;;  %v8292_v49 = vld [vmem:[#allocation152_spill] sm:$0xff] }
 0x276   : > { %v1966_v29 = vadd.f32 %v1958_v27, %v1945_v10  ;;  %v2278_v55 = vadd.f32 %v8290_v51, %v8289_v31  ;;  %v2722_v42 = vadd.f32 %v2714_v24, %v2701_v21  ;;  %v2257_v38 = vld [vmem:[#allocation3 + $0x16e] sm:$0xff]  ;;  %v2332_v39 = vmul.f32 %v4535_v15, %v8292_v49  ;;  %v6767_v10 = vld [vmem:[#allocation3 + $0x13e] sm:$0xff] }
 0x277   : > { %v1967_v47 = vadd.f32 %v1959_v12, %v1946_v53  ;;  %v8291_v13 = vld [vmem:[#allocation150_spill] sm:$0xff]  ;;  %v2723_v6 = vadd.f32 %v2715_v50, %v2702_v8  ;;  %v2333_v59 = vmul.f32 %v6767_v10, %v8292_v49  ;;  %v6772_v57 = vld [vmem:[%s4966_s9 + $0x4] ss:$0 sm:$0xff]  ;;  %v8295_v12 = vld [vmem:[#allocation47_spill] sm:$0xff] }
 0x278   : > { %v2298_v23 = vadd.f32 %v8291_v13, %v2277_v18  ;;  %v1987_v7 = vadd.f32 %v1979_v25, %v1966_v29  ;;  %v8293_v27 = vld [vmem:[#allocation142_spill] sm:$0xff]  ;;  %8294 = vst [vmem:[#allocation73_spill] sm:$0xff] %v6772_v57  ;;  %v2033_v24 = vmul.f32 %v6772_v57, %v8180_v61  ;;  %v8296_v8 = vld [vmem:[#allocation165_spill] sm:$0xff] }
 0x279   : > { %v2299_v28 = vadd.f32 %v8293_v27, %v2278_v55  ;;  %v1988_v62 = vadd.f32 %v1980_v14, %v1967_v47  ;;  %v4538_v53 = vld [vmem:[%s4971_s1 + $0x15] ss:$0 sm:$0xff]  ;;  %v2732_v50 = vpack.c.bf16 %v2723_v6, %v2722_v42  ;;  %v2034_v55 = vmul.f32 %v6772_v57, %v8186_v63  ;;  %v6782_v14 = vld [vmem:[%s4966_s9 + $0x9] ss:$0 sm:$0xff]  ;;  %v4541_v27 = vld [vmem:[#allocation3 + $0x98] sm:$0xff] }
 0x27a   : > { %v2319_v21 = vadd.f32 %v8295_v12, %v2298_v23  ;;  %v2353_v18 = vmul.f32 %v4538_v53, %v2256_v9  ;;  %v2008_v25 = vadd.f32 %v2000_v43, %v1987_v7  ;;  %v2354_v31 = vmul.f32 %v4538_v53, %v2257_v38  ;;  %8297 = vst [vmem:[#allocation130_spill] sm:$0xff] %v6782_v14  ;;  %v8298_v23 = vld [vmem:[#allocation160_spill] sm:$0xff]  ;;  %v8300_v15 = vld [vmem:[#allocation161_spill] sm:$0xff]  ;;  %v8310_v57 = vld [vmem:[#allocation167_spill] sm:$0xff] }
 0x27b   : > { %v2320_v29 = vadd.f32 %v8296_v8, %v2299_v28  ;;  %v2009_v51 = vadd.f32 %v2001_v4, %v1988_v62  ;;  %v2054_v47 = vmul.f32 %v6782_v14, %v8186_v63  ;;  %2990 = vmatprep.mubr.bf16.mxu0 %v2732_v50  ;;  %v2055_v9 = vmul.f32 %v6782_v14, %v8298_v23  ;;  %v8299_v43 = vld [vmem:[#allocation40_spill] sm:$0xff]  ;;  %v8302_v53 = vld [vmem:[#allocation101_spill] sm:$0xff] }
 0x27c   : > { %v2340_v61 = vadd.f32 %v2332_v39, %v2319_v21  ;;  %v2041_v13 = vadd.f32 %v2033_v24, %v2008_v25  ;;  %v2075_v42 = vmul.f32 %v8299_v43, %v8298_v23  ;;  %v2076_v49 = vmul.f32 %v8299_v43, %v8300_v15  ;;  %v4540_v7 = vld [vmem:[%s4971_s1 + $0x2] ss:$0 sm:$0xff]  ;;  %v8301_v39 = vld [vmem:[#allocation109_spill] sm:$0xff]  ;;  %v4542_v25 = vld [vmem:[%s4971_s1 + $0x7] ss:$0 sm:$0xff] }
 0x27d   : > { %v2341_v38 = vadd.f32 %v2333_v59, %v2320_v29  ;;  %v2042_v4 = vadd.f32 %v2034_v55, %v2009_v51  ;;  %v2390_v28 = vmul.f32 %v4541_v27, %v4540_v7  ;;  %v2096_v62 = vmul.f32 %v8301_v39, %v8300_v15  ;;  %v2377_v55 = vld [vmem:[#allocation3 + $0x158] sm:$0xff]  ;;  %v4547_v14 = vld [vmem:[%s4966_s9 + $0x1] ss:$0 sm:$0xff] }
 0x27e   : > { %v2361_v6 = vadd.f32 %v2353_v18, %v2340_v61  ;;  %v2062_v63 = vadd.f32 %v2054_v47, %v2041_v13  ;;  %v2391_v12 = vmul.f32 %v4540_v7, %v6662_v5  ;;  %v2097_v50 = vmul.f32 %v8301_v39, %v8302_v53  ;;  %v8303_v18 = vld [vmem:[#allocation85_spill] sm:$0xff]  ;;  %v2378_v13 = vld [vmem:[#allocation3 + $0x170] sm:$0xff]  ;;  %v6803_v23 = vld [vmem:[#allocation3 + $0xf8] sm:$0xff] }
 0x27f   : > { %v2362_v24 = vadd.f32 %v2354_v31, %v2341_v38  ;;  %v2063_v21 = vadd.f32 %v2055_v9, %v2042_v4  ;;  %v2411_v8 = vmul.f32 %v4542_v25, %v6674_v19  ;;  %v2117_v51 = vmul.f32 %v8303_v18, %v8302_v53  ;;  %v8304_v9 = vld [vmem:[#allocation64_spill] sm:$0xff]  ;;  %v6807_v38 = vld [vmem:[#allocation3 + $0x128] sm:$0xff]  ;;  %v4545_v7 = vld [vmem:[#allocation3 + $0x110] sm:$0xff] }
 0x280   : > { %v2398_v59 = vadd.f32 %v2390_v28, %v2361_v6  ;;  %v2083_v29 = vadd.f32 %v2075_v42, %v2062_v63  ;;  %v2412_v61 = vmul.f32 %v4542_v25, %v6691_v54  ;;  %v2432_v43 = vmul.f32 %v6803_v23, %v8304_v9  ;;  %v8305_v42 = vld [vmem:[#allocation44_spill] sm:$0xff] }
 0x281   : > { %v2399_v47 = vadd.f32 %v2391_v12, %v2362_v24  ;;  %v2084_v31 = vadd.f32 %v2076_v49, %v2063_v21  ;;  %v2453_v4 = vmul.f32 %v6807_v38, %v8305_v42  ;;  %v2433_v27 = vmul.f32 %v4545_v7, %v8304_v9  ;;  %v8306_v49 = vld [vmem:[#allocation102_spill] sm:$0xff]  ;;  %v8307_v24 = vld [vmem:[#allocation129_spill] sm:$0xff]  ;;  %v4548_v9 = vld [vmem:[%s4966_s9 + $0x6] ss:$0 sm:$0xff] }
 0x282   : > { %v2419_v5 = vadd.f32 %v2411_v8, %v2398_v59  ;;  %v2104_v15 = vadd.f32 %v2096_v62, %v2083_v29  ;;  %v2454_v28 = vmul.f32 %v8305_v42, %v8306_v49  ;;  %v2118_v12 = vmul.f32 %v8303_v18, %v8307_v24  ;;  %v4546_v59 = vld [vmem:[%s4971_s1 + $0x16] ss:$0 sm:$0xff]  ;;  %v8308_v42 = vld [vmem:[#allocation37_spill] sm:$0xff]  ;;  %v8311_v18 = vld [vmem:[#allocation39_spill] sm:$0xff] }
 0x283   : > { %v2420_v6 = vadd.f32 %v2412_v61, %v2399_v47  ;;  %v2105_v63 = vadd.f32 %v2097_v50, %v2084_v31  ;;  %v2474_v25 = vmul.f32 %v4546_v59, %v2377_v55  ;;  %v2475_v39 = vmul.f32 %v4546_v59, %v2378_v13  ;;  %v8309_v50 = vld [vmem:[#allocation164_spill] sm:$0xff] }
 0x284   : > { %v2440_v21 = vadd.f32 %v2432_v43, %v2419_v5  ;;  %v1685_v62 = vmul.f32 %v4547_v14, %v6447_v26  ;;  %v2125_v29 = vadd.f32 %v2117_v51, %v2104_v15  ;;  %v1705_v7 = vmul.f32 %v4548_v9, %v6447_v26  ;;  %v4549_v43 = vld [vmem:[#allocation3 + $0xc7] sm:$0xff]  ;;  %v4550_v59 = vld [vmem:[#allocation3 + $0x9a] sm:$0xff] }
 0x285   : > { %v2441_v8 = vadd.f32 %v2433_v27, %v2420_v6  ;;  %v2126_v47 = vadd.f32 %v2118_v12, %v2105_v63  ;;  %v1638_v31 = vadd.f32 %v8309_v50, %v8308_v42  ;;  %v1639_v5 = vadd.f32 %v8311_v18, %v8310_v57  ;;  %v8312_v51 = vld [vmem:[#allocation72_spill] sm:$0xff]  ;;  %v4551_v63 = vld [vmem:[#allocation3 + $0xb2] sm:$0xff]  ;;  %v4554_v50 = vld [vmem:[%s4966_s9 + $0xb] ss:$0 sm:$0xff] }
 0x286   : > { %v2461_v61 = vadd.f32 %v2453_v4, %v2440_v21  ;;  %v1684_v13 = vmul.f32 %v4549_v43, %v4547_v14  ;;  %v2511_v15 = vmul.f32 %v4550_v59, %v8312_v51  ;;  %v2512_v12 = vmul.f32 %v4551_v63, %v8312_v51  ;;  %v4552_v26 = vld [vmem:[#allocation3 + $0x126] sm:$0xff]  ;;  %v4553_v21 = vld [vmem:[%s4966_s9 + $0x14] ss:$0 sm:$0xff]  ;;  %v4558_v51 = vld [vmem:[%s4971_s1 + $0x12] ss:$0 sm:$0xff] }
 0x287   : > { %v2462_v55 = vadd.f32 %v2454_v28, %v2441_v8  ;;  %v2728_v6 = vpack.c.bf16 %v2126_v47, %v2125_v29  ;;  %v1651_v40 = vmul.f32 %v4553_v21, %v4552_v26  ;;  %v1652_v42 = vmul.f32 %v4553_v21, %v6767_v10  ;;  %v6832_v28 = vld [vmem:[#allocation3 + $0xca] sm:$0xff]  ;;  %v2498_v8 = vld [vmem:[#allocation3 + $0x15a] sm:$0xff]  ;;  %v2499_v29 = vld [vmem:[#allocation3 + $0x172] sm:$0xff] }
 0x288   : > { %v2482_v27 = vadd.f32 %v2474_v25, %v2461_v61  ;;  %v1727_v57 = vmul.f32 %v4554_v50, %v6637_v34  ;;  %v1706_v14 = vmul.f32 %v4548_v9, %v6629_v46  ;;  %8313 = vst [vmem:[#allocation89_spill] sm:$0xff] %v6832_v28  ;;  %v6836_v61 = vld [vmem:[#allocation3 + $0xe2] sm:$0xff]  ;;  %v4557_v59 = vld [vmem:[%s4971_s1 + $0xd] ss:$0 sm:$0xff] }
 0x289   : > { %v2483_v4 = vadd.f32 %v2475_v39, %v2462_v55  ;;  %2991 = vmatmul.mubr.bf16.gmra.mxu0 %v2728_v6  ;;  %v8314_v39 = vld [vmem:[#allocation56_spill] sm:$0xff]  ;;  %8315 = vst [vmem:[#allocation140_spill] sm:$0xff] %v6836_v61  ;;  %v1659_v55 = vadd.f32 %v1651_v40, %v1638_v31  ;;  %v1660_v43 = vadd.f32 %v1652_v42, %v1639_v5  ;;  %v4559_v40 = vld [vmem:[%s4971_s1 + $0x17] ss:$0 sm:$0xff] }
 0x28a   : > { %v2519_v18 = vadd.f32 %v2511_v15, %v2482_v27  ;;  %v2532_v25 = vmul.f32 %v6832_v28, %v8314_v39  ;;  %v2533_v10 = vmul.f32 %v6836_v61, %v8314_v39  ;;  %v2553_v6 = vmul.f32 %v4557_v59, %v8302_v53  ;;  %v8316_v15 = vld [vmem:[#allocation45_spill] sm:$0xff]  ;;  %v1672_v42 = vld [vmem:[#allocation3 + $0x13f] sm:$0xff] }
 0x28b   : > { %v2520_v47 = vadd.f32 %v2512_v12, %v2483_v4  ;;  %v2554_v27 = vmul.f32 %v4557_v59, %v8307_v24  ;;  %v2574_v63 = vmul.f32 %v4558_v51, %v8316_v15  ;;  %v1671_v26 = vld [vmem:[#allocation3 + $0x127] sm:$0xff]  ;;  %v2575_v4 = vmul.f32 %v4558_v51, %v6601_v36 }
 0x28c   : > { %v2540_v9 = vadd.f32 %v2532_v25, %v2519_v18  ;;  %v1692_v12 = vadd.f32 %v1684_v13, %v1659_v55  ;;  %v1693_v28 = vadd.f32 %v1685_v62, %v1660_v43  ;;  %v1726_v39 = vmul.f32 %v4554_v50, %v6629_v46  ;;  %v2619_v55 = vld [vmem:[#allocation3 + $0x15c] sm:$0xff]  ;;  %v4562_v43 = vld [vmem:[%s4971_s1 + $0xe] ss:$0 sm:$0xff] }
 0x28d   : > { %v2541_v21 = vadd.f32 %v2533_v10, %v2520_v47  ;;  %v2595_v31 = vmul.f32 %v4559_v40, %v2498_v8  ;;  %v2596_v5 = vmul.f32 %v4559_v40, %v2499_v29  ;;  %v1748_v59 = vmul.f32 %v6196_v60, %v1671_v26  ;;  %v4560_v10 = vld [vmem:[#allocation3 + $0x9c] sm:$0xff]  ;;  %v4564_v40 = vld [vmem:[%s4971_s1 + $0x18] ss:$0 sm:$0xff] }
 0x28e   : > { %v2561_v61 = vadd.f32 %v2553_v6, %v2540_v9  ;;  %v1713_v25 = vadd.f32 %v1705_v7, %v1692_v12  ;;  %v1714_v53 = vadd.f32 %v1706_v14, %v1693_v28  ;;  %v1747_v15 = vmul.f32 %v6196_v60, %v6637_v34  ;;  %v4561_v14 = vld [vmem:[#allocation3 + $0xb4] sm:$0xff] }
 0x28f   : > { %v2562_v18 = vadd.f32 %v2554_v27, %v2541_v21  ;;  %v2632_v62 = vmul.f32 %v4560_v10, %v6654_v32  ;;  %v1768_v46 = vmul.f32 %v6220_v22, %v1671_v26  ;;  %v1769_v29 = vmul.f32 %v6220_v22, %v1672_v42 }
 0x290   : > { %v2582_v47 = vadd.f32 %v2574_v63, %v2561_v61  ;;  %v1734_v50 = vadd.f32 %v1726_v39, %v1713_v25  ;;  %v1735_v8 = vadd.f32 %v1727_v57, %v1714_v53  ;;  %v2633_v28 = vmul.f32 %v4561_v14, %v6654_v32  ;;  %v4563_v57 = vld [vmem:[%s4971_s1 + $0x13] ss:$0 sm:$0xff]  ;;  %v2620_v32 = vld [vmem:[#allocation3 + $0x174] sm:$0xff] }
 0x291   : > { %v2583_v13 = vadd.f32 %v2575_v4, %v2562_v18  ;;  %v2653_v60 = vmul.f32 %v6679_v44, %v6204_v11  ;;  %v2654_v34 = vmul.f32 %v6679_v44, %v6224_v45  ;;  %v2674_v9 = vmul.f32 %v4562_v43, %v6465_v3 }
 0x292   : > { %v2603_v7 = vadd.f32 %v2595_v31, %v2582_v47  ;;  %v1755_v6 = vadd.f32 %v1747_v15, %v1734_v50  ;;  %v1756_v27 = vadd.f32 %v1748_v59, %v1735_v8  ;;  %v2675_v22 = vmul.f32 %v4562_v43, %v6467_v17  ;;  %v4565_v43 = vld [vmem:[%s4966_s9 + $0xd] ss:$0 sm:$0xff] }
 0x293   : > { %v2604_v61 = vadd.f32 %v2596_v5, %v2583_v13  ;;  %v2695_v51 = vmul.f32 %v4563_v57, %v6706_v37  ;;  %v1801_v11 = vmul.f32 %v6674_v19, %v6660_v2  ;;  %v1802_v26 = vmul.f32 %v6691_v54, %v6660_v2 }
 0x294   : > { %v2640_v53 = vadd.f32 %v2632_v62, %v2603_v7  ;;  %v1776_v45 = vadd.f32 %v1768_v46, %v1755_v6  ;;  %v1777_v44 = vadd.f32 %v1769_v29, %v1756_v27  ;;  %v2696_v15 = vmul.f32 %v4563_v57, %v6713_v1  ;;  %v8318_v27 = vld [vmem:[#allocation57_spill] sm:$0xff] }
 0x295   : > { %v2641_v63 = vadd.f32 %v2633_v28, %v2604_v61  ;;  %v2716_v21 = vmul.f32 %v8279_v0, %v2619_v55  ;;  %v1822_v17 = vmul.f32 %v6691_v54, %v6670_v58  ;;  %v1823_v19 = vmul.f32 %v6803_v23, %v6670_v58  ;;  %v1906_v55 = vld [vmem:[#allocation3 + $0x141] sm:$0xff] }
 0x296   : > { %v2661_v3 = vadd.f32 %v2653_v60, %v2640_v53  ;;  %v1809_v4 = vadd.f32 %v1801_v11, %v1776_v45  ;;  %v1810_v12 = vadd.f32 %v1802_v26, %v1777_v44  ;;  %v2717_v31 = vmul.f32 %v4564_v40, %v2620_v32  ;;  %v8323_v40 = vld [vmem:[#allocation101_spill] sm:$0xff] }
 0x297   : > { %v2662_v37 = vadd.f32 %v2654_v34, %v2641_v63  ;;  %v1843_v2 = vmul.f32 %v6803_v23, %v6684_v35  ;;  %v1844_v1 = vmul.f32 %v6684_v35, %v6698_v33  ;;  %v1865_v54 = vmul.f32 %v6807_v38, %v6701_v56  ;;  %v4567_v63 = vld [vmem:[%s4966_s9 + $0x17] ss:$0 sm:$0xff] }
 0x298   : > { %v2682_v39 = vadd.f32 %v2674_v9, %v2661_v3  ;;  %v1830_v0 = vadd.f32 %v1822_v17, %v1809_v4  ;;  %v1831_v42 = vadd.f32 %v1823_v19, %v1810_v12  ;;  %v1864_v25 = vmul.f32 %v6701_v56, %v6698_v33  ;;  %v8321_v17 = vld [vmem:[#allocation140_spill] sm:$0xff]  ;;  %v8322_v19 = vld [vmem:[#allocation130_spill] sm:$0xff] }
 0x299   : > { %v2683_v5 = vadd.f32 %v2675_v22, %v2662_v37  ;;  %v1885_v58 = vmul.f32 %v6807_v38, %v6718_v30  ;;  %v2768_v59 = vlaneseq  ;;  %v1886_v35 = vmul.f32 %v6718_v30, %v8306_v49  ;;  %v2766_v30 = vld [vmem:[%s4988_s10] sm:$0x3]  ;;  %v1905_v49 = vld [vmem:[#allocation3 + $0x129] sm:$0xff]  ;;  %v4566_v22 = vld [vmem:[%s4966_s9 + $0x12] ss:$0 sm:$0xff] }
 0x29a   : > { %v2703_v18 = vadd.f32 %v2695_v51, %v2682_v39  ;;  %v1851_v23 = vadd.f32 %v1843_v2, %v1830_v0  ;;  %v1852_v10 = vadd.f32 %v1844_v1, %v1831_v42  ;;  %v1918_v33 = vmul.f32 %v6729_v41, %v6495_v48  ;;  %v4568_v2 = vld [vmem:[%s4966_s9 + $0xe] ss:$0 sm:$0xff] }
 0x29b   : > { %v2704_v47 = vadd.f32 %v2696_v15, %v2683_v5  ;;  %v6887_v46 = vshrl.u32 %v2768_v59, 7  ;;  %v1919_v14 = vmul.f32 %v6729_v41, %v8284_v16  ;;  %v1939_v48 = vmul.f32 %v6740_v52, %v8284_v16  ;;  %v8319_v15 = vld [vmem:[#allocation73_spill] sm:$0xff] }
 0x29c   : > { %v2724_v62 = vadd.f32 %v2716_v21, %v2703_v18  ;;  %v1872_v50 = vadd.f32 %v1864_v25, %v1851_v23  ;;  %v1873_v8 = vadd.f32 %v1865_v54, %v1852_v10  ;;  %v1940_v61 = vmul.f32 %v6740_v52, %v6735_v20  ;;  %v8324_v54 = vld [vmem:[#allocation45_spill] sm:$0xff] }
 0x29d   : > { %v2725_v13 = vadd.f32 %v2717_v31, %v2704_v47  ;;  %v2774_v56 = vsub.s32 1, %v6887_v46  ;;  %v1960_v9 = vmul.f32 %v4565_v43, %v6735_v20  ;;  %v1961_v53 = vmul.f32 %v4565_v43, %v8318_v27  ;;  %v8320_v20 = vld [vmem:[#allocation89_spill] sm:$0xff] }
 0x29e   : > { %v1893_v29 = vadd.f32 %v1885_v58, %v1872_v50  ;;  %v1894_v7 = vadd.f32 %v1886_v35, %v1873_v8  ;;  %v1982_v57 = vmul.f32 %v4566_v22, %v1905_v49  ;;  %v1981_v51 = vmul.f32 %v4566_v22, %v8318_v27  ;;  %v8325_v18 = vld [vmem:[#allocation109_spill] sm:$0xff]  ;;  %v4518_v27 = vld [vmem:[%s4993_s11] sm:$0xff]  }
 0x29f   : > { %v2733_v38 = vpack.c.bf16 %v2725_v13, %v2724_v62  ;;  %v6895_v28 = vrot.slane %v2766_v30, %v2774_v56  ;;  %v2002_v16 = vmul.f32 %v4567_v63, %v1905_v49  ;;  %v2003_v45 = vmul.f32 %v4567_v63, %v1906_v55  ;;  %v8326_v23 = vld [vmem:[#allocation85_spill] sm:$0xff]  ;;  %v4511_v56 = vld [vmem:[%s4993_s11 + $0x38] sm:$0xff]  }
 0x2a0   : > { %v1926_v60 = vadd.f32 %v1918_v33, %v1893_v29  ;;  %v1927_v34 = vadd.f32 %v1919_v14, %v1894_v7  ;;  %v2035_v21 = vmul.f32 %v8320_v20, %v8319_v15  ;;  %v2036_v37 = vmul.f32 %v8321_v17, %v8319_v15  ;;  %4327 = vmatprep.subr.bf16.mxu1 %v4511_v56  ;;  %v4513_v29 = vld [vmem:[%s4993_s11 + $0x28] sm:$0xff]   ;;  %v4514_v14 = vld [vmem:[%s4993_s11 + $0x20] sm:$0xff]  }
 0x2a1   : > { %8317 = vst [vmem:[#allocation61_spill] sm:$0xff] %v6895_v28  ;;  %3000 = vmatprep.mubr.bf16.mxu0 %v2733_v38  ;;  %v2056_v39 = vmul.f32 %v8321_v17, %v8322_v19  ;;  %v2057_v31 = vmul.f32 %v8322_v19, %v8323_v40  ;;  %v2077_v1 = vmul.f32 %v4568_v2, %v8323_v40  ;;  %v4512_v38 = vld [vmem:[%s4993_s11 + $0x30] sm:$0xff]   ;;  %v6968_v15 = vld [vmem:[%s4976_s3 + $0xa] ss:$0 sm:$0xff] }
 0x2a2   : > { %v1947_v6 = vadd.f32 %v1939_v48, %v1926_v60  ;;  %v1948_v41 = vadd.f32 %v1940_v61, %v1927_v34  ;;  %v2078_v42 = vmul.f32 %v4568_v2, %v8307_v24  ;;  %v2099_v25 = vmul.f32 %v8325_v18, %v8324_v54  ;;  %4328 = vmatpush3.bf16.msra.mxu1 %v4511_v56  ;;  %v7014_v56 = vld [vmem:[%s4976_s3 + $0xb] ss:$0 sm:$0xff] }
 0x2a3   : > { %v2098_v58 = vmul.f32 %v8325_v18, %v8307_v24  ;;  %v2119_v10 = vmul.f32 %v8326_v23, %v8324_v54  ;;  %v2120_v35 = vmul.f32 %v8326_v23, %v6601_v36  ;;  %v2770_v24 = vsub.s32 0, %v6887_v46  ;;  %4329 = vmatprep.subr.bf16.mxu1 %v4512_v38  ;;  %v6996_v54 = vld [vmem:[%s4976_s3 + $0x1] ss:$0 sm:$0xff]  ;;  %8334 = vst [vmem:[#allocation92_spill] sm:$0xff] %v7014_v56 }
 0x2a4   : > { %v1968_v11 = vadd.f32 %v1960_v9, %v1947_v6  ;;  %v1969_v32 = vadd.f32 %v1961_v53, %v1948_v41  ;;  %v4516_v6 = vld [vmem:[%s4993_s11 + $0x10] sm:$0xff]   ;;  %v4517_v41 = vld [vmem:[%s4993_s11 + $0x8] sm:$0xff]   ;;  %8332 = vst [vmem:[#allocation106_spill] sm:$0xff] %v6996_v54 }
 0x2a5   : > { %v6930_v7 = vrot.slane %v2766_v30, %v2770_v24  ;;  %v4515_v30 = vld [vmem:[%s4993_s11 + $0x18] sm:$0xff]   ;;  %s8354_s11 = sld [smem:[#allocation175_spill]] }
 0x2a6   : > { %v1989_v44 = vadd.f32 %v1981_v51, %v1968_v11  ;;  %v1990_v52 = vadd.f32 %v1982_v57, %v1969_v32  ;;  %4330 = vmatpush3.bf16.msra.mxu1 %v4512_v38  ;;  %v3027_v53 = vld [vmem:[#allocation3 + $0x36] sm:$0xff]  ;;  %v3028_v57 = vld [vmem:[#allocation3 + $0x4e] sm:$0xff]  ;;  %v6952_v51 = vld [vmem:[%s4976_s3] ss:$0 sm:$0xff] }
 0x2a7   : > { %4331 = vmatprep.subr.bf16.mxu1 %v4513_v29  ;;  %v6955_v11 = vld [vmem:[%s4976_s3 + $0x5] ss:$0 sm:$0xff]  ;;  %v3045_v40 = vmul.f32 %v6952_v51, %v3028_v57 }
 0x2a8   : > { %v2010_v26 = vadd.f32 %v2002_v16, %v1989_v44  ;;  %v2011_v3 = vadd.f32 %v2003_v45, %v1990_v52  ;;  %v3044_v44 = vmul.f32 %v6952_v51, %v3027_v53  ;;  %v3057_v52 = vmul.f32 %v6955_v11, %v3028_v57  ;;  %v3254_v57 = vld [vmem:[#allocation3 + $0x50] sm:$0xff] }
 0x2aa   : > { %v2043_v4 = vadd.f32 %v2035_v21, %v2010_v26  ;;  %v2044_v12 = vadd.f32 %v2036_v37, %v2011_v3  ;;  %4332 = vmatpush3.bf16.msra.mxu1 %v4513_v29  ;;  %v6975_v37 = vld [vmem:[%s4976_s3 + $0xf] ss:$0 sm:$0xff]  ;;  %v3065_v19 = vadd.f32 %v3057_v52, %v3044_v44 }
 0x2ab   : > { %4333 = vmatprep.subr.bf16.mxu1 %v4514_v14 }
 0x2ac   : > { %v2064_v5 = vadd.f32 %v2056_v39, %v2043_v4  ;;  %v2065_v0 = vadd.f32 %v2057_v31, %v2044_v12 }
 0x2ae   : > { %v2085_v59 = vadd.f32 %v2077_v1, %v2064_v5  ;;  %v2086_v47 = vadd.f32 %v2078_v42, %v2065_v0  ;;  %4334 = vmatpush3.bf16.msra.mxu1 %v4514_v14  ;;  %v3136_v1 = vld [vmem:[#allocation3 + $0x37] sm:$0xff]  ;;  %v6991_v5 = vld [vmem:[%s4976_s3 + $0x14] ss:$0 sm:$0xff] }
 0x2af   : > { %4335 = vmatprep.subr.bf16.mxu1 %v4515_v30  ;;  %8331 = vst [vmem:[#allocation136_spill] sm:$0xff] %v6991_v5 }
 0x2b0   : > { %v2106_v62 = vadd.f32 %v2098_v58, %v2085_v59  ;;  %v2107_v13 = vadd.f32 %v2099_v25, %v2086_v47  ;;  %v3137_v25 = vld [vmem:[#allocation3 + $0x4f] sm:$0xff]  ;;  %v3153_v58 = vmul.f32 %v6996_v54, %v3136_v1 }
 0x2b1   : > { %v3154_v29 = vmul.f32 %v6996_v54, %v3137_v25 }
 0x2b2   : > { %v2127_v50 = vadd.f32 %v2119_v10, %v2106_v62  ;;  %v2128_v8 = vadd.f32 %v2120_v35, %v2107_v13  ;;  %4336 = vmatpush3.bf16.msra.mxu1 %v4515_v30  ;;  %v7006_v35 = vld [vmem:[%s4976_s3 + $0x6] ss:$0 sm:$0xff] }
 0x2b3   : > { %4337 = vmatprep.subr.bf16.mxu1 %v4516_v6  ;;  %8333 = vst [vmem:[#allocation91_spill] sm:$0xff] %v7006_v35 }
 0x2b4   : > { %v2729_v33 = vpack.c.bf16 %v2128_v8, %v2127_v50  ;;  %v3174_v50 = vmul.f32 %v7006_v35, %v3137_v25  ;;  %v7058_v25 = vld [vmem:[%s4976_s3 + $0xc] ss:$0 sm:$0xff] }
 0x2b6   : > { %3001 = vmatmul.mubr.bf16.gmra.mxu0 %v2729_v33  ;;  %4338 = vmatpush3.bf16.msra.mxu1 %v4516_v6  ;;  %v3253_v6 = vld [vmem:[#allocation3 + $0x38] sm:$0xff] }
 0x2b7   : > { %4339 = vmatprep.subr.bf16.mxu1 %v4517_v41 }
 0x2ba   : > { %4340 = vmatpush3.bf16.msra.mxu1 %v4517_v41 }
 0x2bb   : > { %4341 = vmatprep.subr.bf16.mxu1 %v4518_v27 }
 0x2be   : > { %4342 = vmatpush3.bf16.msra.mxu1 %v4518_v27 }
 0x307   : > { %v2972_v36 = vpop.f32.mrf.mxu0 }
 0x308   : > { %v2973_v49 = vadd.f32 %v2972_v36, %v6930_v7 }
 0x309   : > { %v2974_v60 = vpop.f32.mrf.mxu0 }
 0x30a   : > { %v6934_v34 = vmax.f32 %v2973_v49, 0.0  ;;  %v6937_v48 = vadd.f32 %v2974_v60, %v6895_v28  ;;  %v7022_v49 = vld [vmem:[%s4976_s3 + $0x10] ss:$0 sm:$0xff] }
 0x30b   : > { %v2976_v46 = vpop.f32.mrf.mxu0 }
 0x30c   : > { %8327 = vst [vmem:[#allocation62_spill] sm:$0xff] %v6937_v48  ;;  %3019 = vst [vmem:[#allocation3 + $0x68] sm:$0xff] %v6934_v34  ;;  %v2977_v61 = vadd.f32 %v2976_v46, %v6930_v7 }
 0x30d   : > { %v2978_v55 = vpop.f32.mrf.mxu0 }
 0x30e   : > { %v6942_v43 = vmax.f32 %v2977_v61, 0.0  ;;  %v6945_v9 = vadd.f32 %v2978_v55, %v6895_v28  ;;  %v7029_v55 = vld [vmem:[%s4976_s3 + $0x15] ss:$0 sm:$0xff] }
 0x310   : > { %8328 = vst [vmem:[#allocation90_spill] sm:$0xff] %v6945_v9  ;;  %3020 = vst [vmem:[#allocation3 + $0x80] sm:$0xff] %v6942_v43 }
 0x313   : > { %v6965_v3 = vld [vmem:[#allocation3 + $0x66] sm:$0xff] }
 0x314   : > { %v3078_v39 = vmul.f32 %v6968_v15, %v6965_v3  ;;  %v3058_v31 = vmul.f32 %v6955_v11, %v6965_v3  ;;  %v7011_v33 = vld [vmem:[#allocation3 + $0x67] sm:$0xff] }
 0x315   : > { %v3195_v61 = vmul.f32 %v7014_v56, %v7011_v33  ;;  %v3175_v27 = vmul.f32 %v7006_v35, %v7011_v33  ;;  %v3155_v9 = vmul.f32 %v6996_v54, %v7011_v33 }
 0x316   : > { %v3086_v42 = vadd.f32 %v3078_v39, %v3065_v19  ;;  %v3066_v59 = vadd.f32 %v3058_v31, %v3045_v40 }
 0x317   : > { %v6972_v17 = vld [vmem:[#allocation3 + $0x7e] sm:$0xff] }
 0x318   : > { %v3099_v2 = vmul.f32 %v6975_v37, %v6972_v17  ;;  %v3079_v0 = vmul.f32 %v6968_v15, %v6972_v17  ;;  %v7019_v14 = vld [vmem:[#allocation3 + $0x7f] sm:$0xff] }
 0x31a   : > { %v3107_v23 = vadd.f32 %v3099_v2, %v3086_v42  ;;  %v3087_v62 = vadd.f32 %v3079_v0, %v3066_v59 }
 0x32a   : > { %v2982_v22 = vpop.f32.mrf.mxu0 }
 0x32b   : > { %v2983_v32 = vadd.f32 %v2982_v22, %v6930_v7  ;;  %v3216_v22 = vmul.f32 %v7022_v49, %v7019_v14 }
 0x32c   : > { %v2984_v63 = vpop.f32.mrf.mxu0 }
 0x32d   : > { %v6958_v16 = vmax.f32 %v2983_v32, 0.0  ;;  %v6961_v45 = vadd.f32 %v2984_v63, %v6895_v28  ;;  %v7036_v32 = vld [vmem:[%s4976_s3 + $0x2] ss:$0 sm:$0xff]  ;;  %v3196_v63 = vmul.f32 %v7014_v56, %v7019_v14 }
 0x32e   : > { %v2986_v26 = vpop.f32.mrf.mxu0  ;;  %v3270_v52 = vmul.f32 %v7036_v32, %v3253_v6 }
 0x32f   : > { %8329 = vst [vmem:[#allocation124_spill] sm:$0xff] %v6961_v45  ;;  %3021 = vst [vmem:[#allocation3 + $0x98] sm:$0xff] %v6958_v16  ;;  %v2987_v20 = vadd.f32 %v2986_v26, %v6930_v7 }
 0x330   : > { %v2988_v21 = vpop.f32.mrf.mxu0 }
 0x331   : > { %v6977_v4 = vmax.f32 %v2987_v20, 0.0  ;;  %v6980_v12 = vadd.f32 %v2988_v21, %v6895_v28  ;;  %v7044_v21 = vld [vmem:[%s4976_s3 + $0x7] ss:$0 sm:$0xff] }
 0x332   : > { %v3291_v31 = vmul.f32 %v7044_v21, %v3254_v57 }
 0x333   : > { %8330 = vst [vmem:[#allocation105_spill] sm:$0xff] %v6980_v12  ;;  %3022 = vst [vmem:[#allocation3 + $0xb0] sm:$0xff] %v6977_v4 }
 0x336   : > { %v6998_v18 = vld [vmem:[#allocation3 + $0x96] sm:$0xff] }
 0x337   : > { %v3100_v47 = vmul.f32 %v6975_v37, %v6998_v18  ;;  %v3120_v10 = vmul.f32 %v6991_v5, %v6998_v18  ;;  %v7024_v46 = vld [vmem:[#allocation3 + $0x97] sm:$0xff]  ;;  %v3048_v19 = vmul.f32 %v6952_v51, %v6998_v18 }
 0x338   : > { %8335 = vst [vmem:[#allocation107_spill] sm:$0xff] %v7024_v46  ;;  %v3237_v44 = vmul.f32 %v7029_v55, %v7024_v46  ;;  %v3217_v1 = vmul.f32 %v7022_v49, %v7024_v46 }
 0x339   : > { %v3128_v13 = vadd.f32 %v3120_v10, %v3107_v23  ;;  %v3108_v38 = vadd.f32 %v3100_v47, %v3087_v62  ;;  %v3271_v47 = vmul.f32 %v7036_v32, %v3254_v57  ;;  %v7064_v10 = vld [vmem:[%s4976_s3 + $0x11] ss:$0 sm:$0xff] }
 0x33a   : > { %v7009_v8 = vld [vmem:[#allocation3 + $0xae] sm:$0xff]  ;;  %v3333_v6 = vmul.f32 %v7064_v10, %v6942_v43 }
 0x33b   : > { %v3121_v24 = vmul.f32 %v6991_v5, %v7009_v8  ;;  %v3161_v36 = vadd.f32 %v3153_v58, %v3128_v13  ;;  %v3061_v39 = vmul.f32 %v6955_v11, %v7009_v8  ;;  %v7050_v40 = vld [vmem:[#allocation3 + $0xaf] sm:$0xff] }
 0x33c   : > { %v3238_v59 = vmul.f32 %v7029_v55, %v7050_v40 }
 0x33d   : > { %v3129_v60 = vadd.f32 %v3121_v24, %v3108_v38  ;;  %v3182_v30 = vadd.f32 %v3174_v50, %v3161_v36  ;;  %v7055_v42 = vadd.f32 %v3061_v39, %v3048_v19  ;;  %v3312_v50 = vmul.f32 %v7058_v25, %v6934_v34  ;;  %v7069_v38 = vld [vmem:[%s4976_s3 + $0x16] ss:$0 sm:$0xff]  ;;  %v3370_v24 = vld [vmem:[#allocation3 + $0x39] sm:$0xff]  ;;  %v7090_v19 = vld [vmem:[%s4976_s3 + $0x8] ss:$0 sm:$0xff] }
 0x33e   : > { %v3292_v36 = vmul.f32 %v7044_v21, %v6934_v34  ;;  %v3354_v57 = vmul.f32 %v7069_v38, %v6958_v16 }
 0x33f   : > { %v3162_v41 = vadd.f32 %v3154_v29, %v3129_v60  ;;  %v3203_v53 = vadd.f32 %v3195_v61, %v3182_v30  ;;  %8336 = vst [vmem:[#allocation162_spill] sm:$0xff] %v7055_v42  ;;  %v7188_v42 = vld [vmem:[%s4976_s3 + $0x13] ss:$0 sm:$0xff] }
 0x340   : > { %8340 = vst [vmem:[#allocation155_spill] sm:$0xff] %v7188_v42 }
 0x341   : > { %v3183_v26 = vadd.f32 %v3175_v27, %v3162_v41  ;;  %v3224_v20 = vadd.f32 %v3216_v22, %v3203_v53  ;;  %v3371_v41 = vld [vmem:[#allocation3 + $0x51] sm:$0xff]  ;;  %v7077_v27 = vld [vmem:[%s4976_s3 + $0x3] ss:$0 sm:$0xff]  ;;  %v3313_v22 = vmul.f32 %v7058_v25, %v6942_v43 }
 0x343   : > { %v3204_v2 = vadd.f32 %v3196_v63, %v3183_v26  ;;  %v3245_v0 = vadd.f32 %v3237_v44, %v3224_v20  ;;  %v3387_v63 = vmul.f32 %v7077_v27, %v3370_v24  ;;  %v7107_v24 = vld [vmem:[%s4976_s3 + $0xd] ss:$0 sm:$0xff] }
 0x345   : > { %v3225_v58 = vadd.f32 %v3217_v1, %v3204_v2  ;;  %v3278_v23 = vadd.f32 %v3270_v52, %v3245_v0  ;;  %v3059_v2 = vmul.f32 %v6955_v11, %v6972_v17 }
 0x347   : > { %v3246_v62 = vadd.f32 %v3238_v59, %v3225_v58  ;;  %v3299_v13 = vadd.f32 %v3291_v31, %v3278_v23  ;;  %v3408_v31 = vmul.f32 %v7090_v19, %v3371_v41  ;;  %v3334_v58 = vmul.f32 %v7064_v10, %v6958_v16 }
 0x348   : > { %v3046_v23 = vmul.f32 %v6952_v51, %v6965_v3 }
 0x349   : > { %v2992_v29 = vpop.f32.mrf.mxu0  ;;  %v3279_v30 = vadd.f32 %v3271_v47, %v3246_v62  ;;  %v3320_v61 = vadd.f32 %v3312_v50, %v3299_v13  ;;  %v3355_v62 = vmul.f32 %v7069_v38, %v6977_v4  ;;  %v7103_v13 = vld [vmem:[#allocation3 + $0x69] sm:$0xff]  ;;  %v3388_v50 = vmul.f32 %v7077_v27, %v3371_v41 }
 0x34a   : > { %v2993_v60 = vadd.f32 %v2992_v29, %v6930_v7  ;;  %v3080_v29 = vmul.f32 %v6968_v15, %v6998_v18  ;;  %v3060_v41 = vmul.f32 %v6955_v11, %v6998_v18  ;;  %v3047_v18 = vmul.f32 %v6952_v51, %v6972_v17 }
 0x34b   : > { %v2994_v53 = vpop.f32.mrf.mxu0  ;;  %v3300_v26 = vadd.f32 %v3292_v36, %v3279_v30  ;;  %v3341_v20 = vadd.f32 %v3333_v6, %v3320_v61  ;;  %v3487_v61 = vld [vmem:[#allocation3 + $0x3a] sm:$0xff] }
 0x34c   : > { %v7084_v44 = vmax.f32 %v2993_v60, 0.0  ;;  %v7087_v52 = vadd.f32 %v2994_v53, %v6895_v28  ;;  %v7116_v6 = vld [vmem:[#allocation3 + $0x81] sm:$0xff]  ;;  %v7119_v53 = vld [vmem:[%s4976_s3 + $0x12] ss:$0 sm:$0xff] }
 0x34d   : > { %v2996_v39 = vpop.f32.mrf.mxu0  ;;  %v3321_v0 = vadd.f32 %v3313_v22, %v3300_v26  ;;  %v3362_v59 = vadd.f32 %v3354_v57, %v3341_v20  ;;  %v3067_v22 = vadd.f32 %v3059_v2, %v3046_v23  ;;  %v3101_v57 = vmul.f32 %v6975_v37, %v7009_v8  ;;  %v7126_v20 = vld [vmem:[#allocation3 + $0x99] sm:$0xff] }
 0x34e   : > { %8337 = vst [vmem:[#allocation76_spill] sm:$0xff] %v7087_v52  ;;  %3023 = vst [vmem:[#allocation3 + $0xc8] sm:$0xff] %v7084_v44  ;;  %v2997_v1 = vadd.f32 %v2996_v39, %v6930_v7  ;;  %v3081_v2 = vmul.f32 %v6968_v15, %v7009_v8 }
 0x34f   : > { %v2998_v47 = vpop.f32.mrf.mxu0  ;;  %v3342_v3 = vadd.f32 %v3334_v58, %v3321_v0  ;;  %v3395_v30 = vadd.f32 %v3387_v63, %v3362_v59  ;;  %v3429_v63 = vmul.f32 %v7107_v24, %v7103_v13  ;;  %v7134_v0 = vld [vmem:[%s4976_s3 + $0x4] ss:$0 sm:$0xff]  ;;  %v3088_v59 = vadd.f32 %v3080_v29, %v3067_v22 }
 0x350   : > { %v7111_v36 = vmax.f32 %v2997_v1, 0.0  ;;  %v7114_v60 = vadd.f32 %v2998_v47, %v6895_v28  ;;  %v7131_v1 = vld [vmem:[%s4976_s3 + $0x17] ss:$0 sm:$0xff]  ;;  %v3504_v58 = vmul.f32 %v7134_v0, %v3487_v61 }
 0x351   : > { %v3363_v26 = vadd.f32 %v3355_v62, %v3342_v3  ;;  %v3416_v39 = vadd.f32 %v3408_v31, %v3395_v30  ;;  %v3409_v31 = vmul.f32 %v7090_v19, %v7103_v13  ;;  %v3450_v62 = vmul.f32 %v7119_v53, %v7116_v6  ;;  %v3488_v3 = vld [vmem:[#allocation3 + $0x52] sm:$0xff] }
 0x352   : > { %8338 = vst [vmem:[#allocation50_spill] sm:$0xff] %v7114_v60  ;;  %3024 = vst [vmem:[#allocation3 + $0xe0] sm:$0xff] %v7111_v36  ;;  %v3430_v30 = vmul.f32 %v7107_v24, %v7116_v6  ;;  %v3471_v17 = vmul.f32 %v7131_v1, %v7126_v20  ;;  %v3068_v60 = vadd.f32 %v3060_v41, %v3047_v18 }
 0x353   : > { %v3396_v47 = vadd.f32 %v3388_v50, %v3363_v26  ;;  %v3437_v23 = vadd.f32 %v3429_v63, %v3416_v39  ;;  %v3109_v29 = vadd.f32 %v3101_v57, %v3088_v59  ;;  %v7151_v50 = vld [vmem:[#allocation3 + $0xb1] sm:$0xff]  ;;  %v7154_v39 = vld [vmem:[%s4976_s3 + $0x9] ss:$0 sm:$0xff]  ;;  %v3451_v57 = vmul.f32 %v7119_v53, %v7126_v20 }
 0x354   : > { %v3525_v12 = vmul.f32 %v7154_v39, %v3488_v3  ;;  %v3089_v48 = vadd.f32 %v3081_v2, %v3068_v60  ;;  %v7165_v59 = vld [vmem:[#allocation3 + $0x6a] sm:$0xff]  ;;  %v3176_v60 = vmul.f32 %v7006_v35, %v7019_v14 }
 0x355   : > { %v7149_v61 = vld [vmem:[#allocation3 + $0xc6] sm:$0xff]  ;;  %v3417_v22 = vadd.f32 %v3409_v31, %v3396_v47  ;;  %v3458_v26 = vadd.f32 %v3450_v62, %v3437_v23  ;;  %v7168_v47 = vld [vmem:[%s4976_s3 + $0xe] ss:$0 sm:$0xff]  ;;  %v3472_v23 = vmul.f32 %v7131_v1, %v7151_v50  ;;  %v3505_v62 = vmul.f32 %v7134_v0, %v3488_v3 }
 0x356   : > { %v3102_v63 = vmul.f32 %v6975_v37, %v7149_v61  ;;  %v3122_v52 = vmul.f32 %v6991_v5, %v7149_v61  ;;  %8339 = vst [vmem:[#allocation77_spill] sm:$0xff] %v7168_v47  ;;  %v3197_v3 = vmul.f32 %v7014_v56, %v7024_v46 }
 0x357   : > { %v3438_v41 = vadd.f32 %v3430_v30, %v3417_v22  ;;  %v3479_v18 = vadd.f32 %v3471_v17, %v3458_v26 }
 0x358   : > { %v3130_v31 = vadd.f32 %v3122_v52, %v3109_v29  ;;  %v3110_v45 = vadd.f32 %v3102_v63, %v3089_v48  ;;  %v3156_v52 = vmul.f32 %v6996_v54, %v7019_v14  ;;  %v3546_v29 = vmul.f32 %v7168_v47, %v7165_v59  ;;  %v7185_v48 = vld [vmem:[#allocation3 + $0x82] sm:$0xff]  ;;  %v7209_v54 = vld [vmem:[%s4976_s3 + $0x18] ss:$0 sm:$0xff]  ;;  %s4722_s3 = smov (!%p4265_p13), 64  }
 0x359   : > { %v7173_v33 = vld [vmem:[#allocation3 + $0xde] sm:$0xff]  ;;  %v3459_v2 = vadd.f32 %v3451_v57, %v3438_v41  ;;  %v3512_v30 = vadd.f32 %v3504_v58, %v3479_v18  ;;  %v7192_v57 = vld [vmem:[#allocation3 + $0xc7] sm:$0xff]  ;;  %v3177_v14 = vmul.f32 %v7006_v35, %v7024_v46  ;;  %v3218_v18 = vmul.f32 %v7022_v49, %v7050_v40  ;;  %8341 = vst [vmem:[#allocation53_spill] sm:$0xff] %v7209_v54 }
 0x35a   : > { %v3123_v17 = vmul.f32 %v6991_v5, %v7173_v33  ;;  %v3163_v22 = vadd.f32 %v3155_v9, %v3130_v31  ;;  %v3526_v9 = vmul.f32 %v7154_v39, %v7165_v59  ;;  %v7198_v31 = vld [vmem:[#allocation3 + $0x9a] sm:$0xff] }
 0x35b   : > { %v3480_v26 = vadd.f32 %v3472_v23, %v3459_v2  ;;  %v3533_v63 = vadd.f32 %v3525_v12, %v3512_v30 }
 0x35c   : > { %v3131_v58 = vadd.f32 %v3123_v17, %v3110_v45  ;;  %v3184_v41 = vadd.f32 %v3176_v60, %v3163_v22  ;;  %v3547_v45 = vmul.f32 %v7168_v47, %v7185_v48  ;;  %v3567_v60 = vmul.f32 %v7188_v42, %v7185_v48  ;;  %v7206_v22 = vld [vmem:[#allocation3 + $0xb2] sm:$0xff] }
 0x35d   : > { %v3513_v23 = vadd.f32 %v3505_v62, %v3480_v26  ;;  %v3554_v12 = vadd.f32 %v3546_v29, %v3533_v63  ;;  %v3198_v17 = vmul.f32 %v7014_v56, %v7050_v40  ;;  %v3239_v62 = vmul.f32 %v7029_v55, %v7192_v57 }
 0x35e   : > { %v3164_v2 = vadd.f32 %v3156_v52, %v3131_v58  ;;  %v3205_v30 = vadd.f32 %v3197_v3, %v3184_v41  ;;  %v3272_v52 = vmul.f32 %v7036_v32, %v6934_v34  ;;  %v3568_v29 = vmul.f32 %v7188_v42, %v7198_v31  ;;  %v7217_v3 = vld [vmem:[#allocation3 + $0xdf] sm:$0xff] }
 0x35f   : > { %v3534_v35 = vadd.f32 %v3526_v9, %v3513_v23  ;;  %v3219_v26 = vmul.f32 %v7022_v49, %v7192_v57  ;;  %v3575_v58 = vadd.f32 %v3567_v60, %v3554_v12  ;;  %v3293_v34 = vmul.f32 %v7044_v21, %v6942_v43 }
 0x360   : > { %v3185_v46 = vadd.f32 %v3177_v14, %v3164_v2  ;;  %v3226_v5 = vadd.f32 %v3218_v18, %v3205_v30  ;;  %v3588_v14 = vmul.f32 %v7209_v54, %v7198_v31  ;;  %v3589_v18 = vmul.f32 %v7209_v54, %v7206_v22 }
 0x361   : > { %v3555_v63 = vadd.f32 %v3547_v45, %v3534_v35  ;;  %v3240_v30 = vmul.f32 %v7029_v55, %v7217_v3  ;;  %v3273_v35 = vmul.f32 %v7036_v32, %v6942_v43  ;;  %v3315_v43 = vmul.f32 %v7058_v25, %v6977_v4 }
 0x362   : > { %v3206_v41 = vadd.f32 %v3198_v17, %v3185_v46  ;;  %v3247_v9 = vadd.f32 %v3239_v62, %v3226_v5  ;;  %v3314_v5 = vmul.f32 %v7058_v25, %v6958_v16  ;;  %v3596_v46 = vadd.f32 %v3588_v14, %v3575_v58 }
 0x363   : > { %v3576_v23 = vadd.f32 %v3568_v29, %v3555_v63  ;;  %v3294_v17 = vmul.f32 %v7044_v21, %v6958_v16  ;;  %v3335_v63 = vmul.f32 %v7064_v10, %v6977_v4  ;;  %v3356_v58 = vmul.f32 %v7069_v38, %v7084_v44 }
 0x364   : > { %v3227_v2 = vadd.f32 %v3219_v26, %v3206_v41  ;;  %v3280_v56 = vadd.f32 %v3272_v52, %v3247_v9  ;;  %v3336_v14 = vmul.f32 %v7064_v10, %v7084_v44 }
 0x365   : > { %v3597_v12 = vadd.f32 %v3589_v18, %v3576_v23  ;;  %v3357_v23 = vmul.f32 %v7069_v38, %v7111_v36 }
 0x366   : > { %v3248_v45 = vadd.f32 %v3240_v30, %v3227_v2  ;;  %v3301_v60 = vadd.f32 %v3293_v34, %v3280_v56  ;;  %v3389_v56 = vmul.f32 %v7077_v27, %v7103_v13  ;;  %v3410_v30 = vmul.f32 %v7090_v19, %v7116_v6 }
 0x367   : > { %v3604_v62 = vpack.c.bf16 %v3597_v12, %v3596_v46  ;;  %v3431_v13 = vmul.f32 %v7107_v24, %v7126_v20  ;;  %v7253_v12 = vld [vmem:[#allocation3 + $0xc9] sm:$0xff] }
 0x368   : > { %v3281_v29 = vadd.f32 %v3273_v35, %v3248_v45  ;;  %v3322_v26 = vadd.f32 %v3314_v5, %v3301_v60  ;;  %v3390_v35 = vmul.f32 %v7077_v27, %v7116_v6  ;;  %v3411_v60 = vmul.f32 %v7090_v19, %v7126_v20 }
 0x369   : > { %4343 = vmatprep.mubr.bf16.mxu1 %v3604_v62  ;;  %v3452_v62 = vmul.f32 %v7119_v53, %v7151_v50 }
 0x36a   : > { %v3302_v52 = vadd.f32 %v3294_v17, %v3281_v29  ;;  %v3343_v41 = vadd.f32 %v3335_v63, %v3322_v26  ;;  %v3432_v26 = vmul.f32 %v7107_v24, %v7151_v50  ;;  %v3473_v63 = vmul.f32 %v7131_v1, %v7253_v12 }
 0x36c   : > { %v3323_v9 = vadd.f32 %v3315_v43, %v3302_v52  ;;  %v3364_v18 = vadd.f32 %v3356_v58, %v3343_v41  ;;  %v7263_v52 = vld [vmem:[#allocation3 + $0xe1] sm:$0xff]  ;;  %v3506_v41 = vmul.f32 %v7134_v0, %v7165_v59 }
 0x36e   : > { %v3344_v34 = vadd.f32 %v3336_v14, %v3323_v9  ;;  %v3397_v2 = vadd.f32 %v3389_v56, %v3364_v18  ;;  %v3453_v56 = vmul.f32 %v7119_v53, %v7253_v12 }
 0x370   : > { %v3365_v5 = vadd.f32 %v3357_v23, %v3344_v34  ;;  %v3418_v46 = vadd.f32 %v3410_v30, %v3397_v2  ;;  %v3474_v23 = vmul.f32 %v7131_v1, %v7263_v52  ;;  %v3527_v30 = vmul.f32 %v7154_v39, %v7185_v48 }
 0x372   : > { %v3398_v45 = vadd.f32 %v3390_v35, %v3365_v5  ;;  %v3439_v17 = vadd.f32 %v3431_v13, %v3418_v46  ;;  %v3507_v46 = vmul.f32 %v7134_v0, %v7185_v48  ;;  %v3082_v48 = vmul.f32 %v6968_v15, %v7149_v61 }
 0x374   : > { %v3419_v29 = vadd.f32 %v3411_v60, %v3398_v45  ;;  %v3460_v6 = vadd.f32 %v3452_v62, %v3439_v17  ;;  %v3548_v60 = vmul.f32 %v7168_v47, %v7198_v31 }
 0x376   : > { %v3002_v43 = vpop.f32.mrf.mxu0  ;;  %v3440_v58 = vadd.f32 %v3432_v26, %v3419_v29  ;;  %v3481_v9 = vadd.f32 %v3473_v63, %v3460_v6  ;;  %v3528_v29 = vmul.f32 %v7154_v39, %v7198_v31  ;;  %v7289_v63 = vld [vmem:[#allocation3 + $0xca] sm:$0xff] }
 0x377   : > { %v3003_v14 = vadd.f32 %v3002_v43, %v6930_v7 }
 0x378   : > { %v3004_v18 = vpop.f32.mrf.mxu0  ;;  %v3461_v34 = vadd.f32 %v3453_v56, %v3440_v58  ;;  %v3514_v2 = vadd.f32 %v3506_v41, %v3481_v9  ;;  %v3549_v41 = vmul.f32 %v7168_v47, %v7206_v22  ;;  %v3569_v58 = vmul.f32 %v7188_v42, %v7206_v22  ;;  %v3037_v56 = vld [vmem:[#allocation3 + $0x126] sm:$0xff] }
 0x379   : > { %v7274_v35 = vmax.f32 %v3003_v14, 0.0  ;;  %v7277_v59 = vadd.f32 %v3004_v18, %v6895_v28  ;;  %v7300_v9 = vld [vmem:[#allocation3 + $0xe2] sm:$0xff]  ;;  %v3103_v14 = vmul.f32 %v6975_v37, %v7173_v33  ;;  %v8346_v28 = vld [vmem:[#allocation107_spill] sm:$0xff] }
 0x37a   : > { %v3006_v5 = vpop.f32.mrf.mxu0  ;;  %v3482_v13 = vadd.f32 %v3474_v23, %v3461_v34  ;;  %v3535_v45 = vadd.f32 %v3527_v30, %v3514_v2  ;;  %8343 = vst [vmem:[#allocation66_spill] sm:$0xff] %v7300_v9  ;;  %v3570_v34 = vmul.f32 %v7188_v42, %v7289_v63  ;;  %v3049_v2 = vmul.f32 %v6952_v51, %v7009_v8  ;;  %v8345_v8 = vld [vmem:[#allocation136_spill] sm:$0xff] }
 0x37b   : > { %8342 = vst [vmem:[#allocation65_spill] sm:$0xff] %v7277_v59  ;;  %3025 = vst [vmem:[#allocation3 + $0xf8] sm:$0xff] %v7274_v35  ;;  %v3007_v17 = vadd.f32 %v3006_v5, %v6930_v7  ;;  %v3062_v7 = vmul.f32 %v6955_v11, %v7149_v61  ;;  %v3083_v30 = vmul.f32 %v6968_v15, %v7173_v33  ;;  %v8344_v5 = vld [vmem:[#allocation162_spill] sm:$0xff] }
 0x37c   : > { %v3515_v62 = vadd.f32 %v3507_v46, %v3482_v13  ;;  %v3556_v26 = vadd.f32 %v3548_v60, %v3535_v45  ;;  %v3090_v46 = vadd.f32 %v3082_v48, %v8344_v5  ;;  %v3106_v13 = vmul.f32 %v6975_v37, %v3037_v56 }
 0x37d   : > { %v7287_v6 = vmax.f32 %v3007_v17, 0.0  ;;  %v3590_v60 = vmul.f32 %v7209_v54, %v7289_v63  ;;  %v3591_v17 = vmul.f32 %v7209_v54, %v7300_v9  ;;  %v3126_v59 = vmul.f32 %v8345_v8, %v3037_v56  ;;  %v8348_v54 = vld [vmem:[#allocation91_spill] sm:$0xff] }
 0x37e   : > { %v3536_v43 = vadd.f32 %v3528_v29, %v3515_v62  ;;  %v3577_v23 = vadd.f32 %v3569_v58, %v3556_v26  ;;  %v3070_v29 = vadd.f32 %v3062_v7, %v3049_v2  ;;  %v3063_v58 = vmul.f32 %v6955_v11, %v7173_v33 }
 0x37f   : > { %3026 = vst [vmem:[#allocation3 + $0x110] sm:$0xff] %v7287_v6  ;;  %v3050_v7 = vmul.f32 %v6952_v51, %v7149_v61  ;;  %v3178_v9 = vmul.f32 %v8348_v54, %v7050_v40  ;;  %v8349_v61 = vld [vmem:[#allocation92_spill] sm:$0xff] }
 0x380   : > { %v3557_v18 = vadd.f32 %v3549_v41, %v3536_v43  ;;  %v3111_v43 = vadd.f32 %v3103_v14, %v3090_v46  ;;  %v3598_v48 = vadd.f32 %v3590_v60, %v3577_v23  ;;  %v3091_v42 = vadd.f32 %v3083_v30, %v3070_v29  ;;  %v3038_v60 = vld [vmem:[#allocation3 + $0x13e] sm:$0xff] }
 0x381   : > { %v3051_v23 = vmul.f32 %v6952_v51, %v7173_v33  ;;  %v3199_v29 = vmul.f32 %v8349_v61, %v7192_v57 }
 0x382   : > { %v3578_v45 = vadd.f32 %v3570_v34, %v3557_v18  ;;  %v3035_v62 = vld [vmem:[#allocation3 + $0xf6] sm:$0xff] }
 0x383   : > { %v3104_v26 = vmul.f32 %v6975_v37, %v3035_v62  ;;  %v3124_v41 = vmul.f32 %v8345_v8, %v3035_v62  ;;  %v8347_v18 = vld [vmem:[#allocation106_spill] sm:$0xff]  ;;  %v3064_v2 = vmul.f32 %v6955_v11, %v3035_v62 }
 0x384   : > { %v3599_v5 = vadd.f32 %v3591_v17, %v3578_v45  ;;  %v3157_v34 = vmul.f32 %v8347_v18, %v8346_v28  ;;  %v3084_v45 = vmul.f32 %v6968_v15, %v3035_v62  ;;  %v3071_v17 = vadd.f32 %v3063_v58, %v3050_v7  ;;  %v3144_v62 = vld [vmem:[#allocation3 + $0xf7] sm:$0xff] }
 0x385   : > { %v3132_v47 = vadd.f32 %v3124_v41, %v3111_v43  ;;  %v3112_v28 = vadd.f32 %v3104_v26, %v3091_v42  ;;  %v3158_v11 = vmul.f32 %v8347_v18, %v7050_v40  ;;  %v3072_v43 = vadd.f32 %v3064_v2, %v3051_v23 }
 0x386   : > { %v3605_v14 = vpack.c.bf16 %v3599_v5, %v3598_v48  ;;  %v3036_v46 = vld [vmem:[#allocation3 + $0x10e] sm:$0xff]  ;;  %v3092_v33 = vadd.f32 %v3084_v45, %v3071_v17  ;;  %v3274_v26 = vmul.f32 %v7036_v32, %v6958_v16  ;;  %v3127_v40 = vmul.f32 %v8345_v8, %v3038_v60 }
 0x387   : > { %v3125_v56 = vmul.f32 %v8345_v8, %v3036_v46  ;;  %v3165_v30 = vadd.f32 %v3157_v34, %v3132_v47  ;;  %v3085_v41 = vmul.f32 %v6968_v15, %v3036_v46  ;;  %v3105_v42 = vmul.f32 %v6975_v37, %v3036_v46  ;;  %v3146_v45 = vld [vmem:[#allocation3 + $0x127] sm:$0xff] }
 0x388   : > { %4344 = vmatmul.mubr.bf16.vlgmr.msra.gmra.mxu1 %v3605_v14  ;;  %v3179_v47 = vmul.f32 %v8348_v54, %v7192_v57  ;;  %v3220_v15 = vmul.f32 %v7022_v49, %v7217_v3  ;;  %v3275_v37 = vmul.f32 %v7036_v32, %v6977_v4  ;;  %v3159_v14 = vmul.f32 %v8347_v18, %v7192_v57 }
 0x389   : > { %v3133_v48 = vadd.f32 %v3125_v56, %v3112_v28  ;;  %v3186_v51 = vadd.f32 %v3178_v9, %v3165_v30  ;;  %v3093_v58 = vadd.f32 %v3085_v41, %v3072_v43  ;;  %v3113_v7 = vadd.f32 %v3105_v42, %v3092_v33  ;;  %v3145_v28 = vld [vmem:[#allocation3 + $0x10f] sm:$0xff] }
 0x38a   : > { %v3200_v9 = vmul.f32 %v8349_v61, %v7217_v3  ;;  %v3241_v8 = vmul.f32 %v7029_v55, %v3144_v62  ;;  %v3295_v56 = vmul.f32 %v7044_v21, %v6977_v4  ;;  %v3160_v60 = vmul.f32 %v8347_v18, %v7217_v3  ;;  %v3147_v18 = vld [vmem:[#allocation3 + $0x13f] sm:$0xff] }
 0x38b   : > { %v3166_v5 = vadd.f32 %v3158_v11, %v3133_v48  ;;  %v3207_v34 = vadd.f32 %v3199_v29, %v3186_v51  ;;  %v3114_v2 = vadd.f32 %v3106_v13, %v3093_v58  ;;  %v3134_v23 = vadd.f32 %v3126_v59, %v3113_v7 }
 0x38c   : > { %v3180_v13 = vmul.f32 %v8348_v54, %v7217_v3  ;;  %v3221_v57 = vmul.f32 %v7022_v49, %v3144_v62  ;;  %v3181_v59 = vmul.f32 %v8348_v54, %v3144_v62  ;;  %v3201_v41 = vmul.f32 %v8349_v61, %v3144_v62 }
 0x38d   : > { %v3187_v16 = vadd.f32 %v3179_v47, %v3166_v5  ;;  %v3228_v46 = vadd.f32 %v3220_v15, %v3207_v34  ;;  %v3135_v30 = vadd.f32 %v3127_v40, %v3114_v2  ;;  %v3167_v29 = vadd.f32 %v3159_v14, %v3134_v23  ;;  %v3263_v47 = vld [vmem:[#allocation3 + $0x128] sm:$0xff] }
 0x38e   : > { %v3223_v48 = vmul.f32 %v7022_v49, %v3146_v45  ;;  %v3242_v51 = vmul.f32 %v7029_v55, %v3145_v28  ;;  %v3316_v3 = vmul.f32 %v7058_v25, %v7084_v44  ;;  %v3202_v40 = vmul.f32 %v8349_v61, %v3145_v28 }
 0x38f   : > { %v3208_v17 = vadd.f32 %v3200_v9, %v3187_v16  ;;  %v3249_v11 = vadd.f32 %v3241_v8, %v3228_v46  ;;  %v3168_v43 = vadd.f32 %v3160_v60, %v3135_v30  ;;  %v3188_v42 = vadd.f32 %v3180_v13, %v3167_v29 }
 0x390   : > { %v3243_v5 = vmul.f32 %v7029_v55, %v3146_v45  ;;  %v3222_v15 = vmul.f32 %v7022_v49, %v3145_v28  ;;  %v3296_v7 = vmul.f32 %v7044_v21, %v7084_v44  ;;  %v3244_v9 = vmul.f32 %v7029_v55, %v3147_v18 }
 0x391   : > { %v3229_v4 = vadd.f32 %v3221_v57, %v3208_v17  ;;  %v3282_v33 = vadd.f32 %v3274_v26, %v3249_v11  ;;  %v3189_v58 = vadd.f32 %v3181_v59, %v3168_v43  ;;  %v3209_v62 = vadd.f32 %v3201_v41, %v3188_v42 }
 0x392   : > { %v3340_v2 = vmul.f32 %v7064_v10, %v3263_v47  ;;  %v3337_v61 = vmul.f32 %v7064_v10, %v7111_v36  ;;  %v3317_v8 = vmul.f32 %v7058_v25, %v7111_v36  ;;  %v3276_v49 = vmul.f32 %v7036_v32, %v7084_v44 }
 0x393   : > { %v3250_v54 = vadd.f32 %v3242_v51, %v3229_v4  ;;  %v3303_v34 = vadd.f32 %v3295_v56, %v3282_v33  ;;  %v3210_v26 = vadd.f32 %v3202_v40, %v3189_v58  ;;  %v3230_v46 = vadd.f32 %v3222_v15, %v3209_v62  ;;  %v3264_v4 = vld [vmem:[#allocation3 + $0x140] sm:$0xff]  ;;  %v3380_v33 = vld [vmem:[#allocation3 + $0x129] sm:$0xff] }
 0x394   : > { %v3360_v45 = vmul.f32 %v7069_v38, %v3263_v47  ;;  %v3358_v55 = vmul.f32 %v7069_v38, %v7274_v35  ;;  %v3391_v30 = vmul.f32 %v7077_v27, %v7126_v20  ;;  %v3277_v13 = vmul.f32 %v7036_v32, %v7111_v36 }
 0x395   : > { %v3283_v14 = vadd.f32 %v3275_v37, %v3250_v54  ;;  %v3324_v16 = vadd.f32 %v3316_v3, %v3303_v34  ;;  %v3231_v23 = vadd.f32 %v3223_v48, %v3210_v26  ;;  %v3251_v37 = vadd.f32 %v3243_v5, %v3230_v46  ;;  %v3378_v5 = vld [vmem:[#allocation3 + $0xf9] sm:$0xff] }
 0x396   : > { %v3297_v17 = vmul.f32 %v7044_v21, %v7111_v36  ;;  %v3338_v44 = vmul.f32 %v7064_v10, %v7274_v35  ;;  %v3412_v43 = vmul.f32 %v7090_v19, %v7151_v50  ;;  %v3298_v20 = vmul.f32 %v7044_v21, %v7274_v35 }
 0x397   : > { %v3304_v28 = vadd.f32 %v3296_v7, %v3283_v14  ;;  %v3345_v56 = vadd.f32 %v3337_v61, %v3324_v16  ;;  %v3252_v60 = vadd.f32 %v3244_v9, %v3231_v23  ;;  %v3284_v29 = vadd.f32 %v3276_v49, %v3251_v37  ;;  %v3379_v16 = vld [vmem:[#allocation3 + $0x111] sm:$0xff] }
 0x398   : > { %v3318_v41 = vmul.f32 %v7058_v25, %v7274_v35  ;;  %v3359_v36 = vmul.f32 %v7069_v38, %v7287_v6  ;;  %v3392_v18 = vmul.f32 %v7077_v27, %v7151_v50  ;;  %v3433_v42 = vmul.f32 %v7107_v24, %v7253_v12 }
 0x399   : > { %v3325_v57 = vadd.f32 %v3317_v8, %v3304_v28  ;;  %v3366_v11 = vadd.f32 %v3358_v55, %v3345_v56  ;;  %v3285_v59 = vadd.f32 %v3277_v13, %v3252_v60  ;;  %v3305_v51 = vadd.f32 %v3297_v17, %v3284_v29 }
 0x39a   : > { %v3319_v21 = vmul.f32 %v7058_v25, %v7287_v6  ;;  %v3339_v40 = vmul.f32 %v7064_v10, %v7287_v6  ;;  %v3413_v54 = vmul.f32 %v7090_v19, %v7253_v12  ;;  %v3361_v50 = vmul.f32 %v7069_v38, %v3264_v4 }
 0x39b   : > { %v3346_v32 = vadd.f32 %v3338_v44, %v3325_v57  ;;  %v3399_v48 = vadd.f32 %v3391_v30, %v3366_v11  ;;  %v3306_v47 = vadd.f32 %v3298_v20, %v3285_v59  ;;  %v3326_v58 = vadd.f32 %v3318_v41, %v3305_v51  ;;  %v3381_v57 = vld [vmem:[#allocation3 + $0x141] sm:$0xff] }
 0x39c   : > { %v3457_v62 = vmul.f32 %v7119_v53, %v3380_v33  ;;  %v3454_v25 = vmul.f32 %v7119_v53, %v7263_v52  ;;  %v3434_v9 = vmul.f32 %v7107_v24, %v7263_v52  ;;  %v3393_v10 = vmul.f32 %v7077_v27, %v7253_v12  ;;  %v8350_v11 = vld [vmem:[#allocation77_spill] sm:$0xff] }
 0x39d   : > { %v3367_v3 = vadd.f32 %v3359_v36, %v3346_v32  ;;  %v3420_v35 = vadd.f32 %v3412_v43, %v3399_v48  ;;  %v3327_v34 = vadd.f32 %v3319_v21, %v3306_v47  ;;  %v3347_v26 = vadd.f32 %v3339_v40, %v3326_v58 }
 0x39e   : > { %v3477_v6 = vmul.f32 %v7131_v1, %v3380_v33  ;;  %v3475_v46 = vmul.f32 %v7131_v1, %v3378_v5  ;;  %v3508_v23 = vmul.f32 %v7134_v0, %v7198_v31  ;;  %v3394_v28 = vmul.f32 %v7077_v27, %v7263_v52 }
 0x39f   : > { %v3400_v15 = vadd.f32 %v3392_v18, %v3367_v3  ;;  %v3441_v7 = vadd.f32 %v3433_v42, %v3420_v35  ;;  %v3348_v14 = vadd.f32 %v3340_v2, %v3327_v34  ;;  %v3368_v8 = vadd.f32 %v3360_v45, %v3347_v26  ;;  %v3495_v18 = vld [vmem:[#allocation3 + $0xfa] sm:$0xff]  ;;  %v8351_v42 = vld [vmem:[#allocation66_spill] sm:$0xff] }
 0x3a0   : > { %v3414_v2 = vmul.f32 %v7090_v19, %v7263_v52  ;;  %v3455_v12 = vmul.f32 %v7119_v53, %v3378_v5  ;;  %v3476_v30 = vmul.f32 %v7131_v1, %v3379_v16  ;;  %v3529_v45 = vmul.f32 %v7154_v39, %v7206_v22  ;;  %v8352_v3 = vld [vmem:[#allocation155_spill] sm:$0xff] }
 0x3a1   : > { %v3421_v61 = vadd.f32 %v3413_v54, %v3400_v15  ;;  %v3462_v38 = vadd.f32 %v3454_v25, %v3441_v7  ;;  %v3369_v49 = vadd.f32 %v3361_v50, %v3348_v14  ;;  %v3401_v37 = vadd.f32 %v3393_v10, %v3368_v8  ;;  %v3497_v15 = vld [vmem:[#allocation3 + $0x12a] sm:$0xff] }
 0x3a2   : > { %v3415_v31 = vmul.f32 %v7090_v19, %v3378_v5  ;;  %v3435_v44 = vmul.f32 %v7107_v24, %v3378_v5  ;;  %v3509_v52 = vmul.f32 %v7134_v0, %v7206_v22  ;;  %v3550_v29 = vmul.f32 %v8350_v11, %v7289_v63  ;;  %v8353_v25 = vld [vmem:[#allocation53_spill] sm:$0xff] }
 0x3a3   : > { %v3442_v56 = vadd.f32 %v3434_v9, %v3421_v61  ;;  %v3483_v55 = vadd.f32 %v3475_v46, %v3462_v38  ;;  %v3402_v60 = vadd.f32 %v3394_v28, %v3369_v49  ;;  %v3422_v27 = vadd.f32 %v3414_v2, %v3401_v37 }
 0x3a4   : > { %v3436_v59 = vmul.f32 %v7107_v24, %v3379_v16  ;;  %v3456_v19 = vmul.f32 %v7119_v53, %v3379_v16  ;;  %v3478_v48 = vmul.f32 %v7131_v1, %v3381_v57  ;;  %v3530_v51 = vmul.f32 %v7154_v39, %v7289_v63  ;;  %v3496_v1 = vld [vmem:[#allocation3 + $0x112] sm:$0xff] }
 0x3a5   : > { %v3463_v13 = vadd.f32 %v3455_v12, %v3442_v56  ;;  %v3516_v17 = vadd.f32 %v3508_v23, %v3483_v55  ;;  %v3423_v43 = vadd.f32 %v3415_v31, %v3402_v60  ;;  %v3443_v32 = vadd.f32 %v3435_v44, %v3422_v27  ;;  %v1230_v31 = vld [vmem:[#allocation4 + $0x7] sm:$0xff]  ;;  %v1240_v57 = vld [vmem:[#allocation5 + $0x7] sm:$0xff]  ;;  %v1241_v27 = vld [vmem:[#allocation5 + $0x1f] sm:$0xff] }
 0x3a6   : > { %v3551_v47 = vmul.f32 %v8350_v11, %v8351_v42  ;;  %v3571_v35 = vmul.f32 %v8352_v3, %v8351_v42  ;;  %v3510_v53 = vmul.f32 %v7134_v0, %v7289_v63  ;;  %v3511_v5 = vmul.f32 %v7134_v0, %v8351_v42  ;;  %v1242_v44 = vld [vmem:[#allocation5 + $0x37] sm:$0xff] }
 0x3a7   : > { %v3484_v20 = vadd.f32 %v3476_v30, %v3463_v13  ;;  %v3537_v41 = vadd.f32 %v3529_v45, %v3516_v17  ;;  %v3444_v36 = vadd.f32 %v3436_v59, %v3423_v43  ;;  %v3464_v22 = vadd.f32 %v3456_v19, %v3443_v32  ;;  %v1231_v13 = vld [vmem:[#allocation4 + $0x1f] sm:$0xff]  ;;  %v1232_v17 = vld [vmem:[#allocation4 + $0x37] sm:$0xff]  ;;  %v7458_v59 = vld [vmem:[#allocation4 + $0x67] sm:$0xff] }
 0x3a8   : > { %v3531_v54 = vmul.f32 %v7154_v39, %v8351_v42  ;;  %v3572_v50 = vmul.f32 %v8352_v3, %v3495_v18  ;;  %v3592_v26 = vmul.f32 %v8353_v25, %v3495_v18  ;;  %v3532_v14 = vmul.f32 %v7154_v39, %v3495_v18  ;;  %v1282_v42 = vld [vmem:[#allocation4 + $0x8] sm:$0xff] }
 0x3a9   : > { %v3517_v4 = vadd.f32 %v3509_v52, %v3484_v20  ;;  %v3558_v33 = vadd.f32 %v3550_v29, %v3537_v41  ;;  %v3465_v21 = vadd.f32 %v3457_v62, %v3444_v36  ;;  %v3485_v58 = vadd.f32 %v3477_v6, %v3464_v22  ;;  %v3498_v6 = vld [vmem:[#allocation3 + $0x142] sm:$0xff]  ;;  %v1233_v52 = vld [vmem:[#allocation4 + $0x4f] sm:$0xff]  ;;  %v7460_v20 = vld [vmem:[#allocation5 + $0x67] sm:$0xff] }
 0x3aa   : > { %v3593_v10 = vmul.f32 %v8353_v25, %v3496_v1  ;;  %v3552_v0 = vmul.f32 %v8350_v11, %v3495_v18  ;;  %v3553_v38 = vmul.f32 %v8350_v11, %v3496_v1  ;;  %v3574_v46 = vmul.f32 %v8352_v3, %v3497_v15  ;;  %v1243_v11 = vld [vmem:[#allocation5 + $0x4f] sm:$0xff] }
 0x3ab   : > { %v3538_v24 = vadd.f32 %v3530_v51, %v3517_v4  ;;  %v3486_v40 = vadd.f32 %v3478_v48, %v3465_v21  ;;  %v3579_v62 = vadd.f32 %v3571_v35, %v3558_v33  ;;  %v3518_v7 = vadd.f32 %v3510_v53, %v3485_v58  ;;  %v7466_v51 = vld [vmem:[#allocation4 + $0x7f] sm:$0xff]  ;;  %v7468_v33 = vld [vmem:[#allocation5 + $0x7f] sm:$0xff] }
 0x3ac   : > { %v3573_v28 = vmul.f32 %v8352_v3, %v3496_v1  ;;  %v3594_v39 = vmul.f32 %v8353_v25, %v3497_v15  ;;  %v3595_v56 = vmul.f32 %v8353_v25, %v3498_v6  ;;  %v1252_v29 = vmax.f32 %v1232_v17, %v1233_v52  ;;  %v1292_v3 = vld [vmem:[#allocation5 + $0x8] sm:$0xff]  ;;  %v1294_v35 = vld [vmem:[#allocation5 + $0x38] sm:$0xff]  ;;  %v1293_v15 = vld [vmem:[#allocation5 + $0x20] sm:$0xff] }
 0x3ad   : > { %v3559_v34 = vadd.f32 %v3551_v47, %v3538_v24  ;;  %v3519_v9 = vadd.f32 %v3511_v5, %v3486_v40  ;;  %v3539_v16 = vadd.f32 %v3531_v54, %v3518_v7  ;;  %v3600_v8 = vadd.f32 %v3592_v26, %v3579_v62  ;;  %v1284_v24 = vld [vmem:[#allocation4 + $0x38] sm:$0xff]  ;;  %v1283_v5 = vld [vmem:[#allocation4 + $0x20] sm:$0xff]  ;;  %v1285_v7 = vld [vmem:[#allocation4 + $0x50] sm:$0xff] }
 0x3ae   : > { %v1260_v43 = vadd.f32 %v1243_v11, %v1242_v44  ;;  %v1250_v41 = vmax.f32 %v1230_v31, %v1231_v13  ;;  %v1258_v32 = vadd.f32 %v1241_v27, %v1240_v57  ;;  %v1268_v19 = vmax.f32 %v1252_v29, %v7458_v59  ;;  %v1295_v25 = vld [vmem:[#allocation5 + $0x50] sm:$0xff]  ;;  %v7474_v6 = vld [vmem:[#allocation5 + $0x68] sm:$0xff] }
 0x3af   : > { %v3580_v63 = vadd.f32 %v3572_v50, %v3559_v34  ;;  %v3540_v61 = vadd.f32 %v3532_v14, %v3519_v9  ;;  %v3560_v49 = vadd.f32 %v3552_v0, %v3539_v16  ;;  %v1253_v48 = vmax.f32 %v1233_v52, %v7458_v59 }
 0x3b0   : > { %v1276_v36 = vadd.f32 %v1260_v43, %v7460_v20  ;;  %v1261_v4 = vadd.f32 %v7460_v20, %v1243_v11  ;;  %v1266_v22 = vmax.f32 %v1250_v41, %v1232_v17  ;;  %v1274_v18 = vadd.f32 %v1258_v32, %v1242_v44  ;;  %v1361_v43 = vld [vmem:[#allocation5 + $0x21] sm:$0xff]  ;;  %v1363_v32 = vld [vmem:[#allocation5 + $0x51] sm:$0xff] }
 0x3b1   : > { %v3601_v23 = vadd.f32 %v3593_v10, %v3580_v63  ;;  %v3561_v2 = vadd.f32 %v3553_v38, %v3540_v61  ;;  %v3581_v55 = vadd.f32 %v3573_v28, %v3560_v49  ;;  %v1251_v47 = vmax.f32 %v1231_v13, %v1232_v17  ;;  %v7472_v10 = vld [vmem:[#allocation4 + $0x68] sm:$0xff]  ;;  %v7480_v28 = vld [vmem:[#allocation4 + $0x80] sm:$0xff]  ;;  %v1353_v41 = vld [vmem:[#allocation4 + $0x51] sm:$0xff] }
 0x3b2   : > { %v1259_v21 = vadd.f32 %v1242_v44, %v1241_v27  ;;  %v1304_v58 = vmax.f32 %v1268_v19, %v1284_v24  ;;  %v1312_v53 = vadd.f32 %v1294_v35, %v1276_v36  ;;  %v1269_v1 = vmax.f32 %v1253_v48, %v7466_v51  ;;  %v1351_v27 = vld [vmem:[#allocation4 + $0x21] sm:$0xff] }
 0x3b3   : > { %v3606_v12 = vpack.c.bf16 %v3601_v23, %v3600_v8  ;;  %v3582_v37 = vadd.f32 %v3574_v46, %v3561_v2  ;;  %v3602_v30 = vadd.f32 %v3594_v39, %v3581_v55  ;;  %v1277_v40 = vadd.f32 %v1261_v4, %v7468_v33  ;;  %v7482_v2 = vld [vmem:[#allocation5 + $0x80] sm:$0xff] }
 0x3b4   : > { %v1302_v54 = vmax.f32 %v1266_v22, %v1282_v42  ;;  %v1310_v34 = vadd.f32 %v1292_v3, %v1274_v18  ;;  %v1267_v50 = vmax.f32 %v1251_v47, %v1233_v52  ;;  %v1275_v62 = vadd.f32 %v1259_v21, %v1243_v11  ;;  %v7486_v22 = vld [vmem:[#allocation4 + $0x69] sm:$0xff]  ;;  %v7488_v18 = vld [vmem:[#allocation5 + $0x69] sm:$0xff] }
 0x3b5   : > { %4347 = vmatprep.mubr.bf16.mxu1 %v3606_v12  ;;  %v3603_v45 = vadd.f32 %v3595_v56, %v3582_v37  ;;  %v1320_v26 = vmax.f32 %v1304_v58, %v1285_v7  ;;  %v1328_v9 = vadd.f32 %v1312_v53, %v1295_v25  ;;  %v1305_v14 = vmax.f32 %v1269_v1, %v1285_v7  ;;  %v1350_v12 = vld [vmem:[#allocation4 + $0x9] sm:$0xff] }
 0x3b6   : > { %v1313_v63 = vadd.f32 %v1295_v25, %v1277_v40  ;;  %v1318_v16 = vmax.f32 %v1302_v54, %v1283_v5  ;;  %v1326_v0 = vadd.f32 %v1310_v34, %v1293_v15  ;;  %v1303_v61 = vmax.f32 %v1267_v50, %v1283_v5  ;;  %v1446_v1 = vld [vmem:[%s8354_s11 + $0x10] sm:$0xff]  ;;  %v7497_v40 = vld [vmem:[#allocation4 + $0x81] sm:$0xff] }
 0x3b7   : > { %v3607_v60 = vpack.c.bf16 %v3603_v45, %v3602_v30  ;;  %v1311_v38 = vadd.f32 %v1293_v15, %v1275_v62  ;;  %v1336_v46 = vmax.f32 %v1320_v26, %v7472_v10  ;;  %v1344_v8 = vadd.f32 %v1328_v9, %v7474_v6  ;;  %v1352_v30 = vld [vmem:[#allocation4 + $0x39] sm:$0xff]  ;;  %v7499_v5 = vld [vmem:[#allocation5 + $0x81] sm:$0xff] }
 0x3b8   : > { %v1321_v23 = vmax.f32 %v1305_v14, %v7472_v10  ;;  %v1329_v49 = vadd.f32 %v1313_v63, %v7474_v6  ;;  %v1334_v39 = vmax.f32 %v1318_v16, %v1284_v24  ;;  %v1342_v56 = vadd.f32 %v1326_v0, %v1294_v35  ;;  %v1360_v45 = vld [vmem:[#allocation5 + $0x9] sm:$0xff] }
 0x3b9   : > { %4348 = vmatmul.mubr.bf16.gmra.mxu1 %v3607_v60  ;;  %v1319_v55 = vmax.f32 %v1303_v61, %v1284_v24  ;;  %v1327_v37 = vadd.f32 %v1311_v38, %v1294_v35  ;;  %v1362_v60 = vld [vmem:[#allocation5 + $0x39] sm:$0xff]  ;;  %v1372_v31 = vmax.f32 %v1336_v46, %v1352_v30  ;;  %v7502_v15 = vld [vmem:[%s5003_s23] ss:$0 sm:$0xff]  ;;  %v1447_v63 = vld [vmem:[%s8354_s11 + $0x18] sm:$0xff] }
 0x3ba   : > { %v1380_v13 = vadd.f32 %v1362_v60, %v1344_v8  ;;  %v1337_v17 = vmax.f32 %v1321_v23, %v7480_v28  ;;  %v1345_v57 = vadd.f32 %v1329_v49, %v7482_v2  ;;  %v1370_v44 = vmax.f32 %v1334_v39, %v1350_v12  ;;  %v7516_v46 = vld [vmem:[%s5003_s23 + $0x1] ss:$0 sm:$0xff]  ;;  %v7519_v8 = vld [vmem:[%s5003_s23 + $0x2] ss:$0 sm:$0xff]  ;;  %v1445_v23 = vld [vmem:[%s8354_s11 + $0x8] sm:$0xff] }
 0x3bb   : > { %v1378_v52 = vadd.f32 %v1360_v45, %v1342_v56  ;;  %v1335_v11 = vmax.f32 %v1319_v55, %v1285_v7  ;;  %v1343_v29 = vadd.f32 %v1327_v37, %v1295_v25  ;;  %v1388_v19 = vmax.f32 %v1372_v31, %v1353_v41  ;;  %v1444_v7 = vld [vmem:[%s8354_s11] sm:$0xff] }
 0x3bc   : > { %v1396_v36 = vadd.f32 %v1380_v13, %v1363_v32  ;;  %v1373_v48 = vmax.f32 %v1337_v17, %v1353_v41  ;;  %v1381_v4 = vadd.f32 %v1363_v32, %v1345_v57  ;;  %v1386_v42 = vmax.f32 %v1370_v44, %v1351_v27  ;;  %v7538_v44 = vld [vmem:[%s5003_s23 + $0x3] ss:$0 sm:$0xff] }
 0x3bd   : > { %v1394_v47 = vadd.f32 %v1378_v52, %v1361_v43  ;;  %v1371_v21 = vmax.f32 %v1335_v11, %v1351_v27  ;;  %v1379_v24 = vadd.f32 %v1361_v43, %v1343_v29  ;;  %v1404_v3 = vmax.f32 %v1388_v19, %v7486_v22  ;;  %v8355_v29 = vld [vmem:[#allocation28_spill] sm:$0xff]  ;;  %v8356_v19 = vld [vmem:[#allocation29_spill] sm:$0xff] }
 0x3be   : > { %v1412_v35 = vadd.f32 %v1396_v36, %v7488_v18  ;;  %v1389_v58 = vmax.f32 %v1373_v48, %v7486_v22  ;;  %v1397_v53 = vadd.f32 %v1381_v4, %v7488_v18  ;;  %v1402_v54 = vmax.f32 %v1386_v42, %v1352_v30  ;;  %v1236_v4 = vld [vmem:[#allocation4 + $0x97] sm:$0xff] }
 0x3bf   : > { %v1410_v34 = vadd.f32 %v1394_v47, %v1362_v60  ;;  %v1387_v50 = vmax.f32 %v1371_v21, %v1352_v30  ;;  %v1395_v62 = vadd.f32 %v1379_v24, %v1362_v60  ;;  %v1425_v25 = vmul.f32 %v7502_v15, %v1404_v3  ;;  %v8357_v21 = vld [vmem:[#allocation30_spill] sm:$0xff]  ;;  %v1246_v3 = vld [vmem:[#allocation5 + $0x97] sm:$0xff] }
 0x3c0   : > { %v1454_v26 = vmul.f32 %v1446_v1, %v1412_v35  ;;  %v1405_v9 = vmax.f32 %v1389_v58, %v7497_v40  ;;  %v1413_v14 = vadd.f32 %v1397_v53, %v7499_v5  ;;  %v1423_v16 = vmul.f32 %v7502_v15, %v1402_v54  ;;  %v1237_v35 = vld [vmem:[#allocation4 + $0xaf] sm:$0xff]  ;;  %v1247_v58 = vld [vmem:[#allocation5 + $0xaf] sm:$0xff] }
 0x3c1   : > { %v1452_v0 = vmul.f32 %v1444_v7, %v1410_v34  ;;  %v1403_v61 = vmax.f32 %v1387_v50, %v1353_v41  ;;  %v1411_v38 = vadd.f32 %v1395_v62, %v1363_v32  ;;  %v1438_v49 = vadd.f32 %v7516_v46, %v1425_v25  ;;  %v7557_v54 = vld [vmem:[%s788_s22] ss:$0 sm:$0xff]  ;;  %v8358_v62 = vld [vmem:[#allocation31_spill] sm:$0xff]  ;;  %v1238_v25 = vld [vmem:[#allocation4 + $0xc7] sm:$0xff] }
 0x3c2   : > { %v1467_v39 = vmul.f32 %v7519_v8, %v1454_v26  ;;  %v1426_v56 = vmul.f32 %v7502_v15, %v1405_v9  ;;  %v1455_v12 = vmul.f32 %v1447_v63, %v1413_v14  ;;  %v1436_v55 = vadd.f32 %v7516_v46, %v1423_v16  ;;  %v1248_v26 = vld [vmem:[#allocation5 + $0xc7] sm:$0xff]  ;;  %v8359_v16 = vld [vmem:[#allocation124_spill] sm:$0xff] }
 0x3c3   : > { %v1465_v37 = vmul.f32 %v7519_v8, %v1452_v0  ;;  %v1424_v30 = vmul.f32 %v7502_v15, %v1403_v61  ;;  %v1453_v45 = vmul.f32 %v1445_v23, %v1411_v38  ;;  %v7540_v52 = vstv %s1200_s0 }
 0x3c4   : > { %v1475_v60 = vadd.f32 %v1467_v39, %v1438_v49  ;;  %v1439_v31 = vadd.f32 %v7516_v46, %v1426_v56  ;;  %v1468_v13 = vmul.f32 %v7519_v8, %v1455_v12  ;;  %v3747_v43 = vmul.f32 %v7540_v52, %v8355_v29  ;;  %v3781_v12 = vld [vmem:[%s7568_s2 + $0x10] sm:$0xff] }
 0x3c5   : > { %v1473_v17 = vadd.f32 %v1465_v37, %v1436_v55  ;;  %v1437_v57 = vadd.f32 %v7516_v46, %v1424_v30  ;;  %v1466_v27 = vmul.f32 %v7519_v8, %v1453_v45  ;;  %v3745_v36 = vmul.f32 %v7540_v52, %v8356_v19  ;;  %v1249_v45 = vld [vmem:[#allocation5 + $0xdf] sm:$0xff] }
 0x3c6   : > { %v1488_v11 = vadd.f32 %v7538_v44, %v1475_v60  ;;  %v1476_v41 = vadd.f32 %v1468_v13, %v1439_v31  ;;  %v3748_v24 = vmul.f32 %v7540_v52, %v8357_v21  ;;  %v1256_v53 = vmax.f32 %v1236_v4, %v1237_v35  ;;  %v1298_v19 = vld [vmem:[#allocation5 + $0x98] sm:$0xff] }
 0x3c7   : > { %v1486_v32 = vadd.f32 %v7538_v44, %v1473_v17  ;;  %v1474_v48 = vadd.f32 %v1466_v27, %v1437_v57  ;;  %v1264_v1 = vadd.f32 %v1247_v58, %v1246_v3  ;;  %v3746_v7 = vmul.f32 %v7540_v52, %v8358_v62 }
 0x3c8   : > { %v3755_v42 = vadd.f32 %v3747_v43, %v1488_v11  ;;  %v1489_v47 = vadd.f32 %v7538_v44, %v1476_v41  ;;  %v1254_v9 = vmax.f32 %v7458_v59, %v7466_v51  ;;  %v1262_v14 = vadd.f32 %v7468_v33, %v7460_v20  ;;  %v8360_v59 = vld [vmem:[#allocation62_spill] sm:$0xff]  ;;  %v1239_v20 = vld [vmem:[#allocation4 + $0xdf] sm:$0xff]  ;;  %v8361_v43 = vld [vmem:[#allocation105_spill] sm:$0xff] }
 0x3c9   : > { %v3753_v34 = vadd.f32 %v3745_v36, %v1486_v32  ;;  %v1487_v50 = vadd.f32 %v7538_v44, %v1474_v48  ;;  %v1272_v23 = vmax.f32 %v1256_v53, %v1238_v25  ;;  %v1280_v49 = vadd.f32 %v1264_v1, %v1248_v26  ;;  %v3779_v11 = vld [vmem:[%s7568_s2] sm:$0xff]  ;;  %v1288_v32 = vld [vmem:[#allocation4 + $0x98] sm:$0xff] }
 0x3ca   : > { %v3763_v0 = vadd.f32 %v3755_v42, %v8359_v16  ;;  %v3756_v61 = vadd.f32 %v3748_v24, %v1489_v47  ;;  %v1257_v39 = vmax.f32 %v1237_v35, %v1238_v25  ;;  %v1265_v56 = vadd.f32 %v1248_v26, %v1247_v58  ;;  %v3780_v25 = vld [vmem:[%s7568_s2 + $0x8] sm:$0xff] }
 0x3cb   : > { %v3761_v37 = vadd.f32 %v3753_v34, %v8360_v59  ;;  %v3754_v30 = vadd.f32 %v3746_v7, %v1487_v50  ;;  %v1270_v13 = vmax.f32 %v1254_v9, %v1236_v4  ;;  %v1278_v17 = vadd.f32 %v1262_v14, %v1246_v3  ;;  %v1289_v14 = vld [vmem:[#allocation4 + $0xb0] sm:$0xff] }
 0x3cc   : > { %v1255_v57 = vmax.f32 %v7466_v51, %v1236_v4  ;;  %v1263_v27 = vadd.f32 %v1246_v3, %v7468_v33  ;;  %v3764_v41 = vadd.f32 %v3756_v61, %v8361_v43  ;;  %v1308_v47 = vmax.f32 %v1272_v23, %v1288_v32  ;;  %v3782_v51 = vld [vmem:[%s7568_s2 + $0x18] sm:$0xff]  ;;  %v8362_v33 = vld [vmem:[#allocation90_spill] sm:$0xff] }
 0x3cd   : > { %v1316_v21 = vadd.f32 %v1298_v19, %v1280_v49  ;;  %v1273_v24 = vmax.f32 %v1257_v39, %v1239_v20  ;;  %v1281_v53 = vadd.f32 %v1265_v56, %v1249_v45  ;;  %v3762_v3 = vadd.f32 %v3754_v30, %v8362_v33  ;;  %v1300_v56 = vld [vmem:[#allocation5 + $0xc8] sm:$0xff]  ;;  %v1291_v20 = vld [vmem:[#allocation4 + $0xe0] sm:$0xff]  ;;  %v1301_v45 = vld [vmem:[#allocation5 + $0xe0] sm:$0xff] }
 0x3ce   : > { %v1306_v62 = vmax.f32 %v1270_v13, %v7472_v10  ;;  %v1314_v7 = vadd.f32 %v7474_v6, %v1278_v17  ;;  %v1271_v26 = vmax.f32 %v1255_v57, %v1237_v35  ;;  %v1279_v9 = vadd.f32 %v1263_v27, %v1247_v58  ;;  %v1290_v10 = vld [vmem:[#allocation4 + $0xc8] sm:$0xff]  ;;  %v1356_v57 = vld [vmem:[#allocation4 + $0x99] sm:$0xff] }
 0x3cf   : > { %v1324_v61 = vmax.f32 %v1308_v47, %v1289_v14  ;;  %v1309_v23 = vmax.f32 %v1273_v24, %v1289_v14  ;;  %v1366_v27 = vld [vmem:[#allocation5 + $0x99] sm:$0xff]  ;;  %v1367_v47 = vld [vmem:[#allocation5 + $0xb1] sm:$0xff] }
 0x3d0   : > { %v1322_v6 = vmax.f32 %v1306_v62, %v7480_v28  ;;  %v1330_v35 = vadd.f32 %v1314_v7, %v7482_v2  ;;  %v1307_v58 = vmax.f32 %v1271_v26, %v7480_v28  ;;  %v1450_v62 = vld [vmem:[%s8354_s11 + $0x30] sm:$0xff]  ;;  %v1359_v7 = vld [vmem:[#allocation4 + $0xe1] sm:$0xff] }
 0x3d2   : > { %v1323_v13 = vmax.f32 %v1307_v58, %v1288_v32 }
 0x448   : > { %v4345_v63 = vpop.f32.mrf.mxu1 }
 0x449   : > { %v3722_v38 = vadd.f32 %v4345_v63, %v7557_v54 }
 0x44a   : > { %v3713_v55 = vpop.f32.mrf.mxu1 }
 0x44b   : > { %v3771_v60 = vadd.f32 %v3763_v0, %v3722_v38  ;;  %v3714_v31 = vadd.f32 %v7557_v54, %v3713_v55  ;;  %v1299_v0 = vld [vmem:[#allocation5 + $0xb0] sm:$0xff]  ;;  %v1340_v55 = vmax.f32 %v1324_v61, %v1290_v10 }
 0x44c   : > { %v4346_v29 = vpop.f32.mrf.mxu1  ;;  %v1332_v38 = vadd.f32 %v1316_v21, %v1299_v0  ;;  %v1317_v49 = vadd.f32 %v1299_v0, %v1281_v53 }
 0x44d   : > { %v3789_v36 = vadd.f32 %v3781_v12, %v3771_v60  ;;  %v3769_v48 = vadd.f32 %v3761_v37, %v3714_v31  ;;  %v3725_v42 = vadd.f32 %v4346_v29, %v7557_v54  ;;  %v1315_v12 = vadd.f32 %v7482_v2, %v1279_v9 }
 0x44e   : > { %v3716_v4 = vpop.f32.mrf.mxu1  ;;  %v1348_v59 = vadd.f32 %v1332_v38, %v1300_v56  ;;  %v1325_v37 = vmax.f32 %v1309_v23, %v1290_v10  ;;  %v1333_v30 = vadd.f32 %v1317_v49, %v1300_v56  ;;  %v1338_v60 = vmax.f32 %v1322_v6, %v1288_v32  ;;  %v1358_v32 = vld [vmem:[#allocation4 + $0xc9] sm:$0xff]  ;;  %v1451_v38 = vld [vmem:[%s8354_s11 + $0x38] sm:$0xff] }
 0x44f   : > { %3797 = vst.msk [vmem:[%s7568_s2 + $0x10] sm:$0xff] %vm1212_vm3, %v3789_v36  ;;  %v3787_v1 = vadd.f32 %v3779_v11, %v3769_v48  ;;  %v3772_v34 = vadd.f32 %v3764_v41, %v3725_v42  ;;  %v3717_v50 = vadd.f32 %v7557_v54, %v3716_v4  ;;  %v1346_v31 = vadd.f32 %v1330_v35, %v1298_v19  ;;  %v1357_v42 = vld [vmem:[#allocation4 + $0xb1] sm:$0xff]  ;;  %v1449_v56 = vld [vmem:[%s8354_s11 + $0x28] sm:$0xff] }
 0x450   : > { %v1331_v17 = vadd.f32 %v1315_v12, %v1298_v19  ;;  %v1376_v11 = vmax.f32 %v1340_v55, %v1356_v57  ;;  %v1384_v29 = vadd.f32 %v1366_v27, %v1348_v59  ;;  %v1341_v43 = vmax.f32 %v1325_v37, %v1291_v20  ;;  %v1368_v19 = vld [vmem:[#allocation5 + $0xc9] sm:$0xff] }
 0x451   : > { %3795 = vst.msk [vmem:[%s7568_s2] sm:$0xff] %vm1212_vm3, %v3787_v1  ;;  %v3790_v63 = vadd.f32 %v3782_v51, %v3772_v34  ;;  %v3770_v16 = vadd.f32 %v3762_v3, %v3717_v50  ;;  %v1349_v28 = vadd.f32 %v1333_v30, %v1301_v45  ;;  %v1374_v2 = vmax.f32 %v1338_v60, %v7486_v22 }
 0x452   : > { %v1382_v41 = vadd.f32 %v7488_v18, %v1346_v31  ;;  %v1339_v36 = vmax.f32 %v1323_v13, %v1289_v14  ;;  %v1347_v48 = vadd.f32 %v1331_v17, %v1299_v0  ;;  %v1392_v21 = vmax.f32 %v1376_v11, %v1357_v42 }
 0x453   : > { %3798 = vst.msk [vmem:[%s7568_s2 + $0x18] sm:$0xff] %vm1212_vm3, %v3790_v63  ;;  %v3788_v39 = vadd.f32 %v3780_v25, %v3770_v16  ;;  %v1400_v24 = vadd.f32 %v1384_v29, %v1367_v47  ;;  %v1377_v53 = vmax.f32 %v1341_v43, %v1357_v42  ;;  %v1385_v51 = vadd.f32 %v1367_v47, %v1349_v28  ;;  %v1369_v25 = vld [vmem:[#allocation5 + $0xe1] sm:$0xff]  ;;  %v8364_v43 = vld [vmem:[#allocation33_spill] sm:$0xff] }
 0x454   : > { %v1390_v4 = vmax.f32 %v1374_v2, %v7497_v40  ;;  %v1398_v33 = vadd.f32 %v1382_v41, %v7499_v5  ;;  %v1375_v3 = vmax.f32 %v1339_v36, %v7497_v40  ;;  %v1383_v22 = vadd.f32 %v7499_v5, %v1347_v48  ;;  %v1448_v40 = vld [vmem:[%s8354_s11 + $0x20] sm:$0xff]  ;;  %v8365_v48 = vld [vmem:[#allocation34_spill] sm:$0xff] }
 0x455   : > { %3796 = vst.msk [vmem:[%s7568_s2 + $0x8] sm:$0xff] %vm1212_vm3, %v3788_v39  ;;  %v1408_v1 = vmax.f32 %v1392_v21, %v1358_v32  ;;  %v1416_v18 = vadd.f32 %v1400_v24, %v1368_v19  ;;  %v1393_v34 = vmax.f32 %v1377_v53, %v1358_v32  ;;  %v1401_v50 = vadd.f32 %v1385_v51, %v1368_v19  ;;  %v8366_v21 = vld [vmem:[#allocation32_spill] sm:$0xff]  ;;  %v8367_v51 = vld [vmem:[#allocation65_spill] sm:$0xff] }
 0x456   : > { %v1406_v26 = vmax.f32 %v1390_v4, %v1356_v57  ;;  %v1414_v9 = vadd.f32 %v1398_v33, %v1366_v27  ;;  %v1391_v14 = vmax.f32 %v1375_v3, %v1356_v57  ;;  %v1399_v63 = vadd.f32 %v1383_v22, %v1366_v27  ;;  %v8363_v27 = vld [vmem:[#allocation35_spill] sm:$0xff]  ;;  %v8368_v19 = vld [vmem:[#allocation61_spill] sm:$0xff]  ;;  %v3785_v22 = vld [vmem:[%s7568_s2 + $0x30] sm:$0xff] }
 0x457   : > { %v1429_v5 = vmul.f32 %v7502_v15, %v1408_v1  ;;  %v1458_v16 = vmul.f32 %v1450_v62, %v1416_v18  ;;  %v1409_v0 = vmax.f32 %v1393_v34, %v1359_v7  ;;  %v1417_v61 = vadd.f32 %v1401_v50, %v1369_v25  ;;  %v8369_v18 = vld [vmem:[#allocation76_spill] sm:$0xff] }
 0x458   : > { %v1427_v23 = vmul.f32 %v7502_v15, %v1406_v26  ;;  %v1456_v49 = vmul.f32 %v1448_v40, %v1414_v9  ;;  %v1407_v39 = vmax.f32 %v1391_v14, %v1357_v42  ;;  %v1415_v10 = vadd.f32 %v1399_v63, %v1367_v47  ;;  %v3783_v62 = vld [vmem:[%s7568_s2 + $0x20] sm:$0xff]  ;;  %v3786_v63 = vld [vmem:[%s7568_s2 + $0x38] sm:$0xff] }
 0x459   : > { %v1442_v6 = vadd.f32 %v7516_v46, %v1429_v5  ;;  %v1471_v35 = vmul.f32 %v7519_v8, %v1458_v16  ;;  %v1430_v58 = vmul.f32 %v7502_v15, %v1409_v0  ;;  %v1459_v12 = vmul.f32 %v1451_v38, %v1417_v61  ;;  %v8370_v5 = vld [vmem:[#allocation50_spill] sm:$0xff] }
 0x45a   : > { %v1440_v55 = vadd.f32 %v7516_v46, %v1427_v23  ;;  %v1469_v59 = vmul.f32 %v7519_v8, %v1456_v49  ;;  %v1428_v37 = vmul.f32 %v7502_v15, %v1407_v39  ;;  %v1457_v30 = vmul.f32 %v1449_v56, %v1415_v10  ;;  %v3784_v23 = vld [vmem:[%s7568_s2 + $0x28] sm:$0xff] }
 0x45b   : > { %v1479_v20 = vadd.f32 %v1471_v35, %v1442_v6  ;;  %v1443_v45 = vadd.f32 %v7516_v46, %v1430_v58  ;;  %v1472_v60 = vmul.f32 %v7519_v8, %v1459_v12  ;;  %v3751_v11 = vmul.f32 %v7540_v52, %v8363_v27 }
 0x45c   : > { %v1477_v31 = vadd.f32 %v1469_v59, %v1440_v55  ;;  %v1441_v13 = vadd.f32 %v7516_v46, %v1428_v37  ;;  %v1470_v17 = vmul.f32 %v7519_v8, %v1457_v30  ;;  %v3749_v28 = vmul.f32 %v7540_v52, %v8364_v43  ;;  %v3008_v8 = vpop.f32.mrf.mxu0 }
 0x45d   : > { %v1492_v57 = vadd.f32 %v7538_v44, %v1479_v20  ;;  %v1480_v29 = vadd.f32 %v1472_v60, %v1443_v45  ;;  %v3752_v46 = vmul.f32 %v7540_v52, %v8365_v48  ;;  %v3750_v24 = vmul.f32 %v7540_v52, %v8366_v21 }
 0x45e   : > { %v1490_v15 = vadd.f32 %v7538_v44, %v1477_v31  ;;  %v1478_v2 = vadd.f32 %v1470_v17, %v1441_v13  ;;  %v3009_v4 = vadd.f32 %v3008_v8, %v8368_v19 }
 0x45f   : > { %v3759_v41 = vadd.f32 %v3751_v11, %v1492_v57  ;;  %v1493_v36 = vadd.f32 %v7538_v44, %v1480_v29 }
 0x460   : > { %v3757_v42 = vadd.f32 %v3749_v28, %v1490_v15  ;;  %v1491_v47 = vadd.f32 %v7538_v44, %v1478_v2 }
 0x461   : > { %v3767_v32 = vadd.f32 %v3759_v41, %v8367_v51  ;;  %v3760_v33 = vadd.f32 %v3752_v46, %v1493_v36 }
 0x462   : > { %v3765_v34 = vadd.f32 %v3757_v42, %v8369_v18  ;;  %v3758_v50 = vadd.f32 %v3750_v24, %v1491_v47 }
 0x463   : > { %v3768_v25 = vadd.f32 %v3760_v33, %v3009_v4 }
 0x464   : > { %v3766_v16 = vadd.f32 %v3758_v50, %v8370_v5 }
 0x479   : > { %v4349_v53 = vpop.f32.mrf.mxu1 }
 0x47a   : > { %v3738_v3 = vadd.f32 %v4349_v53, %v7557_v54 }
 0x47b   : > { %v3729_v1 = vpop.f32.mrf.mxu1 }
 0x47c   : > { %v3775_v44 = vadd.f32 %v3767_v32, %v3738_v3  ;;  %v3730_v52 = vadd.f32 %v7557_v54, %v3729_v1 }
 0x47d   : > { %v4350_v7 = vpop.f32.mrf.mxu1 }
 0x47e   : > { %v3793_v26 = vadd.f32 %v3785_v22, %v3775_v44  ;;  %v3773_v9 = vadd.f32 %v3765_v34, %v3730_v52  ;;  %v3741_v14 = vadd.f32 %v4350_v7, %v7557_v54 }
 0x47f   : > { %v3732_v40 = vpop.f32.mrf.mxu1 }
 0x480   : > { %3801 = vst.msk [vmem:[%s7568_s2 + $0x30] sm:$0xff] %vm1212_vm3, %v3793_v26  ;;  %v3791_v0 = vadd.f32 %v3783_v62, %v3773_v9  ;;  %v3776_v61 = vadd.f32 %v3768_v25, %v3741_v14  ;;  %v3733_v38 = vadd.f32 %v7557_v54, %v3732_v40 }
 0x482   : > { %3799 = vst.msk [vmem:[%s7568_s2 + $0x20] sm:$0xff] %vm1212_vm3, %v3791_v0  ;;  %v3794_v49 = vadd.f32 %v3786_v63, %v3776_v61  ;;  %v3774_v39 = vadd.f32 %v3766_v16, %v3733_v38  ;;  %3806 = sbr.rel (%p4265_p13) target bundleno = 1295 (0x50f), region = 112 }
 0x484   : > { %3802 = vst.msk [vmem:[%s7568_s2 + $0x38] sm:$0xff] %vm1212_vm3, %v3794_v49  ;;  %v3792_v10 = vadd.f32 %v3784_v23, %v3774_v39 }
 0x486   : > { %3800 = vst.msk [vmem:[%s7568_s2 + $0x28] sm:$0xff] %vm1212_vm3, %v3792_v10 }
 0x48d   : > { %v3819_v56 = vld [vmem:[#allocation2 + $0xd0] sm:$0xff]  ;;  %v3817_v6 = vld [vmem:[#allocation2 + $0xc0] sm:$0xff]  ;;  %v3820_v35 = vld [vmem:[#allocation2 + $0xd8] sm:$0xff] }
 0x48e   : > { %3837 = vrot.lane.b32.xlu1 %v3819_v56, %s4722_s3  ;;  %3833 = vrot.lane.b32.xlu0 %v3817_v6, %s4722_s3  ;;  %v3818_v54 = vld [vmem:[#allocation2 + $0xc8] sm:$0xff]  ;;  %v3821_v12 = vld [vmem:[#allocation2 + $0xe0] sm:$0xff]  ;;  %v3824_v55 = vld [vmem:[#allocation2 + $0xf8] sm:$0xff] }
 0x48f   : > { %v3822_v58 = vld [vmem:[#allocation2 + $0xe8] sm:$0xff]  ;;  %v3823_v59 = vld [vmem:[#allocation2 + $0xf0] sm:$0xff]  ;;  %v3808_v30 = vld [vmem:[#allocation2 + $0x80] sm:$0xff] }
 0x490   : > { %v3810_v37 = vld [vmem:[#allocation2 + $0x90] sm:$0xff]  ;;  %v3811_v13 = vld [vmem:[#allocation2 + $0x98] sm:$0xff]  ;;  %v3809_v17 = vld [vmem:[#allocation2 + $0x88] sm:$0xff] }
 0x491   : > { %v3813_v15 = vld [vmem:[#allocation2 + $0xa8] sm:$0xff]  ;;  %v3812_v43 = vld [vmem:[#allocation2 + $0xa0] sm:$0xff]  ;;  %v3815_v48 = vld [vmem:[#allocation2 + $0xb8] sm:$0xff] }
 0x492   : > { %3839 = vrot.lane.b32.xlu1 %v3820_v35, %s4722_s3  ;;  %3835 = vrot.lane.b32.xlu0 %v3818_v54, %s4722_s3  ;;  %v3814_v46 = vld [vmem:[#allocation2 + $0xb0] sm:$0xff] }
 0x496   : > { %3843 = vrot.lane.b32.xlu1 %v3822_v58, %s4722_s3  ;;  %3841 = vrot.lane.b32.xlu0 %v3821_v12, %s4722_s3 }
 0x49a   : > { %3847 = vrot.lane.b32.xlu1 %v3824_v55, %s4722_s3  ;;  %3845 = vrot.lane.b32.xlu0 %v3823_v59, %s4722_s3 }
 0x500   : > { %v3838_v20 = vpop.permute.xlu1 %3837  ;;  %v3834_v45 = vpop.permute.xlu0 %3833 }
 0x501   : > { %v3859_v60 = vsel %vm1212_vm3, %v3810_v37, %v3838_v20  ;;  %v3857_v31 = vsel %vm1212_vm3, %v3808_v30, %v3834_v45 }
 0x502   : > { %3867 = vst [vmem:[%s5005_s13 + $0x10] sm:$0xff] %v3859_v60  ;;  %3865 = vst [vmem:[%s5005_s13] sm:$0xff] %v3857_v31 }
 0x504   : > { %v3840_v57 = vpop.permute.xlu1 %3839  ;;  %v3836_v27 = vpop.permute.xlu0 %3835 }
 0x505   : > { %v3860_v11 = vsel %vm1212_vm3, %v3811_v13, %v3840_v57  ;;  %v3858_v29 = vsel %vm1212_vm3, %v3809_v17, %v3836_v27 }
 0x506   : > { %3868 = vst [vmem:[%s5005_s13 + $0x18] sm:$0xff] %v3860_v11  ;;  %3866 = vst [vmem:[%s5005_s13 + $0x8] sm:$0xff] %v3858_v29 }
 0x508   : > { %v3844_v28 = vpop.permute.xlu1 %3843  ;;  %v3842_v2 = vpop.permute.xlu0 %3841 }
 0x509   : > { %v3862_v41 = vsel %vm1212_vm3, %v3813_v15, %v3844_v28  ;;  %v3861_v36 = vsel %vm1212_vm3, %v3812_v43, %v3842_v2 }
 0x50a   : > { %3870 = vst [vmem:[%s5005_s13 + $0x28] sm:$0xff] %v3862_v41  ;;  %3869 = vst [vmem:[%s5005_s13 + $0x20] sm:$0xff] %v3861_v36 }
 0x50c   : > { %v3848_v8 = vpop.permute.xlu1 %3847  ;;  %v3846_v42 = vpop.permute.xlu0 %3845 }
 0x50d   : > { %v3864_v47 = vsel %vm1212_vm3, %v3815_v48, %v3848_v8  ;;  %v3863_v21 = vsel %vm1212_vm3, %v3814_v46, %v3846_v42 }
 0x50e   : > { %3872 = vst [vmem:[%s5005_s13 + $0x38] sm:$0xff] %v3864_v47  ;;  %3871 = vst [vmem:[%s5005_s13 + $0x30] sm:$0xff] %v3863_v21 }
 0x50f PF: > { %s8371_s30 = sld [smem:[#allocation19_spill]]  ;;  %s3887_s18 = sshll.u32 %s5005_s13, 4  ;;  %s7682_s18 = int_to_ptr.vmem [resolvable:$true] %s3887_s18 }
 0x510   : > { %s8372_s10 = sld [smem:[#allocation17_spill]]  ;;  %s4614_s26 = scalar_lea.vmem %s7682_s18, 1024 }
 0x511   : > { %s8373_s9 = sld [smem:[#allocation24_spill]]  ;;  %p4615_p0 = scmp.ne.s32.totalorder %s7682_s18, %s4614_s26 }
 0x512   : > { %s8374_s0 = sld [smem:[#allocation180_spill]]  ;;  %s4723_s2 = smov [#allocation12]  }
 0x513   : > { %s4618_s22 = sshll.u32 %s4723_s2, 4  ;;  %s4619_s22 = int_to_ptr.vmem [resolvable:$false] %s4618_s22 }
 0x514   : > { %s4620_s24 = scalar_lea.vmem %s4619_s22, 2048  ;;  %p4621_p8 = scmp.lt.s32.totalorder %s7682_s18, %s4619_s22 }
 0x515   : > { %s4278_s1 = sshll.u32 %s8371_s30, 10  ;;  %p4622_p11 = scmp.lt.s32.totalorder %s4620_s24, %s4614_s26 }
 0x516   : > { %s8376_s21 = sand.u32 1, %s8372_s10  }
 0x517   : > { %s7686_s23 = scalar_lea.sflag [#allocation7], %s8376_s21  ;;  %p8377_p2 = scmp.ne.s32.totalorder %s8373_s9, 0 }
 0x518   : > { %s8375_s12 = smov %s8374_s0  ;;  %s7679_s29 = scalar_lea.hbm %s8374_s0, %s4278_s1 }
 0x519   : > { %p4616_p6 = pnand %p4615_p0, %p8377_p2  ;;  %p4623_p12 = por %p4622_p11, %p4621_p8 }
 0x51b   : > { %p4617_p7 = pneg %p4616_p6 }
 0x51d   : > { %p4624_p1 = pnand %p4623_p12, %p4617_p7 }
 0x51f   : > { %4627 = shalt.err (!%p4624_p1)
}
 0x520   : > { %s4628_s13 = scalar_lea.hbm %s7679_s29, 1024  ;;  %s4632_s4 = scalar_lea.hbm %s8375_s12, 2048 }
 0x521   : > { %p4629_p4 = scmp.ne.s32.totalorder %s7679_s29, %s4628_s13  ;;  %p4633_p9 = scmp.lt.s32.totalorder %s7679_s29, %s8375_s12 }
 0x522   : > { %p4634_p10 = scmp.lt.s32.totalorder %s4632_s4, %s4628_s13 }
 0x523   : > { %p4630_p5 = pnand %p4629_p4, %p8377_p2 }
 0x524   : > { %p4635_p13 = por %p4634_p10, %p4633_p9 }
 0x525   : > { %p4631_p3 = pneg %p4630_p5 }
 0x527   : > { %p4636_p0 = pnand %p4635_p13, %p4631_p3 }
 0x529   : > { %4639 = shalt.err (!%p4636_p0)
}
 0x52a   : > { %s4724_s8 = smov 128   ;;  %s4725_s3 = smov 8  }
 0x52b   : > { %4363 = dma.vmem_to_hbm [thread:$0]  (%p8377_p2), %s7682_s18, 1024, %s7679_s29, %s7686_s23, %s4724_s8, %s4724_s8, %s4725_s3  }
 0x52c PF: > { %s8378_s30 = sld [smem:[#allocation22_spill]] }
 0x52d   : > { %s8379_s10 = sld [smem:[#allocation16_spill]] }
 0x52e   : > { %s8380_s1 = sld [smem:[#allocation26_spill]] }
 0x532   : > { %p4385_p6 = scmp.ge.s32.totalorder %s8378_s30, 2 }
 0x533   : > { %s3902_s20 = sand.u32 1, %s8379_s10  }
 0x534   : > { %p8381_p7 = scmp.ne.s32.totalorder %s8380_s1, 0  ;;  %s3903_s28 = scalar_lea.sflag [#allocation7], %s3902_s20 }
 0x536   : > { %p4376_p8 = pnand %p4385_p6, %p8381_p7 }
 0x538   : > { %p4377_p11 = pneg %p4376_p8 }
 0x53a   : > { %4681 = dma.done.wait (%p4377_p11), %s3903_s28, 1024  }
 0x53b   : > { %4683 = vsyncadd (%p4377_p11), %s3903_s28, 4294966272  ;;  %s33_s20 = sadd.s32 1, %s8378_s30   ;;  %s8382_s27 = sld [smem:[#allocation17_spill]] }
 0x53c   : > { %p30_p12 = scmp.ge.s32.totalorder %s33_s20, 12   ;;  %s8383_s28 = sld [smem:[#allocation18_spill]] }
 0x53d   : > { %s8384_s29 = sld [smem:[#allocation27_spill]] }
 0x53e   : > { %s8385_s30 = sld [smem:[#allocation20_spill]]  ;;  %32 = sbr.rel (!%p30_p12) target bundleno = 21 (0x15), region = 184 }
 0x53f   : > { %s8386_s0 = sld [smem:[#allocation21_spill]] }
 0x540   : > { %s8387_s19 = sld [smem:[#allocation23_spill]] }
 0x541   : > { %s8388_s1 = sld [smem:[#allocation25_spill]] }
 0x543   :  { %3908 = vsyncpa [#allocation7], 1 }
 0x544   :  { %3910 = vsyncpa [#allocation7 + $0x1], 1 }
 0x545   :  { %3911 = vsyncpa [#allocation8], 1 }
 0x546   :  { %3913 = vsyncpa [#allocation8 + $0x1], 1 }
 0x547   :  { %3914 = vsyncpa [#allocation10], 1 }

</bundles_post_ra>
